<compile_context>
chip_gen: v5e
topology: v5e:2x2
jax: 0.10.0
libtpu: 0.0.40
codegen_flags: <defaults>
</compile_context>

<pallas_src>
import functools

import jax
import jax.numpy as jnp
from jax.experimental import pallas as pl
from jax.experimental.pallas import tpu as pltpu


# ----------------------------------------------------------------------------
# Static layer configuration (in_c, out_c, has_batchnorm, activation)
# All convs: kernel=4, stride=2, padding=1, bias=False.
# ----------------------------------------------------------------------------
LAYER_CFG = (
    (3, 64, False, "leaky_relu"),
    (64, 128, True, "leaky_relu"),
    (128, 256, True, "leaky_relu"),
    (256, 512, True, "leaky_relu"),
    (512, 1, False, "sigmoid"),
)
KSIZE, STRIDE, PAD = 4, 2, 1
LEAKY_SLOPE = 0.2
BN_EPS = 1e-5


# ----------------------------------------------------------------------------
# Pallas kernel: (M,K)@(K,N) with K-tiled accumulation and fused
# per-output-channel scale/shift (folded BatchNorm) + activation epilogue.
# ----------------------------------------------------------------------------
def _mm_scale_shift_act_kernel(a_ref, b_ref, scale_ref, shift_ref, o_ref,
                               acc_ref, *, act):
    @pl.when(pl.program_id(0) == 0)
    def _():
        acc_ref[...] = jnp.zeros_like(acc_ref)

    acc_ref[...] += jnp.dot(a_ref[...], b_ref[...],
                            preferred_element_type=jnp.float32)

    @pl.when(pl.program_id(0) == pl.num_programs(0) - 1)
    def _():
        # Epilogue in f32 (VPU/EUP are idle under the MXU; v5e has no bf16 VPU).
        acc = acc_ref[...] * scale_ref[...] + shift_ref[...]
        if act == "leaky_relu":
            acc = jnp.where(acc >= 0.0, acc, LEAKY_SLOPE * acc)
        elif act == "sigmoid":
            acc = jax.nn.sigmoid(acc)
        o_ref[...] = acc.astype(o_ref.dtype)


def matmul_scale_shift_act(a, b, scale, shift, act, out_dtype, tk=1024):
    """a: (M, K) bf16, b: (K, N) bf16, scale/shift: (N,) f32 -> (M, N)."""
    M, K = a.shape
    K2, N = b.shape
    assert K == K2
    if K <= tk or K % tk != 0:
        tk = K
    n_k = K // tk
    scale2 = scale.reshape(1, N).astype(jnp.float32)
    shift2 = shift.reshape(1, N).astype(jnp.float32)

    return pl.pallas_call(
        functools.partial(_mm_scale_shift_act_kernel, act=act),
        out_shape=jax.ShapeDtypeStruct((M, N), out_dtype),
        grid=(n_k,),
        in_specs=[
            pl.BlockSpec((M, tk), lambda kk: (0, kk)),
            pl.BlockSpec((tk, N), lambda kk: (kk, 0)),
            pl.BlockSpec((1, N), lambda kk: (0, 0)),
            pl.BlockSpec((1, N), lambda kk: (0, 0)),
        ],
        out_specs=pl.BlockSpec((M, N), lambda kk: (0, 0)),
        scratch_shapes=[pltpu.VMEM((M, N), jnp.float32)],
        compiler_params=pltpu.CompilerParams(
            dimension_semantics=("arbitrary",),
            vmem_limit_bytes=32 * 1024 * 1024,
        ),
    )(a, b, scale2, shift2)


# ----------------------------------------------------------------------------
# Conv lowering glue: NHWC im2col (channels innermost -> lane-dense K axis).
# ----------------------------------------------------------------------------
def _im2col_nhwc(x, k, stride):
    B, H, W, C = x.shape
    OH = (H - k) // stride + 1
    OW = (W - k) // stride + 1
    cols = []
    for i in range(k):
        for j in range(k):
            cols.append(
                x[:, i: i + (OH - 1) * stride + 1: stride,
                     j: j + (OW - 1) * stride + 1: stride, :]
            )
    p = jnp.stack(cols, axis=3)              # (B, OH, OW, k*k, C)
    p = p.reshape(B * OH * OW, k * k * C)    # K order: (kh, kw, ic)
    return p, OH, OW


def _conv_bn_act(x_nhwc, w_mat, scale, shift, act, out_dtype):
    B = x_nhwc.shape[0]
    xp = jnp.pad(x_nhwc, ((0, 0), (PAD, PAD), (PAD, PAD), (0, 0)))
    patches, OH, OW = _im2col_nhwc(xp, KSIZE, STRIDE)
    out = matmul_scale_shift_act(patches, w_mat, scale, shift, act, out_dtype)
    return out.reshape(B, OH, OW, -1)


# ----------------------------------------------------------------------------
# Discriminator forward (matches the PyTorch module's forward semantics)
# ----------------------------------------------------------------------------
def discriminator_forward(params, x, label=None):
    # x: (B, 3, H, W) NCHW, like PyTorch. `label` is unused in the reference.
    del label
    h = jnp.transpose(x, (0, 2, 3, 1)).astype(jnp.bfloat16)  # NCHW -> NHWC once
    n_layers = len(LAYER_CFG)
    for idx, (cfg, lp) in enumerate(zip(LAYER_CFG, params["layers"])):
        act = cfg[3]
        last = idx == n_layers - 1
        out_dtype = jnp.float32 if last else jnp.bfloat16
        h = _conv_bn_act(h, lp["w_mat"], lp["scale"], lp["shift"], act, out_dtype)
    # h: (B, 1, 1, 1)  ->  out.view(-1, 1).squeeze(1)  ->  (B,)
    return h.reshape(-1)


# ----------------------------------------------------------------------------
# Deterministic parameter init.  Weight layout + BatchNorm folding are hoisted
# here so the forward pass does zero per-call weight-side work.
# ----------------------------------------------------------------------------
# TODO(synk): BatchNorm is folded in eval mode (running_mean=0, running_var=1);
# training-mode batch-statistic computation is not implemented.
def init_params(key):
    layers = []
    keys = jax.random.split(key, 2 * len(LAYER_CFG))
    for idx, (ic, oc, has_bn, _act) in enumerate(LAYER_CFG):
        wk, gk = keys[2 * idx], keys[2 * idx + 1]
        # DCGAN-style init, PyTorch Conv2d layout (OC, IC, kh, kw).
        w = 0.02 * jax.random.normal(wk, (oc, ic, KSIZE, KSIZE), jnp.float32)
        # Pre-lay-out for the im2col K order (kh, kw, ic) and cast to bf16.
        w_mat = w.transpose(2, 3, 1, 0).reshape(KSIZE * KSIZE * ic, oc)
        w_mat = w_mat.astype(jnp.bfloat16)
        if has_bn:
            gamma = 1.0 + 0.02 * jax.random.normal(gk, (oc,), jnp.float32)
            beta = jnp.zeros((oc,), jnp.float32)
            running_mean = jnp.zeros((oc,), jnp.float32)
            running_var = jnp.ones((oc,), jnp.float32)
            scale = gamma / jnp.sqrt(running_var + BN_EPS)
            shift = beta - running_mean * scale
        else:
            scale = jnp.ones((oc,), jnp.float32)
            shift = jnp.zeros((oc,), jnp.float32)
        layers.append({"w_mat": w_mat, "scale": scale, "shift": shift})
    return {"layers": layers}


if __name__ == "__main__":
    key = jax.random.PRNGKey(0)
    pkey, xkey = jax.random.split(key)

    params = init_params(pkey)

    # 32x32 input -> spatial path 32 -> 16 -> 8 -> 4 -> 2 -> 1.
    x = jax.random.normal(xkey, (2, 3, 32, 32), jnp.float32)
    label = jnp.zeros((2,), jnp.int32)  # unused, as in the reference forward

    fwd = jax.jit(discriminator_forward)
    out = fwd(params, x, label)
    out = jax.block_until_ready(out)

    assert out.shape == (2,), out.shape
    assert bool(jnp.all(jnp.isfinite(out)))
    assert bool(jnp.all((out >= 0.0) & (out <= 1.0)))  # sigmoid output
    print("KERNEL_OK")
</pallas_src>

<mosaic_0001>
module attributes {stable_mosaic.version = 11 : i64} {
  func.func @_mm_scale_shift_act_kernel(%arg0: i32, %arg1: memref<512x48xbf16, #tpu.memory_space<vmem>>, %arg2: memref<48x64xbf16, #tpu.memory_space<vmem>>, %arg3: memref<1x64xf32, #tpu.memory_space<vmem>>, %arg4: memref<1x64xf32, #tpu.memory_space<vmem>>, %arg5: memref<512x64xbf16, #tpu.memory_space<vmem>>, %arg6: memref<512x64xf32, #tpu.memory_space<vmem>>) attributes {dimension_semantics = [#tpu.dimension_semantics<arbitrary>], iteration_bounds = array<i64: 1>, scalar_prefetch = 0 : i64, scratch_operands = 1 : i64, tpu.core_type = #tpu.core_type<tc>, window_params = [{transform_indices = @transform_0, window_bounds = array<i64: 512, 48>}, {transform_indices = @transform_1, window_bounds = array<i64: 48, 64>}, {pipeline_mode = #tpu.pipeline_mode<synchronous>, transform_indices = @transform_2, window_bounds = array<i64: 1, 64>}, {pipeline_mode = #tpu.pipeline_mode<synchronous>, transform_indices = @transform_3, window_bounds = array<i64: 1, 64>}, {pipeline_mode = #tpu.pipeline_mode<synchronous>, transform_indices = @transform_4, window_bounds = array<i64: 512, 64>}]} {
    %c0_i32 = arith.constant 0 : i32
    %0 = arith.cmpi eq, %arg0, %c0_i32 : i32
    %1 = arith.extui %0 : i1 to i32
    %c0_i32_0 = arith.constant 0 : i32
    %2 = arith.cmpi ne, %1, %c0_i32_0 : i32
    scf.if %2 {
      %cst_10 = arith.constant 0.000000e+00 : f32
      %12 = vector.broadcast %cst_10 : f32 to vector<512x64xf32>
      %c0_11 = arith.constant 0 : index
      %c0_12 = arith.constant 0 : index
      %13 = vector.load %arg6[%c0_11, %c0_12] : memref<512x64xf32, #tpu.memory_space<vmem>>, vector<512x64xf32>
      tpu.vector_store %arg6[%c0_11, %c0_12], %12 {strides = array<i32>} : memref<512x64xf32, #tpu.memory_space<vmem>>, vector<512x64xf32>,
    } else {
    }
    %c0 = arith.constant 0 : index
    %c0_1 = arith.constant 0 : index
    %3 = vector.load %arg6[%c0, %c0_1] : memref<512x64xf32, #tpu.memory_space<vmem>>, vector<512x64xf32>
    %c0_2 = arith.constant 0 : index
    %c0_3 = arith.constant 0 : index
    %4 = vector.load %arg1[%c0_2, %c0_3] : memref<512x48xbf16, #tpu.memory_space<vmem>>, vector<512x48xbf16>
    %c0_4 = arith.constant 0 : index
    %c0_5 = arith.constant 0 : index
    %5 = vector.load %arg2[%c0_4, %c0_5] : memref<48x64xbf16, #tpu.memory_space<vmem>>, vector<48x64xbf16>
    %cst = arith.constant dense<0.000000e+00> : vector<512x64xf32>
    %6 = tpu.matmul %4, %5, %cst {dimension_numbers = #tpu.dot_dimension_numbers<[1], [0], [0], [1], [0, 0, 1, 1], [], []>} : vector<512x48xbf16>, vector<48x64xbf16>, vector<512x64xf32> -> vector<512x64xf32>
    %7 = arith.addf %3, %6 : vector<512x64xf32>
    %c0_6 = arith.constant 0 : index
    %c0_7 = arith.constant 0 : index
    %8 = vector.load %arg6[%c0_6, %c0_7] : memref<512x64xf32, #tpu.memory_space<vmem>>, vector<512x64xf32>
    tpu.vector_store %arg6[%c0_6, %c0_7], %7 {strides = array<i32>} : memref<512x64xf32, #tpu.memory_space<vmem>>, vector<512x64xf32>,
    %c0_i32_8 = arith.constant 0 : i32
    %9 = arith.cmpi eq, %arg0, %c0_i32_8 : i32
    %10 = arith.extui %9 : i1 to i32
    %c0_i32_9 = arith.constant 0 : i32
    %11 = arith.cmpi ne, %10, %c0_i32_9 : i32
    scf.if %11 {
      %c0_10 = arith.constant 0 : index
      %c0_11 = arith.constant 0 : index
      %12 = vector.load %arg6[%c0_10, %c0_11] : memref<512x64xf32, #tpu.memory_space<vmem>>, vector<512x64xf32>
      %c0_12 = arith.constant 0 : index
      %c0_13 = arith.constant 0 : index
      %13 = vector.load %arg3[%c0_12, %c0_13] : memref<1x64xf32, #tpu.memory_space<vmem>>, vector<1x64xf32>
      %14 = vector.broadcast %13 : vector<1x64xf32> to vector<512x64xf32>
      %15 = arith.mulf %12, %14 : vector<512x64xf32>
      %c0_14 = arith.constant 0 : index
      %c0_15 = arith.constant 0 : index
      %16 = vector.load %arg4[%c0_14, %c0_15] : memref<1x64xf32, #tpu.memory_space<vmem>>, vector<1x64xf32>
      %17 = vector.broadcast %16 : vector<1x64xf32> to vector<512x64xf32>
      %18 = arith.addf %15, %17 : vector<512x64xf32>
      %cst_16 = arith.constant 0.000000e+00 : f32
      %19 = vector.broadcast %cst_16 : f32 to vector<512x64xf32>
      %20 = arith.cmpf oge, %18, %19 : vector<512x64xf32>
      %cst_17 = arith.constant 2.000000e-01 : f32
      %21 = vector.broadcast %cst_17 : f32 to vector<512x64xf32>
      %22 = arith.mulf %21, %18 : vector<512x64xf32>
      %23 = arith.select %20, %18, %22 : vector<512x64xi1>, vector<512x64xf32>
      %24 = arith.truncf %23 : vector<512x64xf32> to vector<512x64xbf16>
      %c0_18 = arith.constant 0 : index
      %c0_19 = arith.constant 0 : index
      %25 = vector.load %arg5[%c0_18, %c0_19] : memref<512x64xbf16, #tpu.memory_space<vmem>>, vector<512x64xbf16>
      tpu.vector_store %arg5[%c0_18, %c0_19], %24 {strides = array<i32>} : memref<512x64xbf16, #tpu.memory_space<vmem>>, vector<512x64xbf16>,
    } else {
    }
    return
  }
  func.func @transform_0(%arg0: i32) -> (i32, i32) {
    %c0_i32 = arith.constant 0 : i32
    %c0_i32_0 = arith.constant 0 : i32
    return %c0_i32, %arg0 : i32, i32
  }
  func.func @transform_1(%arg0: i32) -> (i32, i32) {
    %c0_i32 = arith.constant 0 : i32
    %c0_i32_0 = arith.constant 0 : i32
    return %arg0, %c0_i32 : i32, i32
  }
  func.func @transform_2(%arg0: i32) -> (i32, i32) {
    %c0_i32 = arith.constant 0 : i32
    %c0_i32_0 = arith.constant 0 : i32
    %c0_i32_1 = arith.constant 0 : i32
    return %c0_i32, %c0_i32_0 : i32, i32
  }
  func.func @transform_3(%arg0: i32) -> (i32, i32) {
    %c0_i32 = arith.constant 0 : i32
    %c0_i32_0 = arith.constant 0 : i32
    %c0_i32_1 = arith.constant 0 : i32
    return %c0_i32, %c0_i32_0 : i32, i32
  }
  func.func @transform_4(%arg0: i32) -> (i32, i32) {
    %c0_i32 = arith.constant 0 : i32
    %c0_i32_0 = arith.constant 0 : i32
    %c0_i32_1 = arith.constant 0 : i32
    return %c0_i32, %c0_i32_0 : i32, i32
  }
}

module attributes {stable_mosaic.version = 11 : i64} {
  func.func @_mm_scale_shift_act_kernel(%arg0: i32, %arg1: memref<128x1024xbf16, #tpu.memory_space<vmem>>, %arg2: memref<1024x128xbf16, #tpu.memory_space<vmem>>, %arg3: memref<1x128xf32, #tpu.memory_space<vmem>>, %arg4: memref<1x128xf32, #tpu.memory_space<vmem>>, %arg5: memref<128x128xbf16, #tpu.memory_space<vmem>>, %arg6: memref<128x128xf32, #tpu.memory_space<vmem>>) attributes {dimension_semantics = [#tpu.dimension_semantics<arbitrary>], iteration_bounds = array<i64: 1>, scalar_prefetch = 0 : i64, scratch_operands = 1 : i64, tpu.core_type = #tpu.core_type<tc>, window_params = [{transform_indices = @transform_0, window_bounds = array<i64: 128, 1024>}, {transform_indices = @transform_1, window_bounds = array<i64: 1024, 128>}, {pipeline_mode = #tpu.pipeline_mode<synchronous>, transform_indices = @transform_2, window_bounds = array<i64: 1, 128>}, {pipeline_mode = #tpu.pipeline_mode<synchronous>, transform_indices = @transform_3, window_bounds = array<i64: 1, 128>}, {pipeline_mode = #tpu.pipeline_mode<synchronous>, transform_indices = @transform_4, window_bounds = array<i64: 128, 128>}]} {
    %c0_i32 = arith.constant 0 : i32
    %0 = arith.cmpi eq, %arg0, %c0_i32 : i32
    %1 = arith.extui %0 : i1 to i32
    %c0_i32_0 = arith.constant 0 : i32
    %2 = arith.cmpi ne, %1, %c0_i32_0 : i32
    scf.if %2 {
      %cst_10 = arith.constant 0.000000e+00 : f32
      %12 = vector.broadcast %cst_10 : f32 to vector<128x128xf32>
      %c0_11 = arith.constant 0 : index
      %c0_12 = arith.constant 0 : index
      %13 = vector.load %arg6[%c0_11, %c0_12] : memref<128x128xf32, #tpu.memory_space<vmem>>, vector<128x128xf32>
      tpu.vector_store %arg6[%c0_11, %c0_12], %12 {strides = array<i32>} : memref<128x128xf32, #tpu.memory_space<vmem>>, vector<128x128xf32>,
    } else {
    }
    %c0 = arith.constant 0 : index
    %c0_1 = arith.constant 0 : index
    %3 = vector.load %arg6[%c0, %c0_1] : memref<128x128xf32, #tpu.memory_space<vmem>>, vector<128x128xf32>
    %c0_2 = arith.constant 0 : index
    %c0_3 = arith.constant 0 : index
    %4 = vector.load %arg1[%c0_2, %c0_3] : memref<128x1024xbf16, #tpu.memory_space<vmem>>, vector<128x1024xbf16>
    %c0_4 = arith.constant 0 : index
    %c0_5 = arith.constant 0 : index
    %5 = vector.load %arg2[%c0_4, %c0_5] : memref<1024x128xbf16, #tpu.memory_space<vmem>>, vector<1024x128xbf16>
    %cst = arith.constant dense<0.000000e+00> : vector<128x128xf32>
    %6 = tpu.matmul %4, %5, %cst {dimension_numbers = #tpu.dot_dimension_numbers<[1], [0], [0], [1], [0, 0, 1, 1], [], []>} : vector<128x1024xbf16>, vector<1024x128xbf16>, vector<128x128xf32> -> vector<128x128xf32>
    %7 = arith.addf %3, %6 : vector<128x128xf32>
    %c0_6 = arith.constant 0 : index
    %c0_7 = arith.constant 0 : index
    %8 = vector.load %arg6[%c0_6, %c0_7] : memref<128x128xf32, #tpu.memory_space<vmem>>, vector<128x128xf32>
    tpu.vector_store %arg6[%c0_6, %c0_7], %7 {strides = array<i32>} : memref<128x128xf32, #tpu.memory_space<vmem>>, vector<128x128xf32>,
    %c0_i32_8 = arith.constant 0 : i32
    %9 = arith.cmpi eq, %arg0, %c0_i32_8 : i32
    %10 = arith.extui %9 : i1 to i32
    %c0_i32_9 = arith.constant 0 : i32
    %11 = arith.cmpi ne, %10, %c0_i32_9 : i32
    scf.if %11 {
      %c0_10 = arith.constant 0 : index
      %c0_11 = arith.constant 0 : index
      %12 = vector.load %arg6[%c0_10, %c0_11] : memref<128x128xf32, #tpu.memory_space<vmem>>, vector<128x128xf32>
      %c0_12 = arith.constant 0 : index
      %c0_13 = arith.constant 0 : index
      %13 = vector.load %arg3[%c0_12, %c0_13] : memref<1x128xf32, #tpu.memory_space<vmem>>, vector<1x128xf32>
      %14 = vector.broadcast %13 : vector<1x128xf32> to vector<128x128xf32>
      %15 = arith.mulf %12, %14 : vector<128x128xf32>
      %c0_14 = arith.constant 0 : index
      %c0_15 = arith.constant 0 : index
      %16 = vector.load %arg4[%c0_14, %c0_15] : memref<1x128xf32, #tpu.memory_space<vmem>>, vector<1x128xf32>
      %17 = vector.broadcast %16 : vector<1x128xf32> to vector<128x128xf32>
      %18 = arith.addf %15, %17 : vector<128x128xf32>
      %cst_16 = arith.constant 0.000000e+00 : f32
      %19 = vector.broadcast %cst_16 : f32 to vector<128x128xf32>
      %20 = arith.cmpf oge, %18, %19 : vector<128x128xf32>
      %cst_17 = arith.constant 2.000000e-01 : f32
      %21 = vector.broadcast %cst_17 : f32 to vector<128x128xf32>
      %22 = arith.mulf %21, %18 : vector<128x128xf32>
      %23 = arith.select %20, %18, %22 : vector<128x128xi1>, vector<128x128xf32>
      %24 = arith.truncf %23 : vector<128x128xf32> to vector<128x128xbf16>
      %c0_18 = arith.constant 0 : index
      %c0_19 = arith.constant 0 : index
      %25 = vector.load %arg5[%c0_18, %c0_19] : memref<128x128xbf16, #tpu.memory_space<vmem>>, vector<128x128xbf16>
      tpu.vector_store %arg5[%c0_18, %c0_19], %24 {strides = array<i32>} : memref<128x128xbf16, #tpu.memory_space<vmem>>, vector<128x128xbf16>,
    } else {
    }
    return
  }
  func.func @transform_0(%arg0: i32) -> (i32, i32) {
    %c0_i32 = arith.constant 0 : i32
    %c0_i32_0 = arith.constant 0 : i32
    return %c0_i32, %arg0 : i32, i32
  }
  func.func @transform_1(%arg0: i32) -> (i32, i32) {
    %c0_i32 = arith.constant 0 : i32
    %c0_i32_0 = arith.constant 0 : i32
    return %arg0, %c0_i32 : i32, i32
  }
  func.func @transform_2(%arg0: i32) -> (i32, i32) {
    %c0_i32 = arith.constant 0 : i32
    %c0_i32_0 = arith.constant 0 : i32
    %c0_i32_1 = arith.constant 0 : i32
    return %c0_i32, %c0_i32_0 : i32, i32
  }
  func.func @transform_3(%arg0: i32) -> (i32, i32) {
    %c0_i32 = arith.constant 0 : i32
    %c0_i32_0 = arith.constant 0 : i32
    %c0_i32_1 = arith.constant 0 : i32
    return %c0_i32, %c0_i32_0 : i32, i32
  }
  func.func @transform_4(%arg0: i32) -> (i32, i32) {
    %c0_i32 = arith.constant 0 : i32
    %c0_i32_0 = arith.constant 0 : i32
    %c0_i32_1 = arith.constant 0 : i32
    return %c0_i32, %c0_i32_0 : i32, i32
  }
}

module attributes {stable_mosaic.version = 11 : i64} {
  func.func @_mm_scale_shift_act_kernel(%arg0: i32, %arg1: memref<32x1024xbf16, #tpu.memory_space<vmem>>, %arg2: memref<1024x256xbf16, #tpu.memory_space<vmem>>, %arg3: memref<1x256xf32, #tpu.memory_space<vmem>>, %arg4: memref<1x256xf32, #tpu.memory_space<vmem>>, %arg5: memref<32x256xbf16, #tpu.memory_space<vmem>>, %arg6: memref<32x256xf32, #tpu.memory_space<vmem>>) attributes {dimension_semantics = [#tpu.dimension_semantics<arbitrary>], iteration_bounds = array<i64: 2>, scalar_prefetch = 0 : i64, scratch_operands = 1 : i64, tpu.core_type = #tpu.core_type<tc>, window_params = [{transform_indices = @transform_0, window_bounds = array<i64: 32, 1024>}, {transform_indices = @transform_1, window_bounds = array<i64: 1024, 256>}, {pipeline_mode = #tpu.pipeline_mode<synchronous>, transform_indices = @transform_2, window_bounds = array<i64: 1, 256>}, {pipeline_mode = #tpu.pipeline_mode<synchronous>, transform_indices = @transform_3, window_bounds = array<i64: 1, 256>}, {pipeline_mode = #tpu.pipeline_mode<synchronous>, transform_indices = @transform_4, window_bounds = array<i64: 32, 256>}]} {
    %c0_i32 = arith.constant 0 : i32
    %0 = arith.cmpi eq, %arg0, %c0_i32 : i32
    %1 = arith.extui %0 : i1 to i32
    %c0_i32_0 = arith.constant 0 : i32
    %2 = arith.cmpi ne, %1, %c0_i32_0 : i32
    scf.if %2 {
      %cst_9 = arith.constant 0.000000e+00 : f32
      %12 = vector.broadcast %cst_9 : f32 to vector<32x256xf32>
      %c0_10 = arith.constant 0 : index
      %c0_11 = arith.constant 0 : index
      %13 = vector.load %arg6[%c0_10, %c0_11] : memref<32x256xf32, #tpu.memory_space<vmem>>, vector<32x256xf32>
      tpu.vector_store %arg6[%c0_10, %c0_11], %12 {strides = array<i32>} : memref<32x256xf32, #tpu.memory_space<vmem>>, vector<32x256xf32>,
    } else {
    }
    %c0 = arith.constant 0 : index
    %c0_1 = arith.constant 0 : index
    %3 = vector.load %arg6[%c0, %c0_1] : memref<32x256xf32, #tpu.memory_space<vmem>>, vector<32x256xf32>
    %c0_2 = arith.constant 0 : index
    %c0_3 = arith.constant 0 : index
    %4 = vector.load %arg1[%c0_2, %c0_3] : memref<32x1024xbf16, #tpu.memory_space<vmem>>, vector<32x1024xbf16>
    %c0_4 = arith.constant 0 : index
    %c0_5 = arith.constant 0 : index
    %5 = vector.load %arg2[%c0_4, %c0_5] : memref<1024x256xbf16, #tpu.memory_space<vmem>>, vector<1024x256xbf16>
    %cst = arith.constant dense<0.000000e+00> : vector<32x256xf32>
    %6 = tpu.matmul %4, %5, %cst {dimension_numbers = #tpu.dot_dimension_numbers<[1], [0], [0], [1], [0, 0, 1, 1], [], []>} : vector<32x1024xbf16>, vector<1024x256xbf16>, vector<32x256xf32> -> vector<32x256xf32>
    %7 = arith.addf %3, %6 : vector<32x256xf32>
    %c0_6 = arith.constant 0 : index
    %c0_7 = arith.constant 0 : index
    %8 = vector.load %arg6[%c0_6, %c0_7] : memref<32x256xf32, #tpu.memory_space<vmem>>, vector<32x256xf32>
    tpu.vector_store %arg6[%c0_6, %c0_7], %7 {strides = array<i32>} : memref<32x256xf32, #tpu.memory_space<vmem>>, vector<32x256xf32>,
    %c1_i32 = arith.constant 1 : i32
    %9 = arith.cmpi eq, %arg0, %c1_i32 : i32
    %10 = arith.extui %9 : i1 to i32
    %c0_i32_8 = arith.constant 0 : i32
    %11 = arith.cmpi ne, %10, %c0_i32_8 : i32
    scf.if %11 {
      %c0_9 = arith.constant 0 : index
      %c0_10 = arith.constant 0 : index
      %12 = vector.load %arg6[%c0_9, %c0_10] : memref<32x256xf32, #tpu.memory_space<vmem>>, vector<32x256xf32>
      %c0_11 = arith.constant 0 : index
      %c0_12 = arith.constant 0 : index
      %13 = vector.load %arg3[%c0_11, %c0_12] : memref<1x256xf32, #tpu.memory_space<vmem>>, vector<1x256xf32>
      %14 = vector.broadcast %13 : vector<1x256xf32> to vector<32x256xf32>
      %15 = arith.mulf %12, %14 : vector<32x256xf32>
      %c0_13 = arith.constant 0 : index
      %c0_14 = arith.constant 0 : index
      %16 = vector.load %arg4[%c0_13, %c0_14] : memref<1x256xf32, #tpu.memory_space<vmem>>, vector<1x256xf32>
      %17 = vector.broadcast %16 : vector<1x256xf32> to vector<32x256xf32>
      %18 = arith.addf %15, %17 : vector<32x256xf32>
      %cst_15 = arith.constant 0.000000e+00 : f32
      %19 = vector.broadcast %cst_15 : f32 to vector<32x256xf32>
      %20 = arith.cmpf oge, %18, %19 : vector<32x256xf32>
      %cst_16 = arith.constant 2.000000e-01 : f32
      %21 = vector.broadcast %cst_16 : f32 to vector<32x256xf32>
      %22 = arith.mulf %21, %18 : vector<32x256xf32>
      %23 = arith.select %20, %18, %22 : vector<32x256xi1>, vector<32x256xf32>
      %24 = arith.truncf %23 : vector<32x256xf32> to vector<32x256xbf16>
      %c0_17 = arith.constant 0 : index
      %c0_18 = arith.constant 0 : index
      %25 = vector.load %arg5[%c0_17, %c0_18] : memref<32x256xbf16, #tpu.memory_space<vmem>>, vector<32x256xbf16>
      tpu.vector_store %arg5[%c0_17, %c0_18], %24 {strides = array<i32>} : memref<32x256xbf16, #tpu.memory_space<vmem>>, vector<32x256xbf16>,
    } else {
    }
    return
  }
  func.func @transform_0(%arg0: i32) -> (i32, i32) {
    %c0_i32 = arith.constant 0 : i32
    %c0_i32_0 = arith.constant 0 : i32
    return %c0_i32, %arg0 : i32, i32
  }
  func.func @transform_1(%arg0: i32) -> (i32, i32) {
    %c0_i32 = arith.constant 0 : i32
    %c0_i32_0 = arith.constant 0 : i32
    return %arg0, %c0_i32 : i32, i32
  }
  func.func @transform_2(%arg0: i32) -> (i32, i32) {
    %c0_i32 = arith.constant 0 : i32
    %c0_i32_0 = arith.constant 0 : i32
    %c0_i32_1 = arith.constant 0 : i32
    return %c0_i32, %c0_i32_0 : i32, i32
  }
  func.func @transform_3(%arg0: i32) -> (i32, i32) {
    %c0_i32 = arith.constant 0 : i32
    %c0_i32_0 = arith.constant 0 : i32
    %c0_i32_1 = arith.constant 0 : i32
    return %c0_i32, %c0_i32_0 : i32, i32
  }
  func.func @transform_4(%arg0: i32) -> (i32, i32) {
    %c0_i32 = arith.constant 0 : i32
    %c0_i32_0 = arith.constant 0 : i32
    %c0_i32_1 = arith.constant 0 : i32
    return %c0_i32, %c0_i32_0 : i32, i32
  }
}

module attributes {stable_mosaic.version = 11 : i64} {
  func.func @_mm_scale_shift_act_kernel(%arg0: i32, %arg1: memref<8x1024xbf16, #tpu.memory_space<vmem>>, %arg2: memref<1024x512xbf16, #tpu.memory_space<vmem>>, %arg3: memref<1x512xf32, #tpu.memory_space<vmem>>, %arg4: memref<1x512xf32, #tpu.memory_space<vmem>>, %arg5: memref<8x512xbf16, #tpu.memory_space<vmem>>, %arg6: memref<8x512xf32, #tpu.memory_space<vmem>>) attributes {dimension_semantics = [#tpu.dimension_semantics<arbitrary>], iteration_bounds = array<i64: 4>, scalar_prefetch = 0 : i64, scratch_operands = 1 : i64, tpu.core_type = #tpu.core_type<tc>, window_params = [{transform_indices = @transform_0, window_bounds = array<i64: 8, 1024>}, {transform_indices = @transform_1, window_bounds = array<i64: 1024, 512>}, {pipeline_mode = #tpu.pipeline_mode<synchronous>, transform_indices = @transform_2, window_bounds = array<i64: 1, 512>}, {pipeline_mode = #tpu.pipeline_mode<synchronous>, transform_indices = @transform_3, window_bounds = array<i64: 1, 512>}, {pipeline_mode = #tpu.pipeline_mode<synchronous>, transform_indices = @transform_4, window_bounds = array<i64: 8, 512>}]} {
    %c0_i32 = arith.constant 0 : i32
    %0 = arith.cmpi eq, %arg0, %c0_i32 : i32
    %1 = arith.extui %0 : i1 to i32
    %c0_i32_0 = arith.constant 0 : i32
    %2 = arith.cmpi ne, %1, %c0_i32_0 : i32
    scf.if %2 {
      %cst_9 = arith.constant 0.000000e+00 : f32
      %12 = vector.broadcast %cst_9 : f32 to vector<8x512xf32>
      %c0_10 = arith.constant 0 : index
      %c0_11 = arith.constant 0 : index
      %13 = vector.load %arg6[%c0_10, %c0_11] : memref<8x512xf32, #tpu.memory_space<vmem>>, vector<8x512xf32>
      tpu.vector_store %arg6[%c0_10, %c0_11], %12 {strides = array<i32>} : memref<8x512xf32, #tpu.memory_space<vmem>>, vector<8x512xf32>,
    } else {
    }
    %c0 = arith.constant 0 : index
    %c0_1 = arith.constant 0 : index
    %3 = vector.load %arg6[%c0, %c0_1] : memref<8x512xf32, #tpu.memory_space<vmem>>, vector<8x512xf32>
    %c0_2 = arith.constant 0 : index
    %c0_3 = arith.constant 0 : index
    %4 = vector.load %arg1[%c0_2, %c0_3] : memref<8x1024xbf16, #tpu.memory_space<vmem>>, vector<8x1024xbf16>
    %c0_4 = arith.constant 0 : index
    %c0_5 = arith.constant 0 : index
    %5 = vector.load %arg2[%c0_4, %c0_5] : memref<1024x512xbf16, #tpu.memory_space<vmem>>, vector<1024x512xbf16>
    %cst = arith.constant dense<0.000000e+00> : vector<8x512xf32>
    %6 = tpu.matmul %4, %5, %cst {dimension_numbers = #tpu.dot_dimension_numbers<[1], [0], [0], [1], [0, 0, 1, 1], [], []>} : vector<8x1024xbf16>, vector<1024x512xbf16>, vector<8x512xf32> -> vector<8x512xf32>
    %7 = arith.addf %3, %6 : vector<8x512xf32>
    %c0_6 = arith.constant 0 : index
    %c0_7 = arith.constant 0 : index
    %8 = vector.load %arg6[%c0_6, %c0_7] : memref<8x512xf32, #tpu.memory_space<vmem>>, vector<8x512xf32>
    tpu.vector_store %arg6[%c0_6, %c0_7], %7 {strides = array<i32>} : memref<8x512xf32, #tpu.memory_space<vmem>>, vector<8x512xf32>,
    %c3_i32 = arith.constant 3 : i32
    %9 = arith.cmpi eq, %arg0, %c3_i32 : i32
    %10 = arith.extui %9 : i1 to i32
    %c0_i32_8 = arith.constant 0 : i32
    %11 = arith.cmpi ne, %10, %c0_i32_8 : i32
    scf.if %11 {
      %c0_9 = arith.constant 0 : index
      %c0_10 = arith.constant 0 : index
      %12 = vector.load %arg6[%c0_9, %c0_10] : memref<8x512xf32, #tpu.memory_space<vmem>>, vector<8x512xf32>
      %c0_11 = arith.constant 0 : index
      %c0_12 = arith.constant 0 : index
      %13 = vector.load %arg3[%c0_11, %c0_12] : memref<1x512xf32, #tpu.memory_space<vmem>>, vector<1x512xf32>
      %14 = vector.broadcast %13 : vector<1x512xf32> to vector<8x512xf32>
      %15 = arith.mulf %12, %14 : vector<8x512xf32>
      %c0_13 = arith.constant 0 : index
      %c0_14 = arith.constant 0 : index
      %16 = vector.load %arg4[%c0_13, %c0_14] : memref<1x512xf32, #tpu.memory_space<vmem>>, vector<1x512xf32>
      %17 = vector.broadcast %16 : vector<1x512xf32> to vector<8x512xf32>
      %18 = arith.addf %15, %17 : vector<8x512xf32>
      %cst_15 = arith.constant 0.000000e+00 : f32
      %19 = vector.broadcast %cst_15 : f32 to vector<8x512xf32>
      %20 = arith.cmpf oge, %18, %19 : vector<8x512xf32>
      %cst_16 = arith.constant 2.000000e-01 : f32
      %21 = vector.broadcast %cst_16 : f32 to vector<8x512xf32>
      %22 = arith.mulf %21, %18 : vector<8x512xf32>
      %23 = arith.select %20, %18, %22 : vector<8x512xi1>, vector<8x512xf32>
      %24 = arith.truncf %23 : vector<8x512xf32> to vector<8x512xbf16>
      %c0_17 = arith.constant 0 : index
      %c0_18 = arith.constant 0 : index
      %25 = vector.load %arg5[%c0_17, %c0_18] : memref<8x512xbf16, #tpu.memory_space<vmem>>, vector<8x512xbf16>
      tpu.vector_store %arg5[%c0_17, %c0_18], %24 {strides = array<i32>} : memref<8x512xbf16, #tpu.memory_space<vmem>>, vector<8x512xbf16>,
    } else {
    }
    return
  }
  func.func @transform_0(%arg0: i32) -> (i32, i32) {
    %c0_i32 = arith.constant 0 : i32
    %c0_i32_0 = arith.constant 0 : i32
    return %c0_i32, %arg0 : i32, i32
  }
  func.func @transform_1(%arg0: i32) -> (i32, i32) {
    %c0_i32 = arith.constant 0 : i32
    %c0_i32_0 = arith.constant 0 : i32
    return %arg0, %c0_i32 : i32, i32
  }
  func.func @transform_2(%arg0: i32) -> (i32, i32) {
    %c0_i32 = arith.constant 0 : i32
    %c0_i32_0 = arith.constant 0 : i32
    %c0_i32_1 = arith.constant 0 : i32
    return %c0_i32, %c0_i32_0 : i32, i32
  }
  func.func @transform_3(%arg0: i32) -> (i32, i32) {
    %c0_i32 = arith.constant 0 : i32
    %c0_i32_0 = arith.constant 0 : i32
    %c0_i32_1 = arith.constant 0 : i32
    return %c0_i32, %c0_i32_0 : i32, i32
  }
  func.func @transform_4(%arg0: i32) -> (i32, i32) {
    %c0_i32 = arith.constant 0 : i32
    %c0_i32_0 = arith.constant 0 : i32
    %c0_i32_1 = arith.constant 0 : i32
    return %c0_i32, %c0_i32_0 : i32, i32
  }
}

module attributes {stable_mosaic.version = 11 : i64} {
  func.func @_mm_scale_shift_act_kernel(%arg0: i32, %arg1: memref<2x1024xbf16, #tpu.memory_space<vmem>>, %arg2: memref<1024x1xbf16, #tpu.memory_space<vmem>>, %arg3: memref<1x1xf32, #tpu.memory_space<vmem>>, %arg4: memref<1x1xf32, #tpu.memory_space<vmem>>, %arg5: memref<2x1xf32, #tpu.memory_space<vmem>>, %arg6: memref<2x1xf32, #tpu.memory_space<vmem>>) attributes {dimension_semantics = [#tpu.dimension_semantics<arbitrary>], iteration_bounds = array<i64: 8>, scalar_prefetch = 0 : i64, scratch_operands = 1 : i64, tpu.core_type = #tpu.core_type<tc>, window_params = [{transform_indices = @transform_0, window_bounds = array<i64: 2, 1024>}, {transform_indices = @transform_1, window_bounds = array<i64: 1024, 1>}, {pipeline_mode = #tpu.pipeline_mode<synchronous>, transform_indices = @transform_2, window_bounds = array<i64: 1, 1>}, {pipeline_mode = #tpu.pipeline_mode<synchronous>, transform_indices = @transform_3, window_bounds = array<i64: 1, 1>}, {pipeline_mode = #tpu.pipeline_mode<synchronous>, transform_indices = @transform_4, window_bounds = array<i64: 2, 1>}]} {
    %c0_i32 = arith.constant 0 : i32
    %0 = arith.cmpi eq, %arg0, %c0_i32 : i32
    %1 = arith.extui %0 : i1 to i32
    %c0_i32_0 = arith.constant 0 : i32
    %2 = arith.cmpi ne, %1, %c0_i32_0 : i32
    scf.if %2 {
      %cst_9 = arith.constant 0.000000e+00 : f32
      %12 = vector.broadcast %cst_9 : f32 to vector<2x1xf32>
      %c0_10 = arith.constant 0 : index
      %c0_11 = arith.constant 0 : index
      %13 = vector.load %arg6[%c0_10, %c0_11] : memref<2x1xf32, #tpu.memory_space<vmem>>, vector<2x1xf32>
      tpu.vector_store %arg6[%c0_10, %c0_11], %12 {strides = array<i32>} : memref<2x1xf32, #tpu.memory_space<vmem>>, vector<2x1xf32>,
    } else {
    }
    %c0 = arith.constant 0 : index
    %c0_1 = arith.constant 0 : index
    %3 = vector.load %arg6[%c0, %c0_1] : memref<2x1xf32, #tpu.memory_space<vmem>>, vector<2x1xf32>
    %c0_2 = arith.constant 0 : index
    %c0_3 = arith.constant 0 : index
    %4 = vector.load %arg1[%c0_2, %c0_3] : memref<2x1024xbf16, #tpu.memory_space<vmem>>, vector<2x1024xbf16>
    %c0_4 = arith.constant 0 : index
    %c0_5 = arith.constant 0 : index
    %5 = vector.load %arg2[%c0_4, %c0_5] : memref<1024x1xbf16, #tpu.memory_space<vmem>>, vector<1024x1xbf16>
    %cst = arith.constant dense<0.000000e+00> : vector<2x1xf32>
    %6 = tpu.matmul %4, %5, %cst {dimension_numbers = #tpu.dot_dimension_numbers<[1], [0], [0], [1], [0, 0, 1, 1], [], []>} : vector<2x1024xbf16>, vector<1024x1xbf16>, vector<2x1xf32> -> vector<2x1xf32>
    %7 = arith.addf %3, %6 : vector<2x1xf32>
    %c0_6 = arith.constant 0 : index
    %c0_7 = arith.constant 0 : index
    %8 = vector.load %arg6[%c0_6, %c0_7] : memref<2x1xf32, #tpu.memory_space<vmem>>, vector<2x1xf32>
    tpu.vector_store %arg6[%c0_6, %c0_7], %7 {strides = array<i32>} : memref<2x1xf32, #tpu.memory_space<vmem>>, vector<2x1xf32>,
    %c7_i32 = arith.constant 7 : i32
    %9 = arith.cmpi eq, %arg0, %c7_i32 : i32
    %10 = arith.extui %9 : i1 to i32
    %c0_i32_8 = arith.constant 0 : i32
    %11 = arith.cmpi ne, %10, %c0_i32_8 : i32
    scf.if %11 {
      %c0_9 = arith.constant 0 : index
      %c0_10 = arith.constant 0 : index
      %12 = vector.load %arg6[%c0_9, %c0_10] : memref<2x1xf32, #tpu.memory_space<vmem>>, vector<2x1xf32>
      %c0_11 = arith.constant 0 : index
      %c0_12 = arith.constant 0 : index
      %13 = vector.load %arg3[%c0_11, %c0_12] : memref<1x1xf32, #tpu.memory_space<vmem>>, vector<1x1xf32>
      %14 = vector.broadcast %13 : vector<1x1xf32> to vector<2x1xf32>
      %15 = arith.mulf %12, %14 : vector<2x1xf32>
      %c0_13 = arith.constant 0 : index
      %c0_14 = arith.constant 0 : index
      %16 = vector.load %arg4[%c0_13, %c0_14] : memref<1x1xf32, #tpu.memory_space<vmem>>, vector<1x1xf32>
      %17 = vector.broadcast %16 : vector<1x1xf32> to vector<2x1xf32>
      %18 = arith.addf %15, %17 : vector<2x1xf32>
      %19 = arith.negf %18 : vector<2x1xf32>
      %20 = math.exp %19 : vector<2x1xf32>
      %cst_15 = arith.constant 1.000000e+00 : f32
      %21 = vector.broadcast %cst_15 : f32 to vector<2x1xf32>
      %22 = arith.addf %21, %20 : vector<2x1xf32>
      %23 = arith.divf %21, %22 : vector<2x1xf32>
      %c0_16 = arith.constant 0 : index
      %c0_17 = arith.constant 0 : index
      %24 = vector.load %arg5[%c0_16, %c0_17] : memref<2x1xf32, #tpu.memory_space<vmem>>, vector<2x1xf32>
      tpu.vector_store %arg5[%c0_16, %c0_17], %23 {strides = array<i32>} : memref<2x1xf32, #tpu.memory_space<vmem>>, vector<2x1xf32>,
    } else {
    }
    return
  }
  func.func @transform_0(%arg0: i32) -> (i32, i32) {
    %c0_i32 = arith.constant 0 : i32
    %c0_i32_0 = arith.constant 0 : i32
    return %c0_i32, %arg0 : i32, i32
  }
  func.func @transform_1(%arg0: i32) -> (i32, i32) {
    %c0_i32 = arith.constant 0 : i32
    %c0_i32_0 = arith.constant 0 : i32
    return %arg0, %c0_i32 : i32, i32
  }
  func.func @transform_2(%arg0: i32) -> (i32, i32) {
    %c0_i32 = arith.constant 0 : i32
    %c0_i32_0 = arith.constant 0 : i32
    %c0_i32_1 = arith.constant 0 : i32
    return %c0_i32, %c0_i32_0 : i32, i32
  }
  func.func @transform_3(%arg0: i32) -> (i32, i32) {
    %c0_i32 = arith.constant 0 : i32
    %c0_i32_0 = arith.constant 0 : i32
    %c0_i32_1 = arith.constant 0 : i32
    return %c0_i32, %c0_i32_0 : i32, i32
  }
  func.func @transform_4(%arg0: i32) -> (i32, i32) {
    %c0_i32 = arith.constant 0 : i32
    %c0_i32_0 = arith.constant 0 : i32
    %c0_i32_1 = arith.constant 0 : i32
    return %c0_i32, %c0_i32_0 : i32, i32
  }
}

</mosaic_0001>

<bundles_post_ra>
// kernel: discriminator_forward.5
= control target key start
LH: loop header
LB: loop body
LE: loop exit
PB: predicated region body
PF: predicated region fallthrough
CT: control target
= control target key end

     0   :  { %9 = vsyncpa [#allocation4], 0  ;;  %s2476_s0 = inlined_call_operand.vmem [shape: bf16[512,48], index: 0, kind: input, shape index: {}]   ;;  %s2477_s1 = inlined_call_operand.hbm [shape: bf16[48,64], index: 1, kind: input, shape index: {}]   ;;  %s2478_s2 = inlined_call_operand.hbm [shape: f32[1,64], index: 2, kind: input, shape index: {}]   ;;  %s2479_s3 = inlined_call_operand.hbm [shape: f32[1,64], index: 3, kind: input, shape index: {}]   ;;  %s2480_s4 = inlined_call_operand.vmem [shape: bf16[512,64], index: 4, kind: output, shape index: {}]  }
   0x1   :  { %10 = vsyncpa [#allocation6], 0  ;;  %s31_s17 = sshll.u32 %s2478_s2, 4  ;;  %s1669_s18 = smov [#allocation5]   ;;  %s32_s17 = int_to_ptr.hbm [resolvable:$true] %s31_s17 }
   0x2   :  { %s33_s19 = sshll.u32 %s1669_s18, 4  ;;  %s17_s22 = sshll.u32 %s2477_s1, 4  ;;  %s34_s19 = int_to_ptr.vmem [resolvable:$true] %s33_s19  ;;  %s18_s22 = int_to_ptr.hbm [resolvable:$true] %s17_s22 }
   0x3   :  { %36 = dma.hbm_to_vmem [thread:$0]  %s32_s17, 16, %s34_s19, [#allocation6]  }
   0x4   :  { %s1670_s23 = smov [#allocation3]   ;;  %s1671_s25 = smov 64  }
   0x5   :  { %s19_s24 = sshll.u32 %s1670_s23, 4  ;;  %s1672_s26 = smov 4   ;;  %s20_s24 = int_to_ptr.vmem [resolvable:$true] %s19_s24 }
   0x6   :  { %25 = dma.hbm_to_vmem [thread:$0]  %s18_s22, 384, %s20_s24, [#allocation4], %s1671_s25, %s1671_s25, %s1672_s26  }
   0x7   :  { %s42_s2 = sshll.u32 %s2479_s3, 4  ;;  %s1673_s29 = smov [#allocation7]   ;;  %s43_s2 = int_to_ptr.hbm [resolvable:$true] %s42_s2 }
   0x8   :  { %s44_s30 = sshll.u32 %s1673_s29, 4  ;;  %s45_s30 = int_to_ptr.vmem [resolvable:$true] %s44_s30 }
   0x9   :  { %47 = dma.hbm_to_vmem [thread:$0]  %s43_s2, 16, %s45_s30, [#allocation6]  }
   0xa   :  { %1665 = dma.done.wait [#allocation4], 384  }
   0xb   :  { %1666 = vsyncadd [#allocation4], 4294966912 }
   0xc   :  { %1667 = dma.done.wait [#allocation6], 32  }
   0xd   :  { %1668 = vsyncadd [#allocation6], 4294967264  ;;  %v1573_v0 = vld [vmem:[#allocation3 + $0x10] sm:$0xff]  ;;  %v1572_v1 = vld [vmem:[#allocation3 + $0x8] sm:$0xff]  ;;  %vm442_vm0 = vcmask 392192   ;;  %vm65_vm1 = vcmask 523264  }
   0xe   :  { %544 = vmatpush.bf16.msra.mxu0 %v1573_v0  ;;  %1574 = vmatpush.bf16.msra.mxu1 %v1573_v0  ;;  %v1571_v2 = vld [vmem:[#allocation3] sm:$0xff]  ;;  %v1540_v7 = vld [vmem:[%s2476_s0 + $0x8] sm:$0xff]  ;;  %v1541_v11 = vld [vmem:[%s2476_s0 + $0x10] sm:$0xff]  ;;  %v1674_v27 = vmov 0.0   ;;  %vm1296_vm3 = vcmask 519168  }
   0xf   :  { %1575 = vmatpush.bf16.msra.mxu2 %v1573_v0  ;;  %1576 = vmatpush.bf16.msra.mxu3 %v1573_v0  ;;  %v1539_v3 = vld [vmem:[%s2476_s0] sm:$0xff]  ;;  %v1548_v8 = vld [vmem:[%s2476_s0 + $0x48] sm:$0xff]  ;;  %v1549_v12 = vld [vmem:[%s2476_s0 + $0x50] sm:$0xff]  ;;  %66 = vst.msk [vmem:[#allocation2] sm:$0xff] %vm65_vm1, %v1674_v27 }
  0x10   :  { %v1547_v4 = vld [vmem:[%s2476_s0 + $0x40] sm:$0xff]  ;;  %v1556_v9 = vld [vmem:[%s2476_s0 + $0x88] sm:$0xff]  ;;  %v1557_v13 = vld [vmem:[%s2476_s0 + $0x90] sm:$0xff]  ;;  %67 = vst.msk [vmem:[#allocation2 + $0x8] sm:$0xff] %vm65_vm1, %v1674_v27 }
  0x11   :  { %v1555_v5 = vld [vmem:[%s2476_s0 + $0x80] sm:$0xff]  ;;  %v1564_v10 = vld [vmem:[%s2476_s0 + $0xc8] sm:$0xff]  ;;  %v1565_v14 = vld [vmem:[%s2476_s0 + $0xd0] sm:$0xff]  ;;  %68 = vst.msk [vmem:[#allocation2 + $0x10] sm:$0xff] %vm65_vm1, %v1674_v27 }
  0x12   :  { %545 = vmatpush.bf16.msra.mxu0 %v1572_v1  ;;  %1577 = vmatpush.bf16.msra.mxu1 %v1572_v1  ;;  %v1563_v6 = vld [vmem:[%s2476_s0 + $0xc0] sm:$0xff]  ;;  %v1542_v15 = vld [vmem:[%s2476_s0 + $0x18] sm:$0xff]  ;;  %v1544_v23 = vld [vmem:[%s2476_s0 + $0x28] sm:$0xff]  ;;  %69 = vst.msk [vmem:[#allocation2 + $0x18] sm:$0xff] %vm65_vm1, %v1674_v27 }
  0x13   :  { %1578 = vmatpush.bf16.msra.mxu2 %v1572_v1  ;;  %1579 = vmatpush.bf16.msra.mxu3 %v1572_v1  ;;  %v1550_v16 = vld [vmem:[%s2476_s0 + $0x58] sm:$0xff]  ;;  %v1543_v19 = vld [vmem:[%s2476_s0 + $0x20] sm:$0xff]  ;;  %v1552_v24 = vld [vmem:[%s2476_s0 + $0x68] sm:$0xff]  ;;  %70 = vst.msk [vmem:[#allocation2 + $0x20] sm:$0xff] %vm65_vm1, %v1674_v27 }
  0x14   :  { %v1558_v17 = vld [vmem:[%s2476_s0 + $0x98] sm:$0xff]  ;;  %v1551_v20 = vld [vmem:[%s2476_s0 + $0x60] sm:$0xff]  ;;  %v1560_v25 = vld [vmem:[%s2476_s0 + $0xa8] sm:$0xff]  ;;  %71 = vst.msk [vmem:[#allocation2 + $0x28] sm:$0xff] %vm65_vm1, %v1674_v27 }
  0x15   :  { %v1566_v18 = vld [vmem:[%s2476_s0 + $0xd8] sm:$0xff]  ;;  %v1559_v21 = vld [vmem:[%s2476_s0 + $0xa0] sm:$0xff]  ;;  %v1568_v26 = vld [vmem:[%s2476_s0 + $0xe8] sm:$0xff]  ;;  %72 = vst.msk [vmem:[#allocation2 + $0x30] sm:$0xff] %vm65_vm1, %v1674_v27 }
  0x16   :  { %546 = vmatpush.bf16.msra.mxu0 %v1571_v2  ;;  %1580 = vmatpush.bf16.msra.mxu1 %v1571_v2  ;;  %v1567_v22 = vld [vmem:[%s2476_s0 + $0xe0] sm:$0xff]  ;;  %73 = vst.msk [vmem:[#allocation2 + $0x38] sm:$0xff] %vm65_vm1, %v1674_v27  ;;  %v1545_v28 = vld [vmem:[%s2476_s0 + $0x30] sm:$0xff]  ;;  %v1546_v32 = vld [vmem:[%s2476_s0 + $0x38] sm:$0xff] }
  0x17   :  { %1581 = vmatpush.bf16.msra.mxu2 %v1571_v2  ;;  %1582 = vmatpush.bf16.msra.mxu3 %v1571_v2  ;;  %74 = vst.msk [vmem:[#allocation2 + $0x40] sm:$0xff] %vm65_vm1, %v1674_v27  ;;  %v1553_v29 = vld [vmem:[%s2476_s0 + $0x70] sm:$0xff]  ;;  %v1554_v33 = vld [vmem:[%s2476_s0 + $0x78] sm:$0xff]  ;;  %v130_v36 = vld [vmem:[#allocation2] sm:$0xff] }
  0x18   :  { %75 = vst.msk [vmem:[#allocation2 + $0x48] sm:$0xff] %vm65_vm1, %v1674_v27  ;;  %v1561_v30 = vld [vmem:[%s2476_s0 + $0xb0] sm:$0xff]  ;;  %v1562_v34 = vld [vmem:[%s2476_s0 + $0xb8] sm:$0xff]  ;;  %v131_v60 = vld [vmem:[#allocation2 + $0x8] sm:$0xff] }
  0x19   :  { %1507 = vmatmul.msk.bf16.vlgmr.msra.gmra.mxu0 %vm442_vm0, %v1539_v3  ;;  %1515 = vmatmul.msk.bf16.vlgmr.msra.gmra.mxu1 %vm442_vm0, %v1547_v4  ;;  %76 = vst.msk [vmem:[#allocation2 + $0x50] sm:$0xff] %vm65_vm1, %v1674_v27  ;;  %v1569_v31 = vld [vmem:[%s2476_s0 + $0xf0] sm:$0xff]  ;;  %v1570_v35 = vld [vmem:[%s2476_s0 + $0xf8] sm:$0xff] }
  0x1a   :  { %1523 = vmatmul.msk.bf16.vlgmr.msra.gmra.mxu2 %vm442_vm0, %v1555_v5  ;;  %1531 = vmatmul.msk.bf16.vlgmr.msra.gmra.mxu3 %vm442_vm0, %v1563_v6  ;;  %77 = vst.msk [vmem:[#allocation2 + $0x58] sm:$0xff] %vm65_vm1, %v1674_v27  ;;  %v1936_v40 = vld [vmem:[#allocation5] ss:$0 sm:$0xff]  ;;  %v1942_v45 = vld [vmem:[#allocation7] ss:$0 sm:$0xff]  ;;  %v132_v4 = vld [vmem:[#allocation2 + $0x10] sm:$0xff] }
  0x1b   :  { %78 = vst.msk [vmem:[#allocation2 + $0x60] sm:$0xff] %vm65_vm1, %v1674_v27 }
  0x1c   :  { %79 = vst.msk [vmem:[#allocation2 + $0x68] sm:$0xff] %vm65_vm1, %v1674_v27 }
  0x1d   :  { %80 = vst.msk [vmem:[#allocation2 + $0x70] sm:$0xff] %vm65_vm1, %v1674_v27 }
  0x1e   :  { %81 = vst.msk [vmem:[#allocation2 + $0x78] sm:$0xff] %vm65_vm1, %v1674_v27 }
  0x1f   :  { %82 = vst.msk [vmem:[#allocation2 + $0x80] sm:$0xff] %vm65_vm1, %v1674_v27 }
  0x20   :  { %83 = vst.msk [vmem:[#allocation2 + $0x88] sm:$0xff] %vm65_vm1, %v1674_v27 }
  0x21   :  { %84 = vst.msk [vmem:[#allocation2 + $0x90] sm:$0xff] %vm65_vm1, %v1674_v27 }
  0x22   :  { %85 = vst.msk [vmem:[#allocation2 + $0x98] sm:$0xff] %vm65_vm1, %v1674_v27 }
  0x23   :  { %86 = vst.msk [vmem:[#allocation2 + $0xa0] sm:$0xff] %vm65_vm1, %v1674_v27 }
  0x24   :  { %87 = vst.msk [vmem:[#allocation2 + $0xa8] sm:$0xff] %vm65_vm1, %v1674_v27 }
  0x25   :  { %88 = vst.msk [vmem:[#allocation2 + $0xb0] sm:$0xff] %vm65_vm1, %v1674_v27 }
  0x26   :  { %89 = vst.msk [vmem:[#allocation2 + $0xb8] sm:$0xff] %vm65_vm1, %v1674_v27  ;;  %v146_v52 = vld [vmem:[#allocation2 + $0x80] sm:$0xff] }
  0x27   :  { %90 = vst.msk [vmem:[#allocation2 + $0xc0] sm:$0xff] %vm65_vm1, %v1674_v27  ;;  %v147_v62 = vld [vmem:[#allocation2 + $0x88] sm:$0xff] }
  0x28   :  { %91 = vst.msk [vmem:[#allocation2 + $0xc8] sm:$0xff] %vm65_vm1, %v1674_v27 }
  0x29   :  { %1508 = vmatmul.msk.bf16.gmra.mxu0 %vm442_vm0, %v1540_v7  ;;  %1516 = vmatmul.msk.bf16.gmra.mxu1 %vm442_vm0, %v1548_v8  ;;  %92 = vst.msk [vmem:[#allocation2 + $0xd0] sm:$0xff] %vm65_vm1, %v1674_v27  ;;  %v148_v8 = vld [vmem:[#allocation2 + $0x90] sm:$0xff] }
  0x2a   :  { %1524 = vmatmul.msk.bf16.gmra.mxu2 %vm442_vm0, %v1556_v9  ;;  %1532 = vmatmul.msk.bf16.gmra.mxu3 %vm442_vm0, %v1564_v10  ;;  %93 = vst.msk [vmem:[#allocation2 + $0xd8] sm:$0xff] %vm65_vm1, %v1674_v27 }
  0x2b   :  { %94 = vst.msk [vmem:[#allocation2 + $0xe0] sm:$0xff] %vm65_vm1, %v1674_v27 }
  0x2c   :  { %95 = vst.msk [vmem:[#allocation2 + $0xe8] sm:$0xff] %vm65_vm1, %v1674_v27 }
  0x2d   :  { %96 = vst.msk [vmem:[#allocation2 + $0xf0] sm:$0xff] %vm65_vm1, %v1674_v27 }
  0x2e   :  { %97 = vst.msk [vmem:[#allocation2 + $0xf8] sm:$0xff] %vm65_vm1, %v1674_v27 }
  0x2f   :  { %98 = vst.msk [vmem:[#allocation2 + $0x100] sm:$0xff] %vm65_vm1, %v1674_v27 }
  0x30   :  { %99 = vst.msk [vmem:[#allocation2 + $0x108] sm:$0xff] %vm65_vm1, %v1674_v27 }
  0x31   :  { %100 = vst.msk [vmem:[#allocation2 + $0x110] sm:$0xff] %vm65_vm1, %v1674_v27 }
  0x32   :  { %101 = vst.msk [vmem:[#allocation2 + $0x118] sm:$0xff] %vm65_vm1, %v1674_v27 }
  0x33   :  { %102 = vst.msk [vmem:[#allocation2 + $0x120] sm:$0xff] %vm65_vm1, %v1674_v27 }
  0x34   :  { %103 = vst.msk [vmem:[#allocation2 + $0x128] sm:$0xff] %vm65_vm1, %v1674_v27 }
  0x35   :  { %104 = vst.msk [vmem:[#allocation2 + $0x130] sm:$0xff] %vm65_vm1, %v1674_v27 }
  0x36   :  { %105 = vst.msk [vmem:[#allocation2 + $0x138] sm:$0xff] %vm65_vm1, %v1674_v27  ;;  %v162_v56 = vld [vmem:[#allocation2 + $0x100] sm:$0xff] }
  0x37   :  { %106 = vst.msk [vmem:[#allocation2 + $0x140] sm:$0xff] %vm65_vm1, %v1674_v27  ;;  %v163_v0 = vld [vmem:[#allocation2 + $0x108] sm:$0xff] }
  0x38   :  { %107 = vst.msk [vmem:[#allocation2 + $0x148] sm:$0xff] %vm65_vm1, %v1674_v27 }
  0x39   :  { %1509 = vmatmul.msk.bf16.gmra.mxu0 %vm442_vm0, %v1541_v11  ;;  %1517 = vmatmul.msk.bf16.gmra.mxu1 %vm442_vm0, %v1549_v12  ;;  %108 = vst.msk [vmem:[#allocation2 + $0x150] sm:$0xff] %vm65_vm1, %v1674_v27  ;;  %v164_v12 = vld [vmem:[#allocation2 + $0x110] sm:$0xff] }
  0x3a   :  { %1525 = vmatmul.msk.bf16.gmra.mxu2 %vm442_vm0, %v1557_v13  ;;  %1533 = vmatmul.msk.bf16.gmra.mxu3 %vm442_vm0, %v1565_v14  ;;  %109 = vst.msk [vmem:[#allocation2 + $0x158] sm:$0xff] %vm65_vm1, %v1674_v27 }
  0x3b   :  { %110 = vst.msk [vmem:[#allocation2 + $0x160] sm:$0xff] %vm65_vm1, %v1674_v27 }
  0x3c   :  { %111 = vst.msk [vmem:[#allocation2 + $0x168] sm:$0xff] %vm65_vm1, %v1674_v27 }
  0x3d   :  { %112 = vst.msk [vmem:[#allocation2 + $0x170] sm:$0xff] %vm65_vm1, %v1674_v27 }
  0x3e   :  { %113 = vst.msk [vmem:[#allocation2 + $0x178] sm:$0xff] %vm65_vm1, %v1674_v27 }
  0x3f   :  { %114 = vst.msk [vmem:[#allocation2 + $0x180] sm:$0xff] %vm65_vm1, %v1674_v27 }
  0x40   :  { %115 = vst.msk [vmem:[#allocation2 + $0x188] sm:$0xff] %vm65_vm1, %v1674_v27 }
  0x41   :  { %116 = vst.msk [vmem:[#allocation2 + $0x190] sm:$0xff] %vm65_vm1, %v1674_v27 }
  0x42   :  { %117 = vst.msk [vmem:[#allocation2 + $0x198] sm:$0xff] %vm65_vm1, %v1674_v27 }
  0x43   :  { %118 = vst.msk [vmem:[#allocation2 + $0x1a0] sm:$0xff] %vm65_vm1, %v1674_v27 }
  0x44   :  { %119 = vst.msk [vmem:[#allocation2 + $0x1a8] sm:$0xff] %vm65_vm1, %v1674_v27 }
  0x45   :  { %120 = vst.msk [vmem:[#allocation2 + $0x1b0] sm:$0xff] %vm65_vm1, %v1674_v27 }
  0x46   :  { %121 = vst.msk [vmem:[#allocation2 + $0x1b8] sm:$0xff] %vm65_vm1, %v1674_v27  ;;  %v178_v58 = vld [vmem:[#allocation2 + $0x180] sm:$0xff] }
  0x47   :  { %122 = vst.msk [vmem:[#allocation2 + $0x1c0] sm:$0xff] %vm65_vm1, %v1674_v27  ;;  %v179_v2 = vld [vmem:[#allocation2 + $0x188] sm:$0xff] }
  0x48   :  { %123 = vst.msk [vmem:[#allocation2 + $0x1c8] sm:$0xff] %vm65_vm1, %v1674_v27  ;;  %v180_v14 = vld [vmem:[#allocation2 + $0x190] sm:$0xff] }
  0x49   :  { %1510 = vmatmul.msk.bf16.gmra.mxu0 %vm442_vm0, %v1542_v15  ;;  %1518 = vmatmul.msk.bf16.gmra.mxu1 %vm442_vm0, %v1550_v16  ;;  %124 = vst.msk [vmem:[#allocation2 + $0x1d0] sm:$0xff] %vm65_vm1, %v1674_v27  ;;  %v133_v16 = vld [vmem:[#allocation2 + $0x18] sm:$0xff] }
  0x4a   :  { %1526 = vmatmul.msk.bf16.gmra.mxu2 %vm442_vm0, %v1558_v17  ;;  %1534 = vmatmul.msk.bf16.gmra.mxu3 %vm442_vm0, %v1566_v18  ;;  %125 = vst.msk [vmem:[#allocation2 + $0x1d8] sm:$0xff] %vm65_vm1, %v1674_v27  ;;  %v149_v18 = vld [vmem:[#allocation2 + $0x98] sm:$0xff] }
  0x4b   :  { %126 = vst.msk [vmem:[#allocation2 + $0x1e0] sm:$0xff] %vm65_vm1, %v1674_v27 }
  0x4c   :  { %127 = vst.msk [vmem:[#allocation2 + $0x1e8] sm:$0xff] %vm65_vm1, %v1674_v27 }
  0x4d   :  { %128 = vst.msk [vmem:[#allocation2 + $0x1f0] sm:$0xff] %vm65_vm1, %v1674_v27 }
  0x4e   :  { %129 = vst.msk [vmem:[#allocation2 + $0x1f8] sm:$0xff] %vm65_vm1, %v1674_v27 }
  0x59   :  { %1511 = vmatmul.msk.bf16.gmra.mxu0 %vm442_vm0, %v1543_v19  ;;  %1519 = vmatmul.msk.bf16.gmra.mxu1 %vm442_vm0, %v1551_v20  ;;  %v165_v20 = vld [vmem:[#allocation2 + $0x118] sm:$0xff] }
  0x5a   :  { %1527 = vmatmul.msk.bf16.gmra.mxu2 %vm442_vm0, %v1559_v21  ;;  %1535 = vmatmul.msk.bf16.gmra.mxu3 %vm442_vm0, %v1567_v22 }
  0x69   :  { %1512 = vmatmul.msk.bf16.gmra.mxu0 %vm442_vm0, %v1544_v23  ;;  %1520 = vmatmul.msk.bf16.gmra.mxu1 %vm442_vm0, %v1552_v24  ;;  %v181_v23 = vld [vmem:[#allocation2 + $0x198] sm:$0xff] }
  0x6a   :  { %1528 = vmatmul.msk.bf16.gmra.mxu2 %vm442_vm0, %v1560_v25  ;;  %1536 = vmatmul.msk.bf16.gmra.mxu3 %vm442_vm0, %v1568_v26 }
  0x79   :  { %1513 = vmatmul.msk.bf16.gmra.mxu0 %vm442_vm0, %v1545_v28  ;;  %1521 = vmatmul.msk.bf16.gmra.mxu1 %vm442_vm0, %v1553_v29  ;;  %v134_v29 = vld [vmem:[#allocation2 + $0x20] sm:$0xff] }
  0x7a   :  { %1529 = vmatmul.msk.bf16.gmra.mxu2 %vm442_vm0, %v1561_v30  ;;  %1537 = vmatmul.msk.bf16.gmra.mxu3 %vm442_vm0, %v1569_v31  ;;  %v150_v30 = vld [vmem:[#allocation2 + $0xa0] sm:$0xff] }
  0x89   :  { %1514 = vmatmul.msk.bf16.gmra.mxu0 %vm442_vm0, %v1546_v32  ;;  %1522 = vmatmul.msk.bf16.gmra.mxu1 %vm442_vm0, %v1554_v33 }
  0x8a   :  { %1530 = vmatmul.msk.bf16.gmra.mxu2 %vm442_vm0, %v1562_v34  ;;  %1538 = vmatmul.msk.bf16.gmra.mxu3 %vm442_vm0, %v1570_v35 }
  0x96   :  { %v548_v37 = vpop.f32.mrf.mxu0  ;;  %v588_v38 = vpop.f32.mrf.mxu1 }
  0x97   :  { %v708_v39 = vadd.f32 %v548_v37, %v130_v36  ;;  %v724_v59 = vadd.f32 %v588_v38, %v146_v52 }
  0x99   :  { %773 = vst.msk [vmem:[#allocation2] sm:$0xff] %vm65_vm1, %v708_v39 }
  0x9a   :  { %789 = vst.msk [vmem:[#allocation2 + $0x80] sm:$0xff] %vm65_vm1, %v724_v59 }
  0x9d   :  { %v628_v41 = vpop.f32.mrf.mxu2  ;;  %v668_v42 = vpop.f32.mrf.mxu3 }
  0x9e   :  { %v550_v43 = vpop.f32.mrf.mxu0  ;;  %v590_v44 = vpop.f32.mrf.mxu1  ;;  %v740_v61 = vadd.f32 %v628_v41, %v162_v56  ;;  %v756_v63 = vadd.f32 %v668_v42, %v178_v58 }
  0x9f   :  { %v709_v1 = vadd.f32 %v550_v43, %v131_v60  ;;  %v725_v3 = vadd.f32 %v590_v44, %v147_v62 }
  0xa0   :  { %v840_v46 = vld [vmem:[#allocation2] sm:$0xff]  ;;  %805 = vst.msk [vmem:[#allocation2 + $0x100] sm:$0xff] %vm65_vm1, %v740_v61 }
  0xa1   :  { %v908_v47 = vmul.f32 %v1936_v40, %v840_v46  ;;  %821 = vst.msk [vmem:[#allocation2 + $0x180] sm:$0xff] %vm65_vm1, %v756_v63  ;;  %v856_v21 = vld [vmem:[#allocation2 + $0x80] sm:$0xff] }
  0xa2   :  { %774 = vst.msk [vmem:[#allocation2 + $0x8] sm:$0xff] %vm65_vm1, %v709_v1  ;;  %v924_v24 = vmul.f32 %v1936_v40, %v856_v21 }
  0xa3   :  { %v976_v48 = vadd.f32 %v1942_v45, %v908_v47  ;;  %790 = vst.msk [vmem:[#allocation2 + $0x88] sm:$0xff] %vm65_vm1, %v725_v3 }
  0xa4   :  { %v992_v36 = vadd.f32 %v1942_v45, %v924_v24 }
  0xa5   :  { %vm1040_vm2 = vcmp.ge.f32.partialorder %v976_v48, 0.0  ;;  %v1104_v49 = vmul.f32 0.2, %v976_v48  ;;  %v630_v50 = vpop.f32.mrf.mxu2  ;;  %v670_v51 = vpop.f32.mrf.mxu3 }
  0xa6   :  { %v553_v53 = vpop.f32.mrf.mxu0  ;;  %v593_v54 = vpop.f32.mrf.mxu1  ;;  %v741_v7 = vadd.f32 %v630_v50, %v163_v0  ;;  %v757_v11 = vadd.f32 %v670_v51, %v179_v2  ;;  %vm1056_vm4 = vcmp.ge.f32.partialorder %v992_v36, 0.0  ;;  %v1120_v47 = vmul.f32 0.2, %v992_v36 }
  0xa7   :  { %v1168_v55 = vsel %vm1040_vm2, %v976_v48, %v1104_v49  ;;  %v710_v13 = vadd.f32 %v553_v53, %v132_v4  ;;  %v726_v15 = vadd.f32 %v593_v54, %v148_v8  ;;  %v872_v25 = vld [vmem:[#allocation2 + $0x100] sm:$0xff] }
  0xa8   :  { %v1232_v57 = vpack.c.bf16 %v1168_v55, %v1168_v55  ;;  %806 = vst.msk [vmem:[#allocation2 + $0x108] sm:$0xff] %vm65_vm1, %v741_v7  ;;  %v940_v31 = vmul.f32 %v1936_v40, %v872_v25  ;;  %v888_v32 = vld [vmem:[#allocation2 + $0x180] sm:$0xff]  ;;  %v1184_v54 = vsel %vm1056_vm4, %v992_v36, %v1120_v47 }
  0xa9   :  { %822 = vst.msk [vmem:[#allocation2 + $0x188] sm:$0xff] %vm65_vm1, %v757_v11  ;;  %v956_v37 = vmul.f32 %v1936_v40, %v888_v32  ;;  %v841_v38 = vld [vmem:[#allocation2 + $0x8] sm:$0xff]  ;;  %v1248_v58 = vpack.c.bf16 %v1184_v54, %v1184_v54 }
  0xaa   :  { %1297 = vst.msk [vmem:[%s2480_s4] sm:$0xf] %vm1296_vm3, %v1232_v57  ;;  %v1008_v41 = vadd.f32 %v1942_v45, %v940_v31  ;;  %v909_v42 = vmul.f32 %v1936_v40, %v841_v38  ;;  %v857_v43 = vld [vmem:[#allocation2 + $0x88] sm:$0xff] }
  0xab   :  { %775 = vst.msk [vmem:[#allocation2 + $0x10] sm:$0xff] %vm65_vm1, %v710_v13  ;;  %v1024_v48 = vadd.f32 %v1942_v45, %v956_v37  ;;  %v925_v49 = vmul.f32 %v1936_v40, %v857_v43 }
  0xac   :  { %791 = vst.msk [vmem:[#allocation2 + $0x90] sm:$0xff] %vm65_vm1, %v726_v15  ;;  %vm1072_vm5 = vcmp.ge.f32.partialorder %v1008_v41, 0.0  ;;  %v1136_v51 = vmul.f32 0.2, %v1008_v41  ;;  %v977_v52 = vadd.f32 %v1942_v45, %v909_v42 }
  0xad   :  { %v633_v5 = vpop.f32.mrf.mxu2  ;;  %v673_v6 = vpop.f32.mrf.mxu3  ;;  %vm1088_vm6 = vcmp.ge.f32.partialorder %v1024_v48, 0.0  ;;  %v1152_v55 = vmul.f32 0.2, %v1024_v48  ;;  %v993_v56 = vadd.f32 %v1942_v45, %v925_v49  ;;  %1313 = vst.msk [vmem:[%s2480_s4 + $0x40] sm:$0xf] %vm1296_vm3, %v1248_v58 }
  0xae   :  { %v555_v9 = vpop.f32.mrf.mxu0  ;;  %v595_v10 = vpop.f32.mrf.mxu1  ;;  %v742_v17 = vadd.f32 %v633_v5, %v164_v12  ;;  %v758_v19 = vadd.f32 %v673_v6, %v180_v14  ;;  %v1200_v59 = vsel %vm1072_vm5, %v1008_v41, %v1136_v51  ;;  %vm1041_vm7 = vcmp.ge.f32.partialorder %v977_v52, 0.0 }
  0xaf   :  { %v711_v22 = vadd.f32 %v555_v9, %v133_v16  ;;  %v727_v26 = vadd.f32 %v595_v10, %v149_v18  ;;  %v873_v50 = vld [vmem:[#allocation2 + $0x108] sm:$0xff]  ;;  %v1105_v60 = vmul.f32 0.2, %v977_v52  ;;  %v1264_v63 = vpack.c.bf16 %v1200_v59, %v1200_v59 }
  0xb0   :  { %807 = vst.msk [vmem:[#allocation2 + $0x110] sm:$0xff] %vm65_vm1, %v742_v17  ;;  %v941_v53 = vmul.f32 %v1936_v40, %v873_v50  ;;  %v889_v57 = vld [vmem:[#allocation2 + $0x188] sm:$0xff]  ;;  %v1216_v0 = vsel %vm1088_vm6, %v1024_v48, %v1152_v55  ;;  %vm1057_vm8 = vcmp.ge.f32.partialorder %v993_v56, 0.0  ;;  %v1121_v1 = vmul.f32 0.2, %v993_v56 }
  0xb1   :  { %823 = vst.msk [vmem:[#allocation2 + $0x190] sm:$0xff] %vm65_vm1, %v758_v19  ;;  %v1280_v4 = vpack.c.bf16 %v1216_v0, %v1216_v0  ;;  %v1169_v5 = vsel %vm1041_vm7, %v977_v52, %v1105_v60  ;;  %v957_v7 = vmul.f32 %v1936_v40, %v889_v57 }
  0xb2   :  { %776 = vst.msk [vmem:[#allocation2 + $0x18] sm:$0xff] %vm65_vm1, %v711_v22  ;;  %v842_v61 = vld [vmem:[#allocation2 + $0x10] sm:$0xff]  ;;  %v1009_v6 = vadd.f32 %v1942_v45, %v941_v53  ;;  %v1233_v12 = vpack.c.bf16 %v1169_v5, %v1169_v5  ;;  %v1185_v13 = vsel %vm1057_vm8, %v993_v56, %v1121_v1 }
  0xb3   :  { %792 = vst.msk [vmem:[#allocation2 + $0x98] sm:$0xff] %vm65_vm1, %v727_v26  ;;  %v858_v62 = vld [vmem:[#allocation2 + $0x90] sm:$0xff]  ;;  %v910_v14 = vmul.f32 %v1936_v40, %v842_v61  ;;  %v1249_v17 = vpack.c.bf16 %v1185_v13, %v1185_v13  ;;  %v1025_v19 = vadd.f32 %v1942_v45, %v957_v7  ;;  %v166_v61 = vld [vmem:[#allocation2 + $0x120] sm:$0xff] }
  0xb4   :  { %1329 = vst.msk [vmem:[%s2480_s4 + $0x80] sm:$0xf] %vm1296_vm3, %v1264_v63  ;;  %v926_v15 = vmul.f32 %v1936_v40, %v858_v62  ;;  %vm1073_vm9 = vcmp.ge.f32.partialorder %v1009_v6, 0.0  ;;  %v1137_v18 = vmul.f32 0.2, %v1009_v6  ;;  %v182_v62 = vld [vmem:[#allocation2 + $0x1a0] sm:$0xff] }
  0xb5   :  { %v635_v27 = vpop.f32.mrf.mxu2  ;;  %v675_v28 = vpop.f32.mrf.mxu3  ;;  %1345 = vst.msk [vmem:[%s2480_s4 + $0xc0] sm:$0xf] %vm1296_vm3, %v1280_v4  ;;  %vm1089_vm10 = vcmp.ge.f32.partialorder %v1025_v19, 0.0  ;;  %v1153_v25 = vmul.f32 0.2, %v1025_v19 }
  0xb6   :  { %v743_v33 = vadd.f32 %v635_v27, %v165_v20  ;;  %v558_v34 = vpop.f32.mrf.mxu0  ;;  %v598_v35 = vpop.f32.mrf.mxu1  ;;  %v759_v39 = vadd.f32 %v675_v28, %v181_v23  ;;  %1298 = vst.msk [vmem:[%s2480_s4 + $0x4] sm:$0xf] %vm1296_vm3, %v1233_v12  ;;  %v978_v20 = vadd.f32 %v1942_v45, %v910_v14  ;;  %v994_v21 = vadd.f32 %v1942_v45, %v926_v15  ;;  %v135_v14 = vld [vmem:[#allocation2 + $0x28] sm:$0xff] }
  0xb7   :  { %v712_v44 = vadd.f32 %v558_v34, %v134_v29  ;;  %v728_v46 = vadd.f32 %v598_v35, %v150_v30  ;;  %v874_v8 = vld [vmem:[#allocation2 + $0x110] sm:$0xff]  ;;  %1314 = vst.msk [vmem:[%s2480_s4 + $0x44] sm:$0xf] %vm1296_vm3, %v1249_v17  ;;  %v1201_v24 = vsel %vm1073_vm9, %v1009_v6, %v1137_v18  ;;  %v1217_v30 = vsel %vm1089_vm10, %v1025_v19, %v1153_v25  ;;  %v151_v15 = vld [vmem:[#allocation2 + $0xa8] sm:$0xff] }
  0xb8   :  { %808 = vst.msk [vmem:[#allocation2 + $0x118] sm:$0xff] %vm65_vm1, %v743_v33  ;;  %v890_v9 = vld [vmem:[#allocation2 + $0x190] sm:$0xff]  ;;  %v942_v22 = vmul.f32 %v1936_v40, %v874_v8  ;;  %v1265_v28 = vpack.c.bf16 %v1201_v24, %v1201_v24  ;;  %vm1042_vm11 = vcmp.ge.f32.partialorder %v978_v20, 0.0  ;;  %v1106_v29 = vmul.f32 0.2, %v978_v20 }
  0xb9   :  { %824 = vst.msk [vmem:[#allocation2 + $0x198] sm:$0xff] %vm65_vm1, %v759_v39  ;;  %v843_v16 = vld [vmem:[#allocation2 + $0x18] sm:$0xff]  ;;  %v958_v23 = vmul.f32 %v1936_v40, %v890_v9  ;;  %vm1058_vm12 = vcmp.ge.f32.partialorder %v994_v21, 0.0  ;;  %v1122_v31 = vmul.f32 0.2, %v994_v21  ;;  %v1281_v34 = vpack.c.bf16 %v1217_v30, %v1217_v30 }
  0xba   :  { %777 = vst.msk [vmem:[#allocation2 + $0x20] sm:$0xff] %vm65_vm1, %v712_v44  ;;  %v911_v26 = vmul.f32 %v1936_v40, %v843_v16  ;;  %v859_v27 = vld [vmem:[#allocation2 + $0x98] sm:$0xff]  ;;  %v1010_v32 = vadd.f32 %v1942_v45, %v942_v22  ;;  %v1170_v35 = vsel %vm1042_vm11, %v978_v20, %v1106_v29 }
  0xbb   :  { %793 = vst.msk [vmem:[#allocation2 + $0xa0] sm:$0xff] %vm65_vm1, %v728_v46  ;;  %v1026_v33 = vadd.f32 %v1942_v45, %v958_v23  ;;  %v927_v37 = vmul.f32 %v1936_v40, %v859_v27  ;;  %v1234_v42 = vpack.c.bf16 %v1170_v35, %v1170_v35  ;;  %v1186_v43 = vsel %vm1058_vm12, %v994_v21, %v1122_v31 }
  0xbc   :  { %1330 = vst.msk [vmem:[%s2480_s4 + $0x84] sm:$0xf] %vm1296_vm3, %v1265_v28  ;;  %v979_v36 = vadd.f32 %v1942_v45, %v911_v26  ;;  %vm1074_vm13 = vcmp.ge.f32.partialorder %v1010_v32, 0.0  ;;  %v1138_v44 = vmul.f32 0.2, %v1010_v32  ;;  %v1250_v50 = vpack.c.bf16 %v1186_v43, %v1186_v43  ;;  %v167_v28 = vld [vmem:[#allocation2 + $0x128] sm:$0xff] }
  0xbd   :  { %v2004_v2 = vpop.f32.mrf.mxu2  ;;  %v2006_v3 = vpop.f32.mrf.mxu3  ;;  %1346 = vst.msk [vmem:[%s2480_s4 + $0xc4] sm:$0xf] %vm1296_vm3, %v1281_v34  ;;  %vm1090_vm14 = vcmp.ge.f32.partialorder %v1026_v33, 0.0  ;;  %v1154_v51 = vmul.f32 0.2, %v1026_v33  ;;  %v995_v54 = vadd.f32 %v1942_v45, %v927_v37 }
  0xbe   :  { %v2014_v10 = vpop.f32.mrf.mxu0  ;;  %v2016_v11 = vpop.f32.mrf.mxu1  ;;  %vm1043_vm15 = vcmp.ge.f32.partialorder %v979_v36, 0.0  ;;  %1299 = vst.msk [vmem:[%s2480_s4 + $0x8] sm:$0xf] %vm1296_vm3, %v1234_v42  ;;  %v1202_v52 = vsel %vm1074_vm13, %v1010_v32, %v1138_v44  ;;  %v1107_v53 = vmul.f32 0.2, %v979_v36  ;;  %v744_v12 = vadd.f32 %v2004_v2, %v166_v61  ;;  %v184_v44 = vld [vmem:[#allocation2 + $0x1b0] sm:$0xff] }
  0xbf   :  { %v875_v38 = vld [vmem:[#allocation2 + $0x118] sm:$0xff]  ;;  %1315 = vst.msk [vmem:[%s2480_s4 + $0x48] sm:$0xf] %vm1296_vm3, %v1250_v50  ;;  %v1266_v56 = vpack.c.bf16 %v1202_v52, %v1202_v52  ;;  %v1218_v57 = vsel %vm1090_vm14, %v1026_v33, %v1154_v51  ;;  %vm1059_vm0 = vcmp.ge.f32.partialorder %v995_v54, 0.0  ;;  %v1123_v1 = vmul.f32 0.2, %v995_v54 }
  0xc0   :  { %v891_v46 = vld [vmem:[#allocation2 + $0x198] sm:$0xff]  ;;  %v943_v55 = vmul.f32 %v1936_v40, %v875_v38  ;;  %v1282_v63 = vpack.c.bf16 %v1218_v57, %v1218_v57  ;;  %v1171_v0 = vsel %vm1043_vm15, %v979_v36, %v1107_v53  ;;  %v760_v13 = vadd.f32 %v2006_v3, %v182_v62  ;;  %809 = vst.msk [vmem:[#allocation2 + $0x120] sm:$0xff] %vm65_vm1, %v744_v12  ;;  %v183_v33 = vld [vmem:[#allocation2 + $0x1a8] sm:$0xff]  ;;  %v152_v36 = vld [vmem:[#allocation2 + $0xb0] sm:$0xff] }
  0xc1   :  { %v844_v47 = vld [vmem:[#allocation2 + $0x20] sm:$0xff]  ;;  %v959_v58 = vmul.f32 %v1936_v40, %v891_v46  ;;  %1331 = vst.msk [vmem:[%s2480_s4 + $0x88] sm:$0xf] %vm1296_vm3, %v1266_v56  ;;  %v1235_v4 = vpack.c.bf16 %v1171_v0, %v1171_v0  ;;  %v1187_v8 = vsel %vm1059_vm0, %v995_v54, %v1123_v1  ;;  %v713_v24 = vadd.f32 %v2014_v10, %v135_v14  ;;  %v136_v10 = vld [vmem:[#allocation2 + $0x30] sm:$0xff]  ;;  %v137_v51 = vld [vmem:[#allocation2 + $0x38] sm:$0xff] }
  0xc2   :  { %v912_v59 = vmul.f32 %v1936_v40, %v844_v47  ;;  %v860_v60 = vld [vmem:[#allocation2 + $0xa0] sm:$0xff]  ;;  %v1011_v5 = vadd.f32 %v1942_v45, %v943_v55  ;;  %1347 = vst.msk [vmem:[%s2480_s4 + $0xc8] sm:$0xf] %vm1296_vm3, %v1282_v63  ;;  %v1251_v16 = vpack.c.bf16 %v1187_v8, %v1187_v8  ;;  %v729_v32 = vadd.f32 %v2016_v11, %v151_v15  ;;  %v168_v38 = vld [vmem:[#allocation2 + $0x130] sm:$0xff]  ;;  %v185_v1 = vld [vmem:[#allocation2 + $0x1b8] sm:$0xff] }
  0xc3   :  { %v1027_v6 = vadd.f32 %v1942_v45, %v959_v58  ;;  %v928_v9 = vmul.f32 %v1936_v40, %v860_v60  ;;  %1300 = vst.msk [vmem:[%s2480_s4 + $0xc] sm:$0xf] %vm1296_vm3, %v1235_v4  ;;  %v169_v60 = vld [vmem:[#allocation2 + $0x138] sm:$0xff]  ;;  %v138_v4 = vld [vmem:[#allocation2 + $0x40] sm:$0xff] }
  0xc4   :  { %v980_v7 = vadd.f32 %v1942_v45, %v912_v59  ;;  %vm1075_vm2 = vcmp.ge.f32.partialorder %v1011_v5, 0.0  ;;  %v1139_v17 = vmul.f32 0.2, %v1011_v5  ;;  %1316 = vst.msk [vmem:[%s2480_s4 + $0x4c] sm:$0xf] %vm1296_vm3, %v1251_v16  ;;  %v170_v15 = vld [vmem:[#allocation2 + $0x140] sm:$0xff] }
  0xc5   :  { %v2051_v39 = vpop.f32.mrf.mxu2  ;;  %v2053_v41 = vpop.f32.mrf.mxu3  ;;  %vm1091_vm4 = vcmp.ge.f32.partialorder %v1027_v6, 0.0  ;;  %v1155_v20 = vmul.f32 0.2, %v1027_v6  ;;  %v996_v2 = vadd.f32 %v1942_v45, %v928_v9  ;;  %825 = vst.msk [vmem:[#allocation2 + $0x1a0] sm:$0xff] %vm65_vm1, %v760_v13 }
  0xc6   :  { %v2055_v48 = vpop.f32.mrf.mxu0  ;;  %v2057_v49 = vpop.f32.mrf.mxu1  ;;  %vm1044_vm5 = vcmp.ge.f32.partialorder %v980_v7, 0.0  ;;  %v1108_v21 = vmul.f32 0.2, %v980_v7  ;;  %v1203_v23 = vsel %vm1075_vm2, %v1011_v5, %v1139_v17  ;;  %778 = vst.msk [vmem:[#allocation2 + $0x28] sm:$0xff] %vm65_vm1, %v713_v24  ;;  %v745_v35 = vadd.f32 %v2051_v39, %v167_v28  ;;  %v154_v5 = vld [vmem:[#allocation2 + $0xc0] sm:$0xff] }
  0xc7   :  { %v1267_v25 = vpack.c.bf16 %v1203_v23, %v1203_v23  ;;  %v1219_v26 = vsel %vm1091_vm4, %v1027_v6, %v1155_v20  ;;  %vm1060_vm6 = vcmp.ge.f32.partialorder %v996_v2, 0.0  ;;  %v1124_v31 = vmul.f32 0.2, %v996_v2  ;;  %v876_v42 = vld [vmem:[#allocation2 + $0x120] sm:$0xff]  ;;  %794 = vst.msk [vmem:[#allocation2 + $0xa8] sm:$0xff] %vm65_vm1, %v729_v32 }
  0xc8   :  { %v1172_v27 = vsel %vm1044_vm5, %v980_v7, %v1108_v21  ;;  %v1283_v29 = vpack.c.bf16 %v1219_v26, %v1219_v26  ;;  %v761_v37 = vadd.f32 %v2053_v41, %v183_v33  ;;  %v714_v43 = vadd.f32 %v2055_v48, %v136_v10  ;;  %810 = vst.msk [vmem:[#allocation2 + $0x128] sm:$0xff] %vm65_vm1, %v745_v35  ;;  %v153_v48 = vld [vmem:[#allocation2 + $0xb8] sm:$0xff]  ;;  %v186_v17 = vld [vmem:[#allocation2 + $0x1c0] sm:$0xff] }
  0xc9   :  { %v1236_v30 = vpack.c.bf16 %v1172_v27, %v1172_v27  ;;  %1332 = vst.msk [vmem:[%s2480_s4 + $0x8c] sm:$0xf] %vm1296_vm3, %v1267_v25  ;;  %v1188_v34 = vsel %vm1060_vm6, %v996_v2, %v1124_v31  ;;  %v944_v39 = vmul.f32 %v1936_v40, %v876_v42  ;;  %v730_v50 = vadd.f32 %v2057_v49, %v152_v36 }
  0xca   :  { %1348 = vst.msk [vmem:[%s2480_s4 + $0xcc] sm:$0xf] %vm1296_vm3, %v1283_v29  ;;  %v1252_v11 = vpack.c.bf16 %v1188_v34, %v1188_v34  ;;  %v139_v29 = vld [vmem:[#allocation2 + $0x48] sm:$0xff] }
  0xcb   :  { %1301 = vst.msk [vmem:[%s2480_s4 + $0x10] sm:$0xf] %vm1296_vm3, %v1236_v30  ;;  %v1012_v55 = vadd.f32 %v1942_v45, %v944_v39  ;;  %v155_v30 = vld [vmem:[#allocation2 + $0xc8] sm:$0xff] }
  0xcc   :  { %1317 = vst.msk [vmem:[%s2480_s4 + $0x50] sm:$0xf] %vm1296_vm3, %v1252_v11  ;;  %v892_v53 = vld [vmem:[#allocation2 + $0x1a0] sm:$0xff] }
  0xcd   :  { %v643_v18 = vpop.f32.mrf.mxu2  ;;  %v683_v19 = vpop.f32.mrf.mxu3  ;;  %v960_v56 = vmul.f32 %v1936_v40, %v892_v53  ;;  %v845_v57 = vld [vmem:[#allocation2 + $0x28] sm:$0xff]  ;;  %826 = vst.msk [vmem:[#allocation2 + $0x1a8] sm:$0xff] %vm65_vm1, %v761_v37  ;;  %vm1076_vm7 = vcmp.ge.f32.partialorder %v1012_v55, 0.0  ;;  %v1140_v61 = vmul.f32 0.2, %v1012_v55 }
  0xce   :  { %v565_v3 = vpop.f32.mrf.mxu0  ;;  %v605_v22 = vpop.f32.mrf.mxu1  ;;  %v746_v54 = vadd.f32 %v643_v18, %v168_v38  ;;  %v762_v58 = vadd.f32 %v683_v19, %v184_v44  ;;  %v913_v59 = vmul.f32 %v1936_v40, %v845_v57  ;;  %779 = vst.msk [vmem:[#allocation2 + $0x30] sm:$0xff] %vm65_vm1, %v714_v43  ;;  %v861_v8 = vld [vmem:[#allocation2 + $0xa8] sm:$0xff] }
  0xcf   :  { %v715_v49 = vadd.f32 %v565_v3, %v137_v51  ;;  %v1028_v62 = vadd.f32 %v1942_v45, %v960_v56  ;;  %795 = vst.msk [vmem:[#allocation2 + $0xb0] sm:$0xff] %vm65_vm1, %v730_v50  ;;  %v731_v63 = vadd.f32 %v605_v22, %v153_v48  ;;  %v1204_v6 = vsel %vm1076_vm7, %v1012_v55, %v1140_v61  ;;  %v877_v20 = vld [vmem:[#allocation2 + $0x128] sm:$0xff] }
  0xd0   :  { %v981_v0 = vadd.f32 %v1942_v45, %v913_v59  ;;  %811 = vst.msk [vmem:[#allocation2 + $0x130] sm:$0xff] %vm65_vm1, %v746_v54  ;;  %v1268_v12 = vpack.c.bf16 %v1204_v6, %v1204_v6  ;;  %v929_v14 = vmul.f32 %v1936_v40, %v861_v8  ;;  %v945_v27 = vmul.f32 %v1936_v40, %v877_v20  ;;  %v171_v6 = vld [vmem:[#allocation2 + $0x148] sm:$0xff] }
  0xd1   :  { %vm1092_vm8 = vcmp.ge.f32.partialorder %v1028_v62, 0.0  ;;  %v1156_v7 = vmul.f32 0.2, %v1028_v62  ;;  %827 = vst.msk [vmem:[#allocation2 + $0x1b0] sm:$0xff] %vm65_vm1, %v762_v58 }
  0xd2   :  { %vm1045_vm9 = vcmp.ge.f32.partialorder %v981_v0, 0.0  ;;  %v1109_v13 = vmul.f32 0.2, %v981_v0  ;;  %780 = vst.msk [vmem:[#allocation2 + $0x38] sm:$0xff] %vm65_vm1, %v715_v49  ;;  %v997_v26 = vadd.f32 %v1942_v45, %v929_v14  ;;  %v1013_v36 = vadd.f32 %v1942_v45, %v945_v27 }
  0xd3   :  { %v1220_v19 = vsel %vm1092_vm8, %v1028_v62, %v1156_v7  ;;  %796 = vst.msk [vmem:[#allocation2 + $0xb8] sm:$0xff] %vm65_vm1, %v731_v63 }
  0xd4   :  { %1333 = vst.msk [vmem:[%s2480_s4 + $0x90] sm:$0xf] %vm1296_vm3, %v1268_v12  ;;  %v1284_v24 = vpack.c.bf16 %v1220_v19, %v1220_v19  ;;  %v1173_v25 = vsel %vm1045_vm9, %v981_v0, %v1109_v13  ;;  %v893_v28 = vld [vmem:[#allocation2 + $0x1a8] sm:$0xff]  ;;  %vm1061_vm10 = vcmp.ge.f32.partialorder %v997_v26, 0.0  ;;  %v1125_v35 = vmul.f32 0.2, %v997_v26 }
  0xd5   :  { %v645_v46 = vpop.f32.mrf.mxu2  ;;  %v685_v47 = vpop.f32.mrf.mxu3  ;;  %v1237_v31 = vpack.c.bf16 %v1173_v25, %v1173_v25  ;;  %v961_v32 = vmul.f32 %v1936_v40, %v893_v28  ;;  %v846_v33 = vld [vmem:[#allocation2 + $0x30] sm:$0xff]  ;;  %vm1077_vm11 = vcmp.ge.f32.partialorder %v1013_v36, 0.0  ;;  %v1141_v39 = vmul.f32 0.2, %v1013_v36 }
  0xd6   :  { %v568_v41 = vpop.f32.mrf.mxu0  ;;  %v608_v52 = vpop.f32.mrf.mxu1  ;;  %v747_v9 = vadd.f32 %v645_v46, %v169_v60  ;;  %v763_v21 = vadd.f32 %v685_v47, %v185_v1  ;;  %1349 = vst.msk [vmem:[%s2480_s4 + $0xd0] sm:$0xf] %vm1296_vm3, %v1284_v24  ;;  %v914_v11 = vmul.f32 %v1936_v40, %v846_v33  ;;  %v862_v37 = vld [vmem:[#allocation2 + $0xb0] sm:$0xff]  ;;  %v1189_v47 = vsel %vm1061_vm10, %v997_v26, %v1125_v35 }
  0xd7   :  { %v716_v2 = vadd.f32 %v568_v41, %v138_v4  ;;  %v732_v3 = vadd.f32 %v608_v52, %v154_v5  ;;  %1302 = vst.msk [vmem:[%s2480_s4 + $0x14] sm:$0xf] %vm1296_vm3, %v1237_v31  ;;  %v1029_v38 = vadd.f32 %v1942_v45, %v961_v32  ;;  %v930_v42 = vmul.f32 %v1936_v40, %v862_v37  ;;  %v878_v43 = vld [vmem:[#allocation2 + $0x130] sm:$0xff] }
  0xd8   :  { %812 = vst.msk [vmem:[#allocation2 + $0x138] sm:$0xff] %vm65_vm1, %v747_v9  ;;  %v982_v50 = vadd.f32 %v1942_v45, %v914_v11  ;;  %v1253_v51 = vpack.c.bf16 %v1189_v47, %v1189_v47  ;;  %v894_v53 = vld [vmem:[#allocation2 + $0x1b0] sm:$0xff]  ;;  %v1205_v54 = vsel %vm1077_vm11, %v1013_v36, %v1141_v39  ;;  %v946_v55 = vmul.f32 %v1936_v40, %v878_v43  ;;  %v187_v11 = vld [vmem:[#allocation2 + $0x1c8] sm:$0xff] }
  0xd9   :  { %828 = vst.msk [vmem:[#allocation2 + $0x1b8] sm:$0xff] %vm65_vm1, %v763_v21  ;;  %vm1093_vm12 = vcmp.ge.f32.partialorder %v1029_v38, 0.0  ;;  %v1157_v41 = vmul.f32 0.2, %v1029_v38  ;;  %v998_v52 = vadd.f32 %v1942_v45, %v930_v42  ;;  %v847_v56 = vld [vmem:[#allocation2 + $0x38] sm:$0xff]  ;;  %v1269_v49 = vpack.c.bf16 %v1205_v54, %v1205_v54 }
  0xda   :  { %781 = vst.msk [vmem:[#allocation2 + $0x40] sm:$0xff] %vm65_vm1, %v716_v2  ;;  %vm1046_vm13 = vcmp.ge.f32.partialorder %v982_v50, 0.0  ;;  %v1110_v48 = vmul.f32 0.2, %v982_v50  ;;  %v863_v57 = vld [vmem:[#allocation2 + $0xb8] sm:$0xff]  ;;  %v1014_v1 = vadd.f32 %v1942_v45, %v946_v55  ;;  %v962_v4 = vmul.f32 %v1936_v40, %v894_v53 }
  0xdb   :  { %797 = vst.msk [vmem:[#allocation2 + $0xc0] sm:$0xff] %vm65_vm1, %v732_v3  ;;  %v1221_v60 = vsel %vm1093_vm12, %v1029_v38, %v1157_v41  ;;  %vm1062_vm14 = vcmp.ge.f32.partialorder %v998_v52, 0.0  ;;  %v1126_v61 = vmul.f32 0.2, %v998_v52  ;;  %v915_v9 = vmul.f32 %v1936_v40, %v847_v56 }
  0xdc   :  { %1318 = vst.msk [vmem:[%s2480_s4 + $0x54] sm:$0xf] %vm1296_vm3, %v1253_v51  ;;  %v1285_v63 = vpack.c.bf16 %v1221_v60, %v1221_v60  ;;  %v1174_v0 = vsel %vm1046_vm13, %v982_v50, %v1110_v48  ;;  %v931_v12 = vmul.f32 %v1936_v40, %v863_v57  ;;  %vm1078_vm15 = vcmp.ge.f32.partialorder %v1014_v1, 0.0 }
  0xdd   :  { %v648_v16 = vpop.f32.mrf.mxu2  ;;  %v688_v18 = vpop.f32.mrf.mxu3  ;;  %1334 = vst.msk [vmem:[%s2480_s4 + $0x94] sm:$0xf] %vm1296_vm3, %v1269_v49  ;;  %v1238_v7 = vpack.c.bf16 %v1174_v0, %v1174_v0  ;;  %v1190_v8 = vsel %vm1062_vm14, %v998_v52, %v1126_v61  ;;  %v140_v52 = vld [vmem:[#allocation2 + $0x50] sm:$0xff] }
  0xde   :  { %v570_v22 = vpop.f32.mrf.mxu0  ;;  %v610_v23 = vpop.f32.mrf.mxu1  ;;  %v748_v10 = vadd.f32 %v648_v16, %v170_v15  ;;  %v2148_v34 = vadd.f32 %v688_v18, %v186_v17  ;;  %1350 = vst.msk [vmem:[%s2480_s4 + $0xd4] sm:$0xf] %vm1296_vm3, %v1285_v63  ;;  %v1254_v14 = vpack.c.bf16 %v1190_v8, %v1190_v8  ;;  %v1142_v15 = vmul.f32 0.2, %v1014_v1  ;;  %v156_v0 = vld [vmem:[#allocation2 + $0xd0] sm:$0xff] }
  0xdf   :  { %v2162_v44 = vadd.f32 %v570_v22, %v139_v29  ;;  %v2164_v46 = vadd.f32 %v610_v23, %v155_v30  ;;  %v879_v5 = vld [vmem:[#allocation2 + $0x138] sm:$0xff]  ;;  %v1030_v16 = vadd.f32 %v1942_v45, %v962_v4  ;;  %1303 = vst.msk [vmem:[%s2480_s4 + $0x18] sm:$0xf] %vm1296_vm3, %v1238_v7  ;;  %v983_v17 = vadd.f32 %v1942_v45, %v915_v9 }
  0xe0   :  { %813 = vst.msk [vmem:[#allocation2 + $0x140] sm:$0xff] %vm65_vm1, %v748_v10  ;;  %v999_v18 = vadd.f32 %v1942_v45, %v931_v12  ;;  %v947_v19 = vmul.f32 %v1936_v40, %v879_v5  ;;  %v895_v20 = vld [vmem:[#allocation2 + $0x1b8] sm:$0xff]  ;;  %v1206_v2 = vsel %vm1078_vm15, %v1014_v1, %v1142_v15  ;;  %v172_v1 = vld [vmem:[#allocation2 + $0x150] sm:$0xff] }
  0xe1   :  { %1319 = vst.msk [vmem:[%s2480_s4 + $0x58] sm:$0xf] %vm1296_vm3, %v1254_v14  ;;  %vm1094_vm0 = vcmp.ge.f32.partialorder %v1030_v16, 0.0  ;;  %v1158_v3 = vmul.f32 0.2, %v1030_v16  ;;  %v963_v22 = vmul.f32 %v1936_v40, %v895_v20  ;;  %v848_v23 = vld [vmem:[#allocation2 + $0x40] sm:$0xff]  ;;  %v1270_v24 = vpack.c.bf16 %v1206_v2, %v1206_v2 }
  0xe2   :  { %vm1047_vm2 = vcmp.ge.f32.partialorder %v983_v17, 0.0  ;;  %v1111_v25 = vmul.f32 0.2, %v983_v17  ;;  %vm1063_vm4 = vcmp.ge.f32.partialorder %v999_v18, 0.0  ;;  %v864_v26 = vld [vmem:[#allocation2 + $0xc0] sm:$0xff]  ;;  %829 = vst.msk [vmem:[#allocation2 + $0x1c0] sm:$0xff] %vm65_vm1, %v2148_v34  ;;  %v1015_v29 = vadd.f32 %v1942_v45, %v947_v19 }
  0xe3   :  { %v1222_v27 = vsel %vm1094_vm0, %v1030_v16, %v1158_v3  ;;  %v1127_v28 = vmul.f32 0.2, %v999_v18  ;;  %v1031_v30 = vadd.f32 %v1942_v45, %v963_v22  ;;  %782 = vst.msk [vmem:[#allocation2 + $0x48] sm:$0xff] %vm65_vm1, %v2162_v44  ;;  %v916_v34 = vmul.f32 %v1936_v40, %v848_v23  ;;  %v141_v22 = vld [vmem:[#allocation2 + $0x58] sm:$0xff] }
  0xe4   :  { %1335 = vst.msk [vmem:[%s2480_s4 + $0x98] sm:$0xf] %vm1296_vm3, %v1270_v24  ;;  %v1286_v33 = vpack.c.bf16 %v1222_v27, %v1222_v27  ;;  %v1175_v10 = vsel %vm1047_vm2, %v983_v17, %v1111_v25  ;;  %v932_v35 = vmul.f32 %v1936_v40, %v864_v26  ;;  %vm1079_vm5 = vcmp.ge.f32.partialorder %v1015_v29, 0.0 }
  0xe5   :  { %v650_v58 = vpop.f32.mrf.mxu2  ;;  %v2172_v59 = vpop.f32.mrf.mxu3  ;;  %v1239_v37 = vpack.c.bf16 %v1175_v10, %v1175_v10  ;;  %v1191_v38 = vsel %vm1063_vm4, %v999_v18, %v1127_v28  ;;  %v1143_v42 = vmul.f32 0.2, %v1015_v29  ;;  %798 = vst.msk [vmem:[#allocation2 + $0xc8] sm:$0xff] %vm65_vm1, %v2164_v46  ;;  %vm1095_vm6 = vcmp.ge.f32.partialorder %v1031_v30, 0.0  ;;  %v188_v18 = vld [vmem:[#allocation2 + $0x1d0] sm:$0xff] }
  0xe6   :  { %v2179_v62 = vpop.f32.mrf.mxu0  ;;  %v2190_v13 = vpop.f32.mrf.mxu1  ;;  %v749_v21 = vadd.f32 %v650_v58, %v171_v6  ;;  %1351 = vst.msk [vmem:[%s2480_s4 + $0xd8] sm:$0xf] %vm1296_vm3, %v1286_v33  ;;  %v1255_v44 = vpack.c.bf16 %v1191_v38, %v1191_v38  ;;  %v1159_v47 = vmul.f32 0.2, %v1031_v30  ;;  %v984_v39 = vadd.f32 %v1942_v45, %v916_v34  ;;  %v173_v33 = vld [vmem:[#allocation2 + $0x158] sm:$0xff] }
  0xe7   :  { %v880_v36 = vld [vmem:[#allocation2 + $0x140] sm:$0xff]  ;;  %1304 = vst.msk [vmem:[%s2480_s4 + $0x1c] sm:$0xf] %vm1296_vm3, %v1239_v37  ;;  %v1207_v50 = vsel %vm1079_vm5, %v1015_v29, %v1143_v42  ;;  %v1000_v46 = vadd.f32 %v1942_v45, %v932_v35  ;;  %v765_v41 = vadd.f32 %v2172_v59, %v187_v11  ;;  %v718_v63 = vadd.f32 %v2179_v62, %v140_v52 }
  0xe8   :  { %v948_v51 = vmul.f32 %v1936_v40, %v880_v36  ;;  %1320 = vst.msk [vmem:[%s2480_s4 + $0x5c] sm:$0xf] %vm1296_vm3, %v1255_v44  ;;  %v1271_v53 = vpack.c.bf16 %v1207_v50, %v1207_v50  ;;  %v1223_v54 = vsel %vm1095_vm6, %v1031_v30, %v1159_v47  ;;  %vm1048_vm7 = vcmp.ge.f32.partialorder %v984_v39, 0.0  ;;  %v157_v30 = vld [vmem:[#allocation2 + $0xd8] sm:$0xff] }
  0xe9   :  { %v1112_v48 = vmul.f32 0.2, %v984_v39  ;;  %v1287_v56 = vpack.c.bf16 %v1223_v54, %v1223_v54  ;;  %vm1064_vm8 = vcmp.ge.f32.partialorder %v1000_v46, 0.0  ;;  %v1128_v57 = vmul.f32 0.2, %v1000_v46  ;;  %v896_v49 = vld [vmem:[#allocation2 + $0x1c0] sm:$0xff] }
  0xea   :  { %v1016_v58 = vadd.f32 %v1942_v45, %v948_v51  ;;  %814 = vst.msk [vmem:[#allocation2 + $0x148] sm:$0xff] %vm65_vm1, %v749_v21  ;;  %v964_v60 = vmul.f32 %v1936_v40, %v896_v49  ;;  %v849_v61 = vld [vmem:[#allocation2 + $0x48] sm:$0xff]  ;;  %v734_v16 = vadd.f32 %v2190_v13, %v156_v0  ;;  %v189_v44 = vld [vmem:[#allocation2 + $0x1d8] sm:$0xff]  ;;  %v158_v54 = vld [vmem:[#allocation2 + $0xe0] sm:$0xff] }
  0xeb   :  { %1336 = vst.msk [vmem:[%s2480_s4 + $0x9c] sm:$0xf] %vm1296_vm3, %v1271_v53  ;;  %v1176_v59 = vsel %vm1048_vm7, %v984_v39, %v1112_v48  ;;  %v1192_v5 = vsel %vm1064_vm8, %v1000_v46, %v1128_v57  ;;  %v917_v12 = vmul.f32 %v1936_v40, %v849_v61  ;;  %v142_v46 = vld [vmem:[#allocation2 + $0x60] sm:$0xff] }
  0xec   :  { %1352 = vst.msk [vmem:[%s2480_s4 + $0xdc] sm:$0xf] %vm1296_vm3, %v1287_v56  ;;  %v1240_v4 = vpack.c.bf16 %v1176_v59, %v1176_v59  ;;  %vm1080_vm9 = vcmp.ge.f32.partialorder %v1016_v58, 0.0  ;;  %v1144_v6 = vmul.f32 0.2, %v1016_v58  ;;  %v1256_v8 = vpack.c.bf16 %v1192_v5, %v1192_v5  ;;  %v865_v14 = vld [vmem:[#allocation2 + $0xc8] sm:$0xff] }
  0xed   :  { %v653_v31 = vpop.f32.mrf.mxu2  ;;  %v2215_v32 = vpop.f32.mrf.mxu3  ;;  %v1032_v9 = vadd.f32 %v1942_v45, %v964_v60  ;;  %830 = vst.msk [vmem:[#allocation2 + $0x1c8] sm:$0xff] %vm65_vm1, %v765_v41  ;;  %v933_v15 = vmul.f32 %v1936_v40, %v865_v14  ;;  %v985_v2 = vadd.f32 %v1942_v45, %v917_v12  ;;  %v2300_v41 = vld [vmem:[#allocation5] ss:$0 sm:$0xff]  ;;  %v174_v48 = vld [vmem:[#allocation2 + $0x160] sm:$0xff] }
  0xee   :  { %v2226_v43 = vpop.f32.mrf.mxu0  ;;  %v2244_v55 = vpop.f32.mrf.mxu1  ;;  %1305 = vst.msk [vmem:[%s2480_s4 + $0x20] sm:$0xf] %vm1296_vm3, %v1240_v4  ;;  %v1208_v62 = vsel %vm1080_vm9, %v1016_v58, %v1144_v6  ;;  %v750_v17 = vadd.f32 %v653_v31, %v172_v1  ;;  %v766_v26 = vadd.f32 %v2215_v32, %v188_v18  ;;  %v190_v6 = vld [vmem:[#allocation2 + $0x1e0] sm:$0xff] }
  0xef   :  { %1321 = vst.msk [vmem:[%s2480_s4 + $0x60] sm:$0xf] %vm1296_vm3, %v1256_v8  ;;  %v1272_v20 = vpack.c.bf16 %v1208_v62, %v1208_v62  ;;  %vm1096_vm10 = vcmp.ge.f32.partialorder %v1032_v9, 0.0  ;;  %v1160_v21 = vmul.f32 0.2, %v1032_v9  ;;  %v1001_v3 = vadd.f32 %v1942_v45, %v933_v15  ;;  %v143_v15 = vld [vmem:[#allocation2 + $0x68] sm:$0xff] }
  0xf0   :  { %783 = vst.msk [vmem:[#allocation2 + $0x50] sm:$0xff] %vm65_vm1, %v718_v63  ;;  %vm1049_vm11 = vcmp.ge.f32.partialorder %v985_v2, 0.0  ;;  %v1113_v24 = vmul.f32 0.2, %v985_v2  ;;  %v719_v11 = vadd.f32 %v2226_v43, %v141_v22  ;;  %v735_v42 = vadd.f32 %v2244_v55, %v157_v30 }
  0xf1   :  { %1337 = vst.msk [vmem:[%s2480_s4 + $0xa0] sm:$0xf] %vm1296_vm3, %v1272_v20  ;;  %v1224_v13 = vsel %vm1096_vm10, %v1032_v9, %v1160_v21  ;;  %v881_v25 = vld [vmem:[#allocation2 + $0x148] sm:$0xff]  ;;  %vm1065_vm12 = vcmp.ge.f32.partialorder %v1001_v3, 0.0  ;;  %v1129_v28 = vmul.f32 0.2, %v1001_v3 }
  0xf2   :  { %v1288_v27 = vpack.c.bf16 %v1224_v13, %v1224_v13  ;;  %v949_v29 = vmul.f32 %v1936_v40, %v881_v25  ;;  %799 = vst.msk [vmem:[#allocation2 + $0xd0] sm:$0xff] %vm65_vm1, %v734_v16  ;;  %v1177_v31 = vsel %vm1049_vm11, %v985_v2, %v1113_v24 }
  0xf3   :  { %815 = vst.msk [vmem:[#allocation2 + $0x150] sm:$0xff] %vm65_vm1, %v750_v17  ;;  %v1241_v34 = vpack.c.bf16 %v1177_v31, %v1177_v31  ;;  %v1193_v32 = vsel %vm1065_vm12, %v1001_v3, %v1129_v28 }
  0xf4   :  { %1353 = vst.msk [vmem:[%s2480_s4 + $0xe0] sm:$0xf] %vm1296_vm3, %v1288_v27  ;;  %v1017_v35 = vadd.f32 %v1942_v45, %v949_v29  ;;  %v897_v36 = vld [vmem:[#allocation2 + $0x1c8] sm:$0xff]  ;;  %v1257_v37 = vpack.c.bf16 %v1193_v32, %v1193_v32 }
  0xf5   :  { %v655_v7 = vpop.f32.mrf.mxu2  ;;  %v695_v19 = vpop.f32.mrf.mxu3  ;;  %v965_v38 = vmul.f32 %v1936_v40, %v897_v36  ;;  %831 = vst.msk [vmem:[#allocation2 + $0x1d0] sm:$0xff] %vm65_vm1, %v766_v26  ;;  %v159_v26 = vld [vmem:[#allocation2 + $0xe8] sm:$0xff] }
  0xf6   :  { %v578_v23 = vpop.f32.mrf.mxu0  ;;  %v618_v10 = vpop.f32.mrf.mxu1  ;;  %1306 = vst.msk [vmem:[%s2480_s4 + $0x24] sm:$0xf] %vm1296_vm3, %v1241_v34  ;;  %vm1081_vm13 = vcmp.ge.f32.partialorder %v1017_v35, 0.0  ;;  %v1145_v39 = vmul.f32 0.2, %v1017_v35  ;;  %v751_v50 = vadd.f32 %v655_v7, %v173_v33  ;;  %v767_v53 = vadd.f32 %v695_v19, %v189_v44  ;;  %v175_v27 = vld [vmem:[#allocation2 + $0x168] sm:$0xff] }
  0xf7   :  { %1322 = vst.msk [vmem:[%s2480_s4 + $0x64] sm:$0xf] %vm1296_vm3, %v1257_v37  ;;  %v1033_v40 = vadd.f32 %v1942_v45, %v965_v38  ;;  %v850_v43 = vld [vmem:[#allocation2 + $0x50] sm:$0xff]  ;;  %v720_v49 = vadd.f32 %v578_v23, %v142_v46  ;;  %v2305_v45 = vld [vmem:[#allocation7] ss:$0 sm:$0xff]  ;;  %v736_v4 = vadd.f32 %v618_v10, %v158_v54 }
  0xf8   :  { %v1209_v51 = vsel %vm1081_vm13, %v1017_v35, %v1145_v39  ;;  %v918_v52 = vmul.f32 %v2300_v41, %v850_v43  ;;  %784 = vst.msk [vmem:[#allocation2 + $0x58] sm:$0xff] %vm65_vm1, %v719_v11  ;;  %v191_v35 = vld [vmem:[#allocation2 + $0x1e8] sm:$0xff]  ;;  %v144_v44 = vld [vmem:[#allocation2 + $0x70] sm:$0xff] }
  0xf9   :  { %v1273_v56 = vpack.c.bf16 %v1209_v51, %v1209_v51  ;;  %vm1097_vm14 = vcmp.ge.f32.partialorder %v1033_v40, 0.0  ;;  %v1161_v57 = vmul.f32 0.2, %v1033_v40  ;;  %v866_v58 = vld [vmem:[#allocation2 + $0xd0] sm:$0xff]  ;;  %800 = vst.msk [vmem:[#allocation2 + $0xd8] sm:$0xff] %vm65_vm1, %v735_v42 }
  0xfa   :  { %v986_v59 = vadd.f32 %v2305_v45, %v918_v52  ;;  %v934_v60 = vmul.f32 %v2300_v41, %v866_v58  ;;  %v882_v61 = vld [vmem:[#allocation2 + $0x150] sm:$0xff]  ;;  %816 = vst.msk [vmem:[#allocation2 + $0x158] sm:$0xff] %vm65_vm1, %v751_v50 }
  0xfb   :  { %1338 = vst.msk [vmem:[%s2480_s4 + $0xa4] sm:$0xf] %vm1296_vm3, %v1273_v56  ;;  %v1225_v0 = vsel %vm1097_vm14, %v1033_v40, %v1161_v57  ;;  %v950_v1 = vmul.f32 %v2300_v41, %v882_v61 }
  0xfc   :  { %v1289_v7 = vpack.c.bf16 %v1225_v0, %v1225_v0  ;;  %vm1050_vm15 = vcmp.ge.f32.partialorder %v986_v59, 0.0  ;;  %v1114_v8 = vmul.f32 0.2, %v986_v59  ;;  %v1002_v9 = vadd.f32 %v2305_v45, %v934_v60  ;;  %v898_v12 = vld [vmem:[#allocation2 + $0x1d0] sm:$0xff]  ;;  %832 = vst.msk [vmem:[#allocation2 + $0x1d8] sm:$0xff] %vm65_vm1, %v767_v53 }
  0xfd   :  { %v658_v47 = vpop.f32.mrf.mxu2  ;;  %v698_v55 = vpop.f32.mrf.mxu3  ;;  %v1018_v14 = vadd.f32 %v2305_v45, %v950_v1  ;;  %v966_v62 = vmul.f32 %v2300_v41, %v898_v12  ;;  %785 = vst.msk [vmem:[#allocation2 + $0x60] sm:$0xff] %vm65_vm1, %v720_v49 }
  0xfe   :  { %v580_v63 = vpop.f32.mrf.mxu0  ;;  %v752_v5 = vadd.f32 %v658_v47, %v174_v48  ;;  %v620_v16 = vpop.f32.mrf.mxu1  ;;  %1354 = vst.msk [vmem:[%s2480_s4 + $0xe4] sm:$0xf] %vm1296_vm3, %v1289_v7  ;;  %v1178_v17 = vsel %vm1050_vm15, %v986_v59, %v1114_v8  ;;  %vm1066_vm0 = vcmp.ge.f32.partialorder %v1002_v9, 0.0  ;;  %v1130_v18 = vmul.f32 0.2, %v1002_v9 }
  0xff   :  { %v768_v19 = vadd.f32 %v698_v55, %v190_v6  ;;  %v1242_v20 = vpack.c.bf16 %v1178_v17, %v1178_v17  ;;  %vm1082_vm2 = vcmp.ge.f32.partialorder %v1018_v14, 0.0  ;;  %v1146_v21 = vmul.f32 0.2, %v1018_v14  ;;  %v851_v3 = vld [vmem:[#allocation2 + $0x58] sm:$0xff]  ;;  %801 = vst.msk [vmem:[#allocation2 + $0xe0] sm:$0xff] %vm65_vm1, %v736_v4  ;;  %v160_v4 = vld [vmem:[#allocation2 + $0xf0] sm:$0xff] }
 0x100   :  { %v1034_v2 = vadd.f32 %v2305_v45, %v966_v62  ;;  %v1194_v23 = vsel %vm1066_vm0, %v1002_v9, %v1130_v18  ;;  %v919_v13 = vmul.f32 %v2300_v41, %v851_v3  ;;  %v867_v24 = vld [vmem:[#allocation2 + $0xd8] sm:$0xff]  ;;  %817 = vst.msk [vmem:[#allocation2 + $0x160] sm:$0xff] %vm65_vm1, %v752_v5  ;;  %v721_v25 = vadd.f32 %v580_v63, %v143_v15 }
 0x101   :  { %1307 = vst.msk [vmem:[%s2480_s4 + $0x28] sm:$0xf] %vm1296_vm3, %v1242_v20  ;;  %v1258_v28 = vpack.c.bf16 %v1194_v23, %v1194_v23  ;;  %v1210_v29 = vsel %vm1082_vm2, %v1018_v14, %v1146_v21  ;;  %v883_v31 = vld [vmem:[#allocation2 + $0x158] sm:$0xff]  ;;  %v935_v34 = vmul.f32 %v2300_v41, %v867_v24  ;;  %v737_v38 = vadd.f32 %v620_v16, %v159_v26 }
 0x102   :  { %vm1098_vm4 = vcmp.ge.f32.partialorder %v1034_v2, 0.0  ;;  %v1162_v30 = vmul.f32 0.2, %v1034_v2  ;;  %v1274_v33 = vpack.c.bf16 %v1210_v29, %v1210_v29  ;;  %v987_v10 = vadd.f32 %v2305_v45, %v919_v13  ;;  %833 = vst.msk [vmem:[#allocation2 + $0x1e0] sm:$0xff] %vm65_vm1, %v768_v19  ;;  %v176_v19 = vld [vmem:[#allocation2 + $0x170] sm:$0xff] }
 0x103   :  { %v951_v32 = vmul.f32 %v2300_v41, %v883_v31  ;;  %1323 = vst.msk [vmem:[%s2480_s4 + $0x68] sm:$0xf] %vm1296_vm3, %v1258_v28  ;;  %v899_v37 = vld [vmem:[#allocation2 + $0x1d8] sm:$0xff]  ;;  %v1003_v50 = vadd.f32 %v2305_v45, %v935_v34  ;;  %v192_v29 = vld [vmem:[#allocation2 + $0x1f0] sm:$0xff] }
 0x104   :  { %v1226_v11 = vsel %vm1098_vm4, %v1034_v2, %v1162_v30  ;;  %1339 = vst.msk [vmem:[%s2480_s4 + $0xa8] sm:$0xf] %vm1296_vm3, %v1274_v33  ;;  %vm1051_vm5 = vcmp.ge.f32.partialorder %v987_v10, 0.0  ;;  %v1115_v39 = vmul.f32 0.2, %v987_v10  ;;  %v852_v46 = vld [vmem:[#allocation2 + $0x60] sm:$0xff]  ;;  %v967_v51 = vmul.f32 %v2300_v41, %v899_v37 }
 0x105   :  { %v660_v22 = vpop.f32.mrf.mxu2  ;;  %v700_v36 = vpop.f32.mrf.mxu3  ;;  %v1290_v47 = vpack.c.bf16 %v1226_v11, %v1226_v11  ;;  %v1019_v43 = vadd.f32 %v2305_v45, %v951_v32  ;;  %v920_v52 = vmul.f32 %v2300_v41, %v852_v46  ;;  %786 = vst.msk [vmem:[#allocation2 + $0x68] sm:$0xff] %vm65_vm1, %v721_v25  ;;  %vm1067_vm6 = vcmp.ge.f32.partialorder %v1003_v50, 0.0  ;;  %v145_v30 = vld [vmem:[#allocation2 + $0x78] sm:$0xff] }
 0x106   :  { %v753_v42 = vadd.f32 %v660_v22, %v175_v27  ;;  %v583_v40 = vpop.f32.mrf.mxu0  ;;  %v769_v53 = vadd.f32 %v700_v36, %v191_v35  ;;  %v1179_v54 = vsel %vm1051_vm5, %v987_v10, %v1115_v39  ;;  %v1131_v48 = vmul.f32 0.2, %v1003_v50  ;;  %v868_v55 = vld [vmem:[#allocation2 + $0xe0] sm:$0xff]  ;;  %802 = vst.msk [vmem:[#allocation2 + $0xe8] sm:$0xff] %vm65_vm1, %v737_v38  ;;  %v623_v60 = vpop.f32.mrf.mxu1  ;;  %v161_v39 = vld [vmem:[#allocation2 + $0xf8] sm:$0xff] }
 0x107   :  { %1355 = vst.msk [vmem:[%s2480_s4 + $0xe8] sm:$0xf] %vm1296_vm3, %v1290_v47  ;;  %v722_v56 = vadd.f32 %v583_v40, %v144_v44  ;;  %v1243_v57 = vpack.c.bf16 %v1179_v54, %v1179_v54  ;;  %vm1083_vm7 = vcmp.ge.f32.partialorder %v1019_v43, 0.0  ;;  %v1147_v58 = vmul.f32 0.2, %v1019_v43  ;;  %v884_v59 = vld [vmem:[#allocation2 + $0x160] sm:$0xff] }
 0x108   :  { %v1035_v49 = vadd.f32 %v2305_v45, %v967_v51  ;;  %v1195_v61 = vsel %vm1067_vm6, %v1003_v50, %v1131_v48  ;;  %v988_v63 = vadd.f32 %v2305_v45, %v920_v52  ;;  %v936_v0 = vmul.f32 %v2300_v41, %v868_v55  ;;  %818 = vst.msk [vmem:[#allocation2 + $0x168] sm:$0xff] %vm65_vm1, %v753_v42 }
 0x109   :  { %v952_v1 = vmul.f32 %v2300_v41, %v884_v59  ;;  %1308 = vst.msk [vmem:[%s2480_s4 + $0x2c] sm:$0xf] %vm1296_vm3, %v1243_v57  ;;  %v1259_v5 = vpack.c.bf16 %v1195_v61, %v1195_v61  ;;  %v1211_v6 = vsel %vm1083_vm7, %v1019_v43, %v1147_v58  ;;  %v900_v8 = vld [vmem:[#allocation2 + $0x1e0] sm:$0xff]  ;;  %v738_v18 = vadd.f32 %v623_v60, %v160_v4 }
 0x10a   :  { %vm1099_vm8 = vcmp.ge.f32.partialorder %v1035_v49, 0.0  ;;  %v1163_v7 = vmul.f32 0.2, %v1035_v49  ;;  %v1275_v12 = vpack.c.bf16 %v1211_v6, %v1211_v6  ;;  %vm1052_vm9 = vcmp.ge.f32.partialorder %v988_v63, 0.0  ;;  %834 = vst.msk [vmem:[#allocation2 + $0x1e8] sm:$0xff] %vm65_vm1, %v769_v53  ;;  %v177_v53 = vld [vmem:[#allocation2 + $0x178] sm:$0xff] }
 0x10b   :  { %v1116_v14 = vmul.f32 0.2, %v988_v63  ;;  %v1004_v62 = vadd.f32 %v2305_v45, %v936_v0  ;;  %1324 = vst.msk [vmem:[%s2480_s4 + $0x6c] sm:$0xf] %vm1296_vm3, %v1259_v5  ;;  %v1020_v16 = vadd.f32 %v2305_v45, %v952_v1  ;;  %v968_v17 = vmul.f32 %v2300_v41, %v900_v8  ;;  %v193_v0 = vld [vmem:[#allocation2 + $0x1f8] sm:$0xff] }
 0x10c   :  { %v1227_v15 = vsel %vm1099_vm8, %v1035_v49, %v1163_v7  ;;  %1340 = vst.msk [vmem:[%s2480_s4 + $0xac] sm:$0xf] %vm1296_vm3, %v1275_v12  ;;  %v853_v3 = vld [vmem:[#allocation2 + $0x68] sm:$0xff] }
 0x10d   :  { %v663_v9 = vpop.f32.mrf.mxu2  ;;  %v1291_v20 = vpack.c.bf16 %v1227_v15, %v1227_v15  ;;  %v1180_v21 = vsel %vm1052_vm9, %v988_v63, %v1116_v14  ;;  %vm1068_vm10 = vcmp.ge.f32.partialorder %v1004_v62, 0.0  ;;  %v1132_v2 = vmul.f32 0.2, %v1004_v62  ;;  %v703_v22 = vpop.f32.mrf.mxu3  ;;  %787 = vst.msk [vmem:[#allocation2 + $0x70] sm:$0xff] %vm65_vm1, %v722_v56  ;;  %v869_v27 = vld [vmem:[#allocation2 + $0xe8] sm:$0xff] }
 0x10e   :  { %v1244_v23 = vpack.c.bf16 %v1180_v21, %v1180_v21  ;;  %vm1084_vm11 = vcmp.ge.f32.partialorder %v1020_v16, 0.0  ;;  %v1148_v13 = vmul.f32 0.2, %v1020_v16  ;;  %v1036_v24 = vadd.f32 %v2305_v45, %v968_v17  ;;  %v585_v31 = vpop.f32.mrf.mxu0  ;;  %803 = vst.msk [vmem:[#allocation2 + $0xf0] sm:$0xff] %vm65_vm1, %v738_v18  ;;  %v625_v50 = vpop.f32.mrf.mxu1 }
 0x10f   :  { %1356 = vst.msk [vmem:[%s2480_s4 + $0xec] sm:$0xf] %vm1296_vm3, %v1291_v20  ;;  %v1196_v25 = vsel %vm1068_vm10, %v1004_v62, %v1132_v2  ;;  %v921_v26 = vmul.f32 %v2300_v41, %v853_v3  ;;  %v754_v28 = vadd.f32 %v663_v9, %v176_v19  ;;  %v885_v32 = vld [vmem:[#allocation2 + $0x168] sm:$0xff]  ;;  %v937_v11 = vmul.f32 %v2300_v41, %v869_v27 }
 0x110   :  { %1309 = vst.msk [vmem:[%s2480_s4 + $0x30] sm:$0xf] %vm1296_vm3, %v1244_v23  ;;  %v1260_v33 = vpack.c.bf16 %v1196_v25, %v1196_v25  ;;  %v1212_v10 = vsel %vm1084_vm11, %v1020_v16, %v1148_v13  ;;  %vm1100_vm12 = vcmp.ge.f32.partialorder %v1036_v24, 0.0  ;;  %v1164_v34 = vmul.f32 0.2, %v1036_v24 }
 0x111   :  { %v1276_v35 = vpack.c.bf16 %v1212_v10, %v1212_v10  ;;  %v989_v36 = vadd.f32 %v2305_v45, %v921_v26  ;;  %v953_v37 = vmul.f32 %v2300_v41, %v885_v32  ;;  %v901_v42 = vld [vmem:[#allocation2 + $0x1e8] sm:$0xff]  ;;  %v770_v44 = vadd.f32 %v703_v22, %v192_v29  ;;  %819 = vst.msk [vmem:[#allocation2 + $0x170] sm:$0xff] %vm65_vm1, %v754_v28 }
 0x112   :  { %1325 = vst.msk [vmem:[%s2480_s4 + $0x70] sm:$0xf] %vm1296_vm3, %v1260_v33  ;;  %v1228_v38 = vsel %vm1100_vm12, %v1036_v24, %v1164_v34  ;;  %v723_v47 = vadd.f32 %v585_v31, %v145_v30  ;;  %v1005_v43 = vadd.f32 %v2305_v45, %v937_v11  ;;  %v969_v52 = vmul.f32 %v2300_v41, %v901_v42 }
 0x113   :  { %1341 = vst.msk [vmem:[%s2480_s4 + $0xb0] sm:$0xf] %vm1296_vm3, %v1276_v35  ;;  %v1292_v46 = vpack.c.bf16 %v1228_v38, %v1228_v38  ;;  %vm1053_vm13 = vcmp.ge.f32.partialorder %v989_v36, 0.0  ;;  %v1117_v40 = vmul.f32 0.2, %v989_v36  ;;  %v1021_v51 = vadd.f32 %v2305_v45, %v953_v37 }
 0x114   :  { %vm1069_vm14 = vcmp.ge.f32.partialorder %v1005_v43, 0.0  ;;  %v1133_v55 = vmul.f32 0.2, %v1005_v43  ;;  %v854_v56 = vld [vmem:[#allocation2 + $0x70] sm:$0xff]  ;;  %v739_v57 = vadd.f32 %v625_v50, %v161_v39  ;;  %v1037_v59 = vadd.f32 %v2305_v45, %v969_v52  ;;  %835 = vst.msk [vmem:[#allocation2 + $0x1f0] sm:$0xff] %vm65_vm1, %v770_v44 }
 0x115   :  { %v665_v54 = vpop.f32.mrf.mxu2  ;;  %1357 = vst.msk [vmem:[%s2480_s4 + $0xf0] sm:$0xf] %vm1296_vm3, %v1292_v46  ;;  %v1181_v48 = vsel %vm1053_vm13, %v989_v36, %v1117_v40  ;;  %vm1085_vm15 = vcmp.ge.f32.partialorder %v1021_v51, 0.0  ;;  %v1149_v49 = vmul.f32 0.2, %v1021_v51  ;;  %v922_v61 = vmul.f32 %v2300_v41, %v854_v56  ;;  %v705_v1 = vpop.f32.mrf.mxu3  ;;  %v870_v7 = vld [vmem:[#allocation2 + $0xf0] sm:$0xff] }
 0x116   :  { %v1245_v58 = vpack.c.bf16 %v1181_v48, %v1181_v48  ;;  %v1197_v60 = vsel %vm1069_vm14, %v1005_v43, %v1133_v55  ;;  %788 = vst.msk [vmem:[#allocation2 + $0x78] sm:$0xff] %vm65_vm1, %v723_v47  ;;  %v755_v63 = vadd.f32 %v665_v54, %v177_v53  ;;  %vm1101_vm0 = vcmp.ge.f32.partialorder %v1037_v59, 0.0 }
 0x117   :  { %v1261_v4 = vpack.c.bf16 %v1197_v60, %v1197_v60  ;;  %v1213_v5 = vsel %vm1085_vm15, %v1021_v51, %v1149_v49  ;;  %v1165_v6 = vmul.f32 0.2, %v1037_v59  ;;  %v990_v9 = vadd.f32 %v2305_v45, %v922_v61  ;;  %804 = vst.msk [vmem:[#allocation2 + $0xf8] sm:$0xff] %vm65_vm1, %v739_v57 }
 0x118   :  { %1310 = vst.msk [vmem:[%s2480_s4 + $0x34] sm:$0xf] %vm1296_vm3, %v1245_v58  ;;  %v1277_v8 = vpack.c.bf16 %v1213_v5, %v1213_v5  ;;  %v938_v12 = vmul.f32 %v2300_v41, %v870_v7  ;;  %v771_v62 = vadd.f32 %v705_v1, %v193_v0  ;;  %v886_v18 = vld [vmem:[#allocation2 + $0x170] sm:$0xff] }
 0x119   :  { %1326 = vst.msk [vmem:[%s2480_s4 + $0x74] sm:$0xf] %vm1296_vm3, %v1261_v4  ;;  %v1229_v14 = vsel %vm1101_vm0, %v1037_v59, %v1165_v6  ;;  %vm1054_vm2 = vcmp.ge.f32.partialorder %v990_v9, 0.0  ;;  %v1118_v16 = vmul.f32 0.2, %v990_v9  ;;  %v954_v19 = vmul.f32 %v2300_v41, %v886_v18 }
 0x11a   :  { %1342 = vst.msk [vmem:[%s2480_s4 + $0xb4] sm:$0xf] %vm1296_vm3, %v1277_v8  ;;  %v1293_v15 = vpack.c.bf16 %v1229_v14, %v1229_v14  ;;  %v1006_v17 = vadd.f32 %v2305_v45, %v938_v12 }
 0x11b   :  { %820 = vst.msk [vmem:[#allocation2 + $0x178] sm:$0xff] %vm65_vm1, %v755_v63  ;;  %v1182_v20 = vsel %vm1054_vm2, %v990_v9, %v1118_v16  ;;  %v902_v2 = vld [vmem:[#allocation2 + $0x1f0] sm:$0xff]  ;;  %v1022_v22 = vadd.f32 %v2305_v45, %v954_v19 }
 0x11c   :  { %1358 = vst.msk [vmem:[%s2480_s4 + $0xf4] sm:$0xf] %vm1296_vm3, %v1293_v15  ;;  %vm1070_vm4 = vcmp.ge.f32.partialorder %v1006_v17, 0.0  ;;  %v1134_v21 = vmul.f32 0.2, %v1006_v17  ;;  %v1246_v3 = vpack.c.bf16 %v1182_v20, %v1182_v20  ;;  %v970_v23 = vmul.f32 %v2300_v41, %v902_v2 }
 0x11d   :  { %v855_v13 = vld [vmem:[#allocation2 + $0x78] sm:$0xff]  ;;  %836 = vst.msk [vmem:[#allocation2 + $0x1f8] sm:$0xff] %vm65_vm1, %v771_v62  ;;  %vm1086_vm5 = vcmp.ge.f32.partialorder %v1022_v22, 0.0  ;;  %v1150_v27 = vmul.f32 0.2, %v1022_v22 }
 0x11e   :  { %v1198_v24 = vsel %vm1070_vm4, %v1006_v17, %v1134_v21  ;;  %v923_v25 = vmul.f32 %v2300_v41, %v855_v13  ;;  %1311 = vst.msk [vmem:[%s2480_s4 + $0x38] sm:$0xf] %vm1296_vm3, %v1246_v3  ;;  %v1038_v28 = vadd.f32 %v2305_v45, %v970_v23  ;;  %v871_v29 = vld [vmem:[#allocation2 + $0xf8] sm:$0xff] }
 0x11f   :  { %v1262_v26 = vpack.c.bf16 %v1198_v24, %v1198_v24  ;;  %v939_v31 = vmul.f32 %v2300_v41, %v871_v29  ;;  %v1214_v33 = vsel %vm1086_vm5, %v1022_v22, %v1150_v27 }
 0x120   :  { %v991_v30 = vadd.f32 %v2305_v45, %v923_v25  ;;  %vm1102_vm1 = vcmp.ge.f32.partialorder %v1038_v28, 0.0  ;;  %v1166_v10 = vmul.f32 0.2, %v1038_v28  ;;  %v1278_v34 = vpack.c.bf16 %v1214_v33, %v1214_v33 }
 0x121   :  { %1327 = vst.msk [vmem:[%s2480_s4 + $0x78] sm:$0xf] %vm1296_vm3, %v1262_v26  ;;  %v1007_v35 = vadd.f32 %v2305_v45, %v939_v31 }
 0x122   :  { %vm1055_vm6 = vcmp.ge.f32.partialorder %v991_v30, 0.0  ;;  %v1119_v32 = vmul.f32 0.2, %v991_v30  ;;  %v887_v36 = vld [vmem:[#allocation2 + $0x178] sm:$0xff]  ;;  %v1230_v11 = vsel %vm1102_vm1, %v1038_v28, %v1166_v10  ;;  %1343 = vst.msk [vmem:[%s2480_s4 + $0xb8] sm:$0xf] %vm1296_vm3, %v1278_v34 }
 0x123   :  { %v955_v37 = vmul.f32 %v2300_v41, %v887_v36  ;;  %v1294_v38 = vpack.c.bf16 %v1230_v11, %v1230_v11  ;;  %vm1071_vm7 = vcmp.ge.f32.partialorder %v1007_v35, 0.0  ;;  %v1135_v44 = vmul.f32 0.2, %v1007_v35 }
 0x124   :  { %v1183_v42 = vsel %vm1055_vm6, %v991_v30, %v1119_v32  ;;  %v903_v47 = vld [vmem:[#allocation2 + $0x1f8] sm:$0xff] }
 0x125   :  { %v1247_v39 = vpack.c.bf16 %v1183_v42, %v1183_v42  ;;  %v1023_v50 = vadd.f32 %v2305_v45, %v955_v37  ;;  %v971_v46 = vmul.f32 %v2300_v41, %v903_v47  ;;  %1359 = vst.msk [vmem:[%s2480_s4 + $0xf8] sm:$0xf] %vm1296_vm3, %v1294_v38  ;;  %v1199_v40 = vsel %vm1071_vm7, %v1007_v35, %v1135_v44 }
 0x126   :  { %v1263_v43 = vpack.c.bf16 %v1199_v40, %v1199_v40 }
 0x127   :  { %1312 = vst.msk [vmem:[%s2480_s4 + $0x3c] sm:$0xf] %vm1296_vm3, %v1247_v39  ;;  %vm1087_vm8 = vcmp.ge.f32.partialorder %v1023_v50, 0.0  ;;  %v1151_v51 = vmul.f32 0.2, %v1023_v50  ;;  %v1039_v52 = vadd.f32 %v2305_v45, %v971_v46 }
 0x128   :  { %1328 = vst.msk [vmem:[%s2480_s4 + $0x7c] sm:$0xf] %vm1296_vm3, %v1263_v43 }
 0x129   :  { %v1215_v41 = vsel %vm1087_vm8, %v1023_v50, %v1151_v51  ;;  %vm1103_vm9 = vcmp.ge.f32.partialorder %v1039_v52, 0.0  ;;  %v1167_v53 = vmul.f32 0.2, %v1039_v52 }
 0x12a   :  { %v1279_v54 = vpack.c.bf16 %v1215_v41, %v1215_v41 }
 0x12b   :  { %v1231_v48 = vsel %vm1103_vm9, %v1039_v52, %v1167_v53 }
 0x12c   :  { %1344 = vst.msk [vmem:[%s2480_s4 + $0xbc] sm:$0xf] %vm1296_vm3, %v1279_v54  ;;  %v1295_v55 = vpack.c.bf16 %v1231_v48, %v1231_v48 }
 0x12e   :  { %1360 = vst.msk [vmem:[%s2480_s4 + $0xfc] sm:$0xf] %vm1296_vm3, %v1295_v55 }
 0x12f   :  { %1365 = vsyncpa [#allocation4], 1 }
 0x130   :  { %1366 = vsyncpa [#allocation6], 1 }

// kernel: discriminator_forward.6
= control target key start
LH: loop header
LB: loop body
LE: loop exit
PB: predicated region body
PF: predicated region fallthrough
CT: control target
= control target key end

     0   :  { %s2920_s1 = inlined_call_operand.vmem [shape: bf16[1024,128], index: 1, kind: input, shape index: {}]   ;;  %s2921_s0 = inlined_call_operand.vmem [shape: bf16[128,1024], index: 0, kind: input, shape index: {}]   ;;  %s2922_s2 = inlined_call_operand.vmem [shape: f32[1,128], index: 2, kind: input, shape index: {}]   ;;  %s2923_s3 = inlined_call_operand.vmem [shape: f32[1,128], index: 3, kind: input, shape index: {}]   ;;  %s2924_s4 = inlined_call_operand.vmem [shape: bf16[128,128], index: 4, kind: output, shape index: {}]  }
   0x1   :  { %v2099_v0 = vld [vmem:[%s2920_s1 + $0x38] sm:$0xff]  ;;  %v2098_v4 = vld [vmem:[%s2920_s1 + $0x30] sm:$0xff]  ;;  %v2097_v8 = vld [vmem:[%s2920_s1 + $0x28] sm:$0xff] }
   0x2   :  { %v2107_v1 = vld [vmem:[%s2920_s1 + $0x78] sm:$0xff]  ;;  %949 = vmatpush.bf16.msra.mxu0 %v2099_v0  ;;  %v2106_v5 = vld [vmem:[%s2920_s1 + $0x70] sm:$0xff]  ;;  %v2105_v9 = vld [vmem:[%s2920_s1 + $0x68] sm:$0xff] }
   0x3   :  { %v2115_v2 = vld [vmem:[%s2920_s1 + $0xb8] sm:$0xff]  ;;  %998 = vmatpush.bf16.msra.mxu1 %v2107_v1  ;;  %v2114_v6 = vld [vmem:[%s2920_s1 + $0xb0] sm:$0xff]  ;;  %v2113_v10 = vld [vmem:[%s2920_s1 + $0xa8] sm:$0xff] }
   0x4   :  { %v2123_v3 = vld [vmem:[%s2920_s1 + $0xf8] sm:$0xff]  ;;  %1047 = vmatpush.bf16.msra.mxu2 %v2115_v2  ;;  %v2122_v7 = vld [vmem:[%s2920_s1 + $0xf0] sm:$0xff]  ;;  %v2121_v11 = vld [vmem:[%s2920_s1 + $0xe8] sm:$0xff] }
   0x5   :  { %1096 = vmatpush.bf16.msra.mxu3 %v2123_v3  ;;  %v2096_v12 = vld [vmem:[%s2920_s1 + $0x20] sm:$0xff]  ;;  %v2095_v16 = vld [vmem:[%s2920_s1 + $0x18] sm:$0xff]  ;;  %v2094_v20 = vld [vmem:[%s2920_s1 + $0x10] sm:$0xff] }
   0x6   :  { %950 = vmatpush.bf16.msra.mxu0 %v2098_v4  ;;  %v2104_v13 = vld [vmem:[%s2920_s1 + $0x60] sm:$0xff]  ;;  %v2103_v17 = vld [vmem:[%s2920_s1 + $0x58] sm:$0xff]  ;;  %v2102_v21 = vld [vmem:[%s2920_s1 + $0x50] sm:$0xff] }
   0x7   :  { %999 = vmatpush.bf16.msra.mxu1 %v2106_v5  ;;  %v2112_v14 = vld [vmem:[%s2920_s1 + $0xa0] sm:$0xff]  ;;  %v2111_v18 = vld [vmem:[%s2920_s1 + $0x98] sm:$0xff]  ;;  %v2110_v22 = vld [vmem:[%s2920_s1 + $0x90] sm:$0xff] }
   0x8   :  { %1048 = vmatpush.bf16.msra.mxu2 %v2114_v6  ;;  %v2120_v15 = vld [vmem:[%s2920_s1 + $0xe0] sm:$0xff]  ;;  %v2119_v19 = vld [vmem:[%s2920_s1 + $0xd8] sm:$0xff]  ;;  %v2118_v23 = vld [vmem:[%s2920_s1 + $0xd0] sm:$0xff] }
   0x9   :  { %1097 = vmatpush.bf16.msra.mxu3 %v2122_v7  ;;  %v2093_v24 = vld [vmem:[%s2920_s1 + $0x8] sm:$0xff]  ;;  %v2092_v28 = vld [vmem:[%s2920_s1] sm:$0xff]  ;;  %v2147_v40 = vld [vmem:[%s2920_s1 + $0x1b8] sm:$0xff] }
   0xa   :  { %951 = vmatpush.bf16.msra.mxu0 %v2097_v8  ;;  %v2101_v25 = vld [vmem:[%s2920_s1 + $0x48] sm:$0xff]  ;;  %v2100_v29 = vld [vmem:[%s2920_s1 + $0x40] sm:$0xff]  ;;  %v2131_v41 = vld [vmem:[%s2920_s1 + $0x138] sm:$0xff] }
   0xb   :  { %1000 = vmatpush.bf16.msra.mxu1 %v2105_v9  ;;  %v2109_v26 = vld [vmem:[%s2920_s1 + $0x88] sm:$0xff]  ;;  %v2108_v30 = vld [vmem:[%s2920_s1 + $0x80] sm:$0xff]  ;;  %v2155_v46 = vld [vmem:[%s2920_s1 + $0x1f8] sm:$0xff] }
   0xc   :  { %1049 = vmatpush.bf16.msra.mxu2 %v2113_v10  ;;  %v2117_v27 = vld [vmem:[%s2920_s1 + $0xc8] sm:$0xff]  ;;  %v2116_v31 = vld [vmem:[%s2920_s1 + $0xc0] sm:$0xff]  ;;  %v2139_v47 = vld [vmem:[%s2920_s1 + $0x178] sm:$0xff] }
   0xd   :  { %1098 = vmatpush.bf16.msra.mxu3 %v2121_v11  ;;  %v1518_v32 = vld [vmem:[%s2921_s0] sm:$0xf]  ;;  %v2028_v34 = vld [vmem:[%s2921_s0 + $0x4] sm:$0xf]  ;;  %v1526_v36 = vld [vmem:[%s2921_s0 + $0x8] sm:$0xf] }
   0xe   :  { %952 = vmatpush.bf16.msra.mxu0 %v2096_v12  ;;  %v2032_v33 = vld [vmem:[%s2921_s0 + $0x1c] sm:$0xf0]  ;;  %v1520_v35 = vld [vmem:[%s2921_s0 + $0x20] sm:$0xf0]  ;;  %v2033_v37 = vld [vmem:[%s2921_s0 + $0x24] sm:$0xf0] }
   0xf   :  { %1001 = vmatpush.bf16.msra.mxu1 %v2104_v13  ;;  %v2029_v38 = vld [vmem:[%s2921_s0 + $0xc] sm:$0xf]  ;;  %v1519_v42 = vor.u32 %v2032_v33, %v1518_v32  ;;  %v1523_v43 = vor.u32 %v2028_v34, %v1520_v35  ;;  %v1527_v44 = vor.u32 %v2033_v37, %v1526_v36  ;;  %v2146_v48 = vld [vmem:[%s2920_s1 + $0x1b0] sm:$0xff]  ;;  %v1550_v56 = vld [vmem:[%s2921_s0 + $0x40] sm:$0xf] }
  0x10   :  { %1050 = vmatpush.bf16.msra.mxu2 %v2112_v14  ;;  %v1528_v39 = vld [vmem:[%s2921_s0 + $0x28] sm:$0xf0]  ;;  %v2130_v49 = vld [vmem:[%s2920_s1 + $0x130] sm:$0xff]  ;;  %v2040_v57 = vld [vmem:[%s2921_s0 + $0x5c] sm:$0xf0] }
  0x11   :  { %1099 = vmatpush.bf16.msra.mxu3 %v2120_v15  ;;  %v1531_v45 = vor.u32 %v2029_v38, %v1528_v39  ;;  %v2154_v50 = vld [vmem:[%s2920_s1 + $0x1f0] sm:$0xff]  ;;  %v2145_v52 = vld [vmem:[%s2920_s1 + $0x1a8] sm:$0xff]  ;;  %v2036_v58 = vld [vmem:[%s2921_s0 + $0x44] sm:$0xf]  ;;  %v1551_v0 = vor.u32 %v2040_v57, %v1550_v56 }
  0x12   :  { %953 = vmatpush.bf16.msra.mxu0 %v2095_v16  ;;  %v2138_v51 = vld [vmem:[%s2920_s1 + $0x170] sm:$0xff]  ;;  %v2129_v53 = vld [vmem:[%s2920_s1 + $0x128] sm:$0xff]  ;;  %v1552_v59 = vld [vmem:[%s2921_s0 + $0x60] sm:$0xf0] }
  0x13   :  { %1002 = vmatpush.bf16.msra.mxu1 %v2103_v17  ;;  %v2153_v54 = vld [vmem:[%s2920_s1 + $0x1e8] sm:$0xff]  ;;  %v1555_v1 = vor.u32 %v2036_v58, %v1552_v59  ;;  %v2144_v4 = vld [vmem:[%s2920_s1 + $0x1a0] sm:$0xff]  ;;  %v2142_v36 = vld [vmem:[%s2920_s1 + $0x190] sm:$0xff] }
  0x14   :  { %1051 = vmatpush.bf16.msra.mxu2 %v2111_v18  ;;  %v2137_v55 = vld [vmem:[%s2920_s1 + $0x168] sm:$0xff]  ;;  %v2128_v5 = vld [vmem:[%s2920_s1 + $0x120] sm:$0xff]  ;;  %v2126_v37 = vld [vmem:[%s2920_s1 + $0x110] sm:$0xff] }
  0x15   :  { %1100 = vmatpush.bf16.msra.mxu3 %v2119_v19  ;;  %v1558_v60 = vld [vmem:[%s2921_s0 + $0x48] sm:$0xf]  ;;  %v2037_v62 = vld [vmem:[%s2921_s0 + $0x4c] sm:$0xf]  ;;  %v2152_v6 = vld [vmem:[%s2920_s1 + $0x1e0] sm:$0xff] }
  0x16   :  { %954 = vmatpush.bf16.msra.mxu0 %v2094_v20  ;;  %v2041_v61 = vld [vmem:[%s2921_s0 + $0x64] sm:$0xf0]  ;;  %v1560_v63 = vld [vmem:[%s2921_s0 + $0x68] sm:$0xf0]  ;;  %v2136_v7 = vld [vmem:[%s2920_s1 + $0x160] sm:$0xff] }
  0x17   :  { %1003 = vmatpush.bf16.msra.mxu1 %v2102_v21  ;;  %v1559_v2 = vor.u32 %v2041_v61, %v1558_v60  ;;  %v1563_v3 = vor.u32 %v2037_v62, %v1560_v63  ;;  %v1582_v8 = vld [vmem:[%s2921_s0 + $0x80] sm:$0xf]  ;;  %v2044_v10 = vld [vmem:[%s2921_s0 + $0x84] sm:$0xf]  ;;  %v1590_v12 = vld [vmem:[%s2921_s0 + $0x88] sm:$0xf] }
  0x18   :  { %1052 = vmatpush.bf16.msra.mxu2 %v2110_v22  ;;  %v2048_v9 = vld [vmem:[%s2921_s0 + $0x9c] sm:$0xf0]  ;;  %v1584_v11 = vld [vmem:[%s2921_s0 + $0xa0] sm:$0xf0]  ;;  %v2049_v13 = vld [vmem:[%s2921_s0 + $0xa4] sm:$0xf0] }
  0x19   :  { %1101 = vmatpush.bf16.msra.mxu3 %v2118_v23  ;;  %v2045_v14 = vld [vmem:[%s2921_s0 + $0x8c] sm:$0xf]  ;;  %v1583_v16 = vor.u32 %v2048_v9, %v1582_v8  ;;  %v1587_v17 = vor.u32 %v2044_v10, %v1584_v11  ;;  %v1591_v18 = vor.u32 %v2049_v13, %v1590_v12  ;;  %v2143_v20 = vld [vmem:[%s2920_s1 + $0x198] sm:$0xff]  ;;  %v2150_v38 = vld [vmem:[%s2920_s1 + $0x1d0] sm:$0xff] }
  0x1a   :  { %955 = vmatpush.bf16.msra.mxu0 %v2093_v24  ;;  %v1592_v15 = vld [vmem:[%s2921_s0 + $0xa8] sm:$0xf0]  ;;  %v2127_v21 = vld [vmem:[%s2920_s1 + $0x118] sm:$0xff]  ;;  %v1614_v24 = vld [vmem:[%s2921_s0 + $0xc0] sm:$0xf] }
  0x1b   :  { %1004 = vmatpush.bf16.msra.mxu1 %v2101_v25  ;;  %v1595_v19 = vor.u32 %v2045_v14, %v1592_v15  ;;  %v2151_v22 = vld [vmem:[%s2920_s1 + $0x1d8] sm:$0xff]  ;;  %v2056_v25 = vld [vmem:[%s2921_s0 + $0xdc] sm:$0xf0]  ;;  %v2134_v39 = vld [vmem:[%s2920_s1 + $0x150] sm:$0xff] }
  0x1c   :  { %1053 = vmatpush.bf16.msra.mxu2 %v2109_v26  ;;  %v2135_v23 = vld [vmem:[%s2920_s1 + $0x158] sm:$0xff]  ;;  %v2052_v26 = vld [vmem:[%s2921_s0 + $0xc4] sm:$0xf]  ;;  %v1615_v32 = vor.u32 %v2056_v25, %v1614_v24  ;;  %v1678_v56 = vld [vmem:[%s2921_s0 + $0x140] sm:$0xf] }
  0x1d   :  { %1102 = vmatpush.bf16.msra.mxu3 %v2117_v27  ;;  %v1616_v27 = vld [vmem:[%s2921_s0 + $0xe0] sm:$0xf0]  ;;  %v2072_v57 = vld [vmem:[%s2921_s0 + $0x15c] sm:$0xf0]  ;;  %v1686_v60 = vld [vmem:[%s2921_s0 + $0x148] sm:$0xf] }
  0x1e   :  { %956 = vmatpush.bf16.msra.mxu0 %v2092_v28  ;;  %v1622_v28 = vld [vmem:[%s2921_s0 + $0xc8] sm:$0xf]  ;;  %v1619_v33 = vor.u32 %v2052_v26, %v1616_v27  ;;  %v2068_v58 = vld [vmem:[%s2921_s0 + $0x144] sm:$0xf]  ;;  %v2069_v62 = vld [vmem:[%s2921_s0 + $0x14c] sm:$0xf] }
  0x1f   :  { %1005 = vmatpush.bf16.msra.mxu1 %v2100_v29  ;;  %v2057_v29 = vld [vmem:[%s2921_s0 + $0xe4] sm:$0xf0]  ;;  %v1680_v59 = vld [vmem:[%s2921_s0 + $0x160] sm:$0xf0]  ;;  %v1688_v63 = vld [vmem:[%s2921_s0 + $0x168] sm:$0xf0] }
  0x20   :  { %1054 = vmatpush.bf16.msra.mxu2 %v2108_v30  ;;  %v2053_v30 = vld [vmem:[%s2921_s0 + $0xcc] sm:$0xf]  ;;  %v1623_v34 = vor.u32 %v2057_v29, %v1622_v28  ;;  %v2073_v61 = vld [vmem:[%s2921_s0 + $0x164] sm:$0xf0]  ;;  %v1710_v8 = vld [vmem:[%s2921_s0 + $0x180] sm:$0xf] }
  0x21   :  { %1103 = vmatpush.bf16.msra.mxu3 %v2116_v31  ;;  %957 = vmatmul.bf16.vlgmr.msra.gmra.mxu0 %v1519_v42  ;;  %v1624_v31 = vld [vmem:[%s2921_s0 + $0xe8] sm:$0xf0]  ;;  %v2060_v42 = vld [vmem:[%s2921_s0 + $0x104] sm:$0xf]  ;;  %v2080_v9 = vld [vmem:[%s2921_s0 + $0x19c] sm:$0xf0] }
  0x22   :  { %1145 = vmatpush.bf16.msrb.mxu0 %v2131_v41  ;;  %1006 = vmatmul.bf16.vlgmr.msra.gmra.mxu1 %v1523_v43  ;;  %v1627_v35 = vor.u32 %v2053_v30, %v1624_v31  ;;  %v2064_v41 = vld [vmem:[%s2921_s0 + $0x11c] sm:$0xf0]  ;;  %v1648_v43 = vld [vmem:[%s2921_s0 + $0x120] sm:$0xf0]  ;;  %v1718_v12 = vld [vmem:[%s2921_s0 + $0x188] sm:$0xf] }
  0x23   :  { %1055 = vmatmul.bf16.vlgmr.msra.gmra.mxu2 %v1527_v44  ;;  %1194 = vmatpush.bf16.msrb.mxu1 %v2139_v47  ;;  %v1654_v44 = vld [vmem:[%s2921_s0 + $0x108] sm:$0xf]  ;;  %v1656_v47 = vld [vmem:[%s2921_s0 + $0x128] sm:$0xf0]  ;;  %v2076_v10 = vld [vmem:[%s2921_s0 + $0x184] sm:$0xf] }
  0x24   :  { %1243 = vmatpush.bf16.msrb.mxu2 %v2147_v40  ;;  %1104 = vmatmul.bf16.vlgmr.msra.gmra.mxu3 %v1531_v45  ;;  %v1646_v40 = vld [vmem:[%s2921_s0 + $0x100] sm:$0xf]  ;;  %v2065_v45 = vld [vmem:[%s2921_s0 + $0x124] sm:$0xf0]  ;;  %v1712_v11 = vld [vmem:[%s2921_s0 + $0x1a0] sm:$0xf0] }
  0x25   :  { %1292 = vmatpush.bf16.msrb.mxu3 %v2155_v46  ;;  %v2061_v46 = vld [vmem:[%s2921_s0 + $0x10c] sm:$0xf]  ;;  %v2081_v13 = vld [vmem:[%s2921_s0 + $0x1a4] sm:$0xf0] }
  0x26   :  { %1146 = vmatpush.bf16.msrb.mxu0 %v2130_v49  ;;  %v1651_v49 = vor.u32 %v2060_v42, %v1648_v43  ;;  %v2077_v14 = vld [vmem:[%s2921_s0 + $0x18c] sm:$0xf]  ;;  %v1750_v24 = vld [vmem:[%s2921_s0 + $0x1c8] sm:$0xf] }
  0x27   :  { %1195 = vmatpush.bf16.msrb.mxu1 %v2138_v51  ;;  %v1659_v51 = vor.u32 %v2061_v46, %v1656_v47  ;;  %v1720_v15 = vld [vmem:[%s2921_s0 + $0x1a8] sm:$0xf0]  ;;  %v2089_v25 = vld [vmem:[%s2921_s0 + $0x1e4] sm:$0xf0] }
  0x28   :  { %1244 = vmatpush.bf16.msrb.mxu2 %v2146_v48  ;;  %v1647_v48 = vor.u32 %v2064_v41, %v1646_v40  ;;  %v2085_v26 = vld [vmem:[%s2921_s0 + $0x1cc] sm:$0xf]  ;;  %v1751_v30 = vor.u32 %v2089_v25, %v1750_v24 }
  0x29   :  { %1293 = vmatpush.bf16.msrb.mxu3 %v2154_v50  ;;  %v1655_v50 = vor.u32 %v2065_v45, %v1654_v44  ;;  %v1752_v27 = vld [vmem:[%s2921_s0 + $0x1e8] sm:$0xf0] }
  0x2a   :  { %1147 = vmatpush.bf16.msrb.mxu0 %v2129_v53  ;;  %v2125_v53 = vld [vmem:[%s2920_s1 + $0x108] sm:$0xff]  ;;  %v1755_v31 = vor.u32 %v2085_v26, %v1752_v27 }
  0x2b   :  { %1196 = vmatpush.bf16.msrb.mxu1 %v2137_v55  ;;  %v2133_v55 = vld [vmem:[%s2920_s1 + $0x148] sm:$0xff] }
  0x2c   :  { %1245 = vmatpush.bf16.msrb.mxu2 %v2145_v52  ;;  %v2141_v52 = vld [vmem:[%s2920_s1 + $0x188] sm:$0xff] }
  0x2d   :  { %1294 = vmatpush.bf16.msrb.mxu3 %v2153_v54  ;;  %v2149_v54 = vld [vmem:[%s2920_s1 + $0x1c8] sm:$0xff] }
  0x2e   :  { %1148 = vmatpush.bf16.msrb.mxu0 %v2128_v5  ;;  %v2124_v5 = vld [vmem:[%s2920_s1 + $0x100] sm:$0xff] }
  0x2f   :  { %1197 = vmatpush.bf16.msrb.mxu1 %v2136_v7  ;;  %v2132_v7 = vld [vmem:[%s2920_s1 + $0x140] sm:$0xff] }
  0x30   :  { %1246 = vmatpush.bf16.msrb.mxu2 %v2144_v4  ;;  %v2140_v4 = vld [vmem:[%s2920_s1 + $0x180] sm:$0xff] }
  0x31   :  { %962 = vmatmul.bf16.gmra.mxu0 %v1551_v0  ;;  %1295 = vmatpush.bf16.msrb.mxu3 %v2152_v6  ;;  %v1679_v0 = vor.u32 %v2072_v57, %v1678_v56  ;;  %v2148_v6 = vld [vmem:[%s2920_s1 + $0x1c0] sm:$0xff]  ;;  %v2038_v56 = vld [vmem:[%s2921_s0 + $0x54] sm:$0xf] }
  0x32   :  { %1011 = vmatmul.bf16.gmra.mxu1 %v1555_v1  ;;  %1149 = vmatpush.bf16.msrb.mxu0 %v2127_v21  ;;  %v1683_v1 = vor.u32 %v2068_v58, %v1680_v59  ;;  %v2088_v21 = vld [vmem:[%s2921_s0 + $0x1dc] sm:$0xf0]  ;;  %v1568_v57 = vld [vmem:[%s2921_s0 + $0x70] sm:$0xf0]  ;;  %v1574_v58 = vld [vmem:[%s2921_s0 + $0x58] sm:$0xf] }
  0x33   :  { %1060 = vmatmul.bf16.gmra.mxu2 %v1559_v2  ;;  %1198 = vmatpush.bf16.msrb.mxu1 %v2135_v23  ;;  %v1687_v2 = vor.u32 %v2073_v61, %v1686_v60  ;;  %v1744_v23 = vld [vmem:[%s2921_s0 + $0x1e0] sm:$0xf0]  ;;  %v2043_v59 = vld [vmem:[%s2921_s0 + $0x74] sm:$0xf0]  ;;  %v2039_v60 = vld [vmem:[%s2921_s0 + $0x5c] sm:$0xf] }
  0x34   :  { %1109 = vmatmul.bf16.gmra.mxu3 %v1563_v3  ;;  %1247 = vmatpush.bf16.msrb.mxu2 %v2143_v20  ;;  %v1691_v3 = vor.u32 %v2069_v62, %v1688_v63  ;;  %v1742_v20 = vld [vmem:[%s2921_s0 + $0x1c0] sm:$0xf]  ;;  %v1576_v61 = vld [vmem:[%s2921_s0 + $0x78] sm:$0xf0] }
  0x35   :  { %1296 = vmatpush.bf16.msrb.mxu3 %v2151_v22  ;;  %v2084_v22 = vld [vmem:[%s2921_s0 + $0x1c4] sm:$0xf]  ;;  %v1743_v28 = vor.u32 %v2088_v21, %v1742_v20  ;;  %v1606_v20 = vld [vmem:[%s2921_s0 + $0x98] sm:$0xf] }
  0x36   :  { %1150 = vmatpush.bf16.msrb.mxu0 %v2126_v37  ;;  %v1747_v29 = vor.u32 %v2084_v22, %v1744_v23  ;;  %v2035_v37 = vld [vmem:[%s2921_s0 + $0x34] sm:$0xf0]  ;;  %v2047_v22 = vld [vmem:[%s2921_s0 + $0x9c] sm:$0xf] }
  0x37   :  { %1199 = vmatpush.bf16.msrb.mxu1 %v2134_v39  ;;  %v1544_v39 = vld [vmem:[%s2921_s0 + $0x38] sm:$0xf0]  ;;  %v2051_v21 = vld [vmem:[%s2921_s0 + $0xb4] sm:$0xf0] }
  0x38   :  { %1248 = vmatpush.bf16.msrb.mxu2 %v2142_v36  ;;  %v1542_v36 = vld [vmem:[%s2921_s0 + $0x18] sm:$0xf]  ;;  %v1608_v23 = vld [vmem:[%s2921_s0 + $0xb8] sm:$0xf0] }
  0x39   :  { %1297 = vmatpush.bf16.msrb.mxu3 %v2150_v38  ;;  %v2031_v38 = vld [vmem:[%s2921_s0 + $0x1c] sm:$0xf]  ;;  %v1543_v44 = vor.u32 %v2035_v37, %v1542_v36 }
  0x3a   :  { %1151 = vmatpush.bf16.msrb.mxu0 %v2125_v53  ;;  %v1547_v45 = vor.u32 %v2031_v38, %v1544_v39 }
  0x3b   :  { %1200 = vmatpush.bf16.msrb.mxu1 %v2133_v55  ;;  %v2042_v55 = vld [vmem:[%s2921_s0 + $0x6c] sm:$0xf0] }
  0x3c   :  { %1249 = vmatpush.bf16.msrb.mxu2 %v2141_v52 }
  0x3d   :  { %1298 = vmatpush.bf16.msrb.mxu3 %v2149_v54  ;;  %v1566_v54 = vld [vmem:[%s2921_s0 + $0x50] sm:$0xf] }
  0x3e   :  { %1152 = vmatpush.bf16.msrb.mxu0 %v2124_v5  ;;  %v1575_v5 = vor.u32 %v2043_v59, %v1574_v58 }
  0x3f   :  { %1201 = vmatpush.bf16.msrb.mxu1 %v2132_v7 }
  0x40   :  { %1250 = vmatpush.bf16.msrb.mxu2 %v2140_v4 }
  0x41   :  { %967 = vmatmul.bf16.gmra.mxu0 %v1583_v16  ;;  %1299 = vmatpush.bf16.msrb.mxu3 %v2148_v6  ;;  %v1711_v16 = vor.u32 %v2080_v9, %v1710_v8  ;;  %v1579_v6 = vor.u32 %v2039_v60, %v1576_v61 }
  0x42   :  { %1016 = vmatmul.bf16.gmra.mxu1 %v1587_v17  ;;  %v1715_v17 = vor.u32 %v2076_v10, %v1712_v11 }
  0x43   :  { %1065 = vmatmul.bf16.gmra.mxu2 %v1591_v18  ;;  %v1719_v18 = vor.u32 %v2081_v13, %v1718_v12 }
  0x44   :  { %1114 = vmatmul.bf16.gmra.mxu3 %v1595_v19  ;;  %v1723_v19 = vor.u32 %v2077_v14, %v1720_v15 }
  0x51   :  { %972 = vmatmul.bf16.gmra.mxu0 %v1615_v32  ;;  %v1534_v32 = vld [vmem:[%s2921_s0 + $0x10] sm:$0xf] }
  0x52   :  { %1021 = vmatmul.bf16.gmra.mxu1 %v1619_v33  ;;  %v2034_v33 = vld [vmem:[%s2921_s0 + $0x2c] sm:$0xf0] }
  0x53   :  { %1070 = vmatmul.bf16.gmra.mxu2 %v1623_v34  ;;  %v2030_v34 = vld [vmem:[%s2921_s0 + $0x14] sm:$0xf]  ;;  %v1535_v40 = vor.u32 %v2034_v33, %v1534_v32  ;;  %v1611_v32 = vor.u32 %v2047_v22, %v1608_v23 }
  0x54   :  { %1119 = vmatmul.bf16.gmra.mxu3 %v1627_v35  ;;  %v1536_v35 = vld [vmem:[%s2921_s0 + $0x30] sm:$0xf0] }
  0x55   :  { %v1539_v41 = vor.u32 %v2030_v34, %v1536_v35 }
  0x61   :  { %977 = vmatmul.bf16.gmra.mxu0 %v1647_v48 }
  0x62   :  { %1026 = vmatmul.bf16.gmra.mxu1 %v1651_v49 }
  0x63   :  { %1075 = vmatmul.bf16.gmra.mxu2 %v1655_v50 }
  0x64   :  { %1124 = vmatmul.bf16.gmra.mxu3 %v1659_v51 }
  0x71   :  { %982 = vmatmul.bf16.gmra.mxu0 %v1679_v0  ;;  %v1567_v0 = vor.u32 %v2042_v55, %v1566_v54 }
  0x72   :  { %1031 = vmatmul.bf16.gmra.mxu1 %v1683_v1  ;;  %v1571_v1 = vor.u32 %v2038_v56, %v1568_v57 }
  0x73   :  { %1080 = vmatmul.bf16.gmra.mxu2 %v1687_v2 }
  0x74   :  { %1129 = vmatmul.bf16.gmra.mxu3 %v1691_v3 }
  0x81   :  { %987 = vmatmul.bf16.gmra.mxu0 %v1711_v16  ;;  %v1598_v16 = vld [vmem:[%s2921_s0 + $0x90] sm:$0xf] }
  0x82   :  { %1036 = vmatmul.bf16.gmra.mxu1 %v1715_v17  ;;  %v2050_v17 = vld [vmem:[%s2921_s0 + $0xac] sm:$0xf0] }
  0x83   :  { %1085 = vmatmul.bf16.gmra.mxu2 %v1719_v18  ;;  %v2046_v18 = vld [vmem:[%s2921_s0 + $0x94] sm:$0xf]  ;;  %v1599_v26 = vor.u32 %v2050_v17, %v1598_v16 }
  0x84   :  { %1134 = vmatmul.bf16.gmra.mxu3 %v1723_v19  ;;  %v1600_v19 = vld [vmem:[%s2921_s0 + $0xb0] sm:$0xf0] }
  0x85   :  { %v1603_v27 = vor.u32 %v2046_v18, %v1600_v19 }
  0x91   :  { %992 = vmatmul.bf16.gmra.mxu0 %v1743_v28 }
  0x92   :  { %1041 = vmatmul.bf16.gmra.mxu1 %v1747_v29 }
  0x93   :  { %1090 = vmatmul.bf16.gmra.mxu2 %v1751_v30 }
  0x94   :  { %1139 = vmatmul.bf16.gmra.mxu3 %v1755_v31  ;;  %v1607_v31 = vor.u32 %v2051_v21, %v1606_v20 }
  0x9e   :  { %v958_v42 = vpop.f32.mrf.mxu0 }
  0x9f   :  { %v1007_v43 = vpop.f32.mrf.mxu1 }
  0xa0   :  { %v1008_v46 = vadd.f32 %v1007_v43, %v958_v42  ;;  %v1630_v42 = vld [vmem:[%s2921_s0 + $0xd0] sm:$0xf] }
  0xa1   :  { %1153 = vmatmul.bf16.vlgmr.msrb.gmra.mxu0 %v1535_v40  ;;  %v2058_v43 = vld [vmem:[%s2921_s0 + $0xec] sm:$0xf0] }
  0xa2   :  { %1202 = vmatmul.bf16.vlgmr.msrb.gmra.mxu1 %v1539_v41 }
  0xa3   :  { %1251 = vmatmul.bf16.vlgmr.msrb.gmra.mxu2 %v1543_v44  ;;  %v2054_v44 = vld [vmem:[%s2921_s0 + $0xd4] sm:$0xf] }
  0xa4   :  { %1300 = vmatmul.bf16.vlgmr.msrb.gmra.mxu3 %v1547_v45  ;;  %v1632_v45 = vld [vmem:[%s2921_s0 + $0xf0] sm:$0xf0] }
  0xa5   :  { %v1635_v54 = vor.u32 %v2054_v44, %v1632_v45 }
  0xa6   :  { %v1056_v47 = vpop.f32.mrf.mxu2  ;;  %v960_v50 = vpop.f32.mrf.mxu0 }
  0xa7   :  { %v1105_v48 = vpop.f32.mrf.mxu3  ;;  %v1057_v49 = vadd.f32 %v1056_v47, %v1008_v46  ;;  %v1009_v51 = vpop.f32.mrf.mxu1  ;;  %v1638_v46 = vld [vmem:[%s2921_s0 + $0xd8] sm:$0xf] }
  0xa8   :  { %v1010_v52 = vadd.f32 %v1009_v51, %v960_v50  ;;  %v2059_v47 = vld [vmem:[%s2921_s0 + $0xf4] sm:$0xf0] }
  0xa9   :  { %v2638_v53 = vadd.f32 %v1105_v48, %v1057_v49  ;;  %v2055_v48 = vld [vmem:[%s2921_s0 + $0xdc] sm:$0xf]  ;;  %v1639_v58 = vor.u32 %v2059_v47, %v1638_v46 }
  0xaa   :  { %v1640_v49 = vld [vmem:[%s2921_s0 + $0xf8] sm:$0xf0] }
  0xab   :  { %v1643_v59 = vor.u32 %v2055_v48, %v1640_v49 }
  0xae   :  { %v1058_v62 = vpop.f32.mrf.mxu2  ;;  %v963_v3 = vpop.f32.mrf.mxu0 }
  0xaf   :  { %v1107_v63 = vpop.f32.mrf.mxu3  ;;  %v1059_v2 = vadd.f32 %v1058_v62, %v1010_v52  ;;  %v1012_v4 = vpop.f32.mrf.mxu1  ;;  %v1631_v52 = vor.u32 %v2058_v43, %v1630_v42  ;;  %v1704_v42 = vld [vmem:[%s2921_s0 + $0x178] sm:$0xf0] }
  0xb0   :  { %v1013_v7 = vadd.f32 %v1012_v4, %v963_v3 }
  0xb1   :  { %v2664_v8 = vadd.f32 %v1107_v63, %v1059_v2  ;;  %1158 = vmatmul.bf16.gmra.mxu0 %v1567_v0 }
  0xb2   :  { %1207 = vmatmul.bf16.gmra.mxu1 %v1571_v1 }
  0xb3   :  { %1256 = vmatmul.bf16.gmra.mxu2 %v1575_v5  ;;  %v1662_v5 = vld [vmem:[%s2921_s0 + $0x110] sm:$0xf] }
  0xb4   :  { %1305 = vmatmul.bf16.gmra.mxu3 %v1579_v6  ;;  %v2066_v6 = vld [vmem:[%s2921_s0 + $0x12c] sm:$0xf0] }
  0xb5   :  { %v1663_v17 = vor.u32 %v2066_v6, %v1662_v5  ;;  %v2083_v5 = vld [vmem:[%s2921_s0 + $0x1b4] sm:$0xf0]  ;;  %v2079_v6 = vld [vmem:[%s2921_s0 + $0x19c] sm:$0xf] }
  0xb6   :  { %v1061_v9 = vpop.f32.mrf.mxu2  ;;  %v965_v12 = vpop.f32.mrf.mxu0 }
  0xb7   :  { %v1110_v10 = vpop.f32.mrf.mxu3  ;;  %v1062_v11 = vadd.f32 %v1061_v9, %v1013_v7  ;;  %v1014_v13 = vpop.f32.mrf.mxu1  ;;  %v2062_v7 = vld [vmem:[%s2921_s0 + $0x114] sm:$0xf] }
  0xb8   :  { %v1015_v14 = vadd.f32 %v1014_v13, %v965_v12  ;;  %v1664_v9 = vld [vmem:[%s2921_s0 + $0x130] sm:$0xf0]  ;;  %v2063_v12 = vld [vmem:[%s2921_s0 + $0x11c] sm:$0xf] }
  0xb9   :  { %v2666_v15 = vadd.f32 %v1110_v10, %v1062_v11  ;;  %v1670_v10 = vld [vmem:[%s2921_s0 + $0x118] sm:$0xf]  ;;  %v1672_v13 = vld [vmem:[%s2921_s0 + $0x138] sm:$0xf0]  ;;  %v1667_v18 = vor.u32 %v2062_v7, %v1664_v9 }
  0xba   :  { %v2067_v11 = vld [vmem:[%s2921_s0 + $0x134] sm:$0xf0]  ;;  %v1675_v23 = vor.u32 %v2063_v12, %v1672_v13  ;;  %v1736_v7 = vld [vmem:[%s2921_s0 + $0x1b8] sm:$0xf0] }
  0xbb   :  { %v1671_v22 = vor.u32 %v2067_v11, %v1670_v10 }
  0xbe   :  { %v1063_v24 = vpop.f32.mrf.mxu2  ;;  %v968_v29 = vpop.f32.mrf.mxu0 }
  0xbf   :  { %v1112_v25 = vpop.f32.mrf.mxu3  ;;  %v1064_v28 = vadd.f32 %v1063_v24, %v1015_v14  ;;  %v1017_v30 = vpop.f32.mrf.mxu1 }
  0xc0   :  { %v1018_v33 = vadd.f32 %v1017_v30, %v968_v29 }
  0xc1   :  { %v2692_v34 = vadd.f32 %v1112_v25, %v1064_v28  ;;  %1163 = vmatmul.bf16.gmra.mxu0 %v1599_v26 }
  0xc2   :  { %1212 = vmatmul.bf16.gmra.mxu1 %v1603_v27 }
  0xc3   :  { %1261 = vmatmul.bf16.gmra.mxu2 %v1607_v31 }
  0xc4   :  { %1310 = vmatmul.bf16.gmra.mxu3 %v1611_v32 }
  0xc6   :  { %v1066_v35 = vpop.f32.mrf.mxu2  ;;  %v970_v38 = vpop.f32.mrf.mxu0 }
  0xc7   :  { %v1115_v36 = vpop.f32.mrf.mxu3  ;;  %v1067_v37 = vadd.f32 %v1066_v35, %v1018_v33  ;;  %v1019_v39 = vpop.f32.mrf.mxu1  ;;  %v1694_v33 = vld [vmem:[%s2921_s0 + $0x150] sm:$0xf] }
  0xc8   :  { %v1020_v40 = vadd.f32 %v1019_v39, %v970_v38  ;;  %v2074_v35 = vld [vmem:[%s2921_s0 + $0x16c] sm:$0xf0]  ;;  %v1702_v38 = vld [vmem:[%s2921_s0 + $0x158] sm:$0xf] }
  0xc9   :  { %v2694_v41 = vadd.f32 %v1115_v36, %v1067_v37  ;;  %v2070_v36 = vld [vmem:[%s2921_s0 + $0x154] sm:$0xf]  ;;  %v2075_v39 = vld [vmem:[%s2921_s0 + $0x174] sm:$0xf0]  ;;  %v1695_v45 = vor.u32 %v2074_v35, %v1694_v33 }
  0xca   :  { %v1696_v37 = vld [vmem:[%s2921_s0 + $0x170] sm:$0xf0]  ;;  %v1766_v35 = vld [vmem:[%s2921_s0 + $0x1d8] sm:$0xf] }
  0xcb   :  { %v1699_v46 = vor.u32 %v2070_v36, %v1696_v37  ;;  %v1760_v33 = vld [vmem:[%s2921_s0 + $0x1f0] sm:$0xf0]  ;;  %v2091_v36 = vld [vmem:[%s2921_s0 + $0x1f4] sm:$0xf0]  ;;  %v2087_v37 = vld [vmem:[%s2921_s0 + $0x1dc] sm:$0xf] }
  0xce   :  { %v1068_v50 = vpop.f32.mrf.mxu2  ;;  %v973_v56 = vpop.f32.mrf.mxu0 }
  0xcf   :  { %v1117_v51 = vpop.f32.mrf.mxu3  ;;  %v1069_v55 = vadd.f32 %v1068_v50, %v1020_v40  ;;  %v1022_v57 = vpop.f32.mrf.mxu1  ;;  %v2071_v40 = vld [vmem:[%s2921_s0 + $0x15c] sm:$0xf]  ;;  %v1703_v50 = vor.u32 %v2075_v39, %v1702_v38 }
  0xd0   :  { %v1023_v60 = vadd.f32 %v1022_v57, %v973_v56  ;;  %v1768_v38 = vld [vmem:[%s2921_s0 + $0x1f8] sm:$0xf0] }
  0xd1   :  { %v2720_v61 = vadd.f32 %v1117_v51, %v1069_v55  ;;  %1168 = vmatmul.bf16.gmra.mxu0 %v1631_v52  ;;  %v1707_v51 = vor.u32 %v2071_v40, %v1704_v42 }
  0xd2   :  { %1217 = vmatmul.bf16.gmra.mxu1 %v1635_v54 }
  0xd3   :  { %1266 = vmatmul.bf16.gmra.mxu2 %v1639_v58 }
  0xd4   :  { %1315 = vmatmul.bf16.gmra.mxu3 %v1643_v59 }
  0xd6   :  { %v1071_v62 = vpop.f32.mrf.mxu2  ;;  %v975_v1 = vpop.f32.mrf.mxu0 }
  0xd7   :  { %v1120_v63 = vpop.f32.mrf.mxu3  ;;  %v1072_v0 = vadd.f32 %v1071_v62, %v1023_v60  ;;  %v1024_v2 = vpop.f32.mrf.mxu1 }
  0xd8   :  { %v1025_v3 = vadd.f32 %v1024_v2, %v975_v1  ;;  %v2078_v1 = vld [vmem:[%s2921_s0 + $0x194] sm:$0xf] }
  0xd9   :  { %v2722_v4 = vadd.f32 %v1120_v63, %v1072_v0  ;;  %v1726_v63 = vld [vmem:[%s2921_s0 + $0x190] sm:$0xf]  ;;  %v1728_v2 = vld [vmem:[%s2921_s0 + $0x1b0] sm:$0xf0] }
  0xda   :  { %v2082_v0 = vld [vmem:[%s2921_s0 + $0x1ac] sm:$0xf0]  ;;  %v1731_v12 = vor.u32 %v2078_v1, %v1728_v2 }
  0xdb   :  { %v1727_v11 = vor.u32 %v2082_v0, %v1726_v63 }
  0xde   :  { %v1073_v14 = vpop.f32.mrf.mxu2  ;;  %v978_v20 = vpop.f32.mrf.mxu0 }
  0xdf   :  { %v1122_v16 = vpop.f32.mrf.mxu3  ;;  %v1074_v19 = vadd.f32 %v1073_v14, %v1025_v3  ;;  %v1027_v21 = vpop.f32.mrf.mxu1  ;;  %v1734_v3 = vld [vmem:[%s2921_s0 + $0x198] sm:$0xf] }
  0xe0   :  { %v1028_v24 = vadd.f32 %v1027_v21, %v978_v20 }
  0xe1   :  { %v2748_v25 = vadd.f32 %v1122_v16, %v1074_v19  ;;  %1173 = vmatmul.bf16.gmra.mxu0 %v1663_v17  ;;  %v1735_v17 = vor.u32 %v2083_v5, %v1734_v3 }
  0xe2   :  { %1222 = vmatmul.bf16.gmra.mxu1 %v1667_v18  ;;  %v1739_v18 = vor.u32 %v2079_v6, %v1736_v7 }
  0xe3   :  { %1271 = vmatmul.bf16.gmra.mxu2 %v1671_v22 }
  0xe4   :  { %1320 = vmatmul.bf16.gmra.mxu3 %v1675_v23 }
  0xe6   :  { %v1076_v26 = vpop.f32.mrf.mxu2  ;;  %v980_v29 = vpop.f32.mrf.mxu0 }
  0xe7   :  { %v1125_v27 = vpop.f32.mrf.mxu3  ;;  %v1077_v28 = vadd.f32 %v1076_v26, %v1028_v24  ;;  %v1029_v30 = vpop.f32.mrf.mxu1 }
  0xe8   :  { %v1030_v31 = vadd.f32 %v1029_v30, %v980_v29  ;;  %v1758_v29 = vld [vmem:[%s2921_s0 + $0x1d0] sm:$0xf] }
  0xe9   :  { %v2750_v32 = vadd.f32 %v1125_v27, %v1077_v28  ;;  %v2090_v30 = vld [vmem:[%s2921_s0 + $0x1ec] sm:$0xf0] }
  0xea   :  { %v1759_v42 = vor.u32 %v2090_v30, %v1758_v29 }
  0xee   :  { %v1078_v43 = vpop.f32.mrf.mxu2  ;;  %v983_v48 = vpop.f32.mrf.mxu0 }
  0xef   :  { %v1127_v44 = vpop.f32.mrf.mxu3  ;;  %v1079_v47 = vadd.f32 %v1078_v43, %v1030_v31  ;;  %v1032_v49 = vpop.f32.mrf.mxu1  ;;  %v2086_v31 = vld [vmem:[%s2921_s0 + $0x1d4] sm:$0xf] }
  0xf0   :  { %v1033_v52 = vadd.f32 %v1032_v49, %v983_v48  ;;  %v1763_v43 = vor.u32 %v2086_v31, %v1760_v33  ;;  %v1771_v48 = vor.u32 %v2087_v37, %v1768_v38 }
  0xf1   :  { %v2776_v54 = vadd.f32 %v1127_v44, %v1079_v47  ;;  %1178 = vmatmul.bf16.gmra.mxu0 %v1695_v45  ;;  %v1767_v47 = vor.u32 %v2091_v36, %v1766_v35 }
  0xf2   :  { %1227 = vmatmul.bf16.gmra.mxu1 %v1699_v46 }
  0xf3   :  { %1276 = vmatmul.bf16.gmra.mxu2 %v1703_v50 }
  0xf4   :  { %1325 = vmatmul.bf16.gmra.mxu3 %v1707_v51 }
  0xf6   :  { %v1081_v55 = vpop.f32.mrf.mxu2  ;;  %v985_v58 = vpop.f32.mrf.mxu0 }
  0xf7   :  { %v1130_v56 = vpop.f32.mrf.mxu3  ;;  %v1082_v57 = vadd.f32 %v1081_v55, %v1033_v52  ;;  %v1034_v59 = vpop.f32.mrf.mxu1 }
  0xf8   :  { %v1035_v60 = vadd.f32 %v1034_v59, %v985_v58 }
  0xf9   :  { %v2778_v62 = vadd.f32 %v1130_v56, %v1082_v57 }
  0xfe   :  { %v1083_v9 = vpop.f32.mrf.mxu2  ;;  %v988_v14 = vpop.f32.mrf.mxu0 }
  0xff   :  { %v1132_v10 = vpop.f32.mrf.mxu3  ;;  %v1084_v13 = vadd.f32 %v1083_v9, %v1035_v60  ;;  %v1037_v16 = vpop.f32.mrf.mxu1 }
 0x100   :  { %v1038_v19 = vadd.f32 %v1037_v16, %v988_v14  ;;  %v2842_v14 = vld [vmem:[%s2922_s2] ss:$0 sm:$0xff] }
 0x101   :  { %v2804_v20 = vadd.f32 %v1132_v10, %v1084_v13  ;;  %1183 = vmatmul.bf16.gmra.mxu0 %v1727_v11 }
 0x102   :  { %1232 = vmatmul.bf16.gmra.mxu1 %v1731_v12 }
 0x103   :  { %1281 = vmatmul.bf16.gmra.mxu2 %v1735_v17 }
 0x104   :  { %1330 = vmatmul.bf16.gmra.mxu3 %v1739_v18 }
 0x106   :  { %v1086_v21 = vpop.f32.mrf.mxu2  ;;  %v990_v24 = vpop.f32.mrf.mxu0 }
 0x107   :  { %v1135_v22 = vpop.f32.mrf.mxu3  ;;  %v1087_v23 = vadd.f32 %v1086_v21, %v1038_v19  ;;  %v1039_v26 = vpop.f32.mrf.mxu1 }
 0x108   :  { %v1040_v27 = vadd.f32 %v1039_v26, %v990_v24 }
 0x109   :  { %v2806_v28 = vadd.f32 %v1135_v22, %v1087_v23 }
 0x10e   :  { %v1088_v39 = vpop.f32.mrf.mxu2  ;;  %v993_v45 = vpop.f32.mrf.mxu0 }
 0x10f   :  { %v1137_v40 = vpop.f32.mrf.mxu3  ;;  %v1089_v44 = vadd.f32 %v1088_v39, %v1040_v27  ;;  %v1042_v46 = vpop.f32.mrf.mxu1 }
 0x110   :  { %v1043_v49 = vadd.f32 %v1042_v46, %v993_v45 }
 0x111   :  { %v2832_v50 = vadd.f32 %v1137_v40, %v1089_v44  ;;  %1188 = vmatmul.bf16.gmra.mxu0 %v1759_v42 }
 0x112   :  { %1237 = vmatmul.bf16.gmra.mxu1 %v1763_v43 }
 0x113   :  { %1286 = vmatmul.bf16.gmra.mxu2 %v1767_v47 }
 0x114   :  { %1335 = vmatmul.bf16.gmra.mxu3 %v1771_v48 }
 0x116   :  { %v1091_v51 = vpop.f32.mrf.mxu2  ;;  %v995_v56 = vpop.f32.mrf.mxu0 }
 0x117   :  { %v1140_v52 = vpop.f32.mrf.mxu3  ;;  %v1092_v55 = vadd.f32 %v1091_v51, %v1043_v49  ;;  %v1044_v57 = vpop.f32.mrf.mxu1 }
 0x118   :  { %v1045_v58 = vadd.f32 %v1044_v57, %v995_v56 }
 0x119   :  { %v2834_v59 = vadd.f32 %v1140_v52, %v1092_v55 }
 0x11e   :  { %v1093_v60 = vpop.f32.mrf.mxu2  ;;  %v1154_v1 = vpop.f32.mrf.mxu0 }
 0x11f   :  { %v1142_v63 = vpop.f32.mrf.mxu3  ;;  %v1094_v0 = vadd.f32 %v1093_v60, %v1045_v58  ;;  %v1203_v2 = vpop.f32.mrf.mxu1  ;;  %v1155_v5 = vadd.f32 %v1154_v1, %v2638_v53  ;;  %v2849_v53 = vld [vmem:[%s2923_s3] ss:$0 sm:$0xff] }
 0x121   :  { %v2836_v3 = vadd.f32 %v1142_v63, %v1094_v0  ;;  %v1204_v6 = vadd.f32 %v1203_v2, %v1155_v5 }
 0x126   :  { %v1252_v7 = vpop.f32.mrf.mxu2  ;;  %v1156_v11 = vpop.f32.mrf.mxu0 }
 0x127   :  { %v1301_v9 = vpop.f32.mrf.mxu3  ;;  %v1253_v10 = vadd.f32 %v1252_v7, %v1204_v6  ;;  %v1205_v12 = vpop.f32.mrf.mxu1  ;;  %v1157_v16 = vadd.f32 %v1156_v11, %v2664_v8 }
 0x129   :  { %v1302_v13 = vadd.f32 %v1301_v9, %v1253_v10  ;;  %v1206_v18 = vadd.f32 %v1205_v12, %v1157_v16 }
 0x12b   :  { %v1396_v17 = vmul.f32 %v2842_v14, %v1302_v13 }
 0x12d   :  { %v1416_v26 = vadd.f32 %v2849_v53, %v1396_v17 }
 0x12e   :  { %v1254_v19 = vpop.f32.mrf.mxu2  ;;  %v1159_v23 = vpop.f32.mrf.mxu0 }
 0x12f   :  { %v1303_v21 = vpop.f32.mrf.mxu3  ;;  %v1255_v22 = vadd.f32 %v1254_v19, %v1206_v18  ;;  %v1208_v24 = vpop.f32.mrf.mxu1  ;;  %v1160_v29 = vadd.f32 %v1159_v23, %v2666_v15  ;;  %v1448_v30 = vmul.f32 0.2, %v1416_v26  ;;  %vm1432_vm0 = vcmp.ge.f32.partialorder %v1416_v26, 0.0 }
 0x131   :  { %v1304_v27 = vadd.f32 %v1303_v21, %v1255_v22  ;;  %v1209_v33 = vadd.f32 %v1208_v24, %v1160_v29  ;;  %v1464_v42 = vsel %vm1432_vm0, %v1416_v26, %v1448_v30 }
 0x133   :  { %v1397_v8 = vmul.f32 %v2842_v14, %v1304_v27 }
 0x135   :  { %v1417_v31 = vadd.f32 %v2849_v53, %v1397_v8 }
 0x136   :  { %v1257_v35 = vpop.f32.mrf.mxu2  ;;  %v1161_v39 = vpop.f32.mrf.mxu0 }
 0x137   :  { %v1306_v36 = vpop.f32.mrf.mxu3  ;;  %vm1433_vm1 = vcmp.ge.f32.partialorder %v1417_v31, 0.0  ;;  %v1449_v37 = vmul.f32 0.2, %v1417_v31  ;;  %v1258_v38 = vadd.f32 %v1257_v35, %v1209_v33  ;;  %v1210_v40 = vpop.f32.mrf.mxu1  ;;  %v1162_v45 = vadd.f32 %v1161_v39, %v2692_v34 }
 0x139   :  { %v1465_v43 = vsel %vm1433_vm1, %v1417_v31, %v1449_v37  ;;  %v1307_v44 = vadd.f32 %v1306_v36, %v1258_v38  ;;  %v1211_v47 = vadd.f32 %v1210_v40, %v1162_v45 }
 0x13a   :  { %v2159_v15 = vpack.c.bf16 %v1465_v43, %v1464_v42 }
 0x13b   :  { %v1398_v46 = vmul.f32 %v2842_v14, %v1307_v44 }
 0x13c   :  { %2160 = vst [vmem:[%s2924_s4] sm:$0xff] %v2159_v15  }
 0x13d   :  { %v1418_v56 = vadd.f32 %v2849_v53, %v1398_v46 }
 0x13e   :  { %v1259_v48 = vpop.f32.mrf.mxu2  ;;  %v1164_v52 = vpop.f32.mrf.mxu0 }
 0x13f   :  { %v1308_v49 = vpop.f32.mrf.mxu3  ;;  %v1260_v51 = vadd.f32 %v1259_v48, %v1211_v47  ;;  %v1213_v55 = vpop.f32.mrf.mxu1  ;;  %v1165_v58 = vadd.f32 %v1164_v52, %v2694_v41  ;;  %v1450_v60 = vmul.f32 0.2, %v1418_v56  ;;  %vm1434_vm2 = vcmp.ge.f32.partialorder %v1418_v56, 0.0 }
 0x141   :  { %v1309_v57 = vadd.f32 %v1308_v49, %v1260_v51  ;;  %v1214_v0 = vadd.f32 %v1213_v55, %v1165_v58  ;;  %v1466_v10 = vsel %vm1434_vm2, %v1418_v56, %v1450_v60 }
 0x143   :  { %v1399_v34 = vmul.f32 %v2842_v14, %v1309_v57 }
 0x145   :  { %v1419_v63 = vadd.f32 %v2849_v53, %v1399_v34 }
 0x146   :  { %v1262_v1 = vpop.f32.mrf.mxu2  ;;  %v1166_v7 = vpop.f32.mrf.mxu0 }
 0x147   :  { %v1311_v2 = vpop.f32.mrf.mxu3  ;;  %vm1435_vm3 = vcmp.ge.f32.partialorder %v1419_v63, 0.0  ;;  %v1451_v5 = vmul.f32 0.2, %v1419_v63  ;;  %v1263_v6 = vadd.f32 %v1262_v1, %v1214_v0  ;;  %v1215_v9 = vpop.f32.mrf.mxu1  ;;  %v1167_v13 = vadd.f32 %v1166_v7, %v2720_v61 }
 0x149   :  { %v1467_v11 = vsel %vm1435_vm3, %v1419_v63, %v1451_v5  ;;  %v1312_v12 = vadd.f32 %v1311_v2, %v1263_v6  ;;  %v1216_v17 = vadd.f32 %v1215_v9, %v1167_v13 }
 0x14a   :  { %v2164_v41 = vpack.c.bf16 %v1467_v11, %v1466_v10 }
 0x14b   :  { %v1400_v16 = vmul.f32 %v2842_v14, %v1312_v12 }
 0x14c   :  { %2196 = vst [vmem:[%s2924_s4 + $0x8] sm:$0xff] %v2164_v41  }
 0x14d   :  { %v1420_v24 = vadd.f32 %v2849_v53, %v1400_v16 }
 0x14e   :  { %v1264_v18 = vpop.f32.mrf.mxu2  ;;  %v1169_v22 = vpop.f32.mrf.mxu0 }
 0x14f   :  { %v1313_v19 = vpop.f32.mrf.mxu3  ;;  %v1265_v21 = vadd.f32 %v1264_v18, %v1216_v17  ;;  %v1218_v23 = vpop.f32.mrf.mxu1  ;;  %v1170_v27 = vadd.f32 %v1169_v22, %v2722_v4  ;;  %v1452_v29 = vmul.f32 0.2, %v1420_v24  ;;  %vm1436_vm4 = vcmp.ge.f32.partialorder %v1420_v24, 0.0 }
 0x151   :  { %v1314_v26 = vadd.f32 %v1313_v19, %v1265_v21  ;;  %v1219_v30 = vadd.f32 %v1218_v23, %v1170_v27  ;;  %v1468_v39 = vsel %vm1436_vm4, %v1420_v24, %v1452_v29 }
 0x153   :  { %v1401_v61 = vmul.f32 %v2842_v14, %v1314_v26 }
 0x155   :  { %v1421_v8 = vadd.f32 %v2849_v53, %v1401_v61 }
 0x156   :  { %v1267_v31 = vpop.f32.mrf.mxu2  ;;  %v1171_v37 = vpop.f32.mrf.mxu0 }
 0x157   :  { %v1316_v33 = vpop.f32.mrf.mxu3  ;;  %vm1437_vm5 = vcmp.ge.f32.partialorder %v1421_v8, 0.0  ;;  %v1453_v35 = vmul.f32 0.2, %v1421_v8  ;;  %v1268_v36 = vadd.f32 %v1267_v31, %v1219_v30  ;;  %v1220_v38 = vpop.f32.mrf.mxu1  ;;  %v1172_v43 = vadd.f32 %v1171_v37, %v2748_v25 }
 0x159   :  { %v1469_v40 = vsel %vm1437_vm5, %v1421_v8, %v1453_v35  ;;  %v1317_v42 = vadd.f32 %v1316_v33, %v1268_v36  ;;  %v1221_v45 = vadd.f32 %v1220_v38, %v1172_v43 }
 0x15a   :  { %v2169_v4 = vpack.c.bf16 %v1469_v40, %v1468_v39 }
 0x15b   :  { %v1402_v44 = vmul.f32 %v2842_v14, %v1317_v42 }
 0x15c   :  { %2197 = vst [vmem:[%s2924_s4 + $0x10] sm:$0xff] %v2169_v4  }
 0x15d   :  { %v1422_v51 = vadd.f32 %v2849_v53, %v1402_v44 }
 0x15e   :  { %v1269_v15 = vpop.f32.mrf.mxu2  ;;  %v1174_v48 = vpop.f32.mrf.mxu0 }
 0x15f   :  { %v1318_v46 = vpop.f32.mrf.mxu3  ;;  %v1270_v47 = vadd.f32 %v1269_v15, %v1221_v45  ;;  %v1223_v49 = vpop.f32.mrf.mxu1  ;;  %v1175_v55 = vadd.f32 %v1174_v48, %v2750_v32  ;;  %v1454_v56 = vmul.f32 0.2, %v1422_v51  ;;  %vm1438_vm6 = vcmp.ge.f32.partialorder %v1422_v51, 0.0 }
 0x161   :  { %v1319_v52 = vadd.f32 %v1318_v46, %v1270_v47  ;;  %v1224_v58 = vadd.f32 %v1223_v49, %v1175_v55  ;;  %v1470_v5 = vsel %vm1438_vm6, %v1422_v51, %v1454_v56 }
 0x163   :  { %v1403_v25 = vmul.f32 %v2842_v14, %v1319_v52 }
 0x165   :  { %v1423_v57 = vadd.f32 %v2849_v53, %v1403_v25 }
 0x166   :  { %v1272_v34 = vpop.f32.mrf.mxu2  ;;  %v1176_v1 = vpop.f32.mrf.mxu0 }
 0x167   :  { %v1321_v60 = vpop.f32.mrf.mxu3  ;;  %vm1439_vm7 = vcmp.ge.f32.partialorder %v1423_v57, 0.0  ;;  %v1455_v63 = vmul.f32 0.2, %v1423_v57  ;;  %v1273_v0 = vadd.f32 %v1272_v34, %v1224_v58  ;;  %v1225_v2 = vpop.f32.mrf.mxu1  ;;  %v1177_v9 = vadd.f32 %v1176_v1, %v2776_v54 }
 0x169   :  { %v1471_v6 = vsel %vm1439_vm7, %v1423_v57, %v1455_v63  ;;  %v1322_v7 = vadd.f32 %v1321_v60, %v1273_v0  ;;  %v1226_v11 = vadd.f32 %v1225_v2, %v1177_v9 }
 0x16a   :  { %v2174_v32 = vpack.c.bf16 %v1471_v6, %v1470_v5 }
 0x16b   :  { %v1404_v10 = vmul.f32 %v2842_v14, %v1322_v7 }
 0x16c   :  { %2198 = vst [vmem:[%s2924_s4 + $0x18] sm:$0xff] %v2174_v32  }
 0x16d   :  { %v1424_v18 = vadd.f32 %v2849_v53, %v1404_v10 }
 0x16e   :  { %v1274_v12 = vpop.f32.mrf.mxu2  ;;  %v1179_v16 = vpop.f32.mrf.mxu0 }
 0x16f   :  { %v1323_v13 = vpop.f32.mrf.mxu3  ;;  %v1275_v41 = vadd.f32 %v1274_v12, %v1226_v11  ;;  %v1228_v17 = vpop.f32.mrf.mxu1  ;;  %v1180_v21 = vadd.f32 %v1179_v16, %v2778_v62  ;;  %v1456_v22 = vmul.f32 0.2, %v1424_v18  ;;  %vm1440_vm8 = vcmp.ge.f32.partialorder %v1424_v18, 0.0 }
 0x171   :  { %v1324_v19 = vadd.f32 %v1323_v13, %v1275_v41  ;;  %v1229_v24 = vadd.f32 %v1228_v17, %v1180_v21  ;;  %v1472_v31 = vsel %vm1440_vm8, %v1424_v18, %v1456_v22 }
 0x173   :  { %v1405_v54 = vmul.f32 %v2842_v14, %v1324_v19 }
 0x175   :  { %v1425_v23 = vadd.f32 %v2849_v53, %v1405_v54 }
 0x176   :  { %v1277_v26 = vpop.f32.mrf.mxu2  ;;  %v1181_v8 = vpop.f32.mrf.mxu0 }
 0x177   :  { %v1326_v27 = vpop.f32.mrf.mxu3  ;;  %vm1441_vm9 = vcmp.ge.f32.partialorder %v1425_v23, 0.0  ;;  %v1457_v61 = vmul.f32 0.2, %v1425_v23  ;;  %v1278_v29 = vadd.f32 %v1277_v26, %v1229_v24  ;;  %v1230_v30 = vpop.f32.mrf.mxu1  ;;  %v1182_v36 = vadd.f32 %v1181_v8, %v2804_v20 }
 0x179   :  { %v1473_v33 = vsel %vm1441_vm9, %v1425_v23, %v1457_v61  ;;  %v1327_v35 = vadd.f32 %v1326_v27, %v1278_v29  ;;  %v1231_v38 = vadd.f32 %v1230_v30, %v1182_v36 }
 0x17a   :  { %v2179_v62 = vpack.c.bf16 %v1473_v33, %v1472_v31 }
 0x17b   :  { %v1406_v37 = vmul.f32 %v2842_v14, %v1327_v35 }
 0x17c   :  { %2199 = vst [vmem:[%s2924_s4 + $0x20] sm:$0xff] %v2179_v62  }
 0x17d   :  { %v1426_v44 = vadd.f32 %v2849_v53, %v1406_v37 }
 0x17e   :  { %v1279_v39 = vpop.f32.mrf.mxu2  ;;  %v1184_v43 = vpop.f32.mrf.mxu0 }
 0x17f   :  { %v1328_v40 = vpop.f32.mrf.mxu3  ;;  %v1280_v42 = vadd.f32 %v1279_v39, %v1231_v38  ;;  %v1233_v4 = vpop.f32.mrf.mxu1  ;;  %v1185_v15 = vadd.f32 %v1184_v43, %v2806_v28  ;;  %v1458_v46 = vmul.f32 0.2, %v1426_v44  ;;  %vm1442_vm10 = vcmp.ge.f32.partialorder %v1426_v44, 0.0 }
 0x181   :  { %v1329_v45 = vadd.f32 %v1328_v40, %v1280_v42  ;;  %v1234_v48 = vadd.f32 %v1233_v4, %v1185_v15  ;;  %v1474_v57 = vsel %vm1442_vm10, %v1426_v44, %v1458_v46 }
 0x183   :  { %v1407_v20 = vmul.f32 %v2842_v14, %v1329_v45 }
 0x185   :  { %v1427_v47 = vadd.f32 %v2849_v53, %v1407_v20 }
 0x186   :  { %v1282_v49 = vpop.f32.mrf.mxu2  ;;  %v1186_v25 = vpop.f32.mrf.mxu0 }
 0x187   :  { %v1331_v51 = vpop.f32.mrf.mxu3  ;;  %vm1443_vm11 = vcmp.ge.f32.partialorder %v1427_v47, 0.0  ;;  %v1459_v52 = vmul.f32 0.2, %v1427_v47  ;;  %v1283_v55 = vadd.f32 %v1282_v49, %v1234_v48  ;;  %v1235_v56 = vpop.f32.mrf.mxu1  ;;  %v1187_v60 = vadd.f32 %v1186_v25, %v2832_v50 }
 0x189   :  { %v1475_v58 = vsel %vm1443_vm11, %v1427_v47, %v1459_v52  ;;  %v1332_v34 = vadd.f32 %v1331_v51, %v1283_v55  ;;  %v1236_v0 = vadd.f32 %v1235_v56, %v1187_v60 }
 0x18a   :  { %v2184_v28 = vpack.c.bf16 %v1475_v58, %v1474_v57 }
 0x18b   :  { %v1408_v63 = vmul.f32 %v2842_v14, %v1332_v34 }
 0x18c   :  { %2200 = vst [vmem:[%s2924_s4 + $0x28] sm:$0xff] %v2184_v28  }
 0x18d   :  { %v1428_v7 = vadd.f32 %v2849_v53, %v1408_v63 }
 0x18e   :  { %v1284_v1 = vpop.f32.mrf.mxu2  ;;  %v1189_v6 = vpop.f32.mrf.mxu0 }
 0x18f   :  { %v1333_v2 = vpop.f32.mrf.mxu3  ;;  %v1285_v5 = vadd.f32 %v1284_v1, %v1236_v0  ;;  %v1190_v32 = vadd.f32 %v1189_v6, %v2834_v59  ;;  %v1238_v10 = vpop.f32.mrf.mxu1  ;;  %v1460_v11 = vmul.f32 0.2, %v1428_v7  ;;  %vm1444_vm12 = vcmp.ge.f32.partialorder %v1428_v7, 0.0 }
 0x191   :  { %v1334_v9 = vadd.f32 %v1333_v2, %v1285_v5  ;;  %v1239_v13 = vadd.f32 %v1238_v10, %v1190_v32  ;;  %v1476_v21 = vsel %vm1444_vm12, %v1428_v7, %v1460_v11 }
 0x193   :  { %v1409_v50 = vmul.f32 %v2842_v14, %v1334_v9 }
 0x195   :  { %v1429_v12 = vadd.f32 %v2849_v53, %v1409_v50 }
 0x196   :  { %v1287_v41 = vpop.f32.mrf.mxu2  ;;  %v1191_v19 = vpop.f32.mrf.mxu0 }
 0x197   :  { %v1336_v16 = vpop.f32.mrf.mxu3  ;;  %vm1445_vm13 = vcmp.ge.f32.partialorder %v1429_v12, 0.0  ;;  %v1461_v17 = vmul.f32 0.2, %v1429_v12  ;;  %v1288_v18 = vadd.f32 %v1287_v41, %v1239_v13  ;;  %v1192_v23 = vadd.f32 %v1191_v19, %v2836_v3  ;;  %v1240_v24 = vpop.f32.mrf.mxu1 }
 0x199   :  { %v1477_v54 = vsel %vm1445_vm13, %v1429_v12, %v1461_v17  ;;  %v1337_v22 = vadd.f32 %v1336_v16, %v1288_v18  ;;  %v1241_v27 = vadd.f32 %v1240_v24, %v1192_v23 }
 0x19a   :  { %v2189_v59 = vpack.c.bf16 %v1477_v54, %v1476_v21 }
 0x19b   :  { %v1410_v26 = vmul.f32 %v2842_v14, %v1337_v22 }
 0x19c   :  { %2201 = vst [vmem:[%s2924_s4 + $0x30] sm:$0xff] %v2189_v59  }
 0x19d   :  { %v1430_v30 = vadd.f32 %v2849_v53, %v1410_v26 }
 0x19e   :  { %v1289_v61 = vpop.f32.mrf.mxu2 }
 0x19f   :  { %v1290_v29 = vadd.f32 %v1289_v61, %v1241_v27  ;;  %v1338_v8 = vpop.f32.mrf.mxu3  ;;  %v1462_v35 = vmul.f32 0.2, %v1430_v30  ;;  %vm1446_vm14 = vcmp.ge.f32.partialorder %v1430_v30, 0.0 }
 0x1a1   :  { %v1339_v31 = vadd.f32 %v1338_v8, %v1290_v29  ;;  %v1478_v62 = vsel %vm1446_vm14, %v1430_v30, %v1462_v35 }
 0x1a3   :  { %v1411_v33 = vmul.f32 %v2842_v14, %v1339_v31 }
 0x1a5   :  { %v1431_v3 = vadd.f32 %v2849_v53, %v1411_v33 }
 0x1a7   :  { %vm1447_vm15 = vcmp.ge.f32.partialorder %v1431_v3, 0.0  ;;  %v1463_v36 = vmul.f32 0.2, %v1431_v3 }
 0x1a9   :  { %v1479_v37 = vsel %vm1447_vm15, %v1431_v3, %v1463_v36 }
 0x1aa   :  { %v2194_v38 = vpack.c.bf16 %v1479_v37, %v1478_v62 }
 0x1ac   :  { %2202 = vst [vmem:[%s2924_s4 + $0x38] sm:$0xff] %v2194_v38  }

// kernel: discriminator_forward.7
= control target key start
LH: loop header
LB: loop body
LE: loop exit
PB: predicated region body
PF: predicated region fallthrough
CT: control target
= control target key end

     0   :  { %s2393_s15 = smov 0   ;;  %s2395_s16 = smov 0   ;;  %s2840_s0 = inlined_call_operand.vmem [shape: bf16[32,2048], index: 0, kind: input, shape index: {}]   ;;  %s2841_s1 = inlined_call_operand.vmem [shape: bf16[2048,256], index: 1, kind: input, shape index: {}]   ;;  %s2842_s2 = inlined_call_operand.vmem [shape: f32[1,256], index: 2, kind: input, shape index: {}]   ;;  %s2843_s3 = inlined_call_operand.vmem [shape: f32[1,256], index: 3, kind: input, shape index: {}]   ;;  %s2844_s4 = inlined_call_operand.vmem [shape: bf16[32,256], index: 4, kind: output, shape index: {}]  }
   0x1   :  { %s2397_s17 = smov 0  }
   0x2 LB: > { %s2409_s18 = sadd.s32 4294967295, %s2365_s17   ;;  %s2412_s19 = sadd.s32 1, %s2365_s17   ;;  %s2365_s17 = sphi %s2397_s17, %s2847_s17   ;;  %s2361_s16 = sphi %s2395_s16, %s2846_s16   ;;  %s2357_s15 = sphi %s2393_s15, %s2845_s15  }
   0x3   : > { %s18_s20 = ssub.s32 %s2365_s17, %s2412_s19  ;;  %s21_s21 = sadd.s32 1, %s2361_s16 }
   0x4   : > { %p19_p0 = scmp.eq.s32.totalorder %s18_s20, 0  ;;  %p28_p1 = scmp.ne.s32.totalorder %s2361_s16, %s2357_s15 }
   0x5   : > { %p29_p2 = scmp.eq.s32.totalorder %s2365_s17, 0  ;;  %p1583_p4 = scmp.ge.s32.totalorder %s2365_s17, 2 }
   0x6   : > { %s2421_s22 = scalar_select %p19_p0, %s2361_s16, %s21_s21  }
   0x7   : > { %p30_p3 = por %p29_p2, %p28_p1  ;;  %149 = sbr.rel (%p1583_p4) target bundleno = 32 (0x20), region = 24 }
   0xc   : > { %152 = sbr.rel (!%p30_p3) target bundleno = 32 (0x20), region = 28  ;;  %s154_s23 = sand.u32 (%p30_p3), 1, %s2361_s16  }
   0xd   : > { %s2172_s24 = sshll.u32 (%p30_p3), %s2365_s17, 5  ;;  %s1584_s25 = sshll.u32 (%p30_p3), %s154_s23, 7 }
   0xe   : > { %s2429_s28 = scalar_lea.vmem (%p30_p3), %s2840_s0, %s2172_s24  ;;  %s156_s29 = scalar_lea.vmem (%p30_p3), [#allocation3], %s1584_s25 }
   0xf   : > { %v172_v0 = vld [vmem:[%s2429_s28] sm:$0xff] (%p30_p3)  ;;  %v174_v1 = vld [vmem:[%s2429_s28 + $0x8] sm:$0xff] (%p30_p3)  ;;  %v176_v2 = vld [vmem:[%s2429_s28 + $0x10] sm:$0xff] (%p30_p3) }
  0x10   : > { %173 = vst [vmem:[%s156_s29] sm:$0xff] (%p30_p3), %v172_v0  ;;  %v178_v3 = vld [vmem:[%s2429_s28 + $0x18] sm:$0xff] (%p30_p3)  ;;  %v180_v4 = vld [vmem:[%s2429_s28 + $0x40] sm:$0xff] (%p30_p3)  ;;  %v182_v5 = vld [vmem:[%s2429_s28 + $0x48] sm:$0xff] (%p30_p3) }
  0x11   : > { %175 = vst [vmem:[%s156_s29 + $0x8] sm:$0xff] %v174_v1  ;;  %v184_v6 = vld [vmem:[%s2429_s28 + $0x50] sm:$0xff]  ;;  %v186_v7 = vld [vmem:[%s2429_s28 + $0x58] sm:$0xff]  ;;  %v188_v8 = vld [vmem:[%s2429_s28 + $0x80] sm:$0xff] }
  0x12   : > { %177 = vst [vmem:[%s156_s29 + $0x10] sm:$0xff] %v176_v2  ;;  %v190_v9 = vld [vmem:[%s2429_s28 + $0x88] sm:$0xff]  ;;  %v192_v10 = vld [vmem:[%s2429_s28 + $0x90] sm:$0xff]  ;;  %v194_v11 = vld [vmem:[%s2429_s28 + $0x98] sm:$0xff] }
  0x13   : > { %179 = vst [vmem:[%s156_s29 + $0x18] sm:$0xff] %v178_v3  ;;  %v196_v12 = vld [vmem:[%s2429_s28 + $0xc0] sm:$0xff]  ;;  %v198_v13 = vld [vmem:[%s2429_s28 + $0xc8] sm:$0xff]  ;;  %v200_v14 = vld [vmem:[%s2429_s28 + $0xd0] sm:$0xff] }
  0x14   : > { %181 = vst [vmem:[%s156_s29 + $0x20] sm:$0xff] %v180_v4  ;;  %v202_v15 = vld [vmem:[%s2429_s28 + $0xd8] sm:$0xff] }
  0x15   : > { %183 = vst [vmem:[%s156_s29 + $0x28] sm:$0xff] %v182_v5 }
  0x16   : > { %185 = vst [vmem:[%s156_s29 + $0x30] sm:$0xff] %v184_v6 }
  0x17   : > { %187 = vst [vmem:[%s156_s29 + $0x38] sm:$0xff] %v186_v7 }
  0x18   : > { %189 = vst [vmem:[%s156_s29 + $0x40] sm:$0xff] %v188_v8 }
  0x19   : > { %191 = vst [vmem:[%s156_s29 + $0x48] sm:$0xff] %v190_v9 }
  0x1a   : > { %193 = vst [vmem:[%s156_s29 + $0x50] sm:$0xff] %v192_v10 }
  0x1b   : > { %195 = vst [vmem:[%s156_s29 + $0x58] sm:$0xff] %v194_v11 }
  0x1c   : > { %197 = vst [vmem:[%s156_s29 + $0x60] sm:$0xff] %v196_v12 }
  0x1d   : > { %199 = vst [vmem:[%s156_s29 + $0x68] sm:$0xff] %v198_v13 }
  0x1e   : > { %201 = vst [vmem:[%s156_s29 + $0x70] sm:$0xff] %v200_v14 }
  0x1f   : > { %203 = vst [vmem:[%s156_s29 + $0x78] sm:$0xff] %v202_v15 }
  0x20 PF: > { %p1587_p5 = scmp.ge.s32.totalorder %s2365_s17, 1  ;;  %p218_p6 = scmp.lt.s32.totalorder %s2365_s17, 3 }
  0x22   : > { %p219_p7 = pnand %p1587_p5, %p218_p6 }
  0x23   : > { %s225_s30 = sand.u32 (!%p219_p7), 1, %s2357_s15   ;;  %s1589_s5 = sshll.u32 (!%p219_p7), %s2409_s18, 7 }
  0x24   : > { %222 = sbr.rel (%p219_p7) target bundleno = 369 (0x171), region = 55  ;;  %s1588_s6 = sshll.u32 (!%p219_p7), %s225_s30, 7 }
  0x25   : > { %p253_p8 = scmp.lt.s32.totalorder (!%p219_p7), %s1589_s5, 255  ;;  %s2456_s11 = scalar_lea.vmem (!%p219_p7), [#allocation3], %s1588_s6 }
  0x26   : > { %p1592_p9 = scmp.ne.s32.totalorder (!%p219_p7), %s2409_s18, 0 }
  0x29   : > { %s2849_s5 = smov (!%p253_p8, %s1589_s5), 255  ;;  %262 = sbr.rel (%p1592_p9) target bundleno = 55 (0x37), region = 63 }
  0x2a   : > { %s2173_s7 = sshll.u32 %s2849_s5, 3 }
  0x2b   : > { %s2454_s10 = scalar_lea.vmem %s2841_s1, %s2173_s7 }
  0x2e   : > { %v2367_v16 = vmov 0.0  }
  0x2f   : > { %263 = vst [vmem:[#allocation2 + $0x30] sm:$0xff] %v2367_v16 }
  0x30   : > { %264 = vst [vmem:[#allocation2] sm:$0xff] %v2367_v16 }
  0x31   : > { %265 = vst [vmem:[#allocation2 + $0x18] sm:$0xff] %v2367_v16 }
  0x32   : > { %266 = vst [vmem:[#allocation2 + $0x10] sm:$0xff] %v2367_v16 }
  0x33   : > { %267 = vst [vmem:[#allocation2 + $0x8] sm:$0xff] %v2367_v16 }
  0x34   : > { %268 = vst [vmem:[#allocation2 + $0x20] sm:$0xff] %v2367_v16 }
  0x35   : > { %269 = vst [vmem:[#allocation2 + $0x28] sm:$0xff] %v2367_v16 }
  0x36   : > { %270 = vst [vmem:[#allocation2 + $0x38] sm:$0xff] %v2367_v16 }
  0x37 PF: > { %v1715_v17 = vld [vmem:[%s2454_s10 + $0x70] sm:$0xf]  ;;  %v2205_v18 = vld [vmem:[%s2454_s10 + $0x74] sm:$0xf0]  ;;  %v1707_v28 = vld [vmem:[%s2454_s10 + $0x60] sm:$0xf] }
  0x38   : > { %v1779_v19 = vld [vmem:[%s2454_s10 + $0xf0] sm:$0xf]  ;;  %v1716_v20 = vor.u32 %v2205_v18, %v1715_v17  ;;  %v2221_v21 = vld [vmem:[%s2454_s10 + $0xf4] sm:$0xf0]  ;;  %v2203_v30 = vld [vmem:[%s2454_s10 + $0x64] sm:$0xf0] }
  0x39   : > { %v1843_v22 = vld [vmem:[%s2454_s10 + $0x170] sm:$0xf]  ;;  %v2237_v23 = vld [vmem:[%s2454_s10 + $0x174] sm:$0xf0]  ;;  %v1780_v24 = vor.u32 %v2221_v21, %v1779_v19  ;;  %v1771_v31 = vld [vmem:[%s2454_s10 + $0xe0] sm:$0xf]  ;;  %v1708_v33 = vor.u32 %v2203_v30, %v1707_v28 }
  0x3a   : > { %v1844_v25 = vor.u32 %v2237_v23, %v1843_v22  ;;  %v1907_v26 = vld [vmem:[%s2454_s10 + $0x1f0] sm:$0xf]  ;;  %v2253_v27 = vld [vmem:[%s2454_s10 + $0x1f4] sm:$0xf0]  ;;  %1143 = vmatpush.bf16.msra.mxu0 %v1716_v20  ;;  %v2219_v32 = vld [vmem:[%s2454_s10 + $0xe4] sm:$0xf0] }
  0x3b   : > { %v1908_v29 = vor.u32 %v2253_v27, %v1907_v26  ;;  %1162 = vmatpush.bf16.msra.mxu1 %v1780_v24  ;;  %v1772_v34 = vor.u32 %v2219_v32, %v1771_v31  ;;  %v1835_v35 = vld [vmem:[%s2454_s10 + $0x160] sm:$0xf]  ;;  %v2235_v36 = vld [vmem:[%s2454_s10 + $0x164] sm:$0xf0]  ;;  %v1699_v40 = vld [vmem:[%s2454_s10 + $0x50] sm:$0xf] }
  0x3c   : > { %1181 = vmatpush.bf16.msra.mxu2 %v1844_v25  ;;  %v1899_v37 = vld [vmem:[%s2454_s10 + $0x1e0] sm:$0xf]  ;;  %v1836_v38 = vor.u32 %v2235_v36, %v1835_v35  ;;  %v2251_v39 = vld [vmem:[%s2454_s10 + $0x1e4] sm:$0xf0]  ;;  %v2201_v41 = vld [vmem:[%s2454_s10 + $0x54] sm:$0xf0] }
  0x3d   : > { %1200 = vmatpush.bf16.msra.mxu3 %v1908_v29  ;;  %v1900_v42 = vor.u32 %v2251_v39, %v1899_v37  ;;  %v1763_v43 = vld [vmem:[%s2454_s10 + $0xd0] sm:$0xf]  ;;  %v2217_v44 = vld [vmem:[%s2454_s10 + $0xd4] sm:$0xf0]  ;;  %v1700_v46 = vor.u32 %v2201_v41, %v1699_v40  ;;  %v1691_v52 = vld [vmem:[%s2454_s10 + $0x40] sm:$0xf] }
  0x3e   : > { %v1827_v45 = vld [vmem:[%s2454_s10 + $0x150] sm:$0xf]  ;;  %1144 = vmatpush.bf16.msra.mxu0 %v1708_v33  ;;  %v2233_v47 = vld [vmem:[%s2454_s10 + $0x154] sm:$0xf0]  ;;  %v1764_v50 = vor.u32 %v2217_v44, %v1763_v43  ;;  %v2199_v53 = vld [vmem:[%s2454_s10 + $0x44] sm:$0xf0] }
  0x3f   : > { %v1891_v48 = vld [vmem:[%s2454_s10 + $0x1d0] sm:$0xf]  ;;  %v2249_v49 = vld [vmem:[%s2454_s10 + $0x1d4] sm:$0xf0]  ;;  %1163 = vmatpush.bf16.msra.mxu1 %v1772_v34  ;;  %v1828_v51 = vor.u32 %v2233_v47, %v1827_v45  ;;  %v1755_v54 = vld [vmem:[%s2454_s10 + $0xc0] sm:$0xf]  ;;  %v1692_v61 = vor.u32 %v2199_v53, %v1691_v52 }
  0x40   : > { %1182 = vmatpush.bf16.msra.mxu2 %v1836_v38  ;;  %v1892_v55 = vor.u32 %v2249_v49, %v1891_v48  ;;  %v2215_v56 = vld [vmem:[%s2454_s10 + $0xc4] sm:$0xf0]  ;;  %v1819_v57 = vld [vmem:[%s2454_s10 + $0x140] sm:$0xf]  ;;  %v1683_v0 = vld [vmem:[%s2454_s10 + $0x30] sm:$0xf] }
  0x41   : > { %1201 = vmatpush.bf16.msra.mxu3 %v1900_v42  ;;  %v2231_v58 = vld [vmem:[%s2454_s10 + $0x144] sm:$0xf0]  ;;  %v1883_v59 = vld [vmem:[%s2454_s10 + $0x1c0] sm:$0xf]  ;;  %v1756_v62 = vor.u32 %v2215_v56, %v1755_v54  ;;  %v2197_v1 = vld [vmem:[%s2454_s10 + $0x34] sm:$0xf0] }
  0x42   : > { %v2247_v60 = vld [vmem:[%s2454_s10 + $0x1c4] sm:$0xf0]  ;;  %1145 = vmatpush.bf16.msra.mxu0 %v1700_v46  ;;  %v1820_v63 = vor.u32 %v2231_v58, %v1819_v57  ;;  %v1747_v2 = vld [vmem:[%s2454_s10 + $0xb0] sm:$0xf]  ;;  %v2213_v4 = vld [vmem:[%s2454_s10 + $0xb4] sm:$0xf0]  ;;  %v1684_v9 = vor.u32 %v2197_v1, %v1683_v0 }
  0x43   : > { %1164 = vmatpush.bf16.msra.mxu1 %v1764_v50  ;;  %v1884_v3 = vor.u32 %v2247_v60, %v1883_v59  ;;  %v1811_v5 = vld [vmem:[%s2454_s10 + $0x130] sm:$0xf]  ;;  %v2229_v6 = vld [vmem:[%s2454_s10 + $0x134] sm:$0xf0]  ;;  %v1748_v10 = vor.u32 %v2213_v4, %v1747_v2  ;;  %v1675_v12 = vld [vmem:[%s2454_s10 + $0x20] sm:$0xf] }
  0x44   : > { %1183 = vmatpush.bf16.msra.mxu2 %v1828_v51  ;;  %v1875_v7 = vld [vmem:[%s2454_s10 + $0x1b0] sm:$0xf]  ;;  %v2245_v8 = vld [vmem:[%s2454_s10 + $0x1b4] sm:$0xf0]  ;;  %v1812_v11 = vor.u32 %v2229_v6, %v1811_v5  ;;  %v2195_v13 = vld [vmem:[%s2454_s10 + $0x24] sm:$0xf0] }
  0x45   : > { %1202 = vmatpush.bf16.msra.mxu3 %v1892_v55  ;;  %v1739_v14 = vld [vmem:[%s2454_s10 + $0xa0] sm:$0xf]  ;;  %v1876_v15 = vor.u32 %v2245_v8, %v1875_v7  ;;  %v2211_v16 = vld [vmem:[%s2454_s10 + $0xa4] sm:$0xf0]  ;;  %v1676_v21 = vor.u32 %v2195_v13, %v1675_v12  ;;  %v1667_v24 = vld [vmem:[%s2454_s10 + $0x10] sm:$0xf] }
  0x46   : > { %1146 = vmatpush.bf16.msra.mxu0 %v1692_v61  ;;  %v1803_v17 = vld [vmem:[%s2454_s10 + $0x120] sm:$0xf]  ;;  %v2227_v18 = vld [vmem:[%s2454_s10 + $0x124] sm:$0xf0]  ;;  %v1740_v22 = vor.u32 %v2211_v16, %v1739_v14  ;;  %v2193_v25 = vld [vmem:[%s2454_s10 + $0x14] sm:$0xf0] }
  0x47   : > { %1165 = vmatpush.bf16.msra.mxu1 %v1756_v62  ;;  %v1867_v19 = vld [vmem:[%s2454_s10 + $0x1a0] sm:$0xf]  ;;  %v2243_v20 = vld [vmem:[%s2454_s10 + $0x1a4] sm:$0xf0]  ;;  %v1804_v23 = vor.u32 %v2227_v18, %v1803_v17  ;;  %v1731_v26 = vld [vmem:[%s2454_s10 + $0x90] sm:$0xf]  ;;  %v1668_v34 = vor.u32 %v2193_v25, %v1667_v24 }
  0x48   : > { %1184 = vmatpush.bf16.msra.mxu2 %v1820_v63  ;;  %v1868_v27 = vor.u32 %v2243_v20, %v1867_v19  ;;  %v2209_v28 = vld [vmem:[%s2454_s10 + $0x94] sm:$0xf0]  ;;  %v1795_v29 = vld [vmem:[%s2454_s10 + $0x110] sm:$0xf]  ;;  %v1659_v33 = vld [vmem:[%s2454_s10] sm:$0xf] }
  0x49   : > { %1203 = vmatpush.bf16.msra.mxu3 %v1884_v3  ;;  %v2225_v30 = vld [vmem:[%s2454_s10 + $0x114] sm:$0xf0]  ;;  %v1859_v31 = vld [vmem:[%s2454_s10 + $0x190] sm:$0xf]  ;;  %v2191_v35 = vld [vmem:[%s2454_s10 + $0x4] sm:$0xf0]  ;;  %v1732_v38 = vor.u32 %v2209_v28, %v1731_v26 }
  0x4a   : > { %1147 = vmatpush.bf16.msra.mxu0 %v1684_v9  ;;  %v2241_v32 = vld [vmem:[%s2454_s10 + $0x194] sm:$0xf0]  ;;  %v1723_v36 = vld [vmem:[%s2454_s10 + $0x80] sm:$0xf]  ;;  %v2207_v37 = vld [vmem:[%s2454_s10 + $0x84] sm:$0xf0]  ;;  %v1796_v39 = vor.u32 %v2225_v30, %v1795_v29  ;;  %v1660_v51 = vor.u32 %v2191_v35, %v1659_v33 }
  0x4b   : > { %1166 = vmatpush.bf16.msra.mxu1 %v1748_v10  ;;  %v1787_v40 = vld [vmem:[%s2454_s10 + $0x100] sm:$0xf]  ;;  %v2223_v41 = vld [vmem:[%s2454_s10 + $0x104] sm:$0xf0]  ;;  %v1860_v43 = vor.u32 %v2241_v32, %v1859_v31  ;;  %v2174_v47 = vld [vmem:[%s2456_s11 + $0x4] sm:$0xf]  ;;  %v1724_v55 = vor.u32 %v2207_v37, %v1723_v36 }
  0x4c   : > { %1185 = vmatpush.bf16.msra.mxu2 %v1812_v11  ;;  %v1851_v42 = vld [vmem:[%s2454_s10 + $0x180] sm:$0xf]  ;;  %v2239_v44 = vld [vmem:[%s2454_s10 + $0x184] sm:$0xf0]  ;;  %v1597_v48 = vld [vmem:[%s2456_s11 + $0x20] sm:$0xf0]  ;;  %v1788_v56 = vor.u32 %v2223_v41, %v1787_v40 }
  0x4d   : > { %1204 = vmatpush.bf16.msra.mxu3 %v1876_v15  ;;  %v1595_v45 = vld [vmem:[%s2456_s11] sm:$0xf]  ;;  %v2099_v49 = vld [vmem:[%s2454_s10 + $0x370] sm:$0xf]  ;;  %v2301_v50 = vld [vmem:[%s2454_s10 + $0x374] sm:$0xf0]  ;;  %v1852_v60 = vor.u32 %v2239_v44, %v1851_v42  ;;  %v2543_v6 = vor.u32 %v2174_v47, %v1597_v48 }
  0x4e   : > { %1148 = vmatpush.bf16.msra.mxu0 %v1676_v21  ;;  %v2178_v46 = vld [vmem:[%s2456_s11 + $0x1c] sm:$0xf0]  ;;  %v1603_v52 = vld [vmem:[%s2456_s11 + $0x8] sm:$0xf]  ;;  %v2035_v53 = vld [vmem:[%s2454_s10 + $0x2f0] sm:$0xf]  ;;  %v2100_v61 = vor.u32 %v2301_v50, %v2099_v49 }
  0x4f   : > { %1167 = vmatpush.bf16.msra.mxu1 %v1740_v22  ;;  %v2285_v54 = vld [vmem:[%s2454_s10 + $0x2f4] sm:$0xf0]  ;;  %v2179_v57 = vld [vmem:[%s2456_s11 + $0x24] sm:$0xf0]  ;;  %v2175_v58 = vld [vmem:[%s2456_s11 + $0xc] sm:$0xf]  ;;  %v2538_v1 = vor.u32 %v2178_v46, %v1595_v45 }
  0x50   : > { %1186 = vmatpush.bf16.msra.mxu2 %v1804_v23  ;;  %v1605_v59 = vld [vmem:[%s2456_s11 + $0x28] sm:$0xf0]  ;;  %v1971_v62 = vld [vmem:[%s2454_s10 + $0x270] sm:$0xf]  ;;  %v2269_v63 = vld [vmem:[%s2454_s10 + $0x274] sm:$0xf0]  ;;  %v2036_v2 = vor.u32 %v2285_v54, %v2035_v53  ;;  %v2545_v7 = vor.u32 %v2179_v57, %v1603_v52 }
  0x51   : > { %1205 = vmatpush.bf16.msra.mxu3 %v1868_v27  ;;  %v2163_v0 = vld [vmem:[%s2454_s10 + $0x3f0] sm:$0xf]  ;;  %v2317_v3 = vld [vmem:[%s2454_s10 + $0x3f4] sm:$0xf0]  ;;  %v2091_v4 = vld [vmem:[%s2454_s10 + $0x360] sm:$0xf]  ;;  %v2549_v10 = vor.u32 %v2175_v58, %v1605_v59  ;;  %v1972_v11 = vor.u32 %v2269_v63, %v1971_v62 }
  0x52   : > { %1149 = vmatpush.bf16.msra.mxu0 %v1668_v34  ;;  %v2299_v5 = vld [vmem:[%s2454_s10 + $0x364] sm:$0xf0]  ;;  %v2027_v8 = vld [vmem:[%s2454_s10 + $0x2e0] sm:$0xf]  ;;  %v2164_v12 = vor.u32 %v2317_v3, %v2163_v0  ;;  %v2083_v19 = vld [vmem:[%s2454_s10 + $0x350] sm:$0xf] }
  0x53   : > { %1168 = vmatpush.bf16.msra.mxu1 %v1732_v38  ;;  %v2283_v9 = vld [vmem:[%s2454_s10 + $0x2e4] sm:$0xf0]  ;;  %v2092_v13 = vor.u32 %v2299_v5, %v2091_v4  ;;  %v1963_v14 = vld [vmem:[%s2454_s10 + $0x260] sm:$0xf]  ;;  %v2297_v20 = vld [vmem:[%s2454_s10 + $0x354] sm:$0xf0] }
  0x54   : > { %1187 = vmatpush.bf16.msra.mxu2 %v1796_v39  ;;  %v2267_v15 = vld [vmem:[%s2454_s10 + $0x264] sm:$0xf0]  ;;  %v2155_v16 = vld [vmem:[%s2454_s10 + $0x3e0] sm:$0xf]  ;;  %v2028_v17 = vor.u32 %v2283_v9, %v2027_v8  ;;  %v2019_v21 = vld [vmem:[%s2454_s10 + $0x2d0] sm:$0xf]  ;;  %v2084_v25 = vor.u32 %v2297_v20, %v2083_v19 }
  0x55   : > { %1206 = vmatpush.bf16.msra.mxu3 %v1860_v43  ;;  %v2315_v18 = vld [vmem:[%s2454_s10 + $0x3e4] sm:$0xf0]  ;;  %v2281_v22 = vld [vmem:[%s2454_s10 + $0x2d4] sm:$0xf0]  ;;  %v1964_v23 = vor.u32 %v2267_v15, %v1963_v14  ;;  %v1955_v26 = vld [vmem:[%s2454_s10 + $0x250] sm:$0xf] }
  0x56   : > { %1150 = vmatpush.bf16.msra.mxu0 %v1660_v51  ;;  %v2156_v24 = vor.u32 %v2315_v18, %v2155_v16  ;;  %v2265_v27 = vld [vmem:[%s2454_s10 + $0x254] sm:$0xf0]  ;;  %v2147_v28 = vld [vmem:[%s2454_s10 + $0x3d0] sm:$0xf]  ;;  %v2020_v29 = vor.u32 %v2281_v22, %v2019_v21  ;;  %v2075_v31 = vld [vmem:[%s2454_s10 + $0x340] sm:$0xf] }
  0x57   : > { %1169 = vmatpush.bf16.msra.mxu1 %v1724_v55  ;;  %v2313_v30 = vld [vmem:[%s2454_s10 + $0x3d4] sm:$0xf0]  ;;  %v2295_v32 = vld [vmem:[%s2454_s10 + $0x344] sm:$0xf0]  ;;  %v2011_v33 = vld [vmem:[%s2454_s10 + $0x2c0] sm:$0xf]  ;;  %v1956_v35 = vor.u32 %v2265_v27, %v1955_v26 }
  0x58   : > { %1188 = vmatpush.bf16.msra.mxu2 %v1788_v56  ;;  %v2279_v34 = vld [vmem:[%s2454_s10 + $0x2c4] sm:$0xf0]  ;;  %v1947_v36 = vld [vmem:[%s2454_s10 + $0x240] sm:$0xf]  ;;  %v2148_v39 = vor.u32 %v2313_v30, %v2147_v28  ;;  %v2076_v40 = vor.u32 %v2295_v32, %v2075_v31  ;;  %v2182_v45 = vld [vmem:[%s2456_s11 + $0x44] sm:$0xf] }
  0x59   : > { %1207 = vmatpush.bf16.msra.mxu3 %v1852_v60  ;;  %1151 = vmatmul.bf16.vlgmr.msra.gmra.mxu0 %v2538_v1  ;;  %v2263_v37 = vld [vmem:[%s2454_s10 + $0x244] sm:$0xf0]  ;;  %v2139_v38 = vld [vmem:[%s2454_s10 + $0x3c0] sm:$0xf]  ;;  %v2012_v44 = vor.u32 %v2279_v34, %v2011_v33  ;;  %v1629_v46 = vld [vmem:[%s2456_s11 + $0x60] sm:$0xf0] }
  0x5a   : > { %1170 = vmatmul.bf16.vlgmr.msra.gmra.mxu1 %v2543_v6  ;;  %1219 = vmatpush.bf16.msrb.mxu0 %v1972_v11  ;;  %v2311_v41 = vld [vmem:[%s2454_s10 + $0x3c4] sm:$0xf0]  ;;  %v1627_v42 = vld [vmem:[%s2456_s11 + $0x40] sm:$0xf]  ;;  %v2067_v47 = vld [vmem:[%s2454_s10 + $0x330] sm:$0xf]  ;;  %v1948_v52 = vor.u32 %v2263_v37, %v1947_v36  ;;  %v2595_v3 = vor.u32 %v2182_v45, %v1629_v46 }
  0x5b   : > { %1238 = vmatpush.bf16.msrb.mxu1 %v2036_v2  ;;  %1189 = vmatmul.bf16.vlgmr.msra.gmra.mxu2 %v2545_v7  ;;  %v2186_v43 = vld [vmem:[%s2456_s11 + $0x5c] sm:$0xf0]  ;;  %v2293_v48 = vld [vmem:[%s2454_s10 + $0x334] sm:$0xf0]  ;;  %v1635_v49 = vld [vmem:[%s2456_s11 + $0x48] sm:$0xf]  ;;  %v2140_v56 = vor.u32 %v2311_v41, %v2139_v38 }
  0x5c   : > { %1257 = vmatpush.bf16.msrb.mxu2 %v2100_v61  ;;  %1208 = vmatmul.bf16.vlgmr.msra.gmra.mxu3 %v2549_v10  ;;  %v2003_v50 = vld [vmem:[%s2454_s10 + $0x2b0] sm:$0xf]  ;;  %v2277_v51 = vld [vmem:[%s2454_s10 + $0x2b4] sm:$0xf0]  ;;  %v2187_v53 = vld [vmem:[%s2456_s11 + $0x64] sm:$0xf0]  ;;  %v2068_v57 = vor.u32 %v2293_v48, %v2067_v47  ;;  %v2590_v61 = vor.u32 %v2186_v43, %v1627_v42 }
  0x5d   : > { %1276 = vmatpush.bf16.msrb.mxu3 %v2164_v12  ;;  %v2183_v54 = vld [vmem:[%s2456_s11 + $0x4c] sm:$0xf]  ;;  %v1939_v58 = vld [vmem:[%s2454_s10 + $0x230] sm:$0xf]  ;;  %v2261_v59 = vld [vmem:[%s2454_s10 + $0x234] sm:$0xf0]  ;;  %v2004_v62 = vor.u32 %v2277_v51, %v2003_v50  ;;  %v2597_v4 = vor.u32 %v2187_v53, %v1635_v49 }
  0x5e   : > { %1220 = vmatpush.bf16.msrb.mxu0 %v1964_v23  ;;  %v1637_v55 = vld [vmem:[%s2456_s11 + $0x68] sm:$0xf0]  ;;  %v2131_v60 = vld [vmem:[%s2454_s10 + $0x3b0] sm:$0xf]  ;;  %v2309_v63 = vld [vmem:[%s2454_s10 + $0x3b4] sm:$0xf0]  ;;  %v1940_v11 = vor.u32 %v2261_v59, %v1939_v58 }
  0x5f   : > { %1239 = vmatpush.bf16.msrb.mxu1 %v2028_v17  ;;  %v2059_v0 = vld [vmem:[%s2454_s10 + $0x320] sm:$0xf]  ;;  %v2291_v2 = vld [vmem:[%s2454_s10 + $0x324] sm:$0xf0]  ;;  %v2601_v9 = vor.u32 %v2183_v54, %v1637_v55  ;;  %v2132_v12 = vor.u32 %v2309_v63, %v2131_v60  ;;  %v2051_v19 = vld [vmem:[%s2454_s10 + $0x310] sm:$0xf] }
  0x60   : > { %1258 = vmatpush.bf16.msrb.mxu2 %v2092_v13  ;;  %v1995_v5 = vld [vmem:[%s2454_s10 + $0x2a0] sm:$0xf]  ;;  %v2275_v8 = vld [vmem:[%s2454_s10 + $0x2a4] sm:$0xf0]  ;;  %v2060_v13 = vor.u32 %v2291_v2, %v2059_v0  ;;  %v2289_v20 = vld [vmem:[%s2454_s10 + $0x314] sm:$0xf0] }
  0x61   : > { %1277 = vmatpush.bf16.msrb.mxu3 %v2156_v24  ;;  %v1931_v14 = vld [vmem:[%s2454_s10 + $0x220] sm:$0xf]  ;;  %v2259_v15 = vld [vmem:[%s2454_s10 + $0x224] sm:$0xf0]  ;;  %v1996_v17 = vor.u32 %v2275_v8, %v1995_v5  ;;  %v1987_v21 = vld [vmem:[%s2454_s10 + $0x290] sm:$0xf]  ;;  %v2052_v26 = vor.u32 %v2289_v20, %v2051_v19 }
  0x62   : > { %1221 = vmatpush.bf16.msrb.mxu0 %v1956_v35  ;;  %v2123_v16 = vld [vmem:[%s2454_s10 + $0x3a0] sm:$0xf]  ;;  %v2307_v18 = vld [vmem:[%s2454_s10 + $0x3a4] sm:$0xf0]  ;;  %v2273_v22 = vld [vmem:[%s2454_s10 + $0x294] sm:$0xf0]  ;;  %v1932_v23 = vor.u32 %v2259_v15, %v1931_v14 }
  0x63   : > { %1240 = vmatpush.bf16.msrb.mxu1 %v2020_v29  ;;  %v1923_v24 = vld [vmem:[%s2454_s10 + $0x210] sm:$0xf]  ;;  %v2257_v27 = vld [vmem:[%s2454_s10 + $0x214] sm:$0xf0]  ;;  %v1988_v30 = vor.u32 %v2273_v22, %v1987_v21  ;;  %v2043_v31 = vld [vmem:[%s2454_s10 + $0x300] sm:$0xf] }
  0x64   : > { %1259 = vmatpush.bf16.msrb.mxu2 %v2084_v25  ;;  %v2124_v25 = vor.u32 %v2307_v18, %v2123_v16  ;;  %v2115_v28 = vld [vmem:[%s2454_s10 + $0x390] sm:$0xf]  ;;  %v2305_v29 = vld [vmem:[%s2454_s10 + $0x394] sm:$0xf0]  ;;  %v2287_v32 = vld [vmem:[%s2454_s10 + $0x304] sm:$0xf0]  ;;  %v1924_v37 = vor.u32 %v2257_v27, %v1923_v24 }
  0x65   : > { %1278 = vmatpush.bf16.msrb.mxu3 %v2148_v39  ;;  %v1979_v33 = vld [vmem:[%s2454_s10 + $0x280] sm:$0xf]  ;;  %v2271_v34 = vld [vmem:[%s2454_s10 + $0x284] sm:$0xf0]  ;;  %v2236_v35 = vld [vmem:[%s2454_s10 + $0x174] sm:$0xf]  ;;  %v2116_v41 = vor.u32 %v2305_v29, %v2115_v28  ;;  %v2044_v42 = vor.u32 %v2287_v32, %v2043_v31 }
  0x66   : > { %1222 = vmatpush.bf16.msrb.mxu0 %v1948_v52  ;;  %v1845_v36 = vld [vmem:[%s2454_s10 + $0x178] sm:$0xf0]  ;;  %v1915_v38 = vld [vmem:[%s2454_s10 + $0x200] sm:$0xf]  ;;  %v2220_v39 = vld [vmem:[%s2454_s10 + $0xf4] sm:$0xf]  ;;  %v1980_v46 = vor.u32 %v2271_v34, %v1979_v33 }
  0x67   : > { %1241 = vmatpush.bf16.msrb.mxu1 %v2012_v44  ;;  %v2255_v43 = vld [vmem:[%s2454_s10 + $0x204] sm:$0xf0]  ;;  %v2107_v44 = vld [vmem:[%s2454_s10 + $0x380] sm:$0xf]  ;;  %v1611_v47 = vld [vmem:[%s2456_s11 + $0x10] sm:$0xf]  ;;  %v1848_v51 = vor.u32 %v2236_v35, %v1845_v36 }
  0x68   : > { %1260 = vmatpush.bf16.msrb.mxu2 %v2076_v40  ;;  %v1781_v40 = vld [vmem:[%s2454_s10 + $0xf8] sm:$0xf0]  ;;  %v2303_v45 = vld [vmem:[%s2454_s10 + $0x384] sm:$0xf0]  ;;  %v2180_v48 = vld [vmem:[%s2456_s11 + $0x2c] sm:$0xf0]  ;;  %v1916_v59 = vor.u32 %v2255_v43, %v1915_v38 }
  0x69   : > { %1279 = vmatpush.bf16.msrb.mxu3 %v2140_v56  ;;  %1156 = vmatmul.bf16.gmra.mxu0 %v2590_v61  ;;  %v2176_v49 = vld [vmem:[%s2456_s11 + $0x14] sm:$0xf]  ;;  %v1717_v53 = vld [vmem:[%s2454_s10 + $0x78] sm:$0xf0]  ;;  %v1784_v55 = vor.u32 %v2220_v39, %v1781_v40  ;;  %v1837_v58 = vld [vmem:[%s2454_s10 + $0x168] sm:$0xf0]  ;;  %v2108_v0 = vor.u32 %v2303_v45, %v2107_v44 }
  0x6a   : > { %1175 = vmatmul.bf16.gmra.mxu1 %v2595_v3  ;;  %1223 = vmatpush.bf16.msrb.mxu0 %v1940_v11  ;;  %v1613_v50 = vld [vmem:[%s2456_s11 + $0x30] sm:$0xf0]  ;;  %v1909_v56 = vld [vmem:[%s2454_s10 + $0x1f8] sm:$0xf0]  ;;  %v1619_v60 = vld [vmem:[%s2456_s11 + $0x18] sm:$0xf] }
  0x6b   : > { %1242 = vmatpush.bf16.msrb.mxu1 %v2004_v62  ;;  %1194 = vmatmul.bf16.gmra.mxu2 %v2597_v4  ;;  %v2204_v52 = vld [vmem:[%s2454_s10 + $0x74] sm:$0xf]  ;;  %v2181_v62 = vld [vmem:[%s2456_s11 + $0x34] sm:$0xf0]  ;;  %v2177_v63 = vld [vmem:[%s2456_s11 + $0x1c] sm:$0xf]  ;;  %v2652_v18 = vor.u32 %v2176_v49, %v1613_v50 }
  0x6c   : > { %1261 = vmatpush.bf16.msrb.mxu2 %v2068_v57  ;;  %1213 = vmatmul.bf16.gmra.mxu3 %v2601_v9  ;;  %v2252_v54 = vld [vmem:[%s2454_s10 + $0x1f4] sm:$0xf]  ;;  %v2234_v57 = vld [vmem:[%s2454_s10 + $0x164] sm:$0xf]  ;;  %v1621_v2 = vld [vmem:[%s2456_s11 + $0x38] sm:$0xf0]  ;;  %v1720_v5 = vor.u32 %v2204_v52, %v1717_v53  ;;  %v2657_v22 = vor.u32 %v2181_v62, %v1619_v60 }
  0x6d   : > { %1280 = vmatpush.bf16.msrb.mxu3 %v2132_v12  ;;  %v2202_v8 = vld [vmem:[%s2454_s10 + $0x64] sm:$0xf]  ;;  %v1709_v11 = vld [vmem:[%s2454_s10 + $0x68] sm:$0xf0]  ;;  %v1912_v12 = vor.u32 %v2252_v54, %v1909_v56  ;;  %v2232_v20 = vld [vmem:[%s2454_s10 + $0x154] sm:$0xf] }
  0x6e   : > { %1224 = vmatpush.bf16.msrb.mxu0 %v1932_v23  ;;  %v2218_v14 = vld [vmem:[%s2454_s10 + $0xe4] sm:$0xf]  ;;  %v1773_v15 = vld [vmem:[%s2454_s10 + $0xe8] sm:$0xf0]  ;;  %v1829_v21 = vld [vmem:[%s2454_s10 + $0x158] sm:$0xf0]  ;;  %v2659_v23 = vor.u32 %v2177_v63, %v1621_v2  ;;  %v1712_v24 = vor.u32 %v2202_v8, %v1709_v11 }
  0x6f   : > { %1243 = vmatpush.bf16.msrb.mxu1 %v1996_v17  ;;  %v2250_v16 = vld [vmem:[%s2454_s10 + $0x1e4] sm:$0xf]  ;;  %v2650_v17 = vor.u32 %v2180_v48, %v1611_v47  ;;  %v1901_v19 = vld [vmem:[%s2454_s10 + $0x1e8] sm:$0xf0]  ;;  %v1701_v27 = vld [vmem:[%s2454_s10 + $0x58] sm:$0xf0]  ;;  %v1832_v29 = vor.u32 %v2232_v20, %v1829_v21 }
  0x70   : > { %1262 = vmatpush.bf16.msrb.mxu2 %v2060_v13  ;;  %v1840_v13 = vor.u32 %v2234_v57, %v1837_v58  ;;  %v1904_v28 = vor.u32 %v2250_v16, %v1901_v19  ;;  %v1765_v31 = vld [vmem:[%s2454_s10 + $0xd8] sm:$0xf0]  ;;  %v2248_v32 = vld [vmem:[%s2454_s10 + $0x1d4] sm:$0xf]  ;;  %v2230_v34 = vld [vmem:[%s2454_s10 + $0x144] sm:$0xf] }
  0x71   : > { %1281 = vmatpush.bf16.msrb.mxu3 %v2124_v25  ;;  %v1776_v25 = vor.u32 %v2218_v14, %v1773_v15  ;;  %v1893_v33 = vld [vmem:[%s2454_s10 + $0x1d8] sm:$0xf0]  ;;  %v1821_v35 = vld [vmem:[%s2454_s10 + $0x148] sm:$0xf0]  ;;  %v2198_v38 = vld [vmem:[%s2454_s10 + $0x44] sm:$0xf] }
  0x72   : > { %1225 = vmatpush.bf16.msrb.mxu0 %v1924_v37  ;;  %v1693_v39 = vld [vmem:[%s2454_s10 + $0x48] sm:$0xf0]  ;;  %v1896_v40 = vor.u32 %v2248_v32, %v1893_v33  ;;  %v2246_v44 = vld [vmem:[%s2454_s10 + $0x1c4] sm:$0xf]  ;;  %v1813_v47 = vld [vmem:[%s2454_s10 + $0x138] sm:$0xf0] }
  0x73   : > { %1244 = vmatpush.bf16.msrb.mxu1 %v1988_v30  ;;  %v2216_v30 = vld [vmem:[%s2454_s10 + $0xd4] sm:$0xf]  ;;  %v1757_v43 = vld [vmem:[%s2454_s10 + $0xc8] sm:$0xf0]  ;;  %v1696_v48 = vor.u32 %v2198_v38, %v1693_v39  ;;  %v1643_v53 = vld [vmem:[%s2456_s11 + $0x50] sm:$0xf] }
  0x74   : > { %1263 = vmatpush.bf16.msrb.mxu2 %v2052_v26  ;;  %v2200_v26 = vld [vmem:[%s2454_s10 + $0x54] sm:$0xf]  ;;  %v1768_v37 = vor.u32 %v2216_v30, %v1765_v31  ;;  %v1885_v45 = vld [vmem:[%s2454_s10 + $0x1c8] sm:$0xf0]  ;;  %v2188_v54 = vld [vmem:[%s2456_s11 + $0x6c] sm:$0xf0] }
  0x75   : > { %1282 = vmatpush.bf16.msrb.mxu3 %v2116_v41  ;;  %v1704_v36 = vor.u32 %v2200_v26, %v1701_v27  ;;  %v1824_v41 = vor.u32 %v2230_v34, %v1821_v35  ;;  %v2196_v50 = vld [vmem:[%s2454_s10 + $0x34] sm:$0xf]  ;;  %v1888_v52 = vor.u32 %v2246_v44, %v1885_v45  ;;  %v1877_v62 = vld [vmem:[%s2454_s10 + $0x1b8] sm:$0xf0]  ;;  %v2226_v63 = vld [vmem:[%s2454_s10 + $0x124] sm:$0xf] }
  0x76   : > { %1226 = vmatpush.bf16.msrb.mxu0 %v1916_v59  ;;  %v1645_v56 = vld [vmem:[%s2456_s11 + $0x70] sm:$0xf0]  ;;  %v1749_v59 = vld [vmem:[%s2454_s10 + $0xb8] sm:$0xf0]  ;;  %v1651_v2 = vld [vmem:[%s2456_s11 + $0x58] sm:$0xf] }
  0x77   : > { %1245 = vmatpush.bf16.msrb.mxu1 %v1980_v46  ;;  %v2228_v46 = vld [vmem:[%s2454_s10 + $0x134] sm:$0xf]  ;;  %v2185_v8 = vld [vmem:[%s2456_s11 + $0x5c] sm:$0xf]  ;;  %v2194_v14 = vld [vmem:[%s2454_s10 + $0x24] sm:$0xf] }
  0x78   : > { %1264 = vmatpush.bf16.msrb.mxu2 %v2044_v42  ;;  %v2214_v42 = vld [vmem:[%s2454_s10 + $0xc4] sm:$0xf]  ;;  %v1816_v57 = vor.u32 %v2228_v46, %v1813_v47  ;;  %v2212_v58 = vld [vmem:[%s2454_s10 + $0xb4] sm:$0xf]  ;;  %v1653_v11 = vld [vmem:[%s2456_s11 + $0x78] sm:$0xf0] }
  0x79   : > { %1283 = vmatpush.bf16.msrb.mxu3 %v2108_v0  ;;  %1227 = vmatmul.bf16.vlgmr.msrb.gmra.mxu0 %v2650_v17  ;;  %v1760_v49 = vor.u32 %v2214_v42, %v1757_v43  ;;  %v2244_v60 = vld [vmem:[%s2454_s10 + $0x1b4] sm:$0xf]  ;;  %v1805_v0 = vld [vmem:[%s2454_s10 + $0x128] sm:$0xf0]  ;;  %v2210_v20 = vld [vmem:[%s2454_s10 + $0xa4] sm:$0xf]  ;;  %v2711_v31 = vor.u32 %v2185_v8, %v1653_v11 }
  0x7a   : > { %1295 = vmatpush.bf16.msra.mxu0 %v1720_v5  ;;  %1246 = vmatmul.bf16.vlgmr.msrb.gmra.mxu1 %v2652_v18  ;;  %v2189_v5 = vld [vmem:[%s2456_s11 + $0x74] sm:$0xf0]  ;;  %v1677_v15 = vld [vmem:[%s2454_s10 + $0x28] sm:$0xf0]  ;;  %v1880_v16 = vor.u32 %v2244_v60, %v1877_v62  ;;  %v1808_v19 = vor.u32 %v2226_v63, %v1805_v0  ;;  %v2192_v34 = vld [vmem:[%s2454_s10 + $0x14] sm:$0xf] }
  0x7b   : > { %1314 = vmatpush.bf16.msra.mxu1 %v1784_v55  ;;  %1265 = vmatmul.bf16.vlgmr.msrb.gmra.mxu2 %v2657_v22  ;;  %v2184_v55 = vld [vmem:[%s2456_s11 + $0x54] sm:$0xf]  ;;  %v1741_v21 = vld [vmem:[%s2454_s10 + $0xa8] sm:$0xf0]  ;;  %v2709_v30 = vor.u32 %v2189_v5, %v1651_v2  ;;  %v1680_v32 = vor.u32 %v2194_v14, %v1677_v15  ;;  %v1669_v35 = vld [vmem:[%s2454_s10 + $0x18] sm:$0xf0] }
  0x7c   : > { %1333 = vmatpush.bf16.msra.mxu2 %v1848_v51  ;;  %1284 = vmatmul.bf16.vlgmr.msrb.gmra.mxu3 %v2659_v23  ;;  %v1685_v51 = vld [vmem:[%s2454_s10 + $0x38] sm:$0xf0]  ;;  %v2704_v26 = vor.u32 %v2184_v55, %v1645_v56  ;;  %v1869_v27 = vld [vmem:[%s2454_s10 + $0x1a8] sm:$0xf0]  ;;  %v1744_v33 = vor.u32 %v2210_v20, %v1741_v21  ;;  %v2208_v38 = vld [vmem:[%s2454_s10 + $0x94] sm:$0xf]  ;;  %v1672_v46 = vor.u32 %v2192_v34, %v1669_v35 }
  0x7d   : > { %1352 = vmatpush.bf16.msra.mxu3 %v1912_v12  ;;  %v1688_v12 = vor.u32 %v2196_v50, %v1685_v51  ;;  %v1733_v39 = vld [vmem:[%s2454_s10 + $0x98] sm:$0xf0]  ;;  %v2222_v42 = vld [vmem:[%s2454_s10 + $0x104] sm:$0xf]  ;;  %v1789_v43 = vld [vmem:[%s2454_s10 + $0x108] sm:$0xf0] }
  0x7e   : > { %1296 = vmatpush.bf16.msra.mxu0 %v1712_v24  ;;  %v2242_v24 = vld [vmem:[%s2454_s10 + $0x1a4] sm:$0xf]  ;;  %v2300_v44 = vld [vmem:[%s2454_s10 + $0x374] sm:$0xf]  ;;  %v2101_v45 = vld [vmem:[%s2454_s10 + $0x378] sm:$0xf0]  ;;  %v1736_v47 = vor.u32 %v2208_v38, %v1733_v39 }
  0x7f   : > { %1315 = vmatpush.bf16.msra.mxu1 %v1776_v25  ;;  %v2702_v25 = vor.u32 %v2188_v54, %v1643_v53  ;;  %v2206_v50 = vld [vmem:[%s2454_s10 + $0x84] sm:$0xf]  ;;  %v1725_v53 = vld [vmem:[%s2454_s10 + $0x88] sm:$0xf0]  ;;  %v2104_v56 = vor.u32 %v2300_v44, %v2101_v45  ;;  %v2037_v60 = vld [vmem:[%s2454_s10 + $0x2f8] sm:$0xf0] }
  0x80   : > { %1334 = vmatpush.bf16.msra.mxu2 %v1840_v13  ;;  %v1752_v13 = vor.u32 %v2212_v58, %v1749_v59  ;;  %v2238_v54 = vld [vmem:[%s2454_s10 + $0x184] sm:$0xf]  ;;  %v1853_v55 = vld [vmem:[%s2454_s10 + $0x188] sm:$0xf0]  ;;  %v1973_v58 = vld [vmem:[%s2454_s10 + $0x278] sm:$0xf0]  ;;  %v1728_v2 = vor.u32 %v2206_v50, %v1725_v53 }
  0x81   : > { %1353 = vmatpush.bf16.msra.mxu3 %v1904_v28  ;;  %v2224_v28 = vld [vmem:[%s2454_s10 + $0x114] sm:$0xf]  ;;  %v2165_v63 = vld [vmem:[%s2454_s10 + $0x3f8] sm:$0xf0]  ;;  %v2298_v5 = vld [vmem:[%s2454_s10 + $0x364] sm:$0xf]  ;;  %v1856_v11 = vor.u32 %v2238_v54, %v1853_v55 }
  0x82   : > { %1297 = vmatpush.bf16.msra.mxu0 %v1704_v36  ;;  %v1872_v36 = vor.u32 %v2242_v24, %v1869_v27  ;;  %v2284_v59 = vld [vmem:[%s2454_s10 + $0x2f4] sm:$0xf]  ;;  %v2093_v8 = vld [vmem:[%s2454_s10 + $0x368] sm:$0xf0]  ;;  %v2266_v15 = vld [vmem:[%s2454_s10 + $0x264] sm:$0xf] }
  0x83   : > { %1316 = vmatpush.bf16.msra.mxu1 %v1768_v37  ;;  %v2316_v62 = vld [vmem:[%s2454_s10 + $0x3f4] sm:$0xf]  ;;  %v2282_v20 = vld [vmem:[%s2454_s10 + $0x2e4] sm:$0xf]  ;;  %v2029_v21 = vld [vmem:[%s2454_s10 + $0x2e8] sm:$0xf0] }
  0x84   : > { %1335 = vmatpush.bf16.msra.mxu2 %v1832_v29  ;;  %v1797_v29 = vld [vmem:[%s2454_s10 + $0x118] sm:$0xf0]  ;;  %v2168_v14 = vor.u32 %v2316_v62, %v2165_v63  ;;  %v2314_v27 = vld [vmem:[%s2454_s10 + $0x3e4] sm:$0xf]  ;;  %v2032_v35 = vor.u32 %v2282_v20, %v2029_v21  ;;  %v2077_v44 = vld [vmem:[%s2454_s10 + $0x348] sm:$0xf0] }
  0x85   : > { %1354 = vmatpush.bf16.msra.mxu3 %v1896_v40  ;;  %v1800_v37 = vor.u32 %v2224_v28, %v1797_v29  ;;  %v2240_v40 = vld [vmem:[%s2454_s10 + $0x194] sm:$0xf]  ;;  %v2157_v28 = vld [vmem:[%s2454_s10 + $0x3e8] sm:$0xf0]  ;;  %v1957_v34 = vld [vmem:[%s2454_s10 + $0x258] sm:$0xf0] }
  0x86   : > { %1298 = vmatpush.bf16.msra.mxu0 %v1696_v48  ;;  %v2190_v48 = vld [vmem:[%s2454_s10 + $0x4] sm:$0xf]  ;;  %v2296_v29 = vld [vmem:[%s2454_s10 + $0x354] sm:$0xf]  ;;  %v2021_v38 = vld [vmem:[%s2454_s10 + $0x2d8] sm:$0xf0] }
  0x87   : > { %1317 = vmatpush.bf16.msra.mxu1 %v1760_v49  ;;  %v1661_v49 = vld [vmem:[%s2454_s10 + $0x8] sm:$0xf0]  ;;  %v2262_v45 = vld [vmem:[%s2454_s10 + $0x244] sm:$0xf]  ;;  %v2260_v53 = vld [vmem:[%s2454_s10 + $0x234] sm:$0xf] }
  0x88   : > { %1336 = vmatpush.bf16.msra.mxu2 %v1824_v41  ;;  %v1861_v41 = vld [vmem:[%s2454_s10 + $0x198] sm:$0xf0]  ;;  %v1664_v0 = vor.u32 %v2190_v48, %v1661_v49  ;;  %v2308_v62 = vld [vmem:[%s2454_s10 + $0x3b4] sm:$0xf]  ;;  %v2125_v20 = vld [vmem:[%s2454_s10 + $0x3a8] sm:$0xf0] }
  0x89   : > { %1355 = vmatpush.bf16.msra.mxu3 %v1888_v52  ;;  %1232 = vmatmul.bf16.gmra.mxu0 %v2702_v25  ;;  %v1864_v51 = vor.u32 %v2240_v40, %v1861_v41  ;;  %v1792_v52 = vor.u32 %v2222_v42, %v1789_v43  ;;  %v2312_v41 = vld [vmem:[%s2454_s10 + $0x3d4] sm:$0xf]  ;;  %v2149_v42 = vld [vmem:[%s2454_s10 + $0x3d8] sm:$0xf0]  ;;  %v2294_v43 = vld [vmem:[%s2454_s10 + $0x344] sm:$0xf] }
  0x8a   : > { %1299 = vmatpush.bf16.msra.mxu0 %v1688_v12  ;;  %1251 = vmatmul.bf16.gmra.mxu1 %v2704_v26  ;;  %v2152_v48 = vor.u32 %v2312_v41, %v2149_v42  ;;  %v2080_v49 = vor.u32 %v2294_v43, %v2077_v44  ;;  %v1941_v54 = vld [vmem:[%s2454_s10 + $0x238] sm:$0xf0]  ;;  %v2288_v21 = vld [vmem:[%s2454_s10 + $0x314] sm:$0xf]  ;;  %v2254_v41 = vld [vmem:[%s2454_s10 + $0x204] sm:$0xf] }
  0x8b   : > { %1318 = vmatpush.bf16.msra.mxu1 %v1752_v13  ;;  %1270 = vmatmul.bf16.gmra.mxu2 %v2709_v30  ;;  %v2040_v13 = vor.u32 %v2284_v59, %v2037_v60  ;;  %v1944_v60 = vor.u32 %v2260_v53, %v1941_v54  ;;  %v2133_v63 = vld [vmem:[%s2454_s10 + $0x3b8] sm:$0xf0]  ;;  %v1917_v42 = vld [vmem:[%s2454_s10 + $0x208] sm:$0xf0]  ;;  %p2169_p10 = scmp.ne.s32.totalorder %s2409_s18, 1 }
  0x8c   : > { %1337 = vmatpush.bf16.msra.mxu2 %v1816_v57  ;;  %1289 = vmatmul.bf16.gmra.mxu3 %v2711_v31  ;;  %v2268_v57 = vld [vmem:[%s2454_s10 + $0x274] sm:$0xf] }
  0x8d   : > { %1356 = vmatpush.bf16.msra.mxu3 %v1880_v16  ;;  %v1976_v12 = vor.u32 %v2268_v57, %v1973_v58  ;;  %v1965_v16 = vld [vmem:[%s2454_s10 + $0x268] sm:$0xf0]  ;;  %v2276_v57 = vld [vmem:[%s2454_s10 + $0x2b4] sm:$0xf]  ;;  %v2005_v58 = vld [vmem:[%s2454_s10 + $0x2b8] sm:$0xf0] }
  0x8e   : > { %1300 = vmatpush.bf16.msra.mxu0 %v1680_v32  ;;  %v1968_v24 = vor.u32 %v2266_v15, %v1965_v16  ;;  %v2085_v32 = vld [vmem:[%s2454_s10 + $0x358] sm:$0xf0] }
  0x8f   : > { %1319 = vmatpush.bf16.msra.mxu1 %v1744_v33  ;;  %v2264_v33 = vld [vmem:[%s2454_s10 + $0x254] sm:$0xf]  ;;  %v2088_v39 = vor.u32 %v2296_v29, %v2085_v32 }
  0x90   : > { %1338 = vmatpush.bf16.msra.mxu2 %v1808_v19  ;;  %v2096_v19 = vor.u32 %v2298_v5, %v2093_v8  ;;  %v1960_v40 = vor.u32 %v2264_v33, %v1957_v34  ;;  %v2258_v5 = vld [vmem:[%s2454_s10 + $0x224] sm:$0xf]  ;;  %v1933_v8 = vld [vmem:[%s2454_s10 + $0x228] sm:$0xf0]  ;;  %v2272_v33 = vld [vmem:[%s2454_s10 + $0x294] sm:$0xf] }
  0x91   : > { %1357 = vmatpush.bf16.msra.mxu3 %v1872_v36  ;;  %v2160_v36 = vor.u32 %v2314_v27, %v2157_v28  ;;  %v1936_v16 = vor.u32 %v2258_v5, %v1933_v8  ;;  %v2256_v27 = vld [vmem:[%s2454_s10 + $0x214] sm:$0xf]  ;;  %v1925_v28 = vld [vmem:[%s2454_s10 + $0x218] sm:$0xf0] }
  0x92   : > { %1301 = vmatpush.bf16.msra.mxu0 %v1672_v46  ;;  %v1949_v46 = vld [vmem:[%s2454_s10 + $0x248] sm:$0xf0]  ;;  %v1989_v34 = vld [vmem:[%s2454_s10 + $0x298] sm:$0xf0] }
  0x93   : > { %1320 = vmatpush.bf16.msra.mxu1 %v1736_v47  ;;  %v1952_v50 = vor.u32 %v2262_v45, %v1949_v46  ;;  %v1992_v43 = vor.u32 %v2272_v33, %v1989_v34  ;;  %v2270_v45 = vld [vmem:[%s2454_s10 + $0x284] sm:$0xf]  ;;  %v1920_v46 = vor.u32 %v2254_v41, %v1917_v42  ;;  %v273_v33 = vld [vmem:[#allocation2 + $0x18] sm:$0xff] }
  0x94   : > { %1339 = vmatpush.bf16.msra.mxu2 %v1800_v37  ;;  %v2280_v37 = vld [vmem:[%s2454_s10 + $0x2d4] sm:$0xf] }
  0x95   : > { %1358 = vmatpush.bf16.msra.mxu3 %v1864_v51  ;;  %v2024_v47 = vor.u32 %v2280_v37, %v2021_v38  ;;  %v2310_v51 = vld [vmem:[%s2454_s10 + $0x3c4] sm:$0xf]  ;;  %v2304_v37 = vld [vmem:[%s2454_s10 + $0x394] sm:$0xf]  ;;  %v2117_v38 = vld [vmem:[%s2454_s10 + $0x398] sm:$0xf0] }
  0x96   : > { %1302 = vmatpush.bf16.msra.mxu0 %v1664_v0  ;;  %v2290_v0 = vld [vmem:[%s2454_s10 + $0x324] sm:$0xf]  ;;  %v2120_v44 = vor.u32 %v2304_v37, %v2117_v38 }
  0x97   : > { %1321 = vmatpush.bf16.msra.mxu1 %v1728_v2  ;;  %v2061_v2 = vld [vmem:[%s2454_s10 + $0x328] sm:$0xf0] }
  0x98   : > { %1340 = vmatpush.bf16.msra.mxu2 %v1792_v52  ;;  %v2141_v52 = vld [vmem:[%s2454_s10 + $0x3c8] sm:$0xf0]  ;;  %v2064_v15 = vor.u32 %v2290_v0, %v2061_v2 }
  0x99   : > { %1359 = vmatpush.bf16.msra.mxu3 %v1856_v11  ;;  %1303 = vmatmul.bf16.vlgmr.msra.gmra.mxu0 %v2538_v1  ;;  %v2278_v1 = vld [vmem:[%s2454_s10 + $0x2c4] sm:$0xf]  ;;  %v2008_v11 = vor.u32 %v2276_v57, %v2005_v58 }
  0x9a   : > { %1371 = vmatpush.bf16.msrb.mxu0 %v1976_v12  ;;  %1322 = vmatmul.bf16.vlgmr.msra.gmra.mxu1 %v2543_v6  ;;  %v2013_v6 = vld [vmem:[%s2454_s10 + $0x2c8] sm:$0xf0]  ;;  %v2136_v12 = vor.u32 %v2308_v62, %v2133_v63 }
  0x9b   : > { %1390 = vmatpush.bf16.msrb.mxu1 %v2040_v13  ;;  %1341 = vmatmul.bf16.vlgmr.msra.gmra.mxu2 %v2545_v7  ;;  %v2292_v7 = vld [vmem:[%s2454_s10 + $0x334] sm:$0xf]  ;;  %v2016_v55 = vor.u32 %v2278_v1, %v2013_v6  ;;  %v2274_v13 = vld [vmem:[%s2454_s10 + $0x2a4] sm:$0xf] }
  0x9c   : > { %1409 = vmatpush.bf16.msrb.mxu2 %v2104_v56  ;;  %1360 = vmatmul.bf16.vlgmr.msra.gmra.mxu3 %v2549_v10  ;;  %v2069_v10 = vld [vmem:[%s2454_s10 + $0x338] sm:$0xf0]  ;;  %v2144_v56 = vor.u32 %v2310_v51, %v2141_v52 }
  0x9d   : > { %1428 = vmatpush.bf16.msrb.mxu3 %v2168_v14  ;;  %v2072_v59 = vor.u32 %v2292_v7, %v2069_v10  ;;  %v1997_v14 = vld [vmem:[%s2454_s10 + $0x2a8] sm:$0xf0] }
  0x9e   : > { %1372 = vmatpush.bf16.msrb.mxu0 %v1968_v24  ;;  %v2053_v24 = vld [vmem:[%s2454_s10 + $0x318] sm:$0xf0]  ;;  %v2000_v29 = vor.u32 %v2274_v13, %v1997_v14 }
  0x9f   : > { %1391 = vmatpush.bf16.msrb.mxu1 %v2032_v35  ;;  %v2056_v35 = vor.u32 %v2288_v21, %v2053_v24 }
  0xa0   : > { %1410 = vmatpush.bf16.msrb.mxu2 %v2096_v19  ;;  %v2306_v19 = vld [vmem:[%s2454_s10 + $0x3a4] sm:$0xf] }
  0xa1   : > { %1429 = vmatpush.bf16.msrb.mxu3 %v2160_v36  ;;  %v2128_v32 = vor.u32 %v2306_v19, %v2125_v20  ;;  %v1928_v36 = vor.u32 %v2256_v27, %v1925_v28 }
  0xa2   : > { %1373 = vmatpush.bf16.msrb.mxu0 %v1960_v40  ;;  %v2045_v40 = vld [vmem:[%s2454_s10 + $0x308] sm:$0xf0] }
  0xa3   : > { %1392 = vmatpush.bf16.msrb.mxu1 %v2024_v47  ;;  %v1981_v47 = vld [vmem:[%s2454_s10 + $0x288] sm:$0xf0] }
  0xa4   : > { %1411 = vmatpush.bf16.msrb.mxu2 %v2088_v39  ;;  %v2286_v39 = vld [vmem:[%s2454_s10 + $0x304] sm:$0xf]  ;;  %v1984_v1 = vor.u32 %v2270_v45, %v1981_v47 }
  0xa5   : > { %1430 = vmatpush.bf16.msrb.mxu3 %v2152_v48  ;;  %v2109_v48 = vld [vmem:[%s2454_s10 + $0x388] sm:$0xf0] }
  0xa6   : > { %1374 = vmatpush.bf16.msrb.mxu0 %v1952_v50 }
  0xa7   : > { %1393 = vmatpush.bf16.msrb.mxu1 %v2016_v55 }
  0xa8   : > { %1412 = vmatpush.bf16.msrb.mxu2 %v2080_v49 }
  0xa9   : > { %1431 = vmatpush.bf16.msrb.mxu3 %v2144_v56  ;;  %1308 = vmatmul.bf16.gmra.mxu0 %v2590_v61  ;;  %v2048_v61 = vor.u32 %v2286_v39, %v2045_v40 }
  0xaa   : > { %1375 = vmatpush.bf16.msrb.mxu0 %v1944_v60  ;;  %1327 = vmatmul.bf16.gmra.mxu1 %v2595_v3  ;;  %v2302_v3 = vld [vmem:[%s2454_s10 + $0x384] sm:$0xf] }
  0xab   : > { %1394 = vmatpush.bf16.msrb.mxu1 %v2008_v11  ;;  %1346 = vmatmul.bf16.gmra.mxu2 %v2597_v4  ;;  %v2112_v6 = vor.u32 %v2302_v3, %v2109_v48 }
  0xac   : > { %1413 = vmatpush.bf16.msrb.mxu2 %v2072_v59  ;;  %1365 = vmatmul.bf16.gmra.mxu3 %v2601_v9 }
  0xad   : > { %1432 = vmatpush.bf16.msrb.mxu3 %v2136_v12  ;;  %v271_v12 = vld [vmem:[#allocation2 + $0x30] sm:$0xff] }
  0xae   : > { %1376 = vmatpush.bf16.msrb.mxu0 %v1936_v16 }
  0xaf   : > { %1395 = vmatpush.bf16.msrb.mxu1 %v2000_v29 }
  0xb0   : > { %1414 = vmatpush.bf16.msrb.mxu2 %v2064_v15 }
  0xb1   : > { %1433 = vmatpush.bf16.msrb.mxu3 %v2128_v32 }
  0xb2   : > { %1377 = vmatpush.bf16.msrb.mxu0 %v1928_v36 }
  0xb3   : > { %1396 = vmatpush.bf16.msrb.mxu1 %v1992_v43 }
  0xb4   : > { %1415 = vmatpush.bf16.msrb.mxu2 %v2056_v35 }
  0xb5   : > { %1434 = vmatpush.bf16.msrb.mxu3 %v2120_v44 }
  0xb6   : > { %1378 = vmatpush.bf16.msrb.mxu0 %v1920_v46 }
  0xb7   : > { %1397 = vmatpush.bf16.msrb.mxu1 %v1984_v1 }
  0xb8   : > { %1416 = vmatpush.bf16.msrb.mxu2 %v2048_v61  ;;  %v275_v61 = vld [vmem:[#allocation2 + $0x8] sm:$0xff] }
  0xb9   : > { %1435 = vmatpush.bf16.msrb.mxu3 %v2112_v6  ;;  %1379 = vmatmul.bf16.vlgmr.msrb.gmra.mxu0 %v2650_v17 }
  0xba   : > { %1398 = vmatmul.bf16.vlgmr.msrb.gmra.mxu1 %v2652_v18 }
  0xbb   : > { %1417 = vmatmul.bf16.vlgmr.msrb.gmra.mxu2 %v2657_v22 }
  0xbc   : > { %1436 = vmatmul.bf16.vlgmr.msrb.gmra.mxu3 %v2659_v23 }
  0xc9   : > { %1384 = vmatmul.bf16.gmra.mxu0 %v2702_v25 }
  0xca   : > { %1403 = vmatmul.bf16.gmra.mxu1 %v2704_v26 }
  0xcb   : > { %1422 = vmatmul.bf16.gmra.mxu2 %v2709_v30 }
  0xcc   : > { %1441 = vmatmul.bf16.gmra.mxu3 %v2711_v31 }
  0xd6   : > { %v1152_v4 = vpop.f32.mrf.mxu0 }
  0xd7   : > { %v1171_v9 = vpop.f32.mrf.mxu1 }
  0xd8   : > { %v1172_v54 = vadd.f32 %v1171_v9, %v1152_v4 }
  0xde   : > { %v1190_v49 = vpop.f32.mrf.mxu2  ;;  %v1154_v51 = vpop.f32.mrf.mxu0 }
  0xdf   : > { %v1209_v50 = vpop.f32.mrf.mxu3  ;;  %v1173_v17 = vpop.f32.mrf.mxu1  ;;  %v1191_v26 = vadd.f32 %v1190_v49, %v1172_v54 }
  0xe0   : > { %v1174_v58 = vadd.f32 %v1173_v17, %v1154_v51 }
  0xe1   : > { %v1210_v56 = vadd.f32 %v1209_v50, %v1191_v26  ;;  %v277_v50 = vld [vmem:[#allocation2 + $0x28] sm:$0xff] }
  0xe6   : > { %v1192_v52 = vpop.f32.mrf.mxu2  ;;  %v1157_v7 = vpop.f32.mrf.mxu0 }
  0xe7   : > { %v1211_v18 = vpop.f32.mrf.mxu3  ;;  %v1176_v22 = vpop.f32.mrf.mxu1  ;;  %v1193_v60 = vadd.f32 %v1192_v52, %v1174_v58 }
  0xe8   : > { %v1177_v13 = vadd.f32 %v1176_v22, %v1157_v7 }
  0xe9   : > { %v1212_v2 = vadd.f32 %v1211_v18, %v1193_v60 }
  0xee   : > { %v1195_v10 = vpop.f32.mrf.mxu2  ;;  %v1159_v53 = vpop.f32.mrf.mxu0 }
  0xef   : > { %v1214_v23 = vpop.f32.mrf.mxu3  ;;  %v1178_v25 = vpop.f32.mrf.mxu1  ;;  %v1196_v16 = vadd.f32 %v1195_v10, %v1177_v13 }
  0xf0   : > { %v1179_v34 = vadd.f32 %v1178_v25, %v1159_v53 }
  0xf1   : > { %v1215_v27 = vadd.f32 %v1214_v23, %v1196_v16 }
  0xf6   : > { %v1197_v55 = vpop.f32.mrf.mxu2  ;;  %v1228_v31 = vpop.f32.mrf.mxu0 }
  0xf7   : > { %v1216_v30 = vpop.f32.mrf.mxu3  ;;  %v1247_v57 = vpop.f32.mrf.mxu1  ;;  %v1229_v59 = vadd.f32 %v1228_v31, %v1210_v56  ;;  %v1198_v37 = vadd.f32 %v1197_v55, %v1179_v34 }
  0xf9   : > { %v1248_v62 = vadd.f32 %v1247_v57, %v1229_v59  ;;  %v1217_v42 = vadd.f32 %v1216_v30, %v1198_v37 }
  0xfe   : > { %v1266_v63 = vpop.f32.mrf.mxu2  ;;  %v1230_v8 = vpop.f32.mrf.mxu0 }
  0xff   : > { %v1285_v0 = vpop.f32.mrf.mxu3  ;;  %v1267_v5 = vadd.f32 %v1266_v63, %v1248_v62  ;;  %v1249_v11 = vpop.f32.mrf.mxu1  ;;  %v1231_v15 = vadd.f32 %v1230_v8, %v1212_v2 }
 0x101   : > { %v1286_v14 = vadd.f32 %v1285_v0, %v1267_v5  ;;  %v1250_v20 = vadd.f32 %v1249_v11, %v1231_v15  ;;  %v272_v15 = vld [vmem:[#allocation2] sm:$0xff] }
 0x103   : > { %v1447_v19 = vadd.f32 %v1286_v14, %v271_v12 }
 0x105   : > { %1455 = vst [vmem:[#allocation2 + $0x30] sm:$0xff] %v1447_v19 }
 0x106   : > { %v1268_v21 = vpop.f32.mrf.mxu2  ;;  %v1233_v29 = vpop.f32.mrf.mxu0 }
 0x107   : > { %v1287_v24 = vpop.f32.mrf.mxu3  ;;  %v1269_v28 = vadd.f32 %v1268_v21, %v1250_v20  ;;  %v1252_v32 = vpop.f32.mrf.mxu1  ;;  %v1234_v36 = vadd.f32 %v1233_v29, %v1215_v27 }
 0x109   : > { %v1288_v35 = vadd.f32 %v1287_v24, %v1269_v28  ;;  %v1253_v39 = vadd.f32 %v1252_v32, %v1234_v36  ;;  %v274_v36 = vld [vmem:[#allocation2 + $0x10] sm:$0xff] }
 0x10b   : > { %v1449_v38 = vadd.f32 %v1288_v35, %v273_v33 }
 0x10d   : > { %1457 = vst [vmem:[#allocation2 + $0x18] sm:$0xff] %v1449_v38 }
 0x10e   : > { %v1271_v40 = vpop.f32.mrf.mxu2  ;;  %v1235_v44 = vpop.f32.mrf.mxu0 }
 0x10f   : > { %v1290_v41 = vpop.f32.mrf.mxu3  ;;  %v1272_v43 = vadd.f32 %v1271_v40, %v1253_v39  ;;  %v1254_v45 = vpop.f32.mrf.mxu1  ;;  %v1236_v47 = vadd.f32 %v1235_v44, %v1217_v42 }
 0x111   : > { %v1291_v46 = vadd.f32 %v1290_v41, %v1272_v43  ;;  %v1255_v48 = vadd.f32 %v1254_v45, %v1236_v47 }
 0x113   : > { %v1451_v3 = vadd.f32 %v1291_v46, %v275_v61 }
 0x115   : > { %1459 = vst [vmem:[#allocation2 + $0x8] sm:$0xff] %v1451_v3  ;;  %v276_v3 = vld [vmem:[#allocation2 + $0x20] sm:$0xff] }
 0x116   : > { %v1273_v1 = vpop.f32.mrf.mxu2  ;;  %v1304_v9 = vpop.f32.mrf.mxu0 }
 0x117   : > { %v1292_v6 = vpop.f32.mrf.mxu3  ;;  %v1274_v4 = vadd.f32 %v1273_v1, %v1255_v48  ;;  %v1323_v49 = vpop.f32.mrf.mxu1 }
 0x118   : > { %v1324_v56 = vadd.f32 %v1323_v49, %v1304_v9 }
 0x119   : > { %v1293_v51 = vadd.f32 %v1292_v6, %v1274_v4 }
 0x11b   : > { %v1453_v17 = vadd.f32 %v1293_v51, %v277_v50  ;;  %v278_v51 = vld [vmem:[#allocation2 + $0x38] sm:$0xff] }
 0x11d   : > { %1461 = vst [vmem:[#allocation2 + $0x28] sm:$0xff] %v1453_v17 }
 0x11e   : > { %v1342_v52 = vpop.f32.mrf.mxu2  ;;  %v1306_v7 = vpop.f32.mrf.mxu0 }
 0x11f   : > { %v1361_v18 = vpop.f32.mrf.mxu3  ;;  %v1325_v22 = vpop.f32.mrf.mxu1  ;;  %v1343_v31 = vadd.f32 %v1342_v52, %v1324_v56 }
 0x120   : > { %v1326_v63 = vadd.f32 %v1325_v22, %v1306_v7 }
 0x121   : > { %v1362_v59 = vadd.f32 %v1361_v18, %v1343_v31 }
 0x126   : > { %v1344_v10 = vpop.f32.mrf.mxu2  ;;  %v1309_v53 = vpop.f32.mrf.mxu0 }
 0x127   : > { %v1363_v23 = vpop.f32.mrf.mxu3  ;;  %v1328_v25 = vpop.f32.mrf.mxu1  ;;  %v1345_v2 = vadd.f32 %v1344_v10, %v1326_v63 }
 0x128   : > { %v1329_v19 = vadd.f32 %v1328_v25, %v1309_v53 }
 0x129   : > { %v1364_v12 = vadd.f32 %v1363_v23, %v1345_v2 }
 0x12e   : > { %v1347_v54 = vpop.f32.mrf.mxu2  ;;  %v1311_v55 = vpop.f32.mrf.mxu0 }
 0x12f   : > { %v1366_v26 = vpop.f32.mrf.mxu3  ;;  %v1330_v30 = vpop.f32.mrf.mxu1  ;;  %v1348_v24 = vadd.f32 %v1347_v54, %v1329_v19 }
 0x130   : > { %v1331_v37 = vadd.f32 %v1330_v30, %v1311_v55 }
 0x131   : > { %v1367_v33 = vadd.f32 %v1366_v26, %v1348_v24 }
 0x136   : > { %v1349_v57 = vpop.f32.mrf.mxu2  ;;  %v1380_v60 = vpop.f32.mrf.mxu0 }
 0x137   : > { %v1368_v58 = vpop.f32.mrf.mxu3  ;;  %v1399_v62 = vpop.f32.mrf.mxu1  ;;  %v1381_v0 = vadd.f32 %v1380_v60, %v1362_v59  ;;  %v1350_v41 = vadd.f32 %v1349_v57, %v1331_v37 }
 0x139   : > { %v1400_v5 = vadd.f32 %v1399_v62, %v1381_v0  ;;  %v1369_v61 = vadd.f32 %v1368_v58, %v1350_v41 }
 0x13e   : > { %v1418_v8 = vpop.f32.mrf.mxu2  ;;  %v1382_v14 = vpop.f32.mrf.mxu0 }
 0x13f   : > { %v1437_v11 = vpop.f32.mrf.mxu3  ;;  %v1419_v13 = vadd.f32 %v1418_v8, %v1400_v5  ;;  %v1401_v16 = vpop.f32.mrf.mxu1  ;;  %v1383_v21 = vadd.f32 %v1382_v14, %v1364_v12 }
 0x141   : > { %v1438_v20 = vadd.f32 %v1437_v11, %v1419_v13  ;;  %v1402_v28 = vadd.f32 %v1401_v16, %v1383_v21 }
 0x143   : > { %v1448_v27 = vadd.f32 %v1438_v20, %v272_v15 }
 0x145   : > { %1456 = vst [vmem:[#allocation2] sm:$0xff] %v1448_v27 }
 0x146   : > { %v1420_v29 = vpop.f32.mrf.mxu2  ;;  %v1385_v35 = vpop.f32.mrf.mxu0 }
 0x147   : > { %v1439_v32 = vpop.f32.mrf.mxu3  ;;  %v1421_v34 = vadd.f32 %v1420_v29, %v1402_v28  ;;  %v1386_v39 = vadd.f32 %v1385_v35, %v1367_v33  ;;  %v1404_v40 = vpop.f32.mrf.mxu1 }
 0x149   : > { %v1440_v38 = vadd.f32 %v1439_v32, %v1421_v34  ;;  %v1405_v43 = vadd.f32 %v1404_v40, %v1386_v39 }
 0x14b   : > { %v1450_v42 = vadd.f32 %v1440_v38, %v274_v36 }
 0x14d   : > { %1458 = vst [vmem:[#allocation2 + $0x10] sm:$0xff] %v1450_v42 }
 0x14e   : > { %v1423_v44 = vpop.f32.mrf.mxu2  ;;  %v1387_v47 = vpop.f32.mrf.mxu0 }
 0x14f   : > { %v1442_v45 = vpop.f32.mrf.mxu3  ;;  %v1424_v46 = vadd.f32 %v1423_v44, %v1405_v43  ;;  %v1388_v1 = vadd.f32 %v1387_v47, %v1369_v61  ;;  %v1406_v4 = vpop.f32.mrf.mxu1 }
 0x151   : > { %v1443_v48 = vadd.f32 %v1442_v45, %v1424_v46  ;;  %v1407_v9 = vadd.f32 %v1406_v4, %v1388_v1 }
 0x153   : > { %v1452_v6 = vadd.f32 %v1443_v48, %v276_v3 }
 0x155   : > { %1460 = vst [vmem:[#allocation2 + $0x20] sm:$0xff] %v1452_v6 }
 0x156   : > { %v1425_v49 = vpop.f32.mrf.mxu2 }
 0x157   : > { %v1426_v50 = vadd.f32 %v1425_v49, %v1407_v9  ;;  %v1444_v17 = vpop.f32.mrf.mxu3 }
 0x159   : > { %v1445_v52 = vadd.f32 %v1444_v17, %v1426_v50  ;;  %1466 = sbr.rel (%p2169_p10) target bundleno = 369 (0x171), region = 67 }
 0x15b   : > { %v1454_v18 = vadd.f32 %v1445_v52, %v278_v51 }
 0x15d   : > { %1462 = vst [vmem:[#allocation2 + $0x38] sm:$0xff] %v1454_v18 }
 0x15e   : > { %v1467_v7 = vld [vmem:[#allocation2 + $0x30] sm:$0xff]  ;;  %v1468_v22 = vld [vmem:[#allocation2] sm:$0xff]  ;;  %v1469_v54 = vld [vmem:[#allocation2 + $0x18] sm:$0xff] }
 0x15f   : > { %v1475_v10 = vld [vmem:[%s2842_s2] sm:$0x3]  ;;  %v1470_v26 = vld [vmem:[#allocation2 + $0x10] sm:$0xff]  ;;  %v1471_v56 = vld [vmem:[#allocation2 + $0x8] sm:$0xff] }
 0x160   : > { %v1477_v23 = vperm.slane %v1475_v10, 0  ;;  %v1478_v53 = vperm.slane %v1475_v10, 1  ;;  %v1489_v25 = vld [vmem:[%s2843_s3] sm:$0x3]  ;;  %v1473_v57 = vld [vmem:[#allocation2 + $0x28] sm:$0xff] }
 0x161   : > { %v1491_v55 = vperm.slane %v1489_v25, 0  ;;  %v1492_v30 = vperm.slane %v1489_v25, 1  ;;  %v1472_v31 = vld [vmem:[#allocation2 + $0x20] sm:$0xff] }
 0x162   : > { %v1481_v58 = vmul.f32 %v1477_v23, %v1467_v7  ;;  %v1482_v59 = vmul.f32 %v1478_v53, %v1468_v22  ;;  %v1483_v60 = vmul.f32 %v1477_v23, %v1469_v54  ;;  %v1484_v62 = vmul.f32 %v1478_v53, %v1470_v26 }
 0x163   : > { %v1485_v0 = vmul.f32 %v1477_v23, %v1471_v56  ;;  %v1486_v2 = vmul.f32 %v1478_v53, %v1472_v31  ;;  %v1487_v5 = vmul.f32 %v1477_v23, %v1473_v57 }
 0x164   : > { %v1474_v63 = vld [vmem:[#allocation2 + $0x38] sm:$0xff]  ;;  %v1495_v11 = vadd.f32 %v1491_v55, %v1481_v58  ;;  %v1496_v12 = vadd.f32 %v1492_v30, %v1482_v59  ;;  %v1497_v13 = vadd.f32 %v1491_v55, %v1483_v60  ;;  %v1498_v14 = vadd.f32 %v1492_v30, %v1484_v62 }
 0x165   : > { %v1488_v8 = vmul.f32 %v1478_v53, %v1474_v63  ;;  %v1499_v15 = vadd.f32 %v1491_v55, %v1485_v0  ;;  %v1500_v16 = vadd.f32 %v1492_v30, %v1486_v2  ;;  %v1501_v19 = vadd.f32 %v1491_v55, %v1487_v5 }
 0x166   : > { %vm1503_vm0 = vcmp.ge.f32.partialorder %v1495_v11, 0.0  ;;  %vm1504_vm1 = vcmp.ge.f32.partialorder %v1496_v12, 0.0  ;;  %v1511_v21 = vmul.f32 0.2, %v1495_v11  ;;  %v1512_v24 = vmul.f32 0.2, %v1496_v12 }
 0x167   : > { %v1502_v20 = vadd.f32 %v1492_v30, %v1488_v8  ;;  %vm1505_vm2 = vcmp.ge.f32.partialorder %v1497_v13, 0.0  ;;  %vm1506_vm3 = vcmp.ge.f32.partialorder %v1498_v14, 0.0  ;;  %v1513_v27 = vmul.f32 0.2, %v1497_v13 }
 0x168   : > { %v1514_v28 = vmul.f32 0.2, %v1498_v14  ;;  %v1519_v29 = vsel %vm1503_vm0, %v1495_v11, %v1511_v21  ;;  %v1520_v32 = vsel %vm1504_vm1, %v1496_v12, %v1512_v24  ;;  %vm1507_vm4 = vcmp.ge.f32.partialorder %v1499_v15, 0.0 }
 0x169   : > { %vm1508_vm5 = vcmp.ge.f32.partialorder %v1500_v16, 0.0  ;;  %v1527_v33 = vpack.c.bf16 %v1520_v32, %v1519_v29  ;;  %v1521_v34 = vsel %vm1505_vm2, %v1497_v13, %v1513_v27  ;;  %v1515_v36 = vmul.f32 0.2, %v1499_v15 }
 0x16a   : > { %v1522_v35 = vsel %vm1506_vm3, %v1498_v14, %v1514_v28  ;;  %v1516_v38 = vmul.f32 0.2, %v1500_v16  ;;  %vm1509_vm6 = vcmp.ge.f32.partialorder %v1501_v19, 0.0  ;;  %vm1510_vm7 = vcmp.ge.f32.partialorder %v1502_v20, 0.0 }
 0x16b   : > { %v1528_v37 = vpack.c.bf16 %v1522_v35, %v1521_v34  ;;  %1531 = vst [vmem:[%s2844_s4] sm:$0xff] %v1527_v33  ;;  %v1523_v39 = vsel %vm1507_vm4, %v1499_v15, %v1515_v36  ;;  %v1517_v40 = vmul.f32 0.2, %v1501_v19  ;;  %v1518_v41 = vmul.f32 0.2, %v1502_v20 }
 0x16c   : > { %v1524_v42 = vsel %vm1508_vm5, %v1500_v16, %v1516_v38 }
 0x16d   : > { %1532 = vst [vmem:[%s2844_s4 + $0x8] sm:$0xff] %v1528_v37  ;;  %v1529_v43 = vpack.c.bf16 %v1524_v42, %v1523_v39  ;;  %v1525_v44 = vsel %vm1509_vm6, %v1501_v19, %v1517_v40  ;;  %v1526_v45 = vsel %vm1510_vm7, %v1502_v20, %v1518_v41 }
 0x16e   : > { %v1530_v61 = vpack.c.bf16 %v1526_v45, %v1525_v44 }
 0x16f   : > { %1533 = vst [vmem:[%s2844_s4 + $0x10] sm:$0xff] %v1529_v43 }
 0x170   : > { %1534 = vst [vmem:[%s2844_s4 + $0x18] sm:$0xff] %v1530_v61 }
 0x171 PF: > { %p11_p11 = scmp.ge.s32.totalorder %s2412_s19, 4   ;;  %s2845_s15 = smov %s2361_s16 }
 0x172   : > { %s2846_s16 = smov %s2421_s22  ;;  %s2847_s17 = smov %s2412_s19 }
 0x173   :  { %13 = sbr.rel (!%p11_p11) target bundleno = 2 (0x2), region = 101 }

// kernel: discriminator_forward.8
= control target key start
LH: loop header
LB: loop body
LE: loop exit
PB: predicated region body
PF: predicated region fallthrough
CT: control target
= control target key end

     0   :  { %s3643_s15 = smov 0   ;;  %s4258_s0 = inlined_call_operand.vmem [shape: bf16[8,4096], index: 0, kind: input, shape index: {}]   ;;  %s4259_s1 = inlined_call_operand.vmem [shape: bf16[4096,512], index: 1, kind: input, shape index: {}]   ;;  %s4260_s2 = inlined_call_operand.vmem [shape: f32[1,512], index: 2, kind: input, shape index: {}]   ;;  %s4261_s3 = inlined_call_operand.vmem [shape: f32[1,512], index: 3, kind: input, shape index: {}]   ;;  %s4262_s4 = inlined_call_operand.vmem [shape: bf16[8,512], index: 4, kind: output, shape index: {}]  }
   0x1 LB: > { %s3649_s16 = sadd.s32 4294967295, %s3615_s15   ;;  %p2309_p0 = scmp.ge.s32.totalorder %s3615_s15, 1  ;;  %s3615_s15 = sphi %s3643_s15, %s14_s15  }
   0x2   : > { %p170_p1 = scmp.lt.s32.totalorder %s3615_s15, 5 }
   0x4   : > { %p171_p2 = pnand %p2309_p0, %p170_p1 }
   0x5   : > { %s2310_s17 = sshll.u32 (!%p171_p2), %s3649_s16, 3  ;;  %s2312_s18 = sshll.u32 (!%p171_p2), %s3649_s16, 7 }
   0x6   : > { %174 = sbr.rel (%p171_p2) target bundleno = 441 (0x1b9), region = 36  ;;  %p198_p3 = scmp.lt.s32.totalorder (!%p171_p2), %s2310_s17, 31 }
   0x7   : > { %p204_p4 = scmp.lt.s32.totalorder (!%p171_p2), %s2312_s18, 511  ;;  %p2315_p5 = scmp.ne.s32.totalorder (!%p171_p2), %s3649_s16, 0 }
   0xb   : > { %s4264_s17 = smov (!%p198_p3, %s2310_s17), 31  ;;  %s4266_s18 = smov (!%p204_p4, %s2312_s18), 511 }
   0xc   : > { %s2311_s19 = sshll.u32 %s4264_s17, 2  ;;  %s3343_s23 = sshll.u32 %s4266_s18, 4 }
   0xd   : > { %s3658_s22 = scalar_lea.vmem %s4258_s0, %s2311_s19  ;;  %s3663_s26 = scalar_lea.vmem %s4259_s1, %s3343_s23 }
   0xe   : > { %213 = sbr.rel (%p2315_p5) target bundleno = 24 (0x18), region = 40 }
  0x13   : > { %v3617_v0 = vmov 0.0  }
  0x14   : > { %214 = vst [vmem:[#allocation2 + $0x10] sm:$0xff] %v3617_v0 }
  0x15   : > { %215 = vst [vmem:[#allocation2] sm:$0xff] %v3617_v0 }
  0x16   : > { %216 = vst [vmem:[#allocation2 + $0x18] sm:$0xff] %v3617_v0 }
  0x17   : > { %217 = vst [vmem:[#allocation2 + $0x8] sm:$0xff] %v3617_v0 }
  0x18 PF: > { %v2430_v1 = vld [vmem:[%s3663_s26 + $0xe0] sm:$0xf]  ;;  %v3374_v2 = vld [vmem:[%s3663_s26 + $0xec] sm:$0xf0]  ;;  %p3340_p6 = scmp.ne.s32.totalorder %s3649_s16, 3 }
  0x19   : > { %v2558_v3 = vld [vmem:[%s3663_s26 + $0x1e0] sm:$0xf]  ;;  %v2431_v4 = vor.u32 %v3374_v2, %v2430_v1  ;;  %v3406_v5 = vld [vmem:[%s3663_s26 + $0x1ec] sm:$0xf0] }
  0x1a   : > { %v2686_v6 = vld [vmem:[%s3663_s26 + $0x2e0] sm:$0xf]  ;;  %v3438_v7 = vld [vmem:[%s3663_s26 + $0x2ec] sm:$0xf0]  ;;  %v2559_v8 = vor.u32 %v3406_v5, %v2558_v3 }
  0x1b   : > { %v2687_v9 = vor.u32 %v3438_v7, %v2686_v6  ;;  %v2814_v10 = vld [vmem:[%s3663_s26 + $0x3e0] sm:$0xf]  ;;  %v3470_v11 = vld [vmem:[%s3663_s26 + $0x3ec] sm:$0xf0]  ;;  %1790 = vmatpush.bf16.msra.mxu0 %v2431_v4 }
  0x1c   : > { %v2414_v12 = vld [vmem:[%s3663_s26 + $0xc0] sm:$0xf]  ;;  %v2815_v13 = vor.u32 %v3470_v11, %v2814_v10  ;;  %v3370_v14 = vld [vmem:[%s3663_s26 + $0xcc] sm:$0xf0]  ;;  %1803 = vmatpush.bf16.msra.mxu1 %v2559_v8 }
  0x1d   : > { %v2542_v15 = vld [vmem:[%s3663_s26 + $0x1c0] sm:$0xf]  ;;  %v3402_v16 = vld [vmem:[%s3663_s26 + $0x1cc] sm:$0xf0]  ;;  %1816 = vmatpush.bf16.msra.mxu2 %v2687_v9  ;;  %v2415_v17 = vor.u32 %v3370_v14, %v2414_v12 }
  0x1e   : > { %v2543_v18 = vor.u32 %v3402_v16, %v2542_v15  ;;  %v2670_v19 = vld [vmem:[%s3663_s26 + $0x2c0] sm:$0xf]  ;;  %v3434_v20 = vld [vmem:[%s3663_s26 + $0x2cc] sm:$0xf0]  ;;  %1829 = vmatpush.bf16.msra.mxu3 %v2815_v13 }
  0x1f   : > { %v2798_v21 = vld [vmem:[%s3663_s26 + $0x3c0] sm:$0xf]  ;;  %v2671_v22 = vor.u32 %v3434_v20, %v2670_v19  ;;  %v3466_v23 = vld [vmem:[%s3663_s26 + $0x3cc] sm:$0xf0]  ;;  %1791 = vmatpush.bf16.msra.mxu0 %v2415_v17 }
  0x20   : > { %v2398_v24 = vld [vmem:[%s3663_s26 + $0xa0] sm:$0xf]  ;;  %v3366_v25 = vld [vmem:[%s3663_s26 + $0xac] sm:$0xf0]  ;;  %v2799_v26 = vor.u32 %v3466_v23, %v2798_v21  ;;  %1804 = vmatpush.bf16.msra.mxu1 %v2543_v18 }
  0x21   : > { %v2526_v27 = vld [vmem:[%s3663_s26 + $0x1a0] sm:$0xf]  ;;  %v3398_v28 = vld [vmem:[%s3663_s26 + $0x1ac] sm:$0xf0]  ;;  %v2399_v30 = vor.u32 %v3366_v25, %v2398_v24  ;;  %1817 = vmatpush.bf16.msra.mxu2 %v2671_v22 }
  0x22   : > { %v2654_v29 = vld [vmem:[%s3663_s26 + $0x2a0] sm:$0xf]  ;;  %v3430_v31 = vld [vmem:[%s3663_s26 + $0x2ac] sm:$0xf0]  ;;  %v2527_v34 = vor.u32 %v3398_v28, %v2526_v27  ;;  %1830 = vmatpush.bf16.msra.mxu3 %v2799_v26 }
  0x23   : > { %v2782_v32 = vld [vmem:[%s3663_s26 + $0x3a0] sm:$0xf]  ;;  %v3462_v33 = vld [vmem:[%s3663_s26 + $0x3ac] sm:$0xf0]  ;;  %v2655_v35 = vor.u32 %v3430_v31, %v2654_v29  ;;  %1792 = vmatpush.bf16.msra.mxu0 %v2399_v30 }
  0x24   : > { %v2382_v36 = vld [vmem:[%s3663_s26 + $0x80] sm:$0xf]  ;;  %v3362_v37 = vld [vmem:[%s3663_s26 + $0x8c] sm:$0xf0]  ;;  %v2783_v39 = vor.u32 %v3462_v33, %v2782_v32  ;;  %1805 = vmatpush.bf16.msra.mxu1 %v2527_v34 }
  0x25   : > { %v2510_v38 = vld [vmem:[%s3663_s26 + $0x180] sm:$0xf]  ;;  %v3394_v40 = vld [vmem:[%s3663_s26 + $0x18c] sm:$0xf0]  ;;  %v2383_v45 = vor.u32 %v3362_v37, %v2382_v36  ;;  %1818 = vmatpush.bf16.msra.mxu2 %v2655_v35 }
  0x26   : > { %v2638_v41 = vld [vmem:[%s3663_s26 + $0x280] sm:$0xf]  ;;  %v3426_v42 = vld [vmem:[%s3663_s26 + $0x28c] sm:$0xf0]  ;;  %v2511_v46 = vor.u32 %v3394_v40, %v2510_v38  ;;  %1831 = vmatpush.bf16.msra.mxu3 %v2783_v39 }
  0x27   : > { %v2766_v43 = vld [vmem:[%s3663_s26 + $0x380] sm:$0xf]  ;;  %v3458_v44 = vld [vmem:[%s3663_s26 + $0x38c] sm:$0xf0]  ;;  %v2639_v47 = vor.u32 %v3426_v42, %v2638_v41  ;;  %1793 = vmatpush.bf16.msra.mxu0 %v2383_v45 }
  0x28   : > { %v2366_v48 = vld [vmem:[%s3663_s26 + $0x60] sm:$0xf]  ;;  %v3358_v49 = vld [vmem:[%s3663_s26 + $0x6c] sm:$0xf0]  ;;  %v2767_v51 = vor.u32 %v3458_v44, %v2766_v43  ;;  %1806 = vmatpush.bf16.msra.mxu1 %v2511_v46 }
  0x29   : > { %v2494_v50 = vld [vmem:[%s3663_s26 + $0x160] sm:$0xf]  ;;  %v3390_v52 = vld [vmem:[%s3663_s26 + $0x16c] sm:$0xf0]  ;;  %v2367_v57 = vor.u32 %v3358_v49, %v2366_v48  ;;  %1819 = vmatpush.bf16.msra.mxu2 %v2639_v47 }
  0x2a   : > { %v2622_v53 = vld [vmem:[%s3663_s26 + $0x260] sm:$0xf]  ;;  %v3422_v54 = vld [vmem:[%s3663_s26 + $0x26c] sm:$0xf0]  ;;  %v2495_v58 = vor.u32 %v3390_v52, %v2494_v50  ;;  %1832 = vmatpush.bf16.msra.mxu3 %v2767_v51 }
  0x2b   : > { %v2750_v55 = vld [vmem:[%s3663_s26 + $0x360] sm:$0xf]  ;;  %v3454_v56 = vld [vmem:[%s3663_s26 + $0x36c] sm:$0xf0]  ;;  %v2623_v59 = vor.u32 %v3422_v54, %v2622_v53  ;;  %1794 = vmatpush.bf16.msra.mxu0 %v2367_v57 }
  0x2c   : > { %v2350_v60 = vld [vmem:[%s3663_s26 + $0x40] sm:$0xf]  ;;  %v3354_v61 = vld [vmem:[%s3663_s26 + $0x4c] sm:$0xf0]  ;;  %v2751_v63 = vor.u32 %v3454_v56, %v2750_v55  ;;  %1807 = vmatpush.bf16.msra.mxu1 %v2495_v58 }
  0x2d   : > { %v2478_v62 = vld [vmem:[%s3663_s26 + $0x140] sm:$0xf]  ;;  %v3386_v0 = vld [vmem:[%s3663_s26 + $0x14c] sm:$0xf0]  ;;  %v2351_v5 = vor.u32 %v3354_v61, %v2350_v60  ;;  %1820 = vmatpush.bf16.msra.mxu2 %v2623_v59  ;;  %v223_v59 = vld [vmem:[%s3658_s22 + $0x8] sm:$0xff] }
  0x2e   : > { %v2606_v1 = vld [vmem:[%s3663_s26 + $0x240] sm:$0xf]  ;;  %v3418_v2 = vld [vmem:[%s3663_s26 + $0x24c] sm:$0xf0]  ;;  %v2479_v6 = vor.u32 %v3386_v0, %v2478_v62  ;;  %1833 = vmatpush.bf16.msra.mxu3 %v2751_v63  ;;  %v488_v0 = vunpack.c.l.b16 %v223_v59 }
  0x2f   : > { %v2734_v3 = vld [vmem:[%s3663_s26 + $0x340] sm:$0xf]  ;;  %v3450_v4 = vld [vmem:[%s3663_s26 + $0x34c] sm:$0xf0]  ;;  %v2607_v7 = vor.u32 %v3418_v2, %v2606_v1  ;;  %1795 = vmatpush.bf16.msra.mxu0 %v2351_v5  ;;  %v489_v1 = vunpack.c.h.b16 %v223_v59 }
  0x30   : > { %v2334_v8 = vld [vmem:[%s3663_s26 + $0x20] sm:$0xf]  ;;  %v3350_v9 = vld [vmem:[%s3663_s26 + $0x2c] sm:$0xf0]  ;;  %v2735_v11 = vor.u32 %v3450_v4, %v2734_v3  ;;  %1808 = vmatpush.bf16.msra.mxu1 %v2479_v6  ;;  %v3755_v5 = vpack.c.b16 %v488_v0, %v488_v0 }
  0x31   : > { %v2462_v10 = vld [vmem:[%s3663_s26 + $0x120] sm:$0xf]  ;;  %v3382_v12 = vld [vmem:[%s3663_s26 + $0x12c] sm:$0xf0]  ;;  %v2335_v17 = vor.u32 %v3350_v9, %v2334_v8  ;;  %1821 = vmatpush.bf16.msra.mxu2 %v2607_v7  ;;  %v3758_v7 = vpack.c.b16 %v489_v1, %v489_v1 }
  0x32   : > { %v2590_v13 = vld [vmem:[%s3663_s26 + $0x220] sm:$0xf]  ;;  %v3414_v14 = vld [vmem:[%s3663_s26 + $0x22c] sm:$0xf0]  ;;  %v2463_v20 = vor.u32 %v3382_v12, %v2462_v10  ;;  %1834 = vmatpush.bf16.msra.mxu3 %v2735_v11 }
  0x33   : > { %v2718_v15 = vld [vmem:[%s3663_s26 + $0x320] sm:$0xf]  ;;  %v3446_v16 = vld [vmem:[%s3663_s26 + $0x32c] sm:$0xf0]  ;;  %v2591_v21 = vor.u32 %v3414_v14, %v2590_v13  ;;  %1796 = vmatpush.bf16.msra.mxu0 %v2335_v17 }
  0x34   : > { %v2318_v18 = vld [vmem:[%s3663_s26] sm:$0xf]  ;;  %v3346_v19 = vld [vmem:[%s3663_s26 + $0xc] sm:$0xf0]  ;;  %v2719_v25 = vor.u32 %v3446_v16, %v2718_v15  ;;  %1809 = vmatpush.bf16.msra.mxu1 %v2463_v20 }
  0x35   : > { %v2446_v22 = vld [vmem:[%s3663_s26 + $0x100] sm:$0xf]  ;;  %v3378_v23 = vld [vmem:[%s3663_s26 + $0x10c] sm:$0xf0]  ;;  %v2319_v32 = vor.u32 %v3346_v19, %v2318_v18  ;;  %1822 = vmatpush.bf16.msra.mxu2 %v2591_v21 }
  0x36   : > { %v2574_v24 = vld [vmem:[%s3663_s26 + $0x200] sm:$0xf]  ;;  %v3410_v26 = vld [vmem:[%s3663_s26 + $0x20c] sm:$0xf0]  ;;  %v2447_v36 = vor.u32 %v3378_v23, %v2446_v22  ;;  %1835 = vmatpush.bf16.msra.mxu3 %v2719_v25 }
  0x37   : > { %v2702_v27 = vld [vmem:[%s3663_s26 + $0x300] sm:$0xf]  ;;  %v3442_v28 = vld [vmem:[%s3663_s26 + $0x30c] sm:$0xf0]  ;;  %v2575_v37 = vor.u32 %v3410_v26, %v2574_v24  ;;  %1797 = vmatpush.bf16.msra.mxu0 %v2319_v32 }
  0x38   : > { %v2942_v29 = vld [vmem:[%s3663_s26 + $0x4e0] sm:$0xf]  ;;  %v3502_v30 = vld [vmem:[%s3663_s26 + $0x4ec] sm:$0xf0]  ;;  %v2703_v40 = vor.u32 %v3442_v28, %v2702_v27  ;;  %1810 = vmatpush.bf16.msra.mxu1 %v2447_v36 }
  0x39   : > { %v3070_v31 = vld [vmem:[%s3663_s26 + $0x5e0] sm:$0xf]  ;;  %v3534_v33 = vld [vmem:[%s3663_s26 + $0x5ec] sm:$0xf0]  ;;  %v2943_v41 = vor.u32 %v3502_v30, %v2942_v29  ;;  %1823 = vmatpush.bf16.msra.mxu2 %v2575_v37 }
  0x3a   : > { %v3198_v34 = vld [vmem:[%s3663_s26 + $0x6e0] sm:$0xf]  ;;  %v3566_v35 = vld [vmem:[%s3663_s26 + $0x6ec] sm:$0xf0]  ;;  %v3071_v42 = vor.u32 %v3534_v33, %v3070_v31  ;;  %1836 = vmatpush.bf16.msra.mxu3 %v2703_v40 }
  0x3b   : > { %v3326_v38 = vld [vmem:[%s3663_s26 + $0x7e0] sm:$0xf]  ;;  %v3598_v39 = vld [vmem:[%s3663_s26 + $0x7ec] sm:$0xf0]  ;;  %v3199_v43 = vor.u32 %v3566_v35, %v3198_v34  ;;  %1842 = vmatpush.bf16.msrb.mxu0 %v2943_v41 }
  0x3c   : > { %v2926_v44 = vld [vmem:[%s3663_s26 + $0x4c0] sm:$0xf]  ;;  %v3498_v45 = vld [vmem:[%s3663_s26 + $0x4cc] sm:$0xf0]  ;;  %v3327_v47 = vor.u32 %v3598_v39, %v3326_v38  ;;  %1855 = vmatpush.bf16.msrb.mxu1 %v3071_v42  ;;  %1824 = vmatmul.bf16.vlgmr.msra.gmra.mxu2 %v3755_v5 }
  0x3d   : > { %v3054_v46 = vld [vmem:[%s3663_s26 + $0x5c0] sm:$0xf]  ;;  %v3530_v48 = vld [vmem:[%s3663_s26 + $0x5cc] sm:$0xf0]  ;;  %v2927_v53 = vor.u32 %v3498_v45, %v2926_v44  ;;  %1868 = vmatpush.bf16.msrb.mxu2 %v3199_v43  ;;  %1837 = vmatmul.bf16.vlgmr.msra.gmra.mxu3 %v3758_v7 }
  0x3e   : > { %v3182_v49 = vld [vmem:[%s3663_s26 + $0x6c0] sm:$0xf]  ;;  %v3562_v50 = vld [vmem:[%s3663_s26 + $0x6cc] sm:$0xf0]  ;;  %v3055_v55 = vor.u32 %v3530_v48, %v3054_v46  ;;  %1881 = vmatpush.bf16.msrb.mxu3 %v3327_v47 }
  0x3f   : > { %v3310_v51 = vld [vmem:[%s3663_s26 + $0x7c0] sm:$0xf]  ;;  %v3594_v52 = vld [vmem:[%s3663_s26 + $0x7cc] sm:$0xf0]  ;;  %v3183_v56 = vor.u32 %v3562_v50, %v3182_v49  ;;  %1843 = vmatpush.bf16.msrb.mxu0 %v2927_v53 }
  0x40   : > { %v2910_v54 = vld [vmem:[%s3663_s26 + $0x4a0] sm:$0xf]  ;;  %v3494_v57 = vld [vmem:[%s3663_s26 + $0x4ac] sm:$0xf0]  ;;  %v3311_v60 = vor.u32 %v3594_v52, %v3310_v51  ;;  %1856 = vmatpush.bf16.msrb.mxu1 %v3055_v55 }
  0x41   : > { %v3038_v58 = vld [vmem:[%s3663_s26 + $0x5a0] sm:$0xf]  ;;  %v3526_v61 = vld [vmem:[%s3663_s26 + $0x5ac] sm:$0xf0]  ;;  %v2911_v4 = vor.u32 %v3494_v57, %v2910_v54  ;;  %1869 = vmatpush.bf16.msrb.mxu2 %v3183_v56 }
  0x42   : > { %v3166_v62 = vld [vmem:[%s3663_s26 + $0x6a0] sm:$0xf]  ;;  %v3558_v63 = vld [vmem:[%s3663_s26 + $0x6ac] sm:$0xf0]  ;;  %v3039_v8 = vor.u32 %v3526_v61, %v3038_v58  ;;  %1882 = vmatpush.bf16.msrb.mxu3 %v3311_v60 }
  0x43   : > { %v3294_v2 = vld [vmem:[%s3663_s26 + $0x7a0] sm:$0xf]  ;;  %v3590_v3 = vld [vmem:[%s3663_s26 + $0x7ac] sm:$0xf0]  ;;  %v3167_v9 = vor.u32 %v3558_v63, %v3166_v62  ;;  %1844 = vmatpush.bf16.msrb.mxu0 %v2911_v4  ;;  %v225_v4 = vld [vmem:[%s3658_s22 + $0x18] sm:$0xff] }
  0x44   : > { %v222_v6 = vld [vmem:[%s3658_s22] sm:$0xff]  ;;  %v3490_v11 = vld [vmem:[%s3663_s26 + $0x48c] sm:$0xf0]  ;;  %v3295_v15 = vor.u32 %v3590_v3, %v3294_v2  ;;  %1857 = vmatpush.bf16.msrb.mxu1 %v3039_v8 }
  0x45   : > { %v2894_v10 = vld [vmem:[%s3663_s26 + $0x480] sm:$0xf]  ;;  %v486_v13 = vunpack.c.l.b16 %v222_v6  ;;  %v487_v14 = vunpack.c.h.b16 %v222_v6  ;;  %v3522_v16 = vld [vmem:[%s3663_s26 + $0x58c] sm:$0xf0]  ;;  %1870 = vmatpush.bf16.msrb.mxu2 %v3167_v9 }
  0x46   : > { %v3022_v12 = vld [vmem:[%s3663_s26 + $0x580] sm:$0xf]  ;;  %v3554_v18 = vld [vmem:[%s3663_s26 + $0x68c] sm:$0xf0]  ;;  %v2895_v23 = vor.u32 %v3490_v11, %v2894_v10  ;;  %1883 = vmatpush.bf16.msrb.mxu3 %v3295_v15  ;;  %v3372_v11 = vld [vmem:[%s3663_s26 + $0xe4] sm:$0xf] }
  0x47   : > { %v3150_v17 = vld [vmem:[%s3663_s26 + $0x680] sm:$0xf]  ;;  %v3586_v20 = vld [vmem:[%s3663_s26 + $0x78c] sm:$0xf0]  ;;  %v3769_v21 = vpack.c.b16 %v486_v13, %v486_v13  ;;  %v3772_v22 = vpack.c.b16 %v487_v14, %v487_v14  ;;  %v3023_v24 = vor.u32 %v3522_v16, %v3022_v12  ;;  %v2432_v12 = vld [vmem:[%s3663_s26 + $0xf0] sm:$0xf0] }
  0x48   : > { %v3278_v19 = vld [vmem:[%s3663_s26 + $0x780] sm:$0xf]  ;;  %v3151_v25 = vor.u32 %v3554_v18, %v3150_v17  ;;  %v3486_v27 = vld [vmem:[%s3663_s26 + $0x46c] sm:$0xf0]  ;;  %1845 = vmatpush.bf16.msrb.mxu0 %v2895_v23  ;;  %v3404_v13 = vld [vmem:[%s3663_s26 + $0x1e4] sm:$0xf]  ;;  %v492_v18 = vunpack.c.l.b16 %v225_v4 }
  0x49   : > { %v2878_v26 = vld [vmem:[%s3663_s26 + $0x460] sm:$0xf]  ;;  %v3279_v29 = vor.u32 %v3586_v20, %v3278_v19  ;;  %v3518_v30 = vld [vmem:[%s3663_s26 + $0x56c] sm:$0xf0]  ;;  %1798 = vmatmul.bf16.vlgmr.msra.gmra.mxu0 %v3769_v21  ;;  %1811 = vmatmul.bf16.vlgmr.msra.gmra.mxu1 %v3772_v22  ;;  %v2560_v15 = vld [vmem:[%s3663_s26 + $0x1f0] sm:$0xf0] }
  0x4a   : > { %v3006_v28 = vld [vmem:[%s3663_s26 + $0x560] sm:$0xf]  ;;  %v3550_v32 = vld [vmem:[%s3663_s26 + $0x66c] sm:$0xf0]  ;;  %v2879_v35 = vor.u32 %v3486_v27, %v2878_v26  ;;  %1858 = vmatpush.bf16.msrb.mxu1 %v3023_v24  ;;  %1871 = vmatpush.bf16.msrb.mxu2 %v3151_v25  ;;  %v3436_v16 = vld [vmem:[%s3663_s26 + $0x2e4] sm:$0xf]  ;;  %v493_v26 = vunpack.c.h.b16 %v225_v4 }
  0x4b   : > { %v3134_v31 = vld [vmem:[%s3663_s26 + $0x660] sm:$0xf]  ;;  %v3582_v34 = vld [vmem:[%s3663_s26 + $0x76c] sm:$0xf0]  ;;  %v3007_v36 = vor.u32 %v3518_v30, %v3006_v28  ;;  %1884 = vmatpush.bf16.msrb.mxu3 %v3279_v29  ;;  %v2688_v17 = vld [vmem:[%s3663_s26 + $0x2f0] sm:$0xf0]  ;;  %v2435_v28 = vor.u32 %v3372_v11, %v2432_v12  ;;  %v2563_v30 = vor.u32 %v3404_v13, %v2560_v15 }
  0x4c   : > { %v3262_v33 = vld [vmem:[%s3663_s26 + $0x760] sm:$0xf]  ;;  %v3135_v37 = vor.u32 %v3550_v32, %v3134_v31  ;;  %v3482_v39 = vld [vmem:[%s3663_s26 + $0x44c] sm:$0xf0]  ;;  %1846 = vmatpush.bf16.msrb.mxu0 %v2879_v35  ;;  %v3468_v23 = vld [vmem:[%s3663_s26 + $0x3e4] sm:$0xf]  ;;  %v2691_v31 = vor.u32 %v3436_v16, %v2688_v17 }
  0x4d   : > { %v2862_v38 = vld [vmem:[%s3663_s26 + $0x440] sm:$0xf]  ;;  %v3263_v41 = vor.u32 %v3582_v34, %v3262_v33  ;;  %v3514_v42 = vld [vmem:[%s3663_s26 + $0x54c] sm:$0xf0]  ;;  %v2816_v24 = vld [vmem:[%s3663_s26 + $0x3f0] sm:$0xf0] }
  0x4e   : > { %v2990_v40 = vld [vmem:[%s3663_s26 + $0x540] sm:$0xf]  ;;  %v3546_v44 = vld [vmem:[%s3663_s26 + $0x64c] sm:$0xf0]  ;;  %v2863_v47 = vor.u32 %v3482_v39, %v2862_v38  ;;  %1859 = vmatpush.bf16.msrb.mxu1 %v3007_v36  ;;  %1872 = vmatpush.bf16.msrb.mxu2 %v3135_v37  ;;  %v3368_v32 = vld [vmem:[%s3663_s26 + $0xc4] sm:$0xf]  ;;  %v2819_v35 = vor.u32 %v3468_v23, %v2816_v24  ;;  %v3824_v39 = vpack.c.b16 %v492_v18, %v492_v18 }
  0x4f   : > { %v3118_v43 = vld [vmem:[%s3663_s26 + $0x640] sm:$0xf]  ;;  %v3578_v46 = vld [vmem:[%s3663_s26 + $0x74c] sm:$0xf0]  ;;  %v2991_v48 = vor.u32 %v3514_v42, %v2990_v40  ;;  %1885 = vmatpush.bf16.msrb.mxu3 %v3263_v41  ;;  %v2416_v33 = vld [vmem:[%s3663_s26 + $0xd0] sm:$0xf0] }
  0x50   : > { %v3246_v45 = vld [vmem:[%s3663_s26 + $0x740] sm:$0xf]  ;;  %v3119_v49 = vor.u32 %v3546_v44, %v3118_v43  ;;  %v3478_v51 = vld [vmem:[%s3663_s26 + $0x42c] sm:$0xf0]  ;;  %1847 = vmatpush.bf16.msrb.mxu0 %v2863_v47  ;;  %v3400_v34 = vld [vmem:[%s3663_s26 + $0x1c4] sm:$0xf]  ;;  %v3830_v43 = vpack.c.b16 %v493_v26, %v493_v26  ;;  %v2419_v44 = vor.u32 %v3368_v32, %v2416_v33 }
  0x51   : > { %v2846_v50 = vld [vmem:[%s3663_s26 + $0x420] sm:$0xf]  ;;  %v3247_v53 = vor.u32 %v3578_v46, %v3246_v45  ;;  %v3510_v54 = vld [vmem:[%s3663_s26 + $0x52c] sm:$0xf0]  ;;  %v2544_v36 = vld [vmem:[%s3663_s26 + $0x1d0] sm:$0xf0] }
  0x52   : > { %v2974_v52 = vld [vmem:[%s3663_s26 + $0x520] sm:$0xf]  ;;  %v3542_v56 = vld [vmem:[%s3663_s26 + $0x62c] sm:$0xf0]  ;;  %v2847_v60 = vor.u32 %v3478_v51, %v2846_v50  ;;  %1860 = vmatpush.bf16.msrb.mxu1 %v2991_v48  ;;  %1873 = vmatpush.bf16.msrb.mxu2 %v3119_v49  ;;  %v3432_v37 = vld [vmem:[%s3663_s26 + $0x2c4] sm:$0xf]  ;;  %v2547_v46 = vor.u32 %v3400_v34, %v2544_v36 }
  0x53   : > { %v3102_v55 = vld [vmem:[%s3663_s26 + $0x620] sm:$0xf]  ;;  %v3574_v58 = vld [vmem:[%s3663_s26 + $0x72c] sm:$0xf0]  ;;  %v2975_v0 = vor.u32 %v3510_v54, %v2974_v52  ;;  %1886 = vmatpush.bf16.msrb.mxu3 %v3247_v53  ;;  %v2672_v38 = vld [vmem:[%s3663_s26 + $0x2d0] sm:$0xf0] }
  0x54   : > { %v3230_v57 = vld [vmem:[%s3663_s26 + $0x720] sm:$0xf]  ;;  %v3474_v61 = vld [vmem:[%s3663_s26 + $0x40c] sm:$0xf0]  ;;  %v3103_v1 = vor.u32 %v3542_v56, %v3102_v55  ;;  %1848 = vmatpush.bf16.msrb.mxu0 %v2847_v60  ;;  %v3464_v40 = vld [vmem:[%s3663_s26 + $0x3c4] sm:$0xf]  ;;  %v2675_v47 = vor.u32 %v3432_v37, %v2672_v38 }
  0x55   : > { %v2830_v59 = vld [vmem:[%s3663_s26 + $0x400] sm:$0xf]  ;;  %v3506_v63 = vld [vmem:[%s3663_s26 + $0x50c] sm:$0xf0]  ;;  %v3231_v6 = vor.u32 %v3574_v58, %v3230_v57  ;;  %v2800_v41 = vld [vmem:[%s3663_s26 + $0x3d0] sm:$0xf0] }
  0x56   : > { %v2958_v62 = vld [vmem:[%s3663_s26 + $0x500] sm:$0xf]  ;;  %v3538_v3 = vld [vmem:[%s3663_s26 + $0x60c] sm:$0xf0]  ;;  %v2831_v14 = vor.u32 %v3474_v61, %v2830_v59  ;;  %1861 = vmatpush.bf16.msrb.mxu1 %v2975_v0  ;;  %1874 = vmatpush.bf16.msrb.mxu2 %v3103_v1  ;;  %v3364_v48 = vld [vmem:[%s3663_s26 + $0xa4] sm:$0xf]  ;;  %v2803_v51 = vor.u32 %v3464_v40, %v2800_v41 }
  0x57   : > { %v3086_v2 = vld [vmem:[%s3663_s26 + $0x600] sm:$0xf]  ;;  %v3570_v9 = vld [vmem:[%s3663_s26 + $0x70c] sm:$0xf0]  ;;  %v2959_v19 = vor.u32 %v3506_v63, %v2958_v62  ;;  %1887 = vmatpush.bf16.msrb.mxu3 %v3231_v6  ;;  %v2400_v49 = vld [vmem:[%s3663_s26 + $0xb0] sm:$0xf0] }
  0x58   : > { %v3214_v8 = vld [vmem:[%s3663_s26 + $0x700] sm:$0xf]  ;;  %v224_v10 = vld [vmem:[%s3658_s22 + $0x10] sm:$0xff]  ;;  %v3087_v20 = vor.u32 %v3538_v3, %v3086_v2  ;;  %1849 = vmatpush.bf16.msrb.mxu0 %v2831_v14  ;;  %v3396_v50 = vld [vmem:[%s3663_s26 + $0x1a4] sm:$0xf]  ;;  %v2403_v57 = vor.u32 %v3364_v48, %v2400_v49 }
  0x59   : > { %v490_v25 = vunpack.c.l.b16 %v224_v10  ;;  %v3215_v27 = vor.u32 %v3570_v9, %v3214_v8  ;;  %v491_v29 = vunpack.c.h.b16 %v224_v10  ;;  %v2528_v52 = vld [vmem:[%s3663_s26 + $0x1b0] sm:$0xf0]  ;;  %v3428_v53 = vld [vmem:[%s3663_s26 + $0x2a4] sm:$0xf] }
  0x5a   : > { %1862 = vmatpush.bf16.msrb.mxu1 %v2959_v19  ;;  %1875 = vmatpush.bf16.msrb.mxu2 %v3087_v20  ;;  %v2656_v54 = vld [vmem:[%s3663_s26 + $0x2b0] sm:$0xf0]  ;;  %v3460_v55 = vld [vmem:[%s3663_s26 + $0x3a4] sm:$0xf]  ;;  %v2531_v58 = vor.u32 %v3396_v50, %v2528_v52 }
  0x5b   : > { %v3828_v42 = vpack.c.b16 %v490_v25, %v490_v25  ;;  %1888 = vmatpush.bf16.msrb.mxu3 %v3215_v27  ;;  %v3832_v45 = vpack.c.b16 %v491_v29, %v491_v29  ;;  %v2784_v56 = vld [vmem:[%s3663_s26 + $0x3b0] sm:$0xf0]  ;;  %v2659_v59 = vor.u32 %v3428_v53, %v2656_v54  ;;  %v3360_v60 = vld [vmem:[%s3663_s26 + $0x84] sm:$0xf] }
  0x5c   : > { %1894 = vmatpush.bf16.msra.mxu0 %v2435_v28  ;;  %v2384_v61 = vld [vmem:[%s3663_s26 + $0x90] sm:$0xf0]  ;;  %v3392_v62 = vld [vmem:[%s3663_s26 + $0x184] sm:$0xf]  ;;  %v2787_v63 = vor.u32 %v3460_v55, %v2784_v56 }
  0x5d   : > { %1876 = vmatmul.bf16.vlgmr.msrb.gmra.mxu2 %v3824_v39  ;;  %1850 = vmatmul.bf16.vlgmr.msrb.gmra.mxu0 %v3828_v42  ;;  %v2512_v0 = vld [vmem:[%s3663_s26 + $0x190] sm:$0xf0]  ;;  %v3424_v1 = vld [vmem:[%s3663_s26 + $0x284] sm:$0xf]  ;;  %v2387_v6 = vor.u32 %v3360_v60, %v2384_v61 }
  0x5e   : > { %1907 = vmatpush.bf16.msra.mxu1 %v2563_v30  ;;  %1920 = vmatpush.bf16.msra.mxu2 %v2691_v31  ;;  %v2640_v2 = vld [vmem:[%s3663_s26 + $0x290] sm:$0xf0]  ;;  %v3456_v3 = vld [vmem:[%s3663_s26 + $0x384] sm:$0xf]  ;;  %v2515_v8 = vor.u32 %v3392_v62, %v2512_v0 }
  0x5f   : > { %1933 = vmatpush.bf16.msra.mxu3 %v2819_v35  ;;  %1863 = vmatmul.bf16.vlgmr.msrb.gmra.mxu1 %v3832_v45  ;;  %v2768_v4 = vld [vmem:[%s3663_s26 + $0x390] sm:$0xf0]  ;;  %v2643_v9 = vor.u32 %v3424_v1, %v2640_v2  ;;  %v3356_v10 = vld [vmem:[%s3663_s26 + $0x64] sm:$0xf] }
  0x60   : > { %1889 = vmatmul.bf16.vlgmr.msrb.gmra.mxu3 %v3830_v43  ;;  %1895 = vmatpush.bf16.msra.mxu0 %v2419_v44  ;;  %v2368_v11 = vld [vmem:[%s3663_s26 + $0x70] sm:$0xf0]  ;;  %v3388_v12 = vld [vmem:[%s3663_s26 + $0x164] sm:$0xf]  ;;  %v2771_v13 = vor.u32 %v3456_v3, %v2768_v4 }
  0x61   : > { %v2496_v14 = vld [vmem:[%s3663_s26 + $0x170] sm:$0xf0]  ;;  %v3420_v15 = vld [vmem:[%s3663_s26 + $0x264] sm:$0xf]  ;;  %v2371_v19 = vor.u32 %v3356_v10, %v2368_v11 }
  0x62   : > { %1908 = vmatpush.bf16.msra.mxu1 %v2547_v46  ;;  %1921 = vmatpush.bf16.msra.mxu2 %v2675_v47  ;;  %v2624_v16 = vld [vmem:[%s3663_s26 + $0x270] sm:$0xf0]  ;;  %v3452_v17 = vld [vmem:[%s3663_s26 + $0x364] sm:$0xf]  ;;  %v2499_v20 = vor.u32 %v3388_v12, %v2496_v14 }
  0x63   : > { %1934 = vmatpush.bf16.msra.mxu3 %v2803_v51  ;;  %v2752_v18 = vld [vmem:[%s3663_s26 + $0x370] sm:$0xf0]  ;;  %v2627_v23 = vor.u32 %v3420_v15, %v2624_v16  ;;  %v3352_v24 = vld [vmem:[%s3663_s26 + $0x44] sm:$0xf] }
  0x64   : > { %1896 = vmatpush.bf16.msra.mxu0 %v2403_v57  ;;  %v2352_v25 = vld [vmem:[%s3663_s26 + $0x50] sm:$0xf0]  ;;  %v3384_v26 = vld [vmem:[%s3663_s26 + $0x144] sm:$0xf]  ;;  %v2755_v27 = vor.u32 %v3452_v17, %v2752_v18 }
  0x65   : > { %v2480_v28 = vld [vmem:[%s3663_s26 + $0x150] sm:$0xf0]  ;;  %v3416_v29 = vld [vmem:[%s3663_s26 + $0x244] sm:$0xf]  ;;  %v2355_v33 = vor.u32 %v3352_v24, %v2352_v25 }
  0x66   : > { %1909 = vmatpush.bf16.msra.mxu1 %v2531_v58  ;;  %1922 = vmatpush.bf16.msra.mxu2 %v2659_v59  ;;  %v2608_v30 = vld [vmem:[%s3663_s26 + $0x250] sm:$0xf0]  ;;  %v3448_v31 = vld [vmem:[%s3663_s26 + $0x344] sm:$0xf]  ;;  %v2483_v34 = vor.u32 %v3384_v26, %v2480_v28 }
  0x67   : > { %1935 = vmatpush.bf16.msra.mxu3 %v2787_v63  ;;  %v2736_v32 = vld [vmem:[%s3663_s26 + $0x350] sm:$0xf0]  ;;  %v2611_v35 = vor.u32 %v3416_v29, %v2608_v30  ;;  %v3348_v36 = vld [vmem:[%s3663_s26 + $0x24] sm:$0xf] }
  0x68   : > { %1897 = vmatpush.bf16.msra.mxu0 %v2387_v6  ;;  %v2336_v37 = vld [vmem:[%s3663_s26 + $0x30] sm:$0xf0]  ;;  %v3380_v38 = vld [vmem:[%s3663_s26 + $0x124] sm:$0xf]  ;;  %v2739_v40 = vor.u32 %v3448_v31, %v2736_v32 }
  0x69   : > { %v2464_v41 = vld [vmem:[%s3663_s26 + $0x130] sm:$0xf0]  ;;  %v3412_v44 = vld [vmem:[%s3663_s26 + $0x224] sm:$0xf]  ;;  %v2339_v49 = vor.u32 %v3348_v36, %v2336_v37 }
  0x6a   : > { %1910 = vmatpush.bf16.msra.mxu1 %v2515_v8  ;;  %1923 = vmatpush.bf16.msra.mxu2 %v2643_v9  ;;  %v2592_v46 = vld [vmem:[%s3663_s26 + $0x230] sm:$0xf0]  ;;  %v3444_v47 = vld [vmem:[%s3663_s26 + $0x324] sm:$0xf]  ;;  %v2467_v52 = vor.u32 %v3380_v38, %v2464_v41 }
  0x6b   : > { %1936 = vmatpush.bf16.msra.mxu3 %v2771_v13  ;;  %v2720_v48 = vld [vmem:[%s3663_s26 + $0x330] sm:$0xf0]  ;;  %v3344_v50 = vld [vmem:[%s3663_s26 + $0x4] sm:$0xf]  ;;  %v2595_v53 = vor.u32 %v3412_v44, %v2592_v46 }
  0x6c   : > { %1898 = vmatpush.bf16.msra.mxu0 %v2371_v19  ;;  %v2320_v51 = vld [vmem:[%s3663_s26 + $0x10] sm:$0xf0]  ;;  %v3376_v54 = vld [vmem:[%s3663_s26 + $0x104] sm:$0xf]  ;;  %v2723_v57 = vor.u32 %v3444_v47, %v2720_v48 }
  0x6d   : > { %v2448_v55 = vld [vmem:[%s3663_s26 + $0x110] sm:$0xf0]  ;;  %v3408_v56 = vld [vmem:[%s3663_s26 + $0x204] sm:$0xf]  ;;  %v2323_v0 = vor.u32 %v3344_v50, %v2320_v51 }
  0x6e   : > { %1911 = vmatpush.bf16.msra.mxu1 %v2499_v20  ;;  %1924 = vmatpush.bf16.msra.mxu2 %v2627_v23  ;;  %v2576_v58 = vld [vmem:[%s3663_s26 + $0x210] sm:$0xf0]  ;;  %v3440_v59 = vld [vmem:[%s3663_s26 + $0x304] sm:$0xf]  ;;  %v2451_v4 = vor.u32 %v3376_v54, %v2448_v55 }
  0x6f   : > { %1937 = vmatpush.bf16.msra.mxu3 %v2755_v27  ;;  %v2704_v60 = vld [vmem:[%s3663_s26 + $0x310] sm:$0xf0]  ;;  %v3500_v61 = vld [vmem:[%s3663_s26 + $0x4e4] sm:$0xf]  ;;  %v2579_v6 = vor.u32 %v3408_v56, %v2576_v58 }
  0x70   : > { %1899 = vmatpush.bf16.msra.mxu0 %v2355_v33  ;;  %v2944_v62 = vld [vmem:[%s3663_s26 + $0x4f0] sm:$0xf0]  ;;  %v3532_v63 = vld [vmem:[%s3663_s26 + $0x5e4] sm:$0xf]  ;;  %v2707_v10 = vor.u32 %v3440_v59, %v2704_v60 }
  0x71   : > { %v3072_v1 = vld [vmem:[%s3663_s26 + $0x5f0] sm:$0xf0]  ;;  %v3564_v2 = vld [vmem:[%s3663_s26 + $0x6e4] sm:$0xf]  ;;  %v2947_v11 = vor.u32 %v3500_v61, %v2944_v62 }
  0x72   : > { %1912 = vmatpush.bf16.msra.mxu1 %v2483_v34  ;;  %1925 = vmatpush.bf16.msra.mxu2 %v2611_v35  ;;  %v3200_v3 = vld [vmem:[%s3663_s26 + $0x6f0] sm:$0xf0]  ;;  %v3596_v8 = vld [vmem:[%s3663_s26 + $0x7e4] sm:$0xf]  ;;  %v3075_v12 = vor.u32 %v3532_v63, %v3072_v1 }
  0x73   : > { %1938 = vmatpush.bf16.msra.mxu3 %v2739_v40  ;;  %v3328_v9 = vld [vmem:[%s3663_s26 + $0x7f0] sm:$0xf0]  ;;  %v3203_v13 = vor.u32 %v3564_v2, %v3200_v3  ;;  %v3496_v14 = vld [vmem:[%s3663_s26 + $0x4c4] sm:$0xf] }
  0x74   : > { %1900 = vmatpush.bf16.msra.mxu0 %v2339_v49  ;;  %v2928_v15 = vld [vmem:[%s3663_s26 + $0x4d0] sm:$0xf0]  ;;  %v3528_v16 = vld [vmem:[%s3663_s26 + $0x5c4] sm:$0xf]  ;;  %v3331_v17 = vor.u32 %v3596_v8, %v3328_v9 }
  0x75   : > { %v3056_v18 = vld [vmem:[%s3663_s26 + $0x5d0] sm:$0xf0]  ;;  %v3560_v19 = vld [vmem:[%s3663_s26 + $0x6c4] sm:$0xf]  ;;  %v2931_v25 = vor.u32 %v3496_v14, %v2928_v15 }
  0x76   : > { %1913 = vmatpush.bf16.msra.mxu1 %v2467_v52  ;;  %1926 = vmatpush.bf16.msra.mxu2 %v2595_v53  ;;  %v3184_v20 = vld [vmem:[%s3663_s26 + $0x6d0] sm:$0xf0]  ;;  %v3592_v23 = vld [vmem:[%s3663_s26 + $0x7c4] sm:$0xf]  ;;  %v3059_v26 = vor.u32 %v3528_v16, %v3056_v18 }
  0x77   : > { %1939 = vmatpush.bf16.msra.mxu3 %v2723_v57  ;;  %v3312_v24 = vld [vmem:[%s3663_s26 + $0x7d0] sm:$0xf0]  ;;  %v3187_v27 = vor.u32 %v3560_v19, %v3184_v20  ;;  %v3492_v28 = vld [vmem:[%s3663_s26 + $0x4a4] sm:$0xf] }
  0x78   : > { %1901 = vmatpush.bf16.msra.mxu0 %v2323_v0  ;;  %v2912_v29 = vld [vmem:[%s3663_s26 + $0x4b0] sm:$0xf0]  ;;  %v3524_v30 = vld [vmem:[%s3663_s26 + $0x5a4] sm:$0xf]  ;;  %v3315_v31 = vor.u32 %v3592_v23, %v3312_v24 }
  0x79   : > { %v3040_v32 = vld [vmem:[%s3663_s26 + $0x5b0] sm:$0xf0]  ;;  %v3556_v33 = vld [vmem:[%s3663_s26 + $0x6a4] sm:$0xf]  ;;  %v2915_v37 = vor.u32 %v3492_v28, %v2912_v29 }
  0x7a   : > { %1914 = vmatpush.bf16.msra.mxu1 %v2451_v4  ;;  %1927 = vmatpush.bf16.msra.mxu2 %v2579_v6  ;;  %v3168_v34 = vld [vmem:[%s3663_s26 + $0x6b0] sm:$0xf0]  ;;  %v3588_v35 = vld [vmem:[%s3663_s26 + $0x7a4] sm:$0xf]  ;;  %v3043_v38 = vor.u32 %v3524_v30, %v3040_v32 }
  0x7b   : > { %1940 = vmatpush.bf16.msra.mxu3 %v2707_v10  ;;  %v3296_v36 = vld [vmem:[%s3663_s26 + $0x7b0] sm:$0xf0]  ;;  %1902 = vmatmul.bf16.vlgmr.msra.gmra.mxu0 %v3769_v21  ;;  %v3171_v40 = vor.u32 %v3556_v33, %v3168_v34  ;;  %v3488_v41 = vld [vmem:[%s3663_s26 + $0x484] sm:$0xf] }
  0x7c   : > { %1946 = vmatpush.bf16.msrb.mxu0 %v2947_v11  ;;  %v2896_v44 = vld [vmem:[%s3663_s26 + $0x490] sm:$0xf0]  ;;  %v3520_v46 = vld [vmem:[%s3663_s26 + $0x584] sm:$0xf]  ;;  %v3299_v47 = vor.u32 %v3588_v35, %v3296_v36 }
  0x7d   : > { %1928 = vmatmul.bf16.vlgmr.msra.gmra.mxu2 %v3755_v5  ;;  %1915 = vmatmul.bf16.vlgmr.msra.gmra.mxu1 %v3772_v22  ;;  %v3024_v48 = vld [vmem:[%s3663_s26 + $0x590] sm:$0xf0]  ;;  %v3552_v49 = vld [vmem:[%s3663_s26 + $0x684] sm:$0xf]  ;;  %v2899_v53 = vor.u32 %v3488_v41, %v2896_v44  ;;  %v2438_v44 = vld [vmem:[%s3663_s26 + $0xe8] sm:$0xf] }
  0x7e   : > { %1959 = vmatpush.bf16.msrb.mxu1 %v3075_v12  ;;  %1972 = vmatpush.bf16.msrb.mxu2 %v3203_v13  ;;  %v3152_v50 = vld [vmem:[%s3663_s26 + $0x690] sm:$0xf0]  ;;  %v3584_v51 = vld [vmem:[%s3663_s26 + $0x784] sm:$0xf]  ;;  %v3027_v54 = vor.u32 %v3520_v46, %v3024_v48  ;;  %v3375_v46 = vld [vmem:[%s3663_s26 + $0xf4] sm:$0xf0] }
  0x7f   : > { %1985 = vmatpush.bf16.msrb.mxu3 %v3331_v17  ;;  %v3280_v52 = vld [vmem:[%s3663_s26 + $0x790] sm:$0xf0]  ;;  %v3155_v55 = vor.u32 %v3552_v49, %v3152_v50  ;;  %v3484_v56 = vld [vmem:[%s3663_s26 + $0x464] sm:$0xf]  ;;  %v3407_v49 = vld [vmem:[%s3663_s26 + $0x1f4] sm:$0xf0] }
  0x80   : > { %1941 = vmatmul.bf16.vlgmr.msra.gmra.mxu3 %v3758_v7  ;;  %1947 = vmatpush.bf16.msrb.mxu0 %v2931_v25  ;;  %v2880_v57 = vld [vmem:[%s3663_s26 + $0x470] sm:$0xf0]  ;;  %v3516_v58 = vld [vmem:[%s3663_s26 + $0x564] sm:$0xf]  ;;  %v3283_v59 = vor.u32 %v3584_v51, %v3280_v52  ;;  %v2694_v50 = vld [vmem:[%s3663_s26 + $0x2e8] sm:$0xf] }
  0x81   : > { %v3008_v60 = vld [vmem:[%s3663_s26 + $0x570] sm:$0xf0]  ;;  %v3548_v61 = vld [vmem:[%s3663_s26 + $0x664] sm:$0xf]  ;;  %v2883_v1 = vor.u32 %v3484_v56, %v2880_v57  ;;  %v3439_v51 = vld [vmem:[%s3663_s26 + $0x2f4] sm:$0xf0]  ;;  %v2439_v57 = vor.u32 %v3375_v46, %v2438_v44 }
  0x82   : > { %1960 = vmatpush.bf16.msrb.mxu1 %v3059_v26  ;;  %1973 = vmatpush.bf16.msrb.mxu2 %v3187_v27  ;;  %v3136_v62 = vld [vmem:[%s3663_s26 + $0x670] sm:$0xf0]  ;;  %v3580_v63 = vld [vmem:[%s3663_s26 + $0x764] sm:$0xf]  ;;  %v3011_v2 = vor.u32 %v3516_v58, %v3008_v60  ;;  %v2422_v60 = vld [vmem:[%s3663_s26 + $0xc8] sm:$0xf] }
  0x83   : > { %1986 = vmatpush.bf16.msrb.mxu3 %v3315_v31  ;;  %v3264_v0 = vld [vmem:[%s3663_s26 + $0x770] sm:$0xf0]  ;;  %v3139_v3 = vor.u32 %v3548_v61, %v3136_v62  ;;  %v3480_v4 = vld [vmem:[%s3663_s26 + $0x444] sm:$0xf]  ;;  %v3371_v61 = vld [vmem:[%s3663_s26 + $0xd4] sm:$0xf0] }
  0x84   : > { %1948 = vmatpush.bf16.msrb.mxu0 %v2915_v37  ;;  %v2864_v6 = vld [vmem:[%s3663_s26 + $0x450] sm:$0xf0]  ;;  %v3512_v8 = vld [vmem:[%s3663_s26 + $0x544] sm:$0xf]  ;;  %v3267_v9 = vor.u32 %v3580_v63, %v3264_v0  ;;  %v2550_v62 = vld [vmem:[%s3663_s26 + $0x1c8] sm:$0xf] }
  0x85   : > { %v2992_v10 = vld [vmem:[%s3663_s26 + $0x550] sm:$0xf0]  ;;  %v3544_v11 = vld [vmem:[%s3663_s26 + $0x644] sm:$0xf]  ;;  %v2867_v15 = vor.u32 %v3480_v4, %v2864_v6  ;;  %v3403_v0 = vld [vmem:[%s3663_s26 + $0x1d4] sm:$0xf0]  ;;  %v2423_v6 = vor.u32 %v3371_v61, %v2422_v60 }
  0x86   : > { %1961 = vmatpush.bf16.msrb.mxu1 %v3043_v38  ;;  %1974 = vmatpush.bf16.msrb.mxu2 %v3171_v40  ;;  %v3120_v12 = vld [vmem:[%s3663_s26 + $0x650] sm:$0xf0]  ;;  %v3576_v13 = vld [vmem:[%s3663_s26 + $0x744] sm:$0xf]  ;;  %v2995_v16 = vor.u32 %v3512_v8, %v2992_v10  ;;  %v3467_v4 = vld [vmem:[%s3663_s26 + $0x3d4] sm:$0xf0]  ;;  %v2551_v8 = vor.u32 %v3403_v0, %v2550_v62 }
  0x87   : > { %1987 = vmatpush.bf16.msrb.mxu3 %v3299_v47  ;;  %v3248_v14 = vld [vmem:[%s3663_s26 + $0x750] sm:$0xf0]  ;;  %v3123_v17 = vor.u32 %v3544_v11, %v3120_v12  ;;  %v3476_v18 = vld [vmem:[%s3663_s26 + $0x424] sm:$0xf]  ;;  %v2566_v47 = vld [vmem:[%s3663_s26 + $0x1e8] sm:$0xf] }
  0x88   : > { %1949 = vmatpush.bf16.msrb.mxu0 %v2899_v53  ;;  %v2848_v19 = vld [vmem:[%s3663_s26 + $0x430] sm:$0xf0]  ;;  %v3508_v20 = vld [vmem:[%s3663_s26 + $0x524] sm:$0xf]  ;;  %v3251_v23 = vor.u32 %v3576_v13, %v3248_v14  ;;  %v2567_v58 = vor.u32 %v3407_v49, %v2566_v47  ;;  %v2406_v10 = vld [vmem:[%s3663_s26 + $0xa8] sm:$0xf] }
  0x89   : > { %v2976_v24 = vld [vmem:[%s3663_s26 + $0x530] sm:$0xf0]  ;;  %v3540_v25 = vld [vmem:[%s3663_s26 + $0x624] sm:$0xf]  ;;  %v2851_v29 = vor.u32 %v3476_v18, %v2848_v19  ;;  %v3367_v11 = vld [vmem:[%s3663_s26 + $0xb4] sm:$0xf0] }
  0x8a   : > { %1962 = vmatpush.bf16.msrb.mxu1 %v3027_v54  ;;  %1975 = vmatpush.bf16.msrb.mxu2 %v3155_v55  ;;  %v3104_v26 = vld [vmem:[%s3663_s26 + $0x630] sm:$0xf0]  ;;  %v3572_v27 = vld [vmem:[%s3663_s26 + $0x724] sm:$0xf]  ;;  %v2979_v32 = vor.u32 %v3508_v20, %v2976_v24  ;;  %v2822_v54 = vld [vmem:[%s3663_s26 + $0x3e8] sm:$0xf]  ;;  %v2407_v19 = vor.u32 %v3367_v11, %v2406_v10 }
  0x8b   : > { %1988 = vmatpush.bf16.msrb.mxu3 %v3283_v59  ;;  %v3232_v28 = vld [vmem:[%s3663_s26 + $0x730] sm:$0xf0]  ;;  %v3472_v30 = vld [vmem:[%s3663_s26 + $0x404] sm:$0xf]  ;;  %v3107_v33 = vor.u32 %v3540_v25, %v3104_v26  ;;  %v3471_v55 = vld [vmem:[%s3663_s26 + $0x3f4] sm:$0xf0]  ;;  %v2695_v59 = vor.u32 %v3439_v51, %v2694_v50 }
  0x8c   : > { %1950 = vmatpush.bf16.msrb.mxu0 %v2883_v1  ;;  %v2832_v31 = vld [vmem:[%s3663_s26 + $0x410] sm:$0xf0]  ;;  %v3504_v34 = vld [vmem:[%s3663_s26 + $0x504] sm:$0xf]  ;;  %v3235_v37 = vor.u32 %v3572_v27, %v3232_v28  ;;  %v2823_v63 = vor.u32 %v3471_v55, %v2822_v54  ;;  %v2678_v1 = vld [vmem:[%s3663_s26 + $0x2c8] sm:$0xf] }
  0x8d   : > { %v2960_v35 = vld [vmem:[%s3663_s26 + $0x510] sm:$0xf0]  ;;  %v3536_v36 = vld [vmem:[%s3663_s26 + $0x604] sm:$0xf]  ;;  %v2835_v48 = vor.u32 %v3472_v30, %v2832_v31  ;;  %v2534_v12 = vld [vmem:[%s3663_s26 + $0x1a8] sm:$0xf] }
  0x8e   : > { %1963 = vmatpush.bf16.msrb.mxu1 %v3011_v2  ;;  %1976 = vmatpush.bf16.msrb.mxu2 %v3139_v3  ;;  %v3088_v38 = vld [vmem:[%s3663_s26 + $0x610] sm:$0xf0]  ;;  %v3568_v40 = vld [vmem:[%s3663_s26 + $0x704] sm:$0xf]  ;;  %v2963_v52 = vor.u32 %v3504_v34, %v2960_v35  ;;  %v3435_v2 = vld [vmem:[%s3663_s26 + $0x2d4] sm:$0xf0] }
  0x8f   : > { %1989 = vmatpush.bf16.msrb.mxu3 %v3267_v9  ;;  %v3216_v41 = vld [vmem:[%s3663_s26 + $0x710] sm:$0xf0]  ;;  %v3091_v53 = vor.u32 %v3536_v36, %v3088_v38  ;;  %v2806_v3 = vld [vmem:[%s3663_s26 + $0x3c8] sm:$0xf]  ;;  %v2679_v9 = vor.u32 %v3435_v2, %v2678_v1  ;;  %v3399_v14 = vld [vmem:[%s3663_s26 + $0x1b4] sm:$0xf0] }
  0x90   : > { %1951 = vmatpush.bf16.msrb.mxu0 %v2867_v15  ;;  %v3219_v56 = vor.u32 %v3568_v40, %v3216_v41  ;;  %v2807_v13 = vor.u32 %v3467_v4, %v2806_v3  ;;  %v2662_v15 = vld [vmem:[%s3663_s26 + $0x2a8] sm:$0xf]  ;;  %v3463_v18 = vld [vmem:[%s3663_s26 + $0x3b4] sm:$0xf0]  ;;  %v2535_v20 = vor.u32 %v3399_v14, %v2534_v12 }
  0x91   : > { %v2390_v24 = vld [vmem:[%s3663_s26 + $0x88] sm:$0xf]  ;;  %v3363_v25 = vld [vmem:[%s3663_s26 + $0x94] sm:$0xf0] }
  0x92   : > { %1964 = vmatpush.bf16.msrb.mxu1 %v2995_v16  ;;  %1977 = vmatpush.bf16.msrb.mxu2 %v3123_v17  ;;  %v3431_v16 = vld [vmem:[%s3663_s26 + $0x2b4] sm:$0xf0]  ;;  %v2790_v17 = vld [vmem:[%s3663_s26 + $0x3a8] sm:$0xf] }
  0x93   : > { %1990 = vmatpush.bf16.msrb.mxu3 %v3251_v23  ;;  %v2663_v23 = vor.u32 %v3431_v16, %v2662_v15  ;;  %v2518_v26 = vld [vmem:[%s3663_s26 + $0x188] sm:$0xf]  ;;  %v2791_v27 = vor.u32 %v3463_v18, %v2790_v17  ;;  %v3395_v28 = vld [vmem:[%s3663_s26 + $0x194] sm:$0xf0] }
  0x94   : > { %1952 = vmatpush.bf16.msrb.mxu0 %v2851_v29  ;;  %v2646_v29 = vld [vmem:[%s3663_s26 + $0x288] sm:$0xf]  ;;  %v3427_v30 = vld [vmem:[%s3663_s26 + $0x294] sm:$0xf0]  ;;  %v2519_v34 = vor.u32 %v3395_v28, %v2518_v26 }
  0x95   : > { %v2774_v31 = vld [vmem:[%s3663_s26 + $0x388] sm:$0xf]  ;;  %v2647_v35 = vor.u32 %v3427_v30, %v2646_v29  ;;  %v3391_v41 = vld [vmem:[%s3663_s26 + $0x174] sm:$0xf0] }
  0x96   : > { %1965 = vmatpush.bf16.msrb.mxu1 %v2979_v32  ;;  %1978 = vmatpush.bf16.msrb.mxu2 %v3107_v33  ;;  %v3459_v32 = vld [vmem:[%s3663_s26 + $0x394] sm:$0xf0]  ;;  %v2391_v33 = vor.u32 %v3363_v25, %v2390_v24  ;;  %v2374_v36 = vld [vmem:[%s3663_s26 + $0x68] sm:$0xf] }
  0x97   : > { %1991 = vmatpush.bf16.msrb.mxu3 %v3235_v37  ;;  %v3359_v37 = vld [vmem:[%s3663_s26 + $0x74] sm:$0xf0]  ;;  %v2502_v38 = vld [vmem:[%s3663_s26 + $0x168] sm:$0xf]  ;;  %v2775_v40 = vor.u32 %v3459_v32, %v2774_v31 }
  0x98   : > { %1953 = vmatpush.bf16.msrb.mxu0 %v2835_v48  ;;  %v2630_v44 = vld [vmem:[%s3663_s26 + $0x268] sm:$0xf]  ;;  %v3423_v46 = vld [vmem:[%s3663_s26 + $0x274] sm:$0xf0]  ;;  %v2375_v49 = vor.u32 %v3359_v37, %v2374_v36  ;;  %v2503_v50 = vor.u32 %v3391_v41, %v2502_v38 }
  0x99   : > { %v2758_v47 = vld [vmem:[%s3663_s26 + $0x368] sm:$0xf]  ;;  %v3455_v48 = vld [vmem:[%s3663_s26 + $0x374] sm:$0xf0]  ;;  %v2631_v51 = vor.u32 %v3423_v46, %v2630_v44 }
  0x9a   : > { %1966 = vmatpush.bf16.msrb.mxu1 %v2963_v52  ;;  %1979 = vmatpush.bf16.msrb.mxu2 %v3091_v53  ;;  %v2358_v52 = vld [vmem:[%s3663_s26 + $0x48] sm:$0xf]  ;;  %v3355_v53 = vld [vmem:[%s3663_s26 + $0x54] sm:$0xf0]  ;;  %v2759_v55 = vor.u32 %v3455_v48, %v2758_v47 }
  0x9b   : > { %1992 = vmatpush.bf16.msrb.mxu3 %v3219_v56  ;;  %1954 = vmatmul.bf16.vlgmr.msrb.gmra.mxu0 %v3828_v42  ;;  %v2486_v54 = vld [vmem:[%s3663_s26 + $0x148] sm:$0xf]  ;;  %v3387_v56 = vld [vmem:[%s3663_s26 + $0x154] sm:$0xf0]  ;;  %v2359_v61 = vor.u32 %v3355_v53, %v2358_v52 }
  0x9c   : > { %1998 = vmatpush.bf16.msra.mxu0 %v2439_v57  ;;  %v2614_v57 = vld [vmem:[%s3663_s26 + $0x248] sm:$0xf]  ;;  %v3451_v60 = vld [vmem:[%s3663_s26 + $0x354] sm:$0xf0]  ;;  %v2487_v62 = vor.u32 %v3387_v56, %v2486_v54 }
  0x9d   : > { %1980 = vmatmul.bf16.vlgmr.msrb.gmra.mxu2 %v3824_v39  ;;  %1967 = vmatmul.bf16.vlgmr.msrb.gmra.mxu1 %v3832_v45  ;;  %v2342_v0 = vld [vmem:[%s3663_s26 + $0x28] sm:$0xf]  ;;  %v3351_v1 = vld [vmem:[%s3663_s26 + $0x34] sm:$0xf0] }
  0x9e   : > { %2011 = vmatpush.bf16.msra.mxu1 %v2567_v58  ;;  %2024 = vmatpush.bf16.msra.mxu2 %v2695_v59  ;;  %v3419_v58 = vld [vmem:[%s3663_s26 + $0x254] sm:$0xf0]  ;;  %v2742_v59 = vld [vmem:[%s3663_s26 + $0x348] sm:$0xf]  ;;  %v2343_v11 = vor.u32 %v3351_v1, %v2342_v0 }
  0x9f   : > { %2037 = vmatpush.bf16.msra.mxu3 %v2823_v63  ;;  %v2615_v63 = vor.u32 %v3419_v58, %v2614_v57  ;;  %v2470_v2 = vld [vmem:[%s3663_s26 + $0x128] sm:$0xf]  ;;  %v2743_v3 = vor.u32 %v3451_v60, %v2742_v59  ;;  %v3383_v4 = vld [vmem:[%s3663_s26 + $0x134] sm:$0xf0] }
  0xa0   : > { %1993 = vmatmul.bf16.vlgmr.msrb.gmra.mxu3 %v3830_v43  ;;  %1999 = vmatpush.bf16.msra.mxu0 %v2423_v6  ;;  %v2598_v6 = vld [vmem:[%s3663_s26 + $0x228] sm:$0xf]  ;;  %v3447_v10 = vld [vmem:[%s3663_s26 + $0x334] sm:$0xf0]  ;;  %v2471_v14 = vor.u32 %v3383_v4, %v2470_v2 }
  0xa1   : > { %v2326_v12 = vld [vmem:[%s3663_s26 + $0x8] sm:$0xf]  ;;  %v3379_v17 = vld [vmem:[%s3663_s26 + $0x114] sm:$0xf0] }
  0xa2   : > { %2012 = vmatpush.bf16.msra.mxu1 %v2551_v8  ;;  %2025 = vmatpush.bf16.msra.mxu2 %v2679_v9  ;;  %v3415_v8 = vld [vmem:[%s3663_s26 + $0x234] sm:$0xf0]  ;;  %v2726_v9 = vld [vmem:[%s3663_s26 + $0x328] sm:$0xf] }
  0xa3   : > { %2038 = vmatpush.bf16.msra.mxu3 %v2807_v13  ;;  %v3347_v13 = vld [vmem:[%s3663_s26 + $0x14] sm:$0xf0]  ;;  %v2599_v15 = vor.u32 %v3415_v8, %v2598_v6  ;;  %v2454_v16 = vld [vmem:[%s3663_s26 + $0x108] sm:$0xf] }
  0xa4   : > { %2000 = vmatpush.bf16.msra.mxu0 %v2407_v19  ;;  %v2582_v18 = vld [vmem:[%s3663_s26 + $0x208] sm:$0xf]  ;;  %v2727_v19 = vor.u32 %v3447_v10, %v2726_v9  ;;  %v3443_v24 = vld [vmem:[%s3663_s26 + $0x314] sm:$0xf0]  ;;  %v2327_v28 = vor.u32 %v3347_v13, %v2326_v12  ;;  %v2455_v32 = vor.u32 %v3379_v17, %v2454_v16 }
  0xa5   : > { %v2950_v25 = vld [vmem:[%s3663_s26 + $0x4e8] sm:$0xf]  ;;  %v3503_v26 = vld [vmem:[%s3663_s26 + $0x4f4] sm:$0xf0] }
  0xa6   : > { %2013 = vmatpush.bf16.msra.mxu1 %v2535_v20  ;;  %2026 = vmatpush.bf16.msra.mxu2 %v2663_v23  ;;  %v3411_v20 = vld [vmem:[%s3663_s26 + $0x214] sm:$0xf0]  ;;  %v2710_v23 = vld [vmem:[%s3663_s26 + $0x308] sm:$0xf]  ;;  %v2951_v37 = vor.u32 %v3503_v26, %v2950_v25 }
  0xa7   : > { %2039 = vmatpush.bf16.msra.mxu3 %v2791_v27  ;;  %v3078_v27 = vld [vmem:[%s3663_s26 + $0x5e8] sm:$0xf]  ;;  %v3535_v29 = vld [vmem:[%s3663_s26 + $0x5f4] sm:$0xf0]  ;;  %v2711_v36 = vor.u32 %v3443_v24, %v2710_v23 }
  0xa8   : > { %2001 = vmatpush.bf16.msra.mxu0 %v2391_v33  ;;  %v3206_v30 = vld [vmem:[%s3663_s26 + $0x6e8] sm:$0xf]  ;;  %v3567_v31 = vld [vmem:[%s3663_s26 + $0x6f4] sm:$0xf0]  ;;  %v2583_v33 = vor.u32 %v3411_v20, %v2582_v18  ;;  %v3079_v38 = vor.u32 %v3535_v29, %v3078_v27 }
  0xa9   : > { %v2934_v41 = vld [vmem:[%s3663_s26 + $0x4c8] sm:$0xf]  ;;  %v3499_v44 = vld [vmem:[%s3663_s26 + $0x4d4] sm:$0xf0] }
  0xaa   : > { %2014 = vmatpush.bf16.msra.mxu1 %v2519_v34  ;;  %2027 = vmatpush.bf16.msra.mxu2 %v2647_v35  ;;  %v3334_v34 = vld [vmem:[%s3663_s26 + $0x7e8] sm:$0xf]  ;;  %v3599_v35 = vld [vmem:[%s3663_s26 + $0x7f4] sm:$0xf0]  ;;  %v2935_v53 = vor.u32 %v3499_v44, %v2934_v41 }
  0xab   : > { %2040 = vmatpush.bf16.msra.mxu3 %v2775_v40  ;;  %v3207_v40 = vor.u32 %v3567_v31, %v3206_v30  ;;  %v3062_v46 = vld [vmem:[%s3663_s26 + $0x5c8] sm:$0xf]  ;;  %v3335_v47 = vor.u32 %v3599_v35, %v3334_v34  ;;  %v3531_v48 = vld [vmem:[%s3663_s26 + $0x5d4] sm:$0xf0] }
  0xac   : > { %2002 = vmatpush.bf16.msra.mxu0 %v2375_v49  ;;  %v3190_v49 = vld [vmem:[%s3663_s26 + $0x6c8] sm:$0xf]  ;;  %v3595_v52 = vld [vmem:[%s3663_s26 + $0x7d4] sm:$0xf0]  ;;  %v3063_v54 = vor.u32 %v3531_v48, %v3062_v46 }
  0xad   : > { %v2918_v56 = vld [vmem:[%s3663_s26 + $0x4a8] sm:$0xf]  ;;  %v3495_v57 = vld [vmem:[%s3663_s26 + $0x4b4] sm:$0xf0] }
  0xae   : > { %2015 = vmatpush.bf16.msra.mxu1 %v2503_v50  ;;  %2028 = vmatpush.bf16.msra.mxu2 %v2631_v51  ;;  %v3563_v50 = vld [vmem:[%s3663_s26 + $0x6d4] sm:$0xf0]  ;;  %v3318_v51 = vld [vmem:[%s3663_s26 + $0x7c8] sm:$0xf]  ;;  %v2919_v1 = vor.u32 %v3495_v57, %v2918_v56 }
  0xaf   : > { %2041 = vmatpush.bf16.msra.mxu3 %v2759_v55  ;;  %v3191_v55 = vor.u32 %v3563_v50, %v3190_v49  ;;  %v3046_v58 = vld [vmem:[%s3663_s26 + $0x5a8] sm:$0xf]  ;;  %v3319_v59 = vor.u32 %v3595_v52, %v3318_v51  ;;  %v3527_v60 = vld [vmem:[%s3663_s26 + $0x5b4] sm:$0xf0] }
  0xb0   : > { %2003 = vmatpush.bf16.msra.mxu0 %v2359_v61  ;;  %v3174_v61 = vld [vmem:[%s3663_s26 + $0x6a8] sm:$0xf]  ;;  %v3591_v0 = vld [vmem:[%s3663_s26 + $0x7b4] sm:$0xf0]  ;;  %v3047_v2 = vor.u32 %v3527_v60, %v3046_v58 }
  0xb1   : > { %v2902_v4 = vld [vmem:[%s3663_s26 + $0x488] sm:$0xf]  ;;  %v3491_v6 = vld [vmem:[%s3663_s26 + $0x494] sm:$0xf0] }
  0xb2   : > { %2016 = vmatpush.bf16.msra.mxu1 %v2487_v62  ;;  %2029 = vmatpush.bf16.msra.mxu2 %v2615_v63  ;;  %v3559_v62 = vld [vmem:[%s3663_s26 + $0x6b4] sm:$0xf0]  ;;  %v3302_v63 = vld [vmem:[%s3663_s26 + $0x7a8] sm:$0xf] }
  0xb3   : > { %2042 = vmatpush.bf16.msra.mxu3 %v2743_v3  ;;  %v3175_v3 = vor.u32 %v3559_v62, %v3174_v61  ;;  %v3030_v8 = vld [vmem:[%s3663_s26 + $0x588] sm:$0xf]  ;;  %v3303_v9 = vor.u32 %v3591_v0, %v3302_v63  ;;  %v3523_v10 = vld [vmem:[%s3663_s26 + $0x594] sm:$0xf0] }
  0xb4   : > { %2004 = vmatpush.bf16.msra.mxu0 %v2343_v11  ;;  %v3158_v11 = vld [vmem:[%s3663_s26 + $0x688] sm:$0xf]  ;;  %v3555_v12 = vld [vmem:[%s3663_s26 + $0x694] sm:$0xf0]  ;;  %v3031_v16 = vor.u32 %v3523_v10, %v3030_v8 }
  0xb5   : > { %v3286_v13 = vld [vmem:[%s3663_s26 + $0x788] sm:$0xf]  ;;  %v3159_v17 = vor.u32 %v3555_v12, %v3158_v11  ;;  %v3519_v24 = vld [vmem:[%s3663_s26 + $0x574] sm:$0xf0]  ;;  %v3373_v11 = vld [vmem:[%s3663_s26 + $0xec] sm:$0xf] }
  0xb6   : > { %2017 = vmatpush.bf16.msra.mxu1 %v2471_v14  ;;  %2030 = vmatpush.bf16.msra.mxu2 %v2599_v15  ;;  %v3587_v14 = vld [vmem:[%s3663_s26 + $0x794] sm:$0xf0]  ;;  %v2903_v15 = vor.u32 %v3491_v6, %v2902_v4  ;;  %v2886_v18 = vld [vmem:[%s3663_s26 + $0x468] sm:$0xf]  ;;  %v2440_v12 = vld [vmem:[%s3663_s26 + $0xf8] sm:$0xf0] }
  0xb7   : > { %2043 = vmatpush.bf16.msra.mxu3 %v2727_v19  ;;  %v3487_v19 = vld [vmem:[%s3663_s26 + $0x474] sm:$0xf0]  ;;  %v3014_v20 = vld [vmem:[%s3663_s26 + $0x568] sm:$0xf]  ;;  %v3287_v23 = vor.u32 %v3587_v14, %v3286_v13  ;;  %v3405_v13 = vld [vmem:[%s3663_s26 + $0x1ec] sm:$0xf] }
  0xb8   : > { %2005 = vmatpush.bf16.msra.mxu0 %v2327_v28  ;;  %v3142_v25 = vld [vmem:[%s3663_s26 + $0x668] sm:$0xf]  ;;  %v3551_v26 = vld [vmem:[%s3663_s26 + $0x674] sm:$0xf0]  ;;  %v2887_v29 = vor.u32 %v3487_v19, %v2886_v18  ;;  %v3015_v30 = vor.u32 %v3519_v24, %v3014_v20  ;;  %v2696_v18 = vld [vmem:[%s3663_s26 + $0x2f8] sm:$0xf0] }
  0xb9   : > { %v3270_v27 = vld [vmem:[%s3663_s26 + $0x768] sm:$0xf]  ;;  %v3583_v28 = vld [vmem:[%s3663_s26 + $0x774] sm:$0xf0]  ;;  %v3143_v31 = vor.u32 %v3551_v26, %v3142_v25  ;;  %v3469_v24 = vld [vmem:[%s3663_s26 + $0x3ec] sm:$0xf] }
  0xba   : > { %2018 = vmatpush.bf16.msra.mxu1 %v2455_v32  ;;  %2031 = vmatpush.bf16.msra.mxu2 %v2583_v33  ;;  %v2870_v32 = vld [vmem:[%s3663_s26 + $0x448] sm:$0xf]  ;;  %v3483_v33 = vld [vmem:[%s3663_s26 + $0x454] sm:$0xf0]  ;;  %v3271_v35 = vor.u32 %v3583_v28, %v3270_v27  ;;  %v2824_v25 = vld [vmem:[%s3663_s26 + $0x3f8] sm:$0xf0]  ;;  %v2443_v28 = vor.u32 %v3373_v11, %v2440_v12 }
  0xbb   : > { %2044 = vmatpush.bf16.msra.mxu3 %v2711_v36  ;;  %2006 = vmatmul.bf16.vlgmr.msra.gmra.mxu0 %v3769_v21  ;;  %v2998_v34 = vld [vmem:[%s3663_s26 + $0x548] sm:$0xf]  ;;  %v3515_v36 = vld [vmem:[%s3663_s26 + $0x554] sm:$0xf0]  ;;  %v2871_v46 = vor.u32 %v3483_v33, %v2870_v32  ;;  %v3369_v33 = vld [vmem:[%s3663_s26 + $0xcc] sm:$0xf] }
  0xbc   : > { %2050 = vmatpush.bf16.msrb.mxu0 %v2951_v37  ;;  %v3126_v37 = vld [vmem:[%s3663_s26 + $0x648] sm:$0xf]  ;;  %v3579_v41 = vld [vmem:[%s3663_s26 + $0x754] sm:$0xf0]  ;;  %v2999_v48 = vor.u32 %v3515_v36, %v2998_v34  ;;  %v2424_v34 = vld [vmem:[%s3663_s26 + $0xd8] sm:$0xf0]  ;;  %v2827_v36 = vor.u32 %v3469_v24, %v2824_v25 }
  0xbd   : > { %2032 = vmatmul.bf16.vlgmr.msra.gmra.mxu2 %v3755_v5  ;;  %2019 = vmatmul.bf16.vlgmr.msra.gmra.mxu1 %v3772_v22  ;;  %v2854_v50 = vld [vmem:[%s3663_s26 + $0x428] sm:$0xf]  ;;  %v3479_v51 = vld [vmem:[%s3663_s26 + $0x434] sm:$0xf0]  ;;  %v2632_v24 = vld [vmem:[%s3663_s26 + $0x278] sm:$0xf0] }
  0xbe   : > { %2063 = vmatpush.bf16.msrb.mxu1 %v3079_v38  ;;  %2076 = vmatpush.bf16.msrb.mxu2 %v3207_v40  ;;  %v3547_v38 = vld [vmem:[%s3663_s26 + $0x654] sm:$0xf0]  ;;  %v3254_v40 = vld [vmem:[%s3663_s26 + $0x748] sm:$0xf]  ;;  %v2855_v61 = vor.u32 %v3479_v51, %v2854_v50  ;;  %v3365_v50 = vld [vmem:[%s3663_s26 + $0xac] sm:$0xf] }
  0xbf   : > { %2089 = vmatpush.bf16.msrb.mxu3 %v3335_v47  ;;  %v3127_v49 = vor.u32 %v3547_v38, %v3126_v37  ;;  %v2982_v52 = vld [vmem:[%s3663_s26 + $0x528] sm:$0xf]  ;;  %v3543_v57 = vld [vmem:[%s3663_s26 + $0x634] sm:$0xf0]  ;;  %v2552_v37 = vld [vmem:[%s3663_s26 + $0x1d8] sm:$0xf0] }
  0xc0   : > { %2045 = vmatmul.bf16.vlgmr.msra.gmra.mxu3 %v3758_v7  ;;  %2051 = vmatpush.bf16.msrb.mxu0 %v2935_v53  ;;  %v4077_v53 = vpop.f32.mrf.mxu2  ;;  %v3110_v56 = vld [vmem:[%s3663_s26 + $0x628] sm:$0xf]  ;;  %v4082_v58 = vpop.f32.mrf.mxu3  ;;  %v3575_v60 = vld [vmem:[%s3663_s26 + $0x734] sm:$0xf0]  ;;  %v3433_v38 = vld [vmem:[%s3663_s26 + $0x2cc] sm:$0xf] }
  0xc1   : > { %v2838_v62 = vld [vmem:[%s3663_s26 + $0x408] sm:$0xf]  ;;  %v3475_v63 = vld [vmem:[%s3663_s26 + $0x414] sm:$0xf0]  ;;  %v2408_v51 = vld [vmem:[%s3663_s26 + $0xb8] sm:$0xf0] }
  0xc2   : > { %2064 = vmatpush.bf16.msrb.mxu1 %v3063_v54  ;;  %2077 = vmatpush.bf16.msrb.mxu2 %v3191_v55  ;;  %v3255_v54 = vor.u32 %v3579_v41, %v3254_v40  ;;  %v3511_v55 = vld [vmem:[%s3663_s26 + $0x534] sm:$0xf0]  ;;  %v3094_v4 = vld [vmem:[%s3663_s26 + $0x608] sm:$0xf]  ;;  %v2680_v40 = vld [vmem:[%s3663_s26 + $0x2d8] sm:$0xf0] }
  0xc3   : > { %2090 = vmatpush.bf16.msrb.mxu3 %v3319_v59  ;;  %v3238_v59 = vld [vmem:[%s3663_s26 + $0x728] sm:$0xf]  ;;  %v2983_v0 = vor.u32 %v3511_v55, %v2982_v52  ;;  %v3539_v8 = vld [vmem:[%s3663_s26 + $0x614] sm:$0xf0]  ;;  %v3465_v41 = vld [vmem:[%s3663_s26 + $0x3cc] sm:$0xf] }
  0xc4   : > { %2052 = vmatpush.bf16.msrb.mxu0 %v2919_v1  ;;  %v3111_v1 = vor.u32 %v3543_v57, %v3110_v56  ;;  %v3239_v6 = vor.u32 %v3575_v60, %v3238_v59  ;;  %v3571_v10 = vld [vmem:[%s3663_s26 + $0x714] sm:$0xf0]  ;;  %v3397_v52 = vld [vmem:[%s3663_s26 + $0x1ac] sm:$0xf]  ;;  %v2536_v55 = vld [vmem:[%s3663_s26 + $0x1b8] sm:$0xf0]  ;;  %v2411_v60 = vor.u32 %v3365_v50, %v2408_v51 }
  0xc5   : > { %v3429_v56 = vld [vmem:[%s3663_s26 + $0x2ac] sm:$0xf]  ;;  %v2664_v57 = vld [vmem:[%s3663_s26 + $0x2b8] sm:$0xf0] }
  0xc6   : > { %2065 = vmatpush.bf16.msrb.mxu1 %v3047_v2  ;;  %2078 = vmatpush.bf16.msrb.mxu2 %v3175_v3  ;;  %v1799_v44 = vpop.f32.mrf.mxu0  ;;  %v1812_v47 = vpop.f32.mrf.mxu1  ;;  %v2966_v2 = vld [vmem:[%s3663_s26 + $0x508] sm:$0xf]  ;;  %v3507_v3 = vld [vmem:[%s3663_s26 + $0x514] sm:$0xf0]  ;;  %v3461_v59 = vld [vmem:[%s3663_s26 + $0x3ac] sm:$0xf] }
  0xc7   : > { %2091 = vmatpush.bf16.msrb.mxu3 %v3303_v9  ;;  %v3222_v9 = vld [vmem:[%s3663_s26 + $0x708] sm:$0xf]  ;;  %v2967_v20 = vor.u32 %v3507_v3, %v2966_v2  ;;  %v1813_v32 = vadd.f32 %v1812_v47, %v1799_v44  ;;  %v2427_v44 = vor.u32 %v3369_v33, %v2424_v34  ;;  %v3393_v2 = vld [vmem:[%s3663_s26 + $0x18c] sm:$0xf] }
  0xc8   : > { %2053 = vmatpush.bf16.msrb.mxu0 %v2903_v15  ;;  %v2839_v15 = vor.u32 %v3475_v63, %v2838_v62  ;;  %v1827_v26 = vpop.f32.mrf.mxu2  ;;  %v3223_v27 = vor.u32 %v3571_v10, %v3222_v9  ;;  %v2539_v62 = vor.u32 %v3397_v52, %v2536_v55  ;;  %v2667_v63 = vor.u32 %v3429_v56, %v2664_v57  ;;  %v3457_v9 = vld [vmem:[%s3663_s26 + $0x38c] sm:$0xf]  ;;  %v2776_v10 = vld [vmem:[%s3663_s26 + $0x398] sm:$0xf0] }
  0xc9   : > { %v3453_v25 = vld [vmem:[%s3663_s26 + $0x36c] sm:$0xf]  ;;  %v2760_v26 = vld [vmem:[%s3663_s26 + $0x378] sm:$0xf0] }
  0xca   : > { %2066 = vmatpush.bf16.msrb.mxu1 %v3031_v16  ;;  %2079 = vmatpush.bf16.msrb.mxu2 %v3159_v17  ;;  %v2568_v16 = vld [vmem:[%s3663_s26 + $0x1f8] sm:$0xf0]  ;;  %v3437_v17 = vld [vmem:[%s3663_s26 + $0x2ec] sm:$0xf] }
  0xcb   : > { %2092 = vmatpush.bf16.msrb.mxu3 %v3287_v23  ;;  %v3095_v23 = vor.u32 %v3539_v8, %v3094_v4  ;;  %v2520_v4 = vld [vmem:[%s3663_s26 + $0x198] sm:$0xf0]  ;;  %v3385_v33 = vld [vmem:[%s3663_s26 + $0x14c] sm:$0xf] }
  0xcc   : > { %2054 = vmatpush.bf16.msrb.mxu0 %v2887_v29  ;;  %v1840_v29 = vpop.f32.mrf.mxu3  ;;  %v2648_v8 = vld [vmem:[%s3663_s26 + $0x298] sm:$0xf0]  ;;  %v2523_v12 = vor.u32 %v3393_v2, %v2520_v4  ;;  %v3381_v56 = vld [vmem:[%s3663_s26 + $0x12c] sm:$0xf] }
  0xcd   : > { %v2344_v55 = vld [vmem:[%s3663_s26 + $0x38] sm:$0xf0]  ;;  %v3345_v2 = vld [vmem:[%s3663_s26 + $0xc] sm:$0xf] }
  0xce   : > { %2067 = vmatpush.bf16.msrb.mxu1 %v3015_v30  ;;  %2080 = vmatpush.bf16.msrb.mxu2 %v3143_v31  ;;  %v1801_v14 = vpop.f32.mrf.mxu0  ;;  %v1814_v19 = vpop.f32.mrf.mxu1  ;;  %v2571_v30 = vor.u32 %v3405_v13, %v2568_v16  ;;  %v2699_v31 = vor.u32 %v3437_v17, %v2696_v18  ;;  %v3389_v16 = vld [vmem:[%s3663_s26 + $0x16c] sm:$0xf] }
  0xcf   : > { %2093 = vmatpush.bf16.msrb.mxu3 %v3271_v35  ;;  %v3401_v35 = vld [vmem:[%s3663_s26 + $0x1cc] sm:$0xf]  ;;  %v2779_v19 = vor.u32 %v3457_v9, %v2776_v10  ;;  %v2456_v9 = vld [vmem:[%s3663_s26 + $0x118] sm:$0xf0] }
  0xd0   : > { %2055 = vmatpush.bf16.msrb.mxu0 %v2871_v46  ;;  %v2808_v46 = vld [vmem:[%s3663_s26 + $0x3d8] sm:$0xf0]  ;;  %v2555_v47 = vor.u32 %v3401_v35, %v2552_v37  ;;  %v3357_v14 = vld [vmem:[%s3663_s26 + $0x6c] sm:$0xf]  ;;  %v2763_v35 = vor.u32 %v3453_v25, %v2760_v26 }
  0xd1   : > { %v3417_v37 = vld [vmem:[%s3663_s26 + $0x24c] sm:$0xf] }
  0xd2   : > { %2068 = vmatpush.bf16.msrb.mxu1 %v2999_v48  ;;  %2081 = vmatpush.bf16.msrb.mxu2 %v3127_v49  ;;  %v2683_v48 = vor.u32 %v3433_v38, %v2680_v40  ;;  %v1826_v49 = vadd.f32 %v4077_v53, %v1813_v32  ;;  %v2792_v53 = vld [vmem:[%s3663_s26 + $0x3b8] sm:$0xf0]  ;;  %v3409_v10 = vld [vmem:[%s3663_s26 + $0x20c] sm:$0xf] }
  0xd3   : > { %2094 = vmatpush.bf16.msrb.mxu3 %v3255_v54  ;;  %v2811_v54 = vor.u32 %v3465_v41, %v2808_v46  ;;  %v2795_v3 = vor.u32 %v3461_v59, %v2792_v53  ;;  %v2360_v32 = vld [vmem:[%s3663_s26 + $0x58] sm:$0xf0]  ;;  %v3449_v46 = vld [vmem:[%s3663_s26 + $0x34c] sm:$0xf] }
  0xd4   : > { %2056 = vmatpush.bf16.msrb.mxu0 %v2855_v61  ;;  %v1839_v61 = vadd.f32 %v4082_v58, %v1826_v49  ;;  %v2616_v38 = vld [vmem:[%s3663_s26 + $0x258] sm:$0xf0] }
  0xd5   : > { %v2619_v52 = vor.u32 %v3417_v37, %v2616_v38  ;;  %v3064_v37 = vld [vmem:[%s3663_s26 + $0x5d8] sm:$0xf0]  ;;  %v3561_v38 = vld [vmem:[%s3663_s26 + $0x6cc] sm:$0xf] }
  0xd6   : > { %2069 = vmatpush.bf16.msrb.mxu1 %v2983_v0  ;;  %2082 = vmatpush.bf16.msrb.mxu2 %v3111_v1  ;;  %v3361_v0 = vld [vmem:[%s3663_s26 + $0x8c] sm:$0xf]  ;;  %v2392_v1 = vld [vmem:[%s3663_s26 + $0x98] sm:$0xf0] }
  0xd7   : > { %2095 = vmatpush.bf16.msrb.mxu3 %v3239_v6  ;;  %v3425_v6 = vld [vmem:[%s3663_s26 + $0x28c] sm:$0xf]  ;;  %v2395_v58 = vor.u32 %v3361_v0, %v2392_v1  ;;  %v2728_v0 = vld [vmem:[%s3663_s26 + $0x338] sm:$0xf0] }
  0xd8   : > { %2057 = vmatpush.bf16.msrb.mxu0 %v2839_v15  ;;  %v2651_v13 = vor.u32 %v3425_v6, %v2648_v8  ;;  %v2376_v15 = vld [vmem:[%s3663_s26 + $0x78] sm:$0xf0]  ;;  %v3377_v8 = vld [vmem:[%s3663_s26 + $0x10c] sm:$0xf] }
  0xd9   : > { %v2459_v25 = vor.u32 %v3377_v8, %v2456_v9  ;;  %v3485_v9 = vld [vmem:[%s3663_s26 + $0x46c] sm:$0xf] }
  0xda   : > { %2070 = vmatpush.bf16.msrb.mxu1 %v2967_v20  ;;  %2083 = vmatpush.bf16.msrb.mxu2 %v3095_v23  ;;  %v1851_v11 = vpop.f32.mrf.mxu0  ;;  %v2504_v20 = vld [vmem:[%s3663_s26 + $0x178] sm:$0xf0]  ;;  %v3421_v23 = vld [vmem:[%s3663_s26 + $0x26c] sm:$0xf] }
  0xdb   : > { %2096 = vmatpush.bf16.msrb.mxu3 %v3223_v27  ;;  %2058 = vmatmul.bf16.vlgmr.msrb.gmra.mxu0 %v3828_v42  ;;  %v1852_v17 = vadd.f32 %v1851_v11, %v1839_v61  ;;  %v2507_v29 = vor.u32 %v3389_v16, %v2504_v20  ;;  %v3413_v61 = vld [vmem:[%s3663_s26 + $0x22c] sm:$0xf]  ;;  %v3080_v20 = vld [vmem:[%s3663_s26 + $0x5f8] sm:$0xf0] }
  0xdc   : > { %2102 = vmatpush.bf16.msra.mxu0 %v2443_v28  ;;  %v1864_v18 = vpop.f32.mrf.mxu1  ;;  %v2379_v28 = vor.u32 %v3357_v14, %v2376_v15  ;;  %v2712_v14 = vld [vmem:[%s3663_s26 + $0x318] sm:$0xf0]  ;;  %v3501_v16 = vld [vmem:[%s3663_s26 + $0x4ec] sm:$0xf] }
  0xdd   : > { %2084 = vmatmul.bf16.vlgmr.msrb.gmra.mxu2 %v3824_v39  ;;  %2071 = vmatmul.bf16.vlgmr.msrb.gmra.mxu1 %v3832_v45  ;;  %v1865_v27 = vadd.f32 %v1864_v18, %v1852_v17  ;;  %v2952_v17 = vld [vmem:[%s3663_s26 + $0x4f8] sm:$0xf0]  ;;  %v3533_v18 = vld [vmem:[%s3663_s26 + $0x5ec] sm:$0xf] }
  0xde   : > { %2115 = vmatpush.bf16.msra.mxu1 %v2571_v30  ;;  %2128 = vmatpush.bf16.msra.mxu2 %v2699_v31  ;;  %v2635_v30 = vor.u32 %v3421_v23, %v2632_v24  ;;  %v3353_v31 = vld [vmem:[%s3663_s26 + $0x4c] sm:$0xf]  ;;  %v3208_v24 = vld [vmem:[%s3663_s26 + $0x6f8] sm:$0xf0] }
  0xdf   : > { %2141 = vmatpush.bf16.msra.mxu3 %v2827_v36  ;;  %v2488_v36 = vld [vmem:[%s3663_s26 + $0x158] sm:$0xf0]  ;;  %v3565_v23 = vld [vmem:[%s3663_s26 + $0x6ec] sm:$0xf] }
  0xe0   : > { %2097 = vmatmul.bf16.vlgmr.msrb.gmra.mxu3 %v3830_v43  ;;  %2103 = vmatpush.bf16.msra.mxu0 %v2427_v44  ;;  %v1877_v34 = vpop.f32.mrf.mxu2  ;;  %v2744_v44 = vld [vmem:[%s3663_s26 + $0x358] sm:$0xf0]  ;;  %v2491_v51 = vor.u32 %v3385_v33, %v2488_v36  ;;  %v3497_v33 = vld [vmem:[%s3663_s26 + $0x4cc] sm:$0xf] }
  0xe1   : > { %v1878_v40 = vadd.f32 %v1877_v34, %v1865_v27  ;;  %v2747_v59 = vor.u32 %v3449_v46, %v2744_v44  ;;  %v3597_v27 = vld [vmem:[%s3663_s26 + $0x7ec] sm:$0xf]  ;;  %v2936_v34 = vld [vmem:[%s3663_s26 + $0x4d8] sm:$0xf0] }
  0xe2   : > { %2116 = vmatpush.bf16.msra.mxu1 %v2555_v47  ;;  %2129 = vmatpush.bf16.msra.mxu2 %v2683_v48  ;;  %v218_v47 = vld [vmem:[#allocation2 + $0x10] sm:$0xff]  ;;  %v2363_v48 = vor.u32 %v3353_v31, %v2360_v32  ;;  %v1853_v50 = vpop.f32.mrf.mxu0  ;;  %v3083_v31 = vor.u32 %v3533_v18, %v3080_v20  ;;  %v3211_v32 = vor.u32 %v3565_v23, %v3208_v24  ;;  %v3320_v46 = vld [vmem:[%s3663_s26 + $0x7d8] sm:$0xf0]  ;;  %v3481_v23 = vld [vmem:[%s3663_s26 + $0x44c] sm:$0xf] }
  0xe3   : > { %2142 = vmatpush.bf16.msra.mxu3 %v2811_v54  ;;  %v1890_v41 = vpop.f32.mrf.mxu3  ;;  %v3349_v54 = vld [vmem:[%s3663_s26 + $0x2c] sm:$0xf]  ;;  %v2939_v44 = vor.u32 %v3497_v33, %v2936_v34  ;;  %v2920_v50 = vld [vmem:[%s3663_s26 + $0x4b8] sm:$0xf0] }
  0xe4   : > { %2104 = vmatpush.bf16.msra.mxu0 %v2411_v60  ;;  %v1891_v49 = vadd.f32 %v1890_v41, %v1878_v40  ;;  %v1866_v57 = vpop.f32.mrf.mxu1  ;;  %v2472_v60 = vld [vmem:[%s3663_s26 + $0x138] sm:$0xf0]  ;;  %v2347_v1 = vor.u32 %v3349_v54, %v2344_v55  ;;  %v3593_v41 = vld [vmem:[%s3663_s26 + $0x7cc] sm:$0xf] }
  0xe5   : > { %v2475_v4 = vor.u32 %v3381_v56, %v2472_v60  ;;  %v3192_v40 = vld [vmem:[%s3663_s26 + $0x6d8] sm:$0xf0]  ;;  %v3557_v55 = vld [vmem:[%s3663_s26 + $0x6ac] sm:$0xf] }
  0xe6   : > { %2117 = vmatpush.bf16.msra.mxu1 %v2539_v62  ;;  %2130 = vmatpush.bf16.msra.mxu2 %v2667_v63  ;;  %v2206_v53 = vadd.f32 %v1891_v49, %v218_v47  ;;  %v2600_v62 = vld [vmem:[%s3663_s26 + $0x238] sm:$0xf0]  ;;  %v3445_v63 = vld [vmem:[%s3663_s26 + $0x32c] sm:$0xf] }
  0xe7   : > { %2143 = vmatpush.bf16.msra.mxu3 %v2795_v3  ;;  %v2328_v3 = vld [vmem:[%s3663_s26 + $0x18] sm:$0xf0]  ;;  %v2603_v6 = vor.u32 %v3413_v61, %v2600_v62  ;;  %v2731_v11 = vor.u32 %v3445_v63, %v2728_v0  ;;  %v3493_v49 = vld [vmem:[%s3663_s26 + $0x4ac] sm:$0xf] }
  0xe8   : > { %2105 = vmatpush.bf16.msra.mxu0 %v2395_v58  ;;  %2210 = vst [vmem:[#allocation2 + $0x10] sm:$0xff] %v2206_v53  ;;  %v1879_v58 = vpop.f32.mrf.mxu2  ;;  %v3048_v54 = vld [vmem:[%s3663_s26 + $0x5b8] sm:$0xf0]  ;;  %v3589_v57 = vld [vmem:[%s3663_s26 + $0x7ac] sm:$0xf]  ;;  %v2923_v53 = vor.u32 %v3493_v49, %v2920_v50 }
  0xe9   : > { %v3176_v56 = vld [vmem:[%s3663_s26 + $0x6b8] sm:$0xf0]  ;;  %v3489_v61 = vld [vmem:[%s3663_s26 + $0x48c] sm:$0xf] }
  0xea   : > { %2118 = vmatpush.bf16.msra.mxu1 %v2523_v12  ;;  %2131 = vmatpush.bf16.msra.mxu2 %v2651_v13  ;;  %v2584_v12 = vld [vmem:[%s3663_s26 + $0x218] sm:$0xf0]  ;;  %v3441_v13 = vld [vmem:[%s3663_s26 + $0x30c] sm:$0xf]  ;;  %v3179_v60 = vor.u32 %v3557_v55, %v3176_v56 }
  0xeb   : > { %2144 = vmatpush.bf16.msra.mxu3 %v2779_v19  ;;  %v1892_v15 = vpop.f32.mrf.mxu3  ;;  %v2331_v19 = vor.u32 %v3345_v2, %v2328_v3  ;;  %v2587_v26 = vor.u32 %v3409_v10, %v2584_v12  ;;  %v2904_v62 = vld [vmem:[%s3663_s26 + $0x498] sm:$0xf0]  ;;  %v3585_v2 = vld [vmem:[%s3663_s26 + $0x78c] sm:$0xf] }
  0xec   : > { %2106 = vmatpush.bf16.msra.mxu0 %v2379_v28  ;;  %v3336_v28 = vld [vmem:[%s3663_s26 + $0x7f8] sm:$0xf0]  ;;  %v3517_v58 = vld [vmem:[%s3663_s26 + $0x56c] sm:$0xf] }
  0xed   : > { %v3339_v36 = vor.u32 %v3597_v27, %v3336_v28  ;;  %v3032_v0 = vld [vmem:[%s3663_s26 + $0x598] sm:$0xf0]  ;;  %v3573_v50 = vld [vmem:[%s3663_s26 + $0x72c] sm:$0xf] }
  0xee   : > { %2119 = vmatpush.bf16.msra.mxu1 %v2507_v29  ;;  %2132 = vmatpush.bf16.msra.mxu2 %v2635_v30  ;;  %v2715_v29 = vor.u32 %v3441_v13, %v2712_v14  ;;  %v2955_v30 = vor.u32 %v3501_v16, %v2952_v17  ;;  %v3288_v3 = vld [vmem:[%s3663_s26 + $0x798] sm:$0xf0]  ;;  %v3549_v14 = vld [vmem:[%s3663_s26 + $0x66c] sm:$0xf] }
  0xef   : > { %2145 = vmatpush.bf16.msra.mxu3 %v2763_v35  ;;  %v3529_v35 = vld [vmem:[%s3663_s26 + $0x5cc] sm:$0xf]  ;;  %v2888_v10 = vld [vmem:[%s3663_s26 + $0x478] sm:$0xf0]  ;;  %v3291_v12 = vor.u32 %v3585_v2, %v3288_v3 }
  0xf0   : > { %2107 = vmatpush.bf16.msra.mxu0 %v2363_v48  ;;  %v3067_v47 = vor.u32 %v3529_v35, %v3064_v37  ;;  %v3195_v48 = vor.u32 %v3561_v38, %v3192_v40  ;;  %v3016_v13 = vld [vmem:[%s3663_s26 + $0x578] sm:$0xf0]  ;;  %v3581_v16 = vld [vmem:[%s3663_s26 + $0x76c] sm:$0xf]  ;;  %v2891_v18 = vor.u32 %v3485_v9, %v2888_v10 }
  0xf1   : > { %v3144_v15 = vld [vmem:[%s3663_s26 + $0x678] sm:$0xf0]  ;;  %v3477_v38 = vld [vmem:[%s3663_s26 + $0x42c] sm:$0xf] }
  0xf2   : > { %2120 = vmatpush.bf16.msra.mxu1 %v2491_v51  ;;  %2133 = vmatpush.bf16.msra.mxu2 %v2619_v52  ;;  %v3525_v51 = vld [vmem:[%s3663_s26 + $0x5ac] sm:$0xf]  ;;  %v3323_v52 = vor.u32 %v3593_v41, %v3320_v46  ;;  %v3272_v17 = vld [vmem:[%s3663_s26 + $0x778] sm:$0xf0]  ;;  %v3147_v20 = vor.u32 %v3549_v14, %v3144_v15  ;;  %v219_v14 = vld [vmem:[#allocation2] sm:$0xff] }
  0xf3   : > { %2146 = vmatpush.bf16.msra.mxu3 %v2747_v59  ;;  %v3304_v59 = vld [vmem:[%s3663_s26 + $0x7b8] sm:$0xf0]  ;;  %v3275_v27 = vor.u32 %v3581_v16, %v3272_v17  ;;  %v3509_v41 = vld [vmem:[%s3663_s26 + $0x52c] sm:$0xf] }
  0xf4   : > { %2108 = vmatpush.bf16.msra.mxu0 %v2347_v1  ;;  %v3307_v63 = vor.u32 %v3589_v57, %v3304_v59  ;;  %v3160_v1 = vld [vmem:[%s3663_s26 + $0x698] sm:$0xf0]  ;;  %v3473_v56 = vld [vmem:[%s3663_s26 + $0x40c] sm:$0xf] }
  0xf5   : > { %v2872_v24 = vld [vmem:[%s3663_s26 + $0x458] sm:$0xf0]  ;;  %v3505_v59 = vld [vmem:[%s3663_s26 + $0x50c] sm:$0xf] }
  0xf6   : > { %2121 = vmatpush.bf16.msra.mxu1 %v2475_v4  ;;  %2134 = vmatpush.bf16.msra.mxu2 %v2603_v6  ;;  %v3000_v28 = vld [vmem:[%s3663_s26 + $0x558] sm:$0xf0]  ;;  %v2875_v34 = vor.u32 %v3481_v23, %v2872_v24 }
  0xf7   : > { %2147 = vmatpush.bf16.msra.mxu3 %v2731_v11  ;;  %v3256_v33 = vld [vmem:[%s3663_s26 + $0x758] sm:$0xf0] }
  0xf8   : > { %2109 = vmatpush.bf16.msra.mxu0 %v2331_v19  ;;  %v4200_v4 = vpop.f32.mrf.mxu0  ;;  %v3019_v19 = vor.u32 %v3517_v58, %v3016_v13  ;;  %v2856_v40 = vld [vmem:[%s3663_s26 + $0x438] sm:$0xf0] }
  0xf9   : > { %v3112_v49 = vld [vmem:[%s3663_s26 + $0x638] sm:$0xf0] }
  0xfa   : > { %2122 = vmatpush.bf16.msra.mxu1 %v2459_v25  ;;  %2135 = vmatpush.bf16.msra.mxu2 %v2587_v26  ;;  %v4205_v11 = vpop.f32.mrf.mxu1  ;;  %v3513_v25 = vld [vmem:[%s3663_s26 + $0x54c] sm:$0xf]  ;;  %v2840_v57 = vld [vmem:[%s3663_s26 + $0x418] sm:$0xf0] }
  0xfb   : > { %2148 = vmatpush.bf16.msra.mxu3 %v2715_v29  ;;  %2110 = vmatmul.bf16.vlgmr.msra.gmra.mxu0 %v3769_v21  ;;  %v3553_v21 = vld [vmem:[%s3663_s26 + $0x68c] sm:$0xf] }
  0xfc   : > { %2154 = vmatpush.bf16.msrb.mxu0 %v2955_v30  ;;  %v3163_v8 = vor.u32 %v3553_v21, %v3160_v1  ;;  %v3545_v29 = vld [vmem:[%s3663_s26 + $0x64c] sm:$0xf]  ;;  %v3128_v30 = vld [vmem:[%s3663_s26 + $0x658] sm:$0xf0]  ;;  %v2843_v21 = vor.u32 %v3473_v56, %v2840_v57 }
  0xfd   : > { %2136 = vmatmul.bf16.vlgmr.msra.gmra.mxu2 %v3755_v5  ;;  %2123 = vmatmul.bf16.vlgmr.msra.gmra.mxu1 %v3772_v22  ;;  %v3051_v5 = vor.u32 %v3525_v51, %v3048_v54  ;;  %v2907_v22 = vor.u32 %v3489_v61, %v2904_v62  ;;  %v3131_v37 = vor.u32 %v3545_v29, %v3128_v30  ;;  %v3240_v51 = vld [vmem:[%s3663_s26 + $0x738] sm:$0xf0]  ;;  %v3537_v61 = vld [vmem:[%s3663_s26 + $0x60c] sm:$0xf] }
  0xfe   : > { %2167 = vmatpush.bf16.msrb.mxu1 %v3083_v31  ;;  %2180 = vmatpush.bf16.msrb.mxu2 %v3211_v32  ;;  %v3577_v32 = vld [vmem:[%s3663_s26 + $0x74c] sm:$0xf]  ;;  %v3096_v62 = vld [vmem:[%s3663_s26 + $0x618] sm:$0xf0] }
  0xff   : > { %2193 = vmatpush.bf16.msrb.mxu3 %v3339_v36  ;;  %v3003_v36 = vor.u32 %v3513_v25, %v3000_v28  ;;  %v3099_v2 = vor.u32 %v3537_v61, %v3096_v62 }
 0x100   : > { %2149 = vmatmul.bf16.vlgmr.msra.gmra.mxu3 %v3758_v7  ;;  %2155 = vmatpush.bf16.msrb.mxu0 %v2939_v44  ;;  %v3521_v7 = vld [vmem:[%s3663_s26 + $0x58c] sm:$0xf]  ;;  %v1929_v26 = vpop.f32.mrf.mxu2  ;;  %v1905_v35 = vpop.f32.mrf.mxu0  ;;  %v3259_v44 = vor.u32 %v3577_v32, %v3256_v33 }
 0x101   : > { %v3035_v6 = vor.u32 %v3521_v7, %v3032_v0  ;;  %v3224_v0 = vld [vmem:[%s3663_s26 + $0x718] sm:$0xf0] }
 0x102   : > { %2168 = vmatpush.bf16.msrb.mxu1 %v3067_v47  ;;  %2181 = vmatpush.bf16.msrb.mxu2 %v3195_v48  ;;  %v1918_v46 = vpop.f32.mrf.mxu1  ;;  %v2984_v47 = vld [vmem:[%s3663_s26 + $0x538] sm:$0xf0]  ;;  %v3541_v48 = vld [vmem:[%s3663_s26 + $0x62c] sm:$0xf] }
 0x103   : > { %2194 = vmatpush.bf16.msrb.mxu3 %v3323_v52  ;;  %v1942_v31 = vpop.f32.mrf.mxu3  ;;  %v2859_v52 = vor.u32 %v3477_v38, %v2856_v40  ;;  %v2987_v54 = vor.u32 %v3509_v41, %v2984_v47  ;;  %v3115_v55 = vor.u32 %v3541_v48, %v3112_v49 }
 0x104   : > { %2156 = vmatpush.bf16.msrb.mxu0 %v2923_v53 }
 0x106   : > { %2169 = vmatpush.bf16.msrb.mxu1 %v3051_v5  ;;  %2182 = vmatpush.bf16.msrb.mxu2 %v3179_v60  ;;  %v3243_v5 = vor.u32 %v3573_v50, %v3240_v51  ;;  %v2968_v60 = vld [vmem:[%s3663_s26 + $0x518] sm:$0xf0] }
 0x107   : > { %2195 = vmatpush.bf16.msrb.mxu3 %v3307_v63  ;;  %v3569_v63 = vld [vmem:[%s3663_s26 + $0x70c] sm:$0xf]  ;;  %v2971_v1 = vor.u32 %v3505_v59, %v2968_v60 }
 0x108   : > { %2157 = vmatpush.bf16.msrb.mxu0 %v2907_v22  ;;  %v1931_v53 = vpop.f32.mrf.mxu2  ;;  %v3227_v3 = vor.u32 %v3569_v63, %v3224_v0  ;;  %v1917_v22 = vadd.f32 %v4205_v11, %v4200_v4 }
 0x10a   : > { %2170 = vmatpush.bf16.msrb.mxu1 %v3035_v6  ;;  %2183 = vmatpush.bf16.msrb.mxu2 %v3163_v8  ;;  %v1930_v6 = vadd.f32 %v1929_v26, %v1917_v22 }
 0x10b   : > { %2196 = vmatpush.bf16.msrb.mxu3 %v3291_v12  ;;  %v1944_v7 = vpop.f32.mrf.mxu3 }
 0x10c   : > { %2158 = vmatpush.bf16.msrb.mxu0 %v2891_v18  ;;  %v1943_v8 = vadd.f32 %v1942_v31, %v1930_v6 }
 0x10e   : > { %2171 = vmatpush.bf16.msrb.mxu1 %v3019_v19  ;;  %2184 = vmatpush.bf16.msrb.mxu2 %v3147_v20 }
 0x10f   : > { %2197 = vmatpush.bf16.msrb.mxu3 %v3275_v27 }
 0x110   : > { %2159 = vmatpush.bf16.msrb.mxu0 %v2875_v34 }
 0x112   : > { %2172 = vmatpush.bf16.msrb.mxu1 %v3003_v36  ;;  %2185 = vmatpush.bf16.msrb.mxu2 %v3131_v37  ;;  %v220_v37 = vld [vmem:[#allocation2 + $0x18] sm:$0xff] }
 0x113   : > { %2198 = vmatpush.bf16.msrb.mxu3 %v3259_v44 }
 0x114   : > { %2160 = vmatpush.bf16.msrb.mxu0 %v2859_v52 }
 0x116   : > { %2173 = vmatpush.bf16.msrb.mxu1 %v2987_v54  ;;  %2186 = vmatpush.bf16.msrb.mxu2 %v3115_v55 }
 0x117   : > { %2199 = vmatpush.bf16.msrb.mxu3 %v3243_v5 }
 0x118   : > { %2161 = vmatpush.bf16.msrb.mxu0 %v2843_v21  ;;  %v1955_v9 = vpop.f32.mrf.mxu0 }
 0x119   : > { %v1956_v10 = vadd.f32 %v1955_v9, %v1943_v8 }
 0x11a   : > { %2174 = vmatpush.bf16.msrb.mxu1 %v2971_v1  ;;  %2187 = vmatpush.bf16.msrb.mxu2 %v3099_v2  ;;  %v1968_v58 = vpop.f32.mrf.mxu1  ;;  %v221_v1 = vld [vmem:[#allocation2 + $0x8] sm:$0xff] }
 0x11b   : > { %2200 = vmatpush.bf16.msrb.mxu3 %v3227_v3  ;;  %2162 = vmatmul.bf16.vlgmr.msrb.gmra.mxu0 %v3828_v42  ;;  %v1969_v12 = vadd.f32 %v1968_v58, %v1956_v10 }
 0x11d   : > { %2175 = vmatmul.bf16.vlgmr.msrb.gmra.mxu1 %v3832_v45  ;;  %2188 = vmatmul.bf16.vlgmr.msrb.gmra.mxu2 %v3824_v39 }
 0x11e   : > { %2201 = vmatmul.bf16.vlgmr.msrb.gmra.mxu3 %v3830_v43 }
 0x120   : > { %v1981_v13 = vpop.f32.mrf.mxu2  ;;  %v1957_v16 = vpop.f32.mrf.mxu0 }
 0x121   : > { %v1982_v4 = vadd.f32 %v1981_v13, %v1969_v12 }
 0x122   : > { %v1970_v17 = vpop.f32.mrf.mxu1 }
 0x123   : > { %v1994_v11 = vpop.f32.mrf.mxu3 }
 0x124   : > { %v1995_v15 = vadd.f32 %v1994_v11, %v1982_v4 }
 0x126   : > { %v2207_v42 = vadd.f32 %v1995_v15, %v219_v14 }
 0x128   : > { %2211 = vst [vmem:[#allocation2] sm:$0xff] %v2207_v42  ;;  %v1983_v18 = vpop.f32.mrf.mxu2 }
 0x12b   : > { %v1996_v45 = vpop.f32.mrf.mxu3 }
 0x138   : > { %v2007_v19 = vpop.f32.mrf.mxu0 }
 0x13a   : > { %v2020_v39 = vpop.f32.mrf.mxu1 }
 0x13b   : > { %v2021_v27 = vadd.f32 %v2020_v39, %v2007_v19 }
 0x140   : > { %v2033_v20 = vpop.f32.mrf.mxu2  ;;  %v2009_v23 = vpop.f32.mrf.mxu0 }
 0x141   : > { %v2034_v28 = vadd.f32 %v2033_v20, %v2021_v27 }
 0x142   : > { %v2022_v24 = vpop.f32.mrf.mxu1 }
 0x143   : > { %v2046_v43 = vpop.f32.mrf.mxu3 }
 0x144   : > { %v2047_v29 = vadd.f32 %v2046_v43, %v2034_v28 }
 0x148   : > { %v2035_v25 = vpop.f32.mrf.mxu2 }
 0x14b   : > { %v2048_v26 = vpop.f32.mrf.mxu3 }
 0x158   : > { %v2059_v30 = vpop.f32.mrf.mxu0 }
 0x159   : > { %v2060_v31 = vadd.f32 %v2059_v30, %v2047_v29 }
 0x15a   : > { %v2072_v32 = vpop.f32.mrf.mxu1 }
 0x15b   : > { %v2073_v33 = vadd.f32 %v2072_v32, %v2060_v31 }
 0x160   : > { %v2085_v34 = vpop.f32.mrf.mxu2  ;;  %v2061_v40 = vpop.f32.mrf.mxu0 }
 0x161   : > { %v2086_v35 = vadd.f32 %v2085_v34, %v2073_v33 }
 0x162   : > { %v2074_v41 = vpop.f32.mrf.mxu1 }
 0x163   : > { %v2098_v36 = vpop.f32.mrf.mxu3 }
 0x164   : > { %v2099_v38 = vadd.f32 %v2098_v36, %v2086_v35 }
 0x166   : > { %v2208_v46 = vadd.f32 %v2099_v38, %v220_v37 }
 0x168   : > { %2212 = vst [vmem:[#allocation2 + $0x18] sm:$0xff] %v2208_v46  ;;  %v2087_v44 = vpop.f32.mrf.mxu2 }
 0x16b   : > { %v2100_v47 = vpop.f32.mrf.mxu3 }
 0x178   : > { %v2111_v48 = vpop.f32.mrf.mxu0 }
 0x17a   : > { %v2124_v49 = vpop.f32.mrf.mxu1 }
 0x17b   : > { %v2125_v57 = vadd.f32 %v2124_v49, %v2111_v48 }
 0x180   : > { %v2137_v50 = vpop.f32.mrf.mxu2  ;;  %v2113_v52 = vpop.f32.mrf.mxu0 }
 0x181   : > { %v2138_v59 = vadd.f32 %v2137_v50, %v2125_v57 }
 0x182   : > { %v2126_v54 = vpop.f32.mrf.mxu1 }
 0x183   : > { %v2150_v51 = vpop.f32.mrf.mxu3 }
 0x184   : > { %v2151_v53 = vadd.f32 %v2150_v51, %v2138_v59 }
 0x188   : > { %v2139_v55 = vpop.f32.mrf.mxu2 }
 0x18b   : > { %v2152_v56 = vpop.f32.mrf.mxu3 }
 0x198   : > { %v2163_v5 = vpop.f32.mrf.mxu0 }
 0x199   : > { %v2164_v61 = vadd.f32 %v2163_v5, %v2151_v53 }
 0x19a   : > { %v2176_v60 = vpop.f32.mrf.mxu1 }
 0x19b   : > { %v2177_v62 = vadd.f32 %v2176_v60, %v2164_v61 }
 0x1a0   : > { %v2189_v7 = vpop.f32.mrf.mxu2  ;;  %v2165_v21 = vpop.f32.mrf.mxu0 }
 0x1a1   : > { %v2190_v63 = vadd.f32 %v2189_v7, %v2177_v62  ;;  %v2202_v0 = vpop.f32.mrf.mxu3 }
 0x1a2   : > { %v2178_v2 = vpop.f32.mrf.mxu1 }
 0x1a3   : > { %v2203_v3 = vadd.f32 %v2202_v0, %v2190_v63 }
 0x1a5   : > { %v2209_v22 = vadd.f32 %v2203_v3, %v221_v1  ;;  %2217 = sbr.rel (%p3340_p6) target bundleno = 441 (0x1b9), region = 44 }
 0x1a7   : > { %2213 = vst [vmem:[#allocation2 + $0x8] sm:$0xff] %v2209_v22 }
 0x1a8   : > { %v2191_v6 = vpop.f32.mrf.mxu2 }
 0x1a9   : > { %v2204_v8 = vpop.f32.mrf.mxu3 }
 0x1aa   : > { %v2218_v9 = vld [vmem:[#allocation2 + $0x10] sm:$0xff]  ;;  %v2219_v10 = vld [vmem:[#allocation2] sm:$0xff]  ;;  %v2220_v11 = vld [vmem:[#allocation2 + $0x18] sm:$0xff] }
 0x1ab   : > { %v2222_v58 = vld [vmem:[%s4260_s2] sm:$0xf] }
 0x1ac   : > { %v2224_v12 = vperm.slane %v2222_v58, 0  ;;  %v2225_v13 = vperm.slane %v2222_v58, 1  ;;  %v2236_v4 = vld [vmem:[%s4261_s3] sm:$0xf]  ;;  %v2226_v17 = vperm.slane %v2222_v58, 2  ;;  %v2227_v42 = vperm.slane %v2222_v58, 3 }
 0x1ad   : > { %v2238_v15 = vperm.slane %v2236_v4, 0  ;;  %v2239_v16 = vperm.slane %v2236_v4, 1  ;;  %v2240_v19 = vperm.slane %v2236_v4, 2  ;;  %v2241_v39 = vperm.slane %v2236_v4, 3 }
 0x1ae   : > { %v2221_v14 = vld [vmem:[#allocation2 + $0x8] sm:$0xff]  ;;  %v2232_v18 = vmul.f32 %v2224_v12, %v2218_v9  ;;  %v2233_v45 = vmul.f32 %v2225_v13, %v2219_v10  ;;  %v2234_v20 = vmul.f32 %v2226_v17, %v2220_v11 }
 0x1af   : > { %v2235_v43 = vmul.f32 %v2227_v42, %v2221_v14 }
 0x1b0   : > { %v2246_v23 = vadd.f32 %v2238_v15, %v2232_v18  ;;  %v2247_v24 = vadd.f32 %v2239_v16, %v2233_v45  ;;  %v2248_v25 = vadd.f32 %v2240_v19, %v2234_v20 }
 0x1b1   : > { %v2249_v26 = vadd.f32 %v2241_v39, %v2235_v43 }
 0x1b2   : > { %vm2250_vm0 = vcmp.ge.f32.partialorder %v2246_v23, 0.0  ;;  %vm2251_vm1 = vcmp.ge.f32.partialorder %v2247_v24, 0.0  ;;  %v2254_v27 = vmul.f32 0.2, %v2246_v23  ;;  %v2255_v28 = vmul.f32 0.2, %v2247_v24 }
 0x1b3   : > { %vm2252_vm2 = vcmp.ge.f32.partialorder %v2248_v25, 0.0  ;;  %vm2253_vm3 = vcmp.ge.f32.partialorder %v2249_v26, 0.0  ;;  %v2256_v29 = vmul.f32 0.2, %v2248_v25  ;;  %v2257_v30 = vmul.f32 0.2, %v2249_v26 }
 0x1b4   : > { %v2258_v31 = vsel %vm2250_vm0, %v2246_v23, %v2254_v27  ;;  %v2259_v32 = vsel %vm2251_vm1, %v2247_v24, %v2255_v28 }
 0x1b5   : > { %v2262_v33 = vpack.c.bf16 %v2259_v32, %v2258_v31  ;;  %v2260_v34 = vsel %vm2252_vm2, %v2248_v25, %v2256_v29  ;;  %v2261_v35 = vsel %vm2253_vm3, %v2249_v26, %v2257_v30 }
 0x1b6   : > { %v2263_v36 = vpack.c.bf16 %v2261_v35, %v2260_v34 }
 0x1b7   : > { %2264 = vst [vmem:[%s4262_s4] sm:$0xff] %v2262_v33 }
 0x1b8   : > { %2265 = vst [vmem:[%s4262_s4 + $0x8] sm:$0xff] %v2263_v36 }
 0x1b9 PF: > { %s14_s15 = sadd.s32 1, %s3615_s15  }
 0x1ba   : > { %p11_p7 = scmp.ge.s32.totalorder %s14_s15, 6  }
 0x1bc   :  { %13 = sbr.rel (!%p11_p7) target bundleno = 1 (0x1), region = 73 }

// kernel: discriminator_forward.9
= control target key start
LH: loop header
LB: loop body
LE: loop exit
PB: predicated region body
PF: predicated region fallthrough
CT: control target
= control target key end

     0   :  { %s1312_s19 = smov 0   ;;  %s1414_s0 = inlined_call_operand.vmem [shape: bf16[2,8192], index: 0, kind: input, shape index: {}]   ;;  %s1415_s1 = inlined_call_operand.vmem [shape: bf16[8192,1], index: 1, kind: input, shape index: {}]   ;;  %s1416_s2 = inlined_call_operand.<no memory space> [shape: f32[1,1], index: 2, kind: input, shape index: {}]   ;;  %s1417_s4 = inlined_call_operand.vmem [shape: f32[2,1], index: 4, kind: output, shape index: {}]   ;;  %s1418_s3 = inlined_call_operand.<no memory space> [shape: f32[1,1], index: 3, kind: input, shape index: {}]  }
   0x1   :  { %v9_v0 = vstv %s1416_s2  ;;  %v11_v1 = vstv %s1418_s3 }
   0x2   :  { %10 = vst [vmem:[#allocation3] sm:$0x1] %v9_v0 }
   0x3   :  { %12 = vst [vmem:[#allocation4] sm:$0x1] %v11_v1 }
   0x4 LB: > { %s1318_s20 = sadd.s32 4294967295, %s1278_s19   ;;  %p928_p0 = scmp.ge.s32.totalorder %s1278_s19, 1  ;;  %s1278_s19 = sphi %s1312_s19, %s18_s19  }
   0x5   : > { %p172_p1 = scmp.lt.s32.totalorder %s1278_s19, 9 }
   0x7   : > { %p173_p2 = pnand %p928_p0, %p172_p1 }
   0x8   : > { %s929_s2 = sshll.u32 (!%p173_p2), %s1318_s20, 3  ;;  %s930_s3 = sshll.u32 (!%p173_p2), %s1318_s20, 7 }
   0x9   : > { %176 = sbr.rel (%p173_p2) target bundleno = 268 (0x10c), region = 36  ;;  %p198_p3 = scmp.lt.s32.totalorder (!%p173_p2), %s929_s2, 63 }
   0xa   : > { %p203_p4 = scmp.lt.s32.totalorder (!%p173_p2), %s930_s3, 1023  ;;  %p932_p5 = scmp.ne.s32.totalorder (!%p173_p2), %s1318_s20, 0 }
   0xe   : > { %s1420_s2 = smov (!%p198_p3, %s929_s2), 63  ;;  %s1422_s3 = smov (!%p203_p4, %s930_s3), 1023 }
   0xf   : > { %s200_s23 = scalar_lea.vmem %s1414_s0, %s1420_s2  ;;  %s931_s24 = sshll.u32 %s1422_s3, 2 }
  0x10   : > { %s1333_s27 = scalar_lea.vmem %s1415_s1, %s931_s24  ;;  %211 = sbr.rel (%p932_p5) target bundleno = 23 (0x17), region = 40 }
  0x15   : > { %vm212_vm0 = vcmask 1024   ;;  %v1280_v2 = vmov 0.0  }
  0x16   : > { %213 = vst.msk [vmem:[#allocation2] sm:$0x3] %vm212_vm0, %v1280_v2 }
  0x17 PF: > { %v1200_v3 = vld [vmem:[%s1333_s27 + $0x38] sm:$0xff]  ;;  %v1199_v7 = vld [vmem:[%s1333_s27 + $0x30] sm:$0xff]  ;;  %v1198_v11 = vld [vmem:[%s1333_s27 + $0x28] sm:$0xff]  ;;  %vm851_vm1 = vcmask 1024   ;;  %p1189_p6 = scmp.ne.s32.totalorder %s1318_s20, 7 }
  0x18   : > { %v1208_v4 = vld [vmem:[%s1333_s27 + $0x78] sm:$0xff]  ;;  %746 = vmatpush.bf16.msra.mxu0 %v1200_v3  ;;  %v1207_v8 = vld [vmem:[%s1333_s27 + $0x70] sm:$0xff]  ;;  %v1206_v12 = vld [vmem:[%s1333_s27 + $0x68] sm:$0xff] }
  0x19   : > { %v1216_v5 = vld [vmem:[%s1333_s27 + $0xb8] sm:$0xff]  ;;  %759 = vmatpush.bf16.msra.mxu1 %v1208_v4  ;;  %v1215_v9 = vld [vmem:[%s1333_s27 + $0xb0] sm:$0xff]  ;;  %v1214_v13 = vld [vmem:[%s1333_s27 + $0xa8] sm:$0xff] }
  0x1a   : > { %v1224_v6 = vld [vmem:[%s1333_s27 + $0xf8] sm:$0xff]  ;;  %772 = vmatpush.bf16.msra.mxu2 %v1216_v5  ;;  %v1223_v10 = vld [vmem:[%s1333_s27 + $0xf0] sm:$0xff]  ;;  %v1222_v14 = vld [vmem:[%s1333_s27 + $0xe8] sm:$0xff] }
  0x1b   : > { %785 = vmatpush.bf16.msra.mxu3 %v1224_v6  ;;  %v1197_v15 = vld [vmem:[%s1333_s27 + $0x20] sm:$0xff]  ;;  %v1196_v20 = vld [vmem:[%s1333_s27 + $0x18] sm:$0xff]  ;;  %v1195_v24 = vld [vmem:[%s1333_s27 + $0x10] sm:$0xff] }
  0x1c   : > { %747 = vmatpush.bf16.msra.mxu0 %v1199_v7  ;;  %v1205_v16 = vld [vmem:[%s1333_s27 + $0x60] sm:$0xff]  ;;  %v1204_v21 = vld [vmem:[%s1333_s27 + $0x58] sm:$0xff]  ;;  %v1203_v25 = vld [vmem:[%s1333_s27 + $0x50] sm:$0xff] }
  0x1d   : > { %760 = vmatpush.bf16.msra.mxu1 %v1207_v8  ;;  %v1213_v17 = vld [vmem:[%s1333_s27 + $0xa0] sm:$0xff]  ;;  %v1212_v22 = vld [vmem:[%s1333_s27 + $0x98] sm:$0xff]  ;;  %v1211_v26 = vld [vmem:[%s1333_s27 + $0x90] sm:$0xff] }
  0x1e   : > { %773 = vmatpush.bf16.msra.mxu2 %v1215_v9  ;;  %v1221_v18 = vld [vmem:[%s1333_s27 + $0xe0] sm:$0xff]  ;;  %v1220_v23 = vld [vmem:[%s1333_s27 + $0xd8] sm:$0xff]  ;;  %v1219_v27 = vld [vmem:[%s1333_s27 + $0xd0] sm:$0xff] }
  0x1f   : > { %786 = vmatpush.bf16.msra.mxu3 %v1223_v10  ;;  %v215_v19 = vld [vmem:[%s200_s23] sm:$0xff]  ;;  %v1194_v28 = vld [vmem:[%s1333_s27 + $0x8] sm:$0xff]  ;;  %v1232_v36 = vld [vmem:[%s1333_s27 + $0x138] sm:$0xff] }
  0x20   : > { %748 = vmatpush.bf16.msra.mxu0 %v1198_v11  ;;  %345 = vst [vmem:[#allocation1] ss:$9 sm:$0xff] %v215_v19  ;;  %v1202_v29 = vld [vmem:[%s1333_s27 + $0x48] sm:$0xff]  ;;  %v1193_v32 = vld [vmem:[%s1333_s27] sm:$0xff]  ;;  %v1240_v37 = vld [vmem:[%s1333_s27 + $0x178] sm:$0xff] }
  0x21   : > { %761 = vmatpush.bf16.msra.mxu1 %v1206_v12  ;;  %v1210_v30 = vld [vmem:[%s1333_s27 + $0x88] sm:$0xff]  ;;  %v1201_v33 = vld [vmem:[%s1333_s27 + $0x40] sm:$0xff]  ;;  %v1248_v38 = vld [vmem:[%s1333_s27 + $0x1b8] sm:$0xff] }
  0x22   : > { %774 = vmatpush.bf16.msra.mxu2 %v1214_v13  ;;  %v1218_v31 = vld [vmem:[%s1333_s27 + $0xc8] sm:$0xff]  ;;  %v1209_v34 = vld [vmem:[%s1333_s27 + $0x80] sm:$0xff]  ;;  %v1256_v39 = vld [vmem:[%s1333_s27 + $0x1f8] sm:$0xff] }
  0x23   : > { %787 = vmatpush.bf16.msra.mxu3 %v1222_v14  ;;  %v1217_v35 = vld [vmem:[%s1333_s27 + $0xc0] sm:$0xff]  ;;  %v1231_v40 = vld [vmem:[%s1333_s27 + $0x130] sm:$0xff]  ;;  %v1230_v48 = vld [vmem:[%s1333_s27 + $0x128] sm:$0xff] }
  0x24   : > { %749 = vmatpush.bf16.msra.mxu0 %v1197_v15  ;;  %v1239_v43 = vld [vmem:[%s1333_s27 + $0x170] sm:$0xff]  ;;  %v1238_v49 = vld [vmem:[%s1333_s27 + $0x168] sm:$0xff]  ;;  %v1229_v52 = vld [vmem:[%s1333_s27 + $0x120] sm:$0xff] }
  0x25   : > { %762 = vmatpush.bf16.msra.mxu1 %v1205_v16  ;;  %v1247_v46 = vld [vmem:[%s1333_s27 + $0x1b0] sm:$0xff]  ;;  %v1246_v50 = vld [vmem:[%s1333_s27 + $0x1a8] sm:$0xff]  ;;  %v1237_v53 = vld [vmem:[%s1333_s27 + $0x160] sm:$0xff] }
  0x26   : > { %775 = vmatpush.bf16.msra.mxu2 %v1213_v17  ;;  %v1255_v47 = vld [vmem:[%s1333_s27 + $0x1f0] sm:$0xff]  ;;  %v1254_v51 = vld [vmem:[%s1333_s27 + $0x1e8] sm:$0xff]  ;;  %v1245_v54 = vld [vmem:[%s1333_s27 + $0x1a0] sm:$0xff] }
  0x27   : > { %788 = vmatpush.bf16.msra.mxu3 %v1221_v18  ;;  %v348_v41 = vld [vmem:[#allocation1 + $0x12] sm:$0xff]  ;;  %v349_v42 = vld [vmem:[#allocation1 + $0x1b] sm:$0xff]  ;;  %v347_v45 = vld [vmem:[#allocation1 + $0x9] sm:$0xff] }
  0x28   : > { %750 = vmatpush.bf16.msra.mxu0 %v1196_v20  ;;  %v346_v44 = vld [vmem:[#allocation1] sm:$0xff]  ;;  %v1228_v56 = vld [vmem:[%s1333_s27 + $0x118] sm:$0xff]  ;;  %v1227_v60 = vld [vmem:[%s1333_s27 + $0x110] sm:$0xff] }
  0x29   : > { %763 = vmatpush.bf16.msra.mxu1 %v1204_v21  ;;  %v1253_v55 = vld [vmem:[%s1333_s27 + $0x1e0] sm:$0xff]  ;;  %v1236_v57 = vld [vmem:[%s1333_s27 + $0x158] sm:$0xff]  ;;  %v1235_v61 = vld [vmem:[%s1333_s27 + $0x150] sm:$0xff] }
  0x2a   : > { %776 = vmatpush.bf16.msra.mxu2 %v1212_v22  ;;  %v1244_v58 = vld [vmem:[%s1333_s27 + $0x198] sm:$0xff]  ;;  %v1243_v62 = vld [vmem:[%s1333_s27 + $0x190] sm:$0xff]  ;;  %v1226_v0 = vld [vmem:[%s1333_s27 + $0x108] sm:$0xff] }
  0x2b   : > { %789 = vmatpush.bf16.msra.mxu3 %v1220_v23  ;;  %v1252_v59 = vld [vmem:[%s1333_s27 + $0x1d8] sm:$0xff]  ;;  %v1251_v63 = vld [vmem:[%s1333_s27 + $0x1d0] sm:$0xff]  ;;  %v1234_v1 = vld [vmem:[%s1333_s27 + $0x148] sm:$0xff] }
  0x2c   : > { %751 = vmatpush.bf16.msra.mxu0 %v1195_v24  ;;  %v1242_v2 = vld [vmem:[%s1333_s27 + $0x188] sm:$0xff]  ;;  %v1225_v4 = vld [vmem:[%s1333_s27 + $0x100] sm:$0xff]  ;;  %v352_v10 = vld [vmem:[#allocation1 + $0x36] sm:$0xff] }
  0x2d   : > { %764 = vmatpush.bf16.msra.mxu1 %v1203_v25  ;;  %v1250_v3 = vld [vmem:[%s1333_s27 + $0x1c8] sm:$0xff]  ;;  %v1233_v5 = vld [vmem:[%s1333_s27 + $0x140] sm:$0xff] }
  0x2e   : > { %777 = vmatpush.bf16.msra.mxu2 %v1211_v26  ;;  %v1241_v6 = vld [vmem:[%s1333_s27 + $0x180] sm:$0xff]  ;;  %v351_v9 = vld [vmem:[#allocation1 + $0x2d] sm:$0xff] }
  0x2f   : > { %790 = vmatpush.bf16.msra.mxu3 %v1219_v27  ;;  %v1249_v7 = vld [vmem:[%s1333_s27 + $0x1c0] sm:$0xff] }
  0x30   : > { %752 = vmatpush.bf16.msra.mxu0 %v1194_v28  ;;  %v350_v8 = vld [vmem:[#allocation1 + $0x24] sm:$0xff] }
  0x31   : > { %765 = vmatpush.bf16.msra.mxu1 %v1202_v29  ;;  %v353_v11 = vld [vmem:[#allocation1 + $0x3f] sm:$0xff] }
  0x32   : > { %778 = vmatpush.bf16.msra.mxu2 %v1210_v30 }
  0x33   : > { %791 = vmatpush.bf16.msra.mxu3 %v1218_v31 }
  0x34   : > { %753 = vmatpush.bf16.msra.mxu0 %v1193_v32  ;;  %v214_v32 = vld [vmem:[#allocation2] sm:$0x3] }
  0x35   : > { %766 = vmatpush.bf16.msra.mxu1 %v1201_v33 }
  0x36   : > { %779 = vmatpush.bf16.msra.mxu2 %v1209_v34 }
  0x37   : > { %792 = vmatpush.bf16.msra.mxu3 %v1217_v35  ;;  %754 = vmatmul.bf16.vlgmr.msra.gmra.mxu0 %v346_v44 }
  0x38   : > { %798 = vmatpush.bf16.msrb.mxu0 %v1232_v36  ;;  %767 = vmatmul.bf16.vlgmr.msra.gmra.mxu1 %v347_v45 }
  0x39   : > { %811 = vmatpush.bf16.msrb.mxu1 %v1240_v37  ;;  %780 = vmatmul.bf16.vlgmr.msra.gmra.mxu2 %v348_v41 }
  0x3a   : > { %824 = vmatpush.bf16.msrb.mxu2 %v1248_v38  ;;  %793 = vmatmul.bf16.vlgmr.msra.gmra.mxu3 %v349_v42 }
  0x3b   : > { %837 = vmatpush.bf16.msrb.mxu3 %v1256_v39 }
  0x3c   : > { %799 = vmatpush.bf16.msrb.mxu0 %v1231_v40 }
  0x3d   : > { %812 = vmatpush.bf16.msrb.mxu1 %v1239_v43 }
  0x3e   : > { %825 = vmatpush.bf16.msrb.mxu2 %v1247_v46 }
  0x3f   : > { %838 = vmatpush.bf16.msrb.mxu3 %v1255_v47 }
  0x40   : > { %800 = vmatpush.bf16.msrb.mxu0 %v1230_v48 }
  0x41   : > { %813 = vmatpush.bf16.msrb.mxu1 %v1238_v49 }
  0x42   : > { %826 = vmatpush.bf16.msrb.mxu2 %v1246_v50 }
  0x43   : > { %839 = vmatpush.bf16.msrb.mxu3 %v1254_v51 }
  0x44   : > { %801 = vmatpush.bf16.msrb.mxu0 %v1229_v52 }
  0x45   : > { %814 = vmatpush.bf16.msrb.mxu1 %v1237_v53 }
  0x46   : > { %827 = vmatpush.bf16.msrb.mxu2 %v1245_v54 }
  0x47   : > { %840 = vmatpush.bf16.msrb.mxu3 %v1253_v55 }
  0x48   : > { %802 = vmatpush.bf16.msrb.mxu0 %v1228_v56 }
  0x49   : > { %815 = vmatpush.bf16.msrb.mxu1 %v1236_v57 }
  0x4a   : > { %828 = vmatpush.bf16.msrb.mxu2 %v1244_v58 }
  0x4b   : > { %841 = vmatpush.bf16.msrb.mxu3 %v1252_v59 }
  0x4c   : > { %803 = vmatpush.bf16.msrb.mxu0 %v1227_v60 }
  0x4d   : > { %816 = vmatpush.bf16.msrb.mxu1 %v1235_v61 }
  0x4e   : > { %829 = vmatpush.bf16.msrb.mxu2 %v1243_v62 }
  0x4f   : > { %842 = vmatpush.bf16.msrb.mxu3 %v1251_v63 }
  0x50   : > { %804 = vmatpush.bf16.msrb.mxu0 %v1226_v0 }
  0x51   : > { %817 = vmatpush.bf16.msrb.mxu1 %v1234_v1 }
  0x52   : > { %830 = vmatpush.bf16.msrb.mxu2 %v1242_v2 }
  0x53   : > { %843 = vmatpush.bf16.msrb.mxu3 %v1250_v3 }
  0x54   : > { %805 = vmatpush.bf16.msrb.mxu0 %v1225_v4 }
  0x55   : > { %818 = vmatpush.bf16.msrb.mxu1 %v1233_v5 }
  0x56   : > { %831 = vmatpush.bf16.msrb.mxu2 %v1241_v6 }
  0x57   : > { %844 = vmatpush.bf16.msrb.mxu3 %v1249_v7  ;;  %806 = vmatmul.bf16.vlgmr.msrb.gmra.mxu0 %v350_v8 }
  0x58   : > { %819 = vmatmul.bf16.vlgmr.msrb.gmra.mxu1 %v351_v9 }
  0x59   : > { %832 = vmatmul.bf16.vlgmr.msrb.gmra.mxu2 %v352_v10 }
  0x5a   : > { %845 = vmatmul.bf16.vlgmr.msrb.gmra.mxu3 %v353_v11 }
  0xb4   : > { %v755_v12 = vpop.f32.mrf.mxu0 }
  0xb5   : > { %v768_v13 = vpop.f32.mrf.mxu1 }
  0xb6   : > { %v769_v20 = vadd.f32 %v768_v13, %v755_v12 }
  0xbc   : > { %v781_v14 = vpop.f32.mrf.mxu2  ;;  %v757_v16 = vpop.f32.mrf.mxu0 }
  0xbd   : > { %v794_v15 = vpop.f32.mrf.mxu3  ;;  %v770_v17 = vpop.f32.mrf.mxu1  ;;  %v782_v21 = vadd.f32 %v781_v14, %v769_v20 }
  0xbf   : > { %v795_v22 = vadd.f32 %v794_v15, %v782_v21 }
  0xc4   : > { %v783_v18 = vpop.f32.mrf.mxu2 }
  0xc5   : > { %v796_v19 = vpop.f32.mrf.mxu3 }
  0xd4   : > { %v807_v23 = vpop.f32.mrf.mxu0 }
  0xd5   : > { %v820_v24 = vpop.f32.mrf.mxu1  ;;  %v808_v25 = vadd.f32 %v807_v23, %v795_v22 }
  0xd7   : > { %v821_v26 = vadd.f32 %v820_v24, %v808_v25 }
  0xdc   : > { %v833_v27 = vpop.f32.mrf.mxu2  ;;  %v809_v30 = vpop.f32.mrf.mxu0 }
  0xdd   : > { %v846_v28 = vpop.f32.mrf.mxu3  ;;  %v834_v29 = vadd.f32 %v833_v27, %v821_v26  ;;  %v822_v31 = vpop.f32.mrf.mxu1 }
  0xdf   : > { %v847_v33 = vadd.f32 %v846_v28, %v834_v29 }
  0xe1   : > { %v850_v34 = vadd.f32 %v847_v33, %v214_v32  ;;  %856 = sbr.rel (%p1189_p6) target bundleno = 268 (0x10c), region = 44 }
  0xe3   : > { %852 = vst.msk [vmem:[#allocation2] sm:$0x3] %vm851_vm1, %v850_v34 }
  0xe4   : > { %v835_v35 = vpop.f32.mrf.mxu2 }
  0xe5   : > { %v848_v36 = vpop.f32.mrf.mxu3 }
  0xe6   : > { %v1266_v38 = vld [vmem:[#allocation3] ss:$0 sm:$0xff]  ;;  %v1267_v39 = vld [vmem:[#allocation4] ss:$0 sm:$0xff] }
  0xea   : > { %v857_v37 = vld [vmem:[#allocation2] sm:$0x3] }
  0xeb   : > { %v862_v40 = vmul.f32 %v1266_v38, %v857_v37 }
  0xed   : > { %v867_v41 = vadd.f32 %v1267_v39, %v862_v40 }
  0xef   : > { %v1190_v42 = vmul.f32 -1.442695, %v867_v41 }
  0xf1   : > { %1268 = vpow2.f32 %v1190_v42 }
  0xf7   : > { %v1269_v43 = vpop.eup %1268 }
  0xf8   : > { %v871_v44 = vadd.f32 1.0, %v1269_v43 }
  0xfa   : > { %1270 = vrcp.f32 %v871_v44  ;;  %v883_v47 = vand.u32 2147483648, %v871_v44  ;;  %vm877_vm2 = vweird.f32 %v871_v44  ;;  %v881_v49 = vand.u32 2147483647, %v871_v44 }
  0xfc   : > { %v884_v51 = vor.u32 1.1754944e-38, %v883_v47  ;;  %vm882_vm5 = vcmp.eq.f32.partialorder %v881_v49, 8.507059e+37 }
 0x100   : > { %v1271_v45 = vpop.eup %1270 }
 0x101   : > { %v873_v46 = vmul.f32 %v1271_v45, %v871_v44  ;;  %vm878_vm3 = vweird.f32 %v1271_v45 }
 0x102   : > { %vm879_vm4 = vmor %vm877_vm2, %vm878_vm3 }
 0x103   : > { %v874_v48 = vsub.f32 1.0, %v873_v46 }
 0x105   : > { %v875_v50 = vmul.f32 %v1271_v45, %v874_v48 }
 0x107   : > { %v876_v52 = vadd.f32 %v1271_v45, %v875_v50 }
 0x109   : > { %v880_v53 = vsel %vm879_vm4, %v1271_v45, %v876_v52 }
 0x10a   : > { %v885_v54 = vsel %vm882_vm5, %v884_v51, %v880_v53 }
 0x10b   : > { %887 = vst.msk [vmem:[%s1417_s4] sm:$0x3] %vm851_vm1, %v885_v54 }
 0x10c PF: > { %s18_s19 = sadd.s32 1, %s1278_s19  }
 0x10d   : > { %p15_p7 = scmp.ge.s32.totalorder %s18_s19, 10  }
 0x10f   :  { %17 = sbr.rel (!%p15_p7) target bundleno = 4 (0x4), region = 73 }

</bundles_post_ra>
